<compile_context>
chip_gen: v6e
topology: v6e:2x2x1
jax: 0.10.0
libtpu: 0.0.40
codegen_flags: <defaults>
</compile_context>

<pallas_src>
import jax
import jax.numpy as jnp
from jax import lax
from jax.experimental import pallas as pl
from jax.experimental.pallas import tpu as pltpu

LRELU_SLOPE = 0.2
BN_EPS = 1e-5
LANE = 128


def _round_up(x, m):
    return ((x + m - 1) // m) * m


def _tpu_vmem_capacity():
    try:
        return int(pltpu.get_tpu_info().vmem_capacity_bytes)
    except Exception:
        return 64 * 1024 * 1024   # conservative (v7x per-TC VMEM)


_VMEM_CAP = _tpu_vmem_capacity()
_VMEM_LIMIT = min(_VMEM_CAP // 2, 64 * 1024 * 1024)   # explicit scoped-VMEM request
_VMEM_BUDGET = _VMEM_LIMIT // 2                        # what one kernel's blocks may use


def _choose_tm(M, row_bytes, budget):
    """Largest M-tile (multiple of 8) dividing M that fits VMEM and leaves >=2 steps."""
    fallback = None
    for tm in (1024, 512, 256, 128, 64, 32, 16, 8):
        if M % tm != 0:
            continue
        if 3 * tm * row_bytes > budget:      # ~double buffer + headroom
            continue
        if M // tm >= 2:
            return tm
        if fallback is None:
            fallback = tm
    return fallback if fallback is not None else M


# ----------------------------------------------------------------------------
# Kernel 1: BN1 + LeakyReLU + Conv1x1  (+ sum / sumsq of the output per tile)
# ----------------------------------------------------------------------------
def _bn_lrelu_conv1_kernel(x_ref, s_ref, b_ref, w_ref, y_ref, sum_ref, sq_ref):
    x = x_ref[...].astype(jnp.float32)                      # (tm, Cin)
    h = x * s_ref[...] + b_ref[...]                         # folded BN1
    h = jnp.where(h >= 0.0, h, LRELU_SLOPE * h)             # LeakyReLU(0.2)
    y = jnp.dot(h.astype(jnp.bfloat16), w_ref[...],         # MXU, bf16 in / f32 acc
                preferred_element_type=jnp.float32)         # (tm, Cmid_p)
    y_ref[...] = y.astype(y_ref.dtype)
    sum_ref[...] = jnp.sum(y, axis=0, keepdims=True)[None]      # (1,1,Cmid_p)
    sq_ref[...] = jnp.sum(y * y, axis=0, keepdims=True)[None]   # (1,1,Cmid_p)


def bn_lrelu_conv1(x2d, scale1, shift1, w1):
    """x2d (M,Cin) f32; scale/shift (1,Cin) f32; w1 (Cin,Cmid_p) bf16 ->
       y (M,Cmid_p) bf16, partial sum/sumsq (grid_m,1,Cmid_p) f32."""
    M, Cin = x2d.shape
    Cmid_p = w1.shape[1]
    row_bytes = Cin * 4 + Cmid_p * 2
    tm = _choose_tm(M, row_bytes, _VMEM_BUDGET)
    grid_m = M // tm
    return pl.pallas_call(
        _bn_lrelu_conv1_kernel,
        out_shape=(
            jax.ShapeDtypeStruct((M, Cmid_p), jnp.bfloat16),
            jax.ShapeDtypeStruct((grid_m, 1, Cmid_p), jnp.float32),
            jax.ShapeDtypeStruct((grid_m, 1, Cmid_p), jnp.float32),
        ),
        grid_spec=pltpu.PrefetchScalarGridSpec(
            num_scalar_prefetch=0,
            grid=(grid_m,),
            in_specs=[
                pl.BlockSpec((tm, Cin), lambda i: (i, 0)),
                pl.BlockSpec((1, Cin), lambda i: (0, 0)),
                pl.BlockSpec((1, Cin), lambda i: (0, 0)),
                pl.BlockSpec((Cin, Cmid_p), lambda i: (0, 0)),
            ],
            out_specs=(
                pl.BlockSpec((tm, Cmid_p), lambda i: (i, 0)),
                pl.BlockSpec((1, 1, Cmid_p), lambda i: (i, 0, 0)),
                pl.BlockSpec((1, 1, Cmid_p), lambda i: (i, 0, 0)),
            ),
        ),
        compiler_params=pltpu.CompilerParams(
            dimension_semantics=("parallel",),
            vmem_limit_bytes=_VMEM_LIMIT),
    )(x2d, scale1, shift1, w1)


# ----------------------------------------------------------------------------
# Kernel 2: BN2 + LeakyReLU + Conv3x3 (pad=1) as 9 shifted MXU dots
#           (+ sum / sumsq of the output per image, for the next layer's BN1)
# ----------------------------------------------------------------------------
def _bn_lrelu_conv3_kernel(x_ref, s_ref, b_ref, w_ref, y_ref, sum_ref, sq_ref, pad_ref):
    H, W, C = x_ref.shape[1], x_ref.shape[2], x_ref.shape[3]
    G = y_ref.shape[3]
    h = x_ref[0].astype(jnp.float32)                        # (H, W, C)
    scale = s_ref[...].reshape(1, 1, C)
    shift = b_ref[...].reshape(1, 1, C)
    h = h * scale + shift                                   # folded BN2
    h = jnp.where(h >= 0.0, h, LRELU_SLOPE * h)             # LeakyReLU(0.2)

    # zero-padded (H+2, W+2, C) tile resident in VMEM (conv padding = post-activation zeros)
    pad_ref[...] = jnp.zeros_like(pad_ref)
    pad_ref[1:H + 1, 1:W + 1, :] = h

    acc = jnp.zeros((H * W, G), jnp.float32)
    for kh in range(3):
        for kw in range(3):
            patch = pad_ref[kh:kh + H, kw:kw + W, :].reshape(H * W, C)
            acc = acc + jnp.dot(patch.astype(jnp.bfloat16), w_ref[kh * 3 + kw],
                                preferred_element_type=jnp.float32)

    y_ref[...] = acc.reshape(1, H, W, G)
    sum_ref[...] = jnp.sum(acc, axis=0, keepdims=True)[None]      # (1,1,Gp)
    sq_ref[...] = jnp.sum(acc * acc, axis=0, keepdims=True)[None]  # (1,1,Gp)


def bn_lrelu_conv3(h4d, scale2, shift2, w3):
    """h4d (N,H,W,Cmid_p) bf16; scale/shift (1,Cmid_p) f32; w3 (9,Cmid_p,Gp) bf16 ->
       y (N,H,W,Gp) f32, partial sum/sumsq (N,1,Gp) f32."""
    N, H, W, Cmid_p = h4d.shape
    Gp = w3.shape[2]
    # TODO(synk): for large H, tile over rows with a 1-row halo instead of one full image per step.
    return pl.pallas_call(
        _bn_lrelu_conv3_kernel,
        out_shape=(
            jax.ShapeDtypeStruct((N, H, W, Gp), jnp.float32),
            jax.ShapeDtypeStruct((N, 1, Gp), jnp.float32),
            jax.ShapeDtypeStruct((N, 1, Gp), jnp.float32),
        ),
        grid_spec=pltpu.PrefetchScalarGridSpec(
            num_scalar_prefetch=0,
            grid=(N,),
            in_specs=[
                pl.BlockSpec((1, H, W, Cmid_p), lambda n: (n, 0, 0, 0)),
                pl.BlockSpec((1, Cmid_p), lambda n: (0, 0)),
                pl.BlockSpec((1, Cmid_p), lambda n: (0, 0)),
                pl.BlockSpec((9, Cmid_p, Gp), lambda n: (0, 0, 0)),
            ],
            out_specs=(
                pl.BlockSpec((1, H, W, Gp), lambda n: (n, 0, 0, 0)),
                pl.BlockSpec((1, 1, Gp), lambda n: (n, 0, 0)),
                pl.BlockSpec((1, 1, Gp), lambda n: (n, 0, 0)),
            ),
            scratch_shapes=[pltpu.VMEM((H + 2, W + 2, Cmid_p), jnp.float32)],
        ),
        compiler_params=pltpu.CompilerParams(
            dimension_semantics=("parallel",),
            vmem_limit_bytes=_VMEM_LIMIT),
    )(h4d, scale2, shift2, w3)


# ----------------------------------------------------------------------------
# Dense_Block forward (glue in JAX; hot paths are the two fused Pallas kernels)
# ----------------------------------------------------------------------------
def dense_layer_forward(x_nhwc, chan_sum, chan_sq, p):
    N, H, W, Cin = x_nhwc.shape
    M = N * H * W
    x2d = x_nhwc.reshape(M, Cin)

    # BN1 stats (carried from the previous layer / initial reduction) folded to scale/shift.
    mean1 = chan_sum / M
    var1 = jnp.maximum(chan_sq / M - mean1 * mean1, 0.0)      # biased var (PyTorch train mode)
    scale1 = p["bn1_gamma"] / jnp.sqrt(var1 + BN_EPS)
    shift1 = p["bn1_beta"] - mean1 * scale1

    # --- kernel 1: BN1 + LReLU + conv1x1 (+ BN2 batch-stat side outputs) ---
    y_mid, ps, pss = bn_lrelu_conv1(x2d, scale1[None, :], shift1[None, :], p["w1"])
    Cmid_p = y_mid.shape[1]
    sum2 = jnp.sum(ps, axis=0)[0]
    sq2 = jnp.sum(pss, axis=0)[0]
    mean2 = sum2 / M
    var2 = jnp.maximum(sq2 / M - mean2 * mean2, 0.0)
    scale2 = p["bn2_gamma"] / jnp.sqrt(var2 + BN_EPS)
    shift2 = p["bn2_beta"] - mean2 * scale2

    # --- kernel 2: BN2 + LReLU + conv3x3 (+ next layer's BN1 stats for the new channels) ---
    y4, ys, yss = bn_lrelu_conv3(y_mid.reshape(N, H, W, Cmid_p),
                                 scale2[None, :], shift2[None, :], p["w3"])
    G = p["growth"]
    y = y4[..., :G]                                           # drop lane padding
    y_sum = jnp.sum(ys, axis=0)[0, :G]
    y_sq = jnp.sum(yss, axis=0)[0, :G]

    # drop_rate == 0 -> nn.Dropout is the identity.
    # TODO(synk): write `y` straight into a preallocated (N,H,W,C_total) slab via
    # channel-offset out_specs + input_output_aliases to avoid the O(L^2) re-concat.
    x_new = jnp.concatenate([x_nhwc, y], axis=-1)
    return (x_new,
            jnp.concatenate([chan_sum, y_sum]),
            jnp.concatenate([chan_sq, y_sq]))


def dense_block_forward(x_nchw, params_list):
    # external interface NCHW (PyTorch); internal compute NHWC / (M, C) channels-last.
    x = jnp.transpose(x_nchw, (0, 2, 3, 1)).astype(jnp.float32)
    x2d = x.reshape(-1, x.shape[-1])
    chan_sum = jnp.sum(x2d, axis=0)            # single pass; carried & extended per layer
    chan_sq = jnp.sum(x2d * x2d, axis=0)
    for p in params_list:
        x, chan_sum, chan_sq = dense_layer_forward(x, chan_sum, chan_sq, p)
    return jnp.transpose(x, (0, 3, 1, 2))


# ----------------------------------------------------------------------------
# Deterministic parameter init (shapes from Dense_Block.__init__)
# ----------------------------------------------------------------------------
def init_dense_block_params(key, num_layers, inplanes, growth_rate=32, bn_size=4):
    params = []
    c = inplanes
    cmid = bn_size * growth_rate
    cmid_p = _round_up(cmid, LANE)
    g_p = _round_up(growth_rate, LANE)
    for _ in range(num_layers):
        key, k1, k2, k3, k4, k5, k6 = jax.random.split(key, 7)
        bn1_gamma = 1.0 + 0.1 * jax.random.normal(k1, (c,), jnp.float32)
        bn1_beta = 0.1 * jax.random.normal(k2, (c,), jnp.float32)
        conv1_w = 0.05 * jax.random.normal(k3, (c, cmid), jnp.float32)       # torch (Cmid,Cin,1,1).T
        bn2_gamma = 1.0 + 0.1 * jax.random.normal(k4, (cmid,), jnp.float32)
        bn2_beta = 0.1 * jax.random.normal(k5, (cmid,), jnp.float32)
        # HWIO layout == torch weight (G, Cmid, kh, kw).transpose(2, 3, 1, 0)
        conv3_whwio = 0.05 * jax.random.normal(k6, (3, 3, cmid, growth_rate), jnp.float32)

        # zero-padded, bf16 weights for the kernels (padding keeps results exact)
        w1 = jnp.zeros((c, cmid_p), jnp.float32).at[:, :cmid].set(conv1_w).astype(jnp.bfloat16)
        w3 = (jnp.zeros((9, cmid_p, g_p), jnp.float32)
              .at[:, :cmid, :growth_rate].set(conv3_whwio.reshape(9, cmid, growth_rate))
              .astype(jnp.bfloat16))

        params.append(dict(
            bn1_gamma=bn1_gamma, bn1_beta=bn1_beta,
            w1=w1,
            bn2_gamma=jnp.zeros((cmid_p,), jnp.float32).at[:cmid].set(bn2_gamma),
            bn2_beta=jnp.zeros((cmid_p,), jnp.float32).at[:cmid].set(bn2_beta),
            w3=w3,
            growth=growth_rate,
            # unpadded f32 copies, used only by the pure-JAX reference
            _conv1_w=conv1_w, _conv3_whwio=conv3_whwio,
            _bn2_gamma=bn2_gamma, _bn2_beta=bn2_beta,
        ))
        c += growth_rate
    return params


# ----------------------------------------------------------------------------
# Pure-JAX f32 reference (correctness check only)
# ----------------------------------------------------------------------------
def _ref_dense_block(x_nchw, params_list):
    x = jnp.transpose(x_nchw, (0, 2, 3, 1)).astype(jnp.float32)
    for p in params_list:
        N, H, W, Cin = x.shape
        x2d = x.reshape(-1, Cin)
        mean = jnp.mean(x2d, axis=0)
        var = jnp.mean((x2d - mean) ** 2, axis=0)
        h1 = (x2d - mean) / jnp.sqrt(var + BN_EPS) * p["bn1_gamma"] + p["bn1_beta"]
        h1 = jnp.where(h1 >= 0, h1, LRELU_SLOPE * h1)
        y_mid = h1 @ p["_conv1_w"]
        mean2 = jnp.mean(y_mid, axis=0)
        var2 = jnp.mean((y_mid - mean2) ** 2, axis=0)
        h2 = (y_mid - mean2) / jnp.sqrt(var2 + BN_EPS) * p["_bn2_gamma"] + p["_bn2_beta"]
        h2 = jnp.where(h2 >= 0, h2, LRELU_SLOPE * h2).reshape(N, H, W, -1)
        y = lax.conv_general_dilated(
            h2, p["_conv3_whwio"], window_strides=(1, 1), padding="SAME",
            dimension_numbers=("NHWC", "HWIO", "NHWC"))
        x = jnp.concatenate([x, y], axis=-1)
    return jnp.transpose(x, (0, 3, 1, 2))


# ----------------------------------------------------------------------------
if __name__ == "__main__":
    # Small config consistent with the module: Dense_Block(num_layers=2,
    # inplances=4, growth_rate=8, bn_size=2) on a (2, 4, 16, 16) NCHW input.
    num_layers, inplanes, growth_rate, bn_size = 2, 4, 8, 2

    key = jax.random.PRNGKey(0)
    key, kx = jax.random.split(key)
    x = jax.random.normal(kx, (2, inplanes, 16, 16), jnp.float32)   # NCHW, like PyTorch

    params = init_dense_block_params(key, num_layers, inplanes, growth_rate, bn_size)

    fwd = jax.jit(lambda xx: dense_block_forward(xx, params))
    out = jax.block_until_ready(fwd(x))

    # output_nc = inplanes + num_layers * growth_rate
    assert out.shape == (2, inplanes + num_layers * growth_rate, 16, 16), out.shape

    ref = jax.block_until_ready(_ref_dense_block(x, params))
    # tolerance accounts for bf16 MXU inputs (f32 accumulation) vs the pure-f32 reference
    max_err = float(jnp.max(jnp.abs(out - ref)))
    assert jnp.allclose(out, ref, atol=5e-2, rtol=5e-2), max_err

    print("KERNEL_OK")
</pallas_src>

<mosaic_0001>
module attributes {stable_mosaic.version = 11 : i64} {
  func.func @_bn_lrelu_conv1_kernel(%arg0: i32, %arg1: memref<256x4xf32, #tpu.memory_space<vmem>>, %arg2: memref<1x4xf32, #tpu.memory_space<vmem>>, %arg3: memref<1x4xf32, #tpu.memory_space<vmem>>, %arg4: memref<4x128xbf16, #tpu.memory_space<vmem>>, %arg5: memref<256x128xbf16, #tpu.memory_space<vmem>>, %arg6: memref<1x1x128xf32, #tpu.memory_space<vmem>>, %arg7: memref<1x1x128xf32, #tpu.memory_space<vmem>>) attributes {dimension_semantics = [#tpu.dimension_semantics<parallel>], iteration_bounds = array<i64: 2>, scalar_prefetch = 0 : i64, scratch_operands = 0 : i64, tpu.core_type = #tpu.core_type<tc>, window_params = [{transform_indices = @transform_0, window_bounds = array<i64: 256, 4>}, {pipeline_mode = #tpu.pipeline_mode<synchronous>, transform_indices = @transform_1, window_bounds = array<i64: 1, 4>}, {pipeline_mode = #tpu.pipeline_mode<synchronous>, transform_indices = @transform_2, window_bounds = array<i64: 1, 4>}, {pipeline_mode = #tpu.pipeline_mode<synchronous>, transform_indices = @transform_3, window_bounds = array<i64: 4, 128>}, {transform_indices = @transform_4, window_bounds = array<i64: 256, 128>}, {transform_indices = @transform_5, window_bounds = array<i64: 1, 1, 128>}, {transform_indices = @transform_6, window_bounds = array<i64: 1, 1, 128>}]} {
    %c0 = arith.constant 0 : index
    %c0_0 = arith.constant 0 : index
    %0 = vector.load %arg1[%c0, %c0_0] : memref<256x4xf32, #tpu.memory_space<vmem>>, vector<256x4xf32>
    %c0_1 = arith.constant 0 : index
    %c0_2 = arith.constant 0 : index
    %1 = vector.load %arg2[%c0_1, %c0_2] : memref<1x4xf32, #tpu.memory_space<vmem>>, vector<1x4xf32>
    %2 = vector.broadcast %1 : vector<1x4xf32> to vector<256x4xf32>
    %3 = arith.mulf %0, %2 : vector<256x4xf32>
    %c0_3 = arith.constant 0 : index
    %c0_4 = arith.constant 0 : index
    %4 = vector.load %arg3[%c0_3, %c0_4] : memref<1x4xf32, #tpu.memory_space<vmem>>, vector<1x4xf32>
    %5 = vector.broadcast %4 : vector<1x4xf32> to vector<256x4xf32>
    %6 = arith.addf %3, %5 : vector<256x4xf32>
    %cst = arith.constant 0.000000e+00 : f32
    %7 = vector.broadcast %cst : f32 to vector<256x4xf32>
    %8 = arith.cmpf oge, %6, %7 : vector<256x4xf32>
    %cst_5 = arith.constant 2.000000e-01 : f32
    %9 = vector.broadcast %cst_5 : f32 to vector<256x4xf32>
    %10 = arith.mulf %9, %6 : vector<256x4xf32>
    %11 = arith.select %8, %6, %10 : vector<256x4xi1>, vector<256x4xf32>
    %12 = arith.truncf %11 : vector<256x4xf32> to vector<256x4xbf16>
    %c0_6 = arith.constant 0 : index
    %c0_7 = arith.constant 0 : index
    %13 = vector.load %arg4[%c0_6, %c0_7] : memref<4x128xbf16, #tpu.memory_space<vmem>>, vector<4x128xbf16>
    %cst_8 = arith.constant dense<0.000000e+00> : vector<256x128xf32>
    %14 = tpu.matmul %12, %13, %cst_8 {dimension_numbers = #tpu.dot_dimension_numbers<[1], [0], [0], [1], [0, 0, 1, 1], [], []>} : vector<256x4xbf16>, vector<4x128xbf16>, vector<256x128xf32> -> vector<256x128xf32>
    %15 = arith.truncf %14 : vector<256x128xf32> to vector<256x128xbf16>
    %c0_9 = arith.constant 0 : index
    %c0_10 = arith.constant 0 : index
    %16 = vector.load %arg5[%c0_9, %c0_10] : memref<256x128xbf16, #tpu.memory_space<vmem>>, vector<256x128xbf16>
    tpu.vector_store %arg5[%c0_9, %c0_10], %15 {strides = array<i32>} : memref<256x128xbf16, #tpu.memory_space<vmem>>, vector<256x128xbf16>,
    %cst_11 = arith.constant dense<0.000000e+00> : vector<128xf32>
    %17 = vector.multi_reduction <add>, %14, %cst_11 [0] : vector<256x128xf32> to vector<128xf32>
    %18 = vector.shape_cast %17 : vector<128xf32> to vector<1x128xf32>
    %19 = vector.shape_cast %18 : vector<1x128xf32> to vector<1x1x128xf32>
    %c0_12 = arith.constant 0 : index
    %c0_13 = arith.constant 0 : index
    %c0_14 = arith.constant 0 : index
    %20 = vector.load %arg6[%c0_12, %c0_13, %c0_14] : memref<1x1x128xf32, #tpu.memory_space<vmem>>, vector<1x1x128xf32>
    tpu.vector_store %arg6[%c0_12, %c0_13, %c0_14], %19 {strides = array<i32>} : memref<1x1x128xf32, #tpu.memory_space<vmem>>, vector<1x1x128xf32>,
    %21 = arith.mulf %14, %14 : vector<256x128xf32>
    %cst_15 = arith.constant dense<0.000000e+00> : vector<128xf32>
    %22 = vector.multi_reduction <add>, %21, %cst_15 [0] : vector<256x128xf32> to vector<128xf32>
    %23 = vector.shape_cast %22 : vector<128xf32> to vector<1x128xf32>
    %24 = vector.shape_cast %23 : vector<1x128xf32> to vector<1x1x128xf32>
    %c0_16 = arith.constant 0 : index
    %c0_17 = arith.constant 0 : index
    %c0_18 = arith.constant 0 : index
    %25 = vector.load %arg7[%c0_16, %c0_17, %c0_18] : memref<1x1x128xf32, #tpu.memory_space<vmem>>, vector<1x1x128xf32>
    tpu.vector_store %arg7[%c0_16, %c0_17, %c0_18], %24 {strides = array<i32>} : memref<1x1x128xf32, #tpu.memory_space<vmem>>, vector<1x1x128xf32>,
    return
  }
  func.func @transform_0(%arg0: i32) -> (i32, i32) {
    %c0_i32 = arith.constant 0 : i32
    %c0_i32_0 = arith.constant 0 : i32
    return %arg0, %c0_i32 : i32, i32
  }
  func.func @transform_1(%arg0: i32) -> (i32, i32) {
    %c0_i32 = arith.constant 0 : i32
    %c0_i32_0 = arith.constant 0 : i32
    %c0_i32_1 = arith.constant 0 : i32
    return %c0_i32, %c0_i32_0 : i32, i32
  }
  func.func @transform_2(%arg0: i32) -> (i32, i32) {
    %c0_i32 = arith.constant 0 : i32
    %c0_i32_0 = arith.constant 0 : i32
    %c0_i32_1 = arith.constant 0 : i32
    return %c0_i32, %c0_i32_0 : i32, i32
  }
  func.func @transform_3(%arg0: i32) -> (i32, i32) {
    %c0_i32 = arith.constant 0 : i32
    %c0_i32_0 = arith.constant 0 : i32
    %c0_i32_1 = arith.constant 0 : i32
    return %c0_i32, %c0_i32_0 : i32, i32
  }
  func.func @transform_4(%arg0: i32) -> (i32, i32) {
    %c0_i32 = arith.constant 0 : i32
    %c0_i32_0 = arith.constant 0 : i32
    return %arg0, %c0_i32 : i32, i32
  }
  func.func @transform_5(%arg0: i32) -> (i32, i32, i32) {
    %c0_i32 = arith.constant 0 : i32
    %c0_i32_0 = arith.constant 0 : i32
    %c0_i32_1 = arith.constant 0 : i32
    return %arg0, %c0_i32, %c0_i32_0 : i32, i32, i32
  }
  func.func @transform_6(%arg0: i32) -> (i32, i32, i32) {
    %c0_i32 = arith.constant 0 : i32
    %c0_i32_0 = arith.constant 0 : i32
    %c0_i32_1 = arith.constant 0 : i32
    return %arg0, %c0_i32, %c0_i32_0 : i32, i32, i32
  }
}

module attributes {stable_mosaic.version = 11 : i64} {
  func.func @_bn_lrelu_conv3_kernel(%arg0: i32, %arg1: memref<1x16x16x128xbf16, #tpu.memory_space<vmem>>, %arg2: memref<1x128xf32, #tpu.memory_space<vmem>>, %arg3: memref<1x128xf32, #tpu.memory_space<vmem>>, %arg4: memref<9x128x128xbf16, #tpu.memory_space<vmem>>, %arg5: memref<1x16x16x128xf32, #tpu.memory_space<vmem>>, %arg6: memref<1x1x128xf32, #tpu.memory_space<vmem>>, %arg7: memref<1x1x128xf32, #tpu.memory_space<vmem>>, %arg8: memref<18x18x128xf32, #tpu.memory_space<vmem>>) attributes {dimension_semantics = [#tpu.dimension_semantics<parallel>], iteration_bounds = array<i64: 2>, scalar_prefetch = 0 : i64, scratch_operands = 1 : i64, tpu.core_type = #tpu.core_type<tc>, window_params = [{transform_indices = @transform_0, window_bounds = array<i64: 1, 16, 16, 128>}, {pipeline_mode = #tpu.pipeline_mode<synchronous>, transform_indices = @transform_1, window_bounds = array<i64: 1, 128>}, {pipeline_mode = #tpu.pipeline_mode<synchronous>, transform_indices = @transform_2, window_bounds = array<i64: 1, 128>}, {pipeline_mode = #tpu.pipeline_mode<synchronous>, transform_indices = @transform_3, window_bounds = array<i64: 9, 128, 128>}, {transform_indices = @transform_4, window_bounds = array<i64: 1, 16, 16, 128>}, {transform_indices = @transform_5, window_bounds = array<i64: 1, 1, 128>}, {transform_indices = @transform_6, window_bounds = array<i64: 1, 1, 128>}]} {
    %c0 = arith.constant 0 : index
    %c0_0 = arith.constant 0 : index
    %c0_1 = arith.constant 0 : index
    %c0_2 = arith.constant 0 : index
    %0 = vector.load %arg1[%c0, %c0_0, %c0_1, %c0_2] : memref<1x16x16x128xbf16, #tpu.memory_space<vmem>>, vector<1x16x16x128xbf16>
    %1 = vector.shape_cast %0 : vector<1x16x16x128xbf16> to vector<16x16x128xbf16>
    %2 = arith.extf %1 : vector<16x16x128xbf16> to vector<16x16x128xf32>
    %c0_3 = arith.constant 0 : index
    %c0_4 = arith.constant 0 : index
    %3 = vector.load %arg2[%c0_3, %c0_4] : memref<1x128xf32, #tpu.memory_space<vmem>>, vector<1x128xf32>
    %4 = vector.shape_cast %3 : vector<1x128xf32> to vector<1x1x128xf32>
    %c0_5 = arith.constant 0 : index
    %c0_6 = arith.constant 0 : index
    %5 = vector.load %arg3[%c0_5, %c0_6] : memref<1x128xf32, #tpu.memory_space<vmem>>, vector<1x128xf32>
    %6 = vector.shape_cast %5 : vector<1x128xf32> to vector<1x1x128xf32>
    %7 = vector.broadcast %4 : vector<1x1x128xf32> to vector<16x16x128xf32>
    %8 = arith.mulf %2, %7 : vector<16x16x128xf32>
    %9 = vector.broadcast %6 : vector<1x1x128xf32> to vector<16x16x128xf32>
    %10 = arith.addf %8, %9 : vector<16x16x128xf32>
    %cst = arith.constant 0.000000e+00 : f32
    %11 = vector.broadcast %cst : f32 to vector<16x16x128xf32>
    %12 = arith.cmpf oge, %10, %11 : vector<16x16x128xf32>
    %cst_7 = arith.constant 2.000000e-01 : f32
    %13 = vector.broadcast %cst_7 : f32 to vector<16x16x128xf32>
    %14 = arith.mulf %13, %10 : vector<16x16x128xf32>
    %15 = arith.select %12, %10, %14 : vector<16x16x128xi1>, vector<16x16x128xf32>
    %cst_8 = arith.constant 0.000000e+00 : f32
    %16 = vector.broadcast %cst_8 : f32 to vector<18x18x128xf32>
    %c0_9 = arith.constant 0 : index
    %c0_10 = arith.constant 0 : index
    %c0_11 = arith.constant 0 : index
    %17 = vector.load %arg8[%c0_9, %c0_10, %c0_11] : memref<18x18x128xf32, #tpu.memory_space<vmem>>, vector<18x18x128xf32>
    tpu.vector_store %arg8[%c0_9, %c0_10, %c0_11], %16 {strides = array<i32>} : memref<18x18x128xf32, #tpu.memory_space<vmem>>, vector<18x18x128xf32>,
    %c1 = arith.constant 1 : index
    %c1_12 = arith.constant 1 : index
    %c0_13 = arith.constant 0 : index
    %18 = vector.load %arg8[%c1, %c1_12, %c0_13] : memref<18x18x128xf32, #tpu.memory_space<vmem>>, vector<16x16x128xf32>
    tpu.vector_store %arg8[%c1, %c1_12, %c0_13], %15 {strides = array<i32>} : memref<18x18x128xf32, #tpu.memory_space<vmem>>, vector<16x16x128xf32>,
    %cst_14 = arith.constant 0.000000e+00 : f32
    %19 = vector.broadcast %cst_14 : f32 to vector<256x128xf32>
    %c0_15 = arith.constant 0 : index
    %c0_16 = arith.constant 0 : index
    %c0_17 = arith.constant 0 : index
    %20 = vector.load %arg8[%c0_15, %c0_16, %c0_17] : memref<18x18x128xf32, #tpu.memory_space<vmem>>, vector<16x16x128xf32>
    %21 = vector.shape_cast %20 : vector<16x16x128xf32> to vector<256x128xf32>
    %22 = arith.truncf %21 : vector<256x128xf32> to vector<256x128xbf16>
    %c0_18 = arith.constant 0 : index
    %c0_19 = arith.constant 0 : index
    %c0_20 = arith.constant 0 : index
    %23 = vector.load %arg4[%c0_18, %c0_19, %c0_20] : memref<9x128x128xbf16, #tpu.memory_space<vmem>>, vector<1x128x128xbf16>
    %24 = vector.shape_cast %23 : vector<1x128x128xbf16> to vector<128x128xbf16>
    %cst_21 = arith.constant dense<0.000000e+00> : vector<256x128xf32>
    %25 = tpu.matmul %22, %24, %cst_21 {dimension_numbers = #tpu.dot_dimension_numbers<[1], [0], [0], [1], [0, 0, 1, 1], [], []>} : vector<256x128xbf16>, vector<128x128xbf16>, vector<256x128xf32> -> vector<256x128xf32>
    %26 = arith.addf %19, %25 : vector<256x128xf32>
    %c0_22 = arith.constant 0 : index
    %c1_23 = arith.constant 1 : index
    %c0_24 = arith.constant 0 : index
    %27 = vector.load %arg8[%c0_22, %c1_23, %c0_24] : memref<18x18x128xf32, #tpu.memory_space<vmem>>, vector<16x16x128xf32>
    %28 = vector.shape_cast %27 : vector<16x16x128xf32> to vector<256x128xf32>
    %29 = arith.truncf %28 : vector<256x128xf32> to vector<256x128xbf16>
    %c1_25 = arith.constant 1 : index
    %c0_26 = arith.constant 0 : index
    %c0_27 = arith.constant 0 : index
    %30 = vector.load %arg4[%c1_25, %c0_26, %c0_27] : memref<9x128x128xbf16, #tpu.memory_space<vmem>>, vector<1x128x128xbf16>
    %31 = vector.shape_cast %30 : vector<1x128x128xbf16> to vector<128x128xbf16>
    %cst_28 = arith.constant dense<0.000000e+00> : vector<256x128xf32>
    %32 = tpu.matmul %29, %31, %cst_28 {dimension_numbers = #tpu.dot_dimension_numbers<[1], [0], [0], [1], [0, 0, 1, 1], [], []>} : vector<256x128xbf16>, vector<128x128xbf16>, vector<256x128xf32> -> vector<256x128xf32>
    %33 = arith.addf %26, %32 : vector<256x128xf32>
    %c0_29 = arith.constant 0 : index
    %c2 = arith.constant 2 : index
    %c0_30 = arith.constant 0 : index
    %34 = vector.load %arg8[%c0_29, %c2, %c0_30] : memref<18x18x128xf32, #tpu.memory_space<vmem>>, vector<16x16x128xf32>
    %35 = vector.shape_cast %34 : vector<16x16x128xf32> to vector<256x128xf32>
    %36 = arith.truncf %35 : vector<256x128xf32> to vector<256x128xbf16>
    %c2_31 = arith.constant 2 : index
    %c0_32 = arith.constant 0 : index
    %c0_33 = arith.constant 0 : index
    %37 = vector.load %arg4[%c2_31, %c0_32, %c0_33] : memref<9x128x128xbf16, #tpu.memory_space<vmem>>, vector<1x128x128xbf16>
    %38 = vector.shape_cast %37 : vector<1x128x128xbf16> to vector<128x128xbf16>
    %cst_34 = arith.constant dense<0.000000e+00> : vector<256x128xf32>
    %39 = tpu.matmul %36, %38, %cst_34 {dimension_numbers = #tpu.dot_dimension_numbers<[1], [0], [0], [1], [0, 0, 1, 1], [], []>} : vector<256x128xbf16>, vector<128x128xbf16>, vector<256x128xf32> -> vector<256x128xf32>
    %40 = arith.addf %33, %39 : vector<256x128xf32>
    %c1_35 = arith.constant 1 : index
    %c0_36 = arith.constant 0 : index
    %c0_37 = arith.constant 0 : index
    %41 = vector.load %arg8[%c1_35, %c0_36, %c0_37] : memref<18x18x128xf32, #tpu.memory_space<vmem>>, vector<16x16x128xf32>
    %42 = vector.shape_cast %41 : vector<16x16x128xf32> to vector<256x128xf32>
    %43 = arith.truncf %42 : vector<256x128xf32> to vector<256x128xbf16>
    %c3 = arith.constant 3 : index
    %c0_38 = arith.constant 0 : index
    %c0_39 = arith.constant 0 : index
    %44 = vector.load %arg4[%c3, %c0_38, %c0_39] : memref<9x128x128xbf16, #tpu.memory_space<vmem>>, vector<1x128x128xbf16>
    %45 = vector.shape_cast %44 : vector<1x128x128xbf16> to vector<128x128xbf16>
    %cst_40 = arith.constant dense<0.000000e+00> : vector<256x128xf32>
    %46 = tpu.matmul %43, %45, %cst_40 {dimension_numbers = #tpu.dot_dimension_numbers<[1], [0], [0], [1], [0, 0, 1, 1], [], []>} : vector<256x128xbf16>, vector<128x128xbf16>, vector<256x128xf32> -> vector<256x128xf32>
    %47 = arith.addf %40, %46 : vector<256x128xf32>
    %c1_41 = arith.constant 1 : index
    %c1_42 = arith.constant 1 : index
    %c0_43 = arith.constant 0 : index
    %48 = vector.load %arg8[%c1_41, %c1_42, %c0_43] : memref<18x18x128xf32, #tpu.memory_space<vmem>>, vector<16x16x128xf32>
    %49 = vector.shape_cast %48 : vector<16x16x128xf32> to vector<256x128xf32>
    %50 = arith.truncf %49 : vector<256x128xf32> to vector<256x128xbf16>
    %c4 = arith.constant 4 : index
    %c0_44 = arith.constant 0 : index
    %c0_45 = arith.constant 0 : index
    %51 = vector.load %arg4[%c4, %c0_44, %c0_45] : memref<9x128x128xbf16, #tpu.memory_space<vmem>>, vector<1x128x128xbf16>
    %52 = vector.shape_cast %51 : vector<1x128x128xbf16> to vector<128x128xbf16>
    %cst_46 = arith.constant dense<0.000000e+00> : vector<256x128xf32>
    %53 = tpu.matmul %50, %52, %cst_46 {dimension_numbers = #tpu.dot_dimension_numbers<[1], [0], [0], [1], [0, 0, 1, 1], [], []>} : vector<256x128xbf16>, vector<128x128xbf16>, vector<256x128xf32> -> vector<256x128xf32>
    %54 = arith.addf %47, %53 : vector<256x128xf32>
    %c1_47 = arith.constant 1 : index
    %c2_48 = arith.constant 2 : index
    %c0_49 = arith.constant 0 : index
    %55 = vector.load %arg8[%c1_47, %c2_48, %c0_49] : memref<18x18x128xf32, #tpu.memory_space<vmem>>, vector<16x16x128xf32>
    %56 = vector.shape_cast %55 : vector<16x16x128xf32> to vector<256x128xf32>
    %57 = arith.truncf %56 : vector<256x128xf32> to vector<256x128xbf16>
    %c5 = arith.constant 5 : index
    %c0_50 = arith.constant 0 : index
    %c0_51 = arith.constant 0 : index
    %58 = vector.load %arg4[%c5, %c0_50, %c0_51] : memref<9x128x128xbf16, #tpu.memory_space<vmem>>, vector<1x128x128xbf16>
    %59 = vector.shape_cast %58 : vector<1x128x128xbf16> to vector<128x128xbf16>
    %cst_52 = arith.constant dense<0.000000e+00> : vector<256x128xf32>
    %60 = tpu.matmul %57, %59, %cst_52 {dimension_numbers = #tpu.dot_dimension_numbers<[1], [0], [0], [1], [0, 0, 1, 1], [], []>} : vector<256x128xbf16>, vector<128x128xbf16>, vector<256x128xf32> -> vector<256x128xf32>
    %61 = arith.addf %54, %60 : vector<256x128xf32>
    %c2_53 = arith.constant 2 : index
    %c0_54 = arith.constant 0 : index
    %c0_55 = arith.constant 0 : index
    %62 = vector.load %arg8[%c2_53, %c0_54, %c0_55] : memref<18x18x128xf32, #tpu.memory_space<vmem>>, vector<16x16x128xf32>
    %63 = vector.shape_cast %62 : vector<16x16x128xf32> to vector<256x128xf32>
    %64 = arith.truncf %63 : vector<256x128xf32> to vector<256x128xbf16>
    %c6 = arith.constant 6 : index
    %c0_56 = arith.constant 0 : index
    %c0_57 = arith.constant 0 : index
    %65 = vector.load %arg4[%c6, %c0_56, %c0_57] : memref<9x128x128xbf16, #tpu.memory_space<vmem>>, vector<1x128x128xbf16>
    %66 = vector.shape_cast %65 : vector<1x128x128xbf16> to vector<128x128xbf16>
    %cst_58 = arith.constant dense<0.000000e+00> : vector<256x128xf32>
    %67 = tpu.matmul %64, %66, %cst_58 {dimension_numbers = #tpu.dot_dimension_numbers<[1], [0], [0], [1], [0, 0, 1, 1], [], []>} : vector<256x128xbf16>, vector<128x128xbf16>, vector<256x128xf32> -> vector<256x128xf32>
    %68 = arith.addf %61, %67 : vector<256x128xf32>
    %c2_59 = arith.constant 2 : index
    %c1_60 = arith.constant 1 : index
    %c0_61 = arith.constant 0 : index
    %69 = vector.load %arg8[%c2_59, %c1_60, %c0_61] : memref<18x18x128xf32, #tpu.memory_space<vmem>>, vector<16x16x128xf32>
    %70 = vector.shape_cast %69 : vector<16x16x128xf32> to vector<256x128xf32>
    %71 = arith.truncf %70 : vector<256x128xf32> to vector<256x128xbf16>
    %c7 = arith.constant 7 : index
    %c0_62 = arith.constant 0 : index
    %c0_63 = arith.constant 0 : index
    %72 = vector.load %arg4[%c7, %c0_62, %c0_63] : memref<9x128x128xbf16, #tpu.memory_space<vmem>>, vector<1x128x128xbf16>
    %73 = vector.shape_cast %72 : vector<1x128x128xbf16> to vector<128x128xbf16>
    %cst_64 = arith.constant dense<0.000000e+00> : vector<256x128xf32>
    %74 = tpu.matmul %71, %73, %cst_64 {dimension_numbers = #tpu.dot_dimension_numbers<[1], [0], [0], [1], [0, 0, 1, 1], [], []>} : vector<256x128xbf16>, vector<128x128xbf16>, vector<256x128xf32> -> vector<256x128xf32>
    %75 = arith.addf %68, %74 : vector<256x128xf32>
    %c2_65 = arith.constant 2 : index
    %c2_66 = arith.constant 2 : index
    %c0_67 = arith.constant 0 : index
    %76 = vector.load %arg8[%c2_65, %c2_66, %c0_67] : memref<18x18x128xf32, #tpu.memory_space<vmem>>, vector<16x16x128xf32>
    %77 = vector.shape_cast %76 : vector<16x16x128xf32> to vector<256x128xf32>
    %78 = arith.truncf %77 : vector<256x128xf32> to vector<256x128xbf16>
    %c8 = arith.constant 8 : index
    %c0_68 = arith.constant 0 : index
    %c0_69 = arith.constant 0 : index
    %79 = vector.load %arg4[%c8, %c0_68, %c0_69] : memref<9x128x128xbf16, #tpu.memory_space<vmem>>, vector<1x128x128xbf16>
    %80 = vector.shape_cast %79 : vector<1x128x128xbf16> to vector<128x128xbf16>
    %cst_70 = arith.constant dense<0.000000e+00> : vector<256x128xf32>
    %81 = tpu.matmul %78, %80, %cst_70 {dimension_numbers = #tpu.dot_dimension_numbers<[1], [0], [0], [1], [0, 0, 1, 1], [], []>} : vector<256x128xbf16>, vector<128x128xbf16>, vector<256x128xf32> -> vector<256x128xf32>
    %82 = arith.addf %75, %81 : vector<256x128xf32>
    %83 = vector.shape_cast %82 : vector<256x128xf32> to vector<1x16x16x128xf32>
    %c0_71 = arith.constant 0 : index
    %c0_72 = arith.constant 0 : index
    %c0_73 = arith.constant 0 : index
    %c0_74 = arith.constant 0 : index
    %84 = vector.load %arg5[%c0_71, %c0_72, %c0_73, %c0_74] : memref<1x16x16x128xf32, #tpu.memory_space<vmem>>, vector<1x16x16x128xf32>
    tpu.vector_store %arg5[%c0_71, %c0_72, %c0_73, %c0_74], %83 {strides = array<i32>} : memref<1x16x16x128xf32, #tpu.memory_space<vmem>>, vector<1x16x16x128xf32>,
    %cst_75 = arith.constant dense<0.000000e+00> : vector<128xf32>
    %85 = vector.multi_reduction <add>, %82, %cst_75 [0] : vector<256x128xf32> to vector<128xf32>
    %86 = vector.shape_cast %85 : vector<128xf32> to vector<1x128xf32>
    %87 = vector.shape_cast %86 : vector<1x128xf32> to vector<1x1x128xf32>
    %c0_76 = arith.constant 0 : index
    %c0_77 = arith.constant 0 : index
    %c0_78 = arith.constant 0 : index
    %88 = vector.load %arg6[%c0_76, %c0_77, %c0_78] : memref<1x1x128xf32, #tpu.memory_space<vmem>>, vector<1x1x128xf32>
    tpu.vector_store %arg6[%c0_76, %c0_77, %c0_78], %87 {strides = array<i32>} : memref<1x1x128xf32, #tpu.memory_space<vmem>>, vector<1x1x128xf32>,
    %89 = arith.mulf %82, %82 : vector<256x128xf32>
    %cst_79 = arith.constant dense<0.000000e+00> : vector<128xf32>
    %90 = vector.multi_reduction <add>, %89, %cst_79 [0] : vector<256x128xf32> to vector<128xf32>
    %91 = vector.shape_cast %90 : vector<128xf32> to vector<1x128xf32>
    %92 = vector.shape_cast %91 : vector<1x128xf32> to vector<1x1x128xf32>
    %c0_80 = arith.constant 0 : index
    %c0_81 = arith.constant 0 : index
    %c0_82 = arith.constant 0 : index
    %93 = vector.load %arg7[%c0_80, %c0_81, %c0_82] : memref<1x1x128xf32, #tpu.memory_space<vmem>>, vector<1x1x128xf32>
    tpu.vector_store %arg7[%c0_80, %c0_81, %c0_82], %92 {strides = array<i32>} : memref<1x1x128xf32, #tpu.memory_space<vmem>>, vector<1x1x128xf32>,
    return
  }
  func.func @transform_0(%arg0: i32) -> (i32, i32, i32, i32) {
    %c0_i32 = arith.constant 0 : i32
    %c0_i32_0 = arith.constant 0 : i32
    %c0_i32_1 = arith.constant 0 : i32
    %c0_i32_2 = arith.constant 0 : i32
    return %arg0, %c0_i32, %c0_i32_0, %c0_i32_1 : i32, i32, i32, i32
  }
  func.func @transform_1(%arg0: i32) -> (i32, i32) {
    %c0_i32 = arith.constant 0 : i32
    %c0_i32_0 = arith.constant 0 : i32
    %c0_i32_1 = arith.constant 0 : i32
    return %c0_i32, %c0_i32_0 : i32, i32
  }
  func.func @transform_2(%arg0: i32) -> (i32, i32) {
    %c0_i32 = arith.constant 0 : i32
    %c0_i32_0 = arith.constant 0 : i32
    %c0_i32_1 = arith.constant 0 : i32
    return %c0_i32, %c0_i32_0 : i32, i32
  }
  func.func @transform_3(%arg0: i32) -> (i32, i32, i32) {
    %c0_i32 = arith.constant 0 : i32
    %c0_i32_0 = arith.constant 0 : i32
    %c0_i32_1 = arith.constant 0 : i32
    %c0_i32_2 = arith.constant 0 : i32
    return %c0_i32, %c0_i32_0, %c0_i32_1 : i32, i32, i32
  }
  func.func @transform_4(%arg0: i32) -> (i32, i32, i32, i32) {
    %c0_i32 = arith.constant 0 : i32
    %c0_i32_0 = arith.constant 0 : i32
    %c0_i32_1 = arith.constant 0 : i32
    %c0_i32_2 = arith.constant 0 : i32
    return %arg0, %c0_i32, %c0_i32_0, %c0_i32_1 : i32, i32, i32, i32
  }
  func.func @transform_5(%arg0: i32) -> (i32, i32, i32) {
    %c0_i32 = arith.constant 0 : i32
    %c0_i32_0 = arith.constant 0 : i32
    %c0_i32_1 = arith.constant 0 : i32
    return %arg0, %c0_i32, %c0_i32_0 : i32, i32, i32
  }
  func.func @transform_6(%arg0: i32) -> (i32, i32, i32) {
    %c0_i32 = arith.constant 0 : i32
    %c0_i32_0 = arith.constant 0 : i32
    %c0_i32_1 = arith.constant 0 : i32
    return %arg0, %c0_i32, %c0_i32_0 : i32, i32, i32
  }
}

module attributes {stable_mosaic.version = 11 : i64} {
  func.func @_bn_lrelu_conv1_kernel(%arg0: i32, %arg1: memref<256x12xf32, #tpu.memory_space<vmem>>, %arg2: memref<1x12xf32, #tpu.memory_space<vmem>>, %arg3: memref<1x12xf32, #tpu.memory_space<vmem>>, %arg4: memref<12x128xbf16, #tpu.memory_space<vmem>>, %arg5: memref<256x128xbf16, #tpu.memory_space<vmem>>, %arg6: memref<1x1x128xf32, #tpu.memory_space<vmem>>, %arg7: memref<1x1x128xf32, #tpu.memory_space<vmem>>) attributes {dimension_semantics = [#tpu.dimension_semantics<parallel>], iteration_bounds = array<i64: 2>, scalar_prefetch = 0 : i64, scratch_operands = 0 : i64, tpu.core_type = #tpu.core_type<tc>, window_params = [{transform_indices = @transform_0, window_bounds = array<i64: 256, 12>}, {pipeline_mode = #tpu.pipeline_mode<synchronous>, transform_indices = @transform_1, window_bounds = array<i64: 1, 12>}, {pipeline_mode = #tpu.pipeline_mode<synchronous>, transform_indices = @transform_2, window_bounds = array<i64: 1, 12>}, {pipeline_mode = #tpu.pipeline_mode<synchronous>, transform_indices = @transform_3, window_bounds = array<i64: 12, 128>}, {transform_indices = @transform_4, window_bounds = array<i64: 256, 128>}, {transform_indices = @transform_5, window_bounds = array<i64: 1, 1, 128>}, {transform_indices = @transform_6, window_bounds = array<i64: 1, 1, 128>}]} {
    %c0 = arith.constant 0 : index
    %c0_0 = arith.constant 0 : index
    %0 = vector.load %arg1[%c0, %c0_0] : memref<256x12xf32, #tpu.memory_space<vmem>>, vector<256x12xf32>
    %c0_1 = arith.constant 0 : index
    %c0_2 = arith.constant 0 : index
    %1 = vector.load %arg2[%c0_1, %c0_2] : memref<1x12xf32, #tpu.memory_space<vmem>>, vector<1x12xf32>
    %2 = vector.broadcast %1 : vector<1x12xf32> to vector<256x12xf32>
    %3 = arith.mulf %0, %2 : vector<256x12xf32>
    %c0_3 = arith.constant 0 : index
    %c0_4 = arith.constant 0 : index
    %4 = vector.load %arg3[%c0_3, %c0_4] : memref<1x12xf32, #tpu.memory_space<vmem>>, vector<1x12xf32>
    %5 = vector.broadcast %4 : vector<1x12xf32> to vector<256x12xf32>
    %6 = arith.addf %3, %5 : vector<256x12xf32>
    %cst = arith.constant 0.000000e+00 : f32
    %7 = vector.broadcast %cst : f32 to vector<256x12xf32>
    %8 = arith.cmpf oge, %6, %7 : vector<256x12xf32>
    %cst_5 = arith.constant 2.000000e-01 : f32
    %9 = vector.broadcast %cst_5 : f32 to vector<256x12xf32>
    %10 = arith.mulf %9, %6 : vector<256x12xf32>
    %11 = arith.select %8, %6, %10 : vector<256x12xi1>, vector<256x12xf32>
    %12 = arith.truncf %11 : vector<256x12xf32> to vector<256x12xbf16>
    %c0_6 = arith.constant 0 : index
    %c0_7 = arith.constant 0 : index
    %13 = vector.load %arg4[%c0_6, %c0_7] : memref<12x128xbf16, #tpu.memory_space<vmem>>, vector<12x128xbf16>
    %cst_8 = arith.constant dense<0.000000e+00> : vector<256x128xf32>
    %14 = tpu.matmul %12, %13, %cst_8 {dimension_numbers = #tpu.dot_dimension_numbers<[1], [0], [0], [1], [0, 0, 1, 1], [], []>} : vector<256x12xbf16>, vector<12x128xbf16>, vector<256x128xf32> -> vector<256x128xf32>
    %15 = arith.truncf %14 : vector<256x128xf32> to vector<256x128xbf16>
    %c0_9 = arith.constant 0 : index
    %c0_10 = arith.constant 0 : index
    %16 = vector.load %arg5[%c0_9, %c0_10] : memref<256x128xbf16, #tpu.memory_space<vmem>>, vector<256x128xbf16>
    tpu.vector_store %arg5[%c0_9, %c0_10], %15 {strides = array<i32>} : memref<256x128xbf16, #tpu.memory_space<vmem>>, vector<256x128xbf16>,
    %cst_11 = arith.constant dense<0.000000e+00> : vector<128xf32>
    %17 = vector.multi_reduction <add>, %14, %cst_11 [0] : vector<256x128xf32> to vector<128xf32>
    %18 = vector.shape_cast %17 : vector<128xf32> to vector<1x128xf32>
    %19 = vector.shape_cast %18 : vector<1x128xf32> to vector<1x1x128xf32>
    %c0_12 = arith.constant 0 : index
    %c0_13 = arith.constant 0 : index
    %c0_14 = arith.constant 0 : index
    %20 = vector.load %arg6[%c0_12, %c0_13, %c0_14] : memref<1x1x128xf32, #tpu.memory_space<vmem>>, vector<1x1x128xf32>
    tpu.vector_store %arg6[%c0_12, %c0_13, %c0_14], %19 {strides = array<i32>} : memref<1x1x128xf32, #tpu.memory_space<vmem>>, vector<1x1x128xf32>,
    %21 = arith.mulf %14, %14 : vector<256x128xf32>
    %cst_15 = arith.constant dense<0.000000e+00> : vector<128xf32>
    %22 = vector.multi_reduction <add>, %21, %cst_15 [0] : vector<256x128xf32> to vector<128xf32>
    %23 = vector.shape_cast %22 : vector<128xf32> to vector<1x128xf32>
    %24 = vector.shape_cast %23 : vector<1x128xf32> to vector<1x1x128xf32>
    %c0_16 = arith.constant 0 : index
    %c0_17 = arith.constant 0 : index
    %c0_18 = arith.constant 0 : index
    %25 = vector.load %arg7[%c0_16, %c0_17, %c0_18] : memref<1x1x128xf32, #tpu.memory_space<vmem>>, vector<1x1x128xf32>
    tpu.vector_store %arg7[%c0_16, %c0_17, %c0_18], %24 {strides = array<i32>} : memref<1x1x128xf32, #tpu.memory_space<vmem>>, vector<1x1x128xf32>,
    return
  }
  func.func @transform_0(%arg0: i32) -> (i32, i32) {
    %c0_i32 = arith.constant 0 : i32
    %c0_i32_0 = arith.constant 0 : i32
    return %arg0, %c0_i32 : i32, i32
  }
  func.func @transform_1(%arg0: i32) -> (i32, i32) {
    %c0_i32 = arith.constant 0 : i32
    %c0_i32_0 = arith.constant 0 : i32
    %c0_i32_1 = arith.constant 0 : i32
    return %c0_i32, %c0_i32_0 : i32, i32
  }
  func.func @transform_2(%arg0: i32) -> (i32, i32) {
    %c0_i32 = arith.constant 0 : i32
    %c0_i32_0 = arith.constant 0 : i32
    %c0_i32_1 = arith.constant 0 : i32
    return %c0_i32, %c0_i32_0 : i32, i32
  }
  func.func @transform_3(%arg0: i32) -> (i32, i32) {
    %c0_i32 = arith.constant 0 : i32
    %c0_i32_0 = arith.constant 0 : i32
    %c0_i32_1 = arith.constant 0 : i32
    return %c0_i32, %c0_i32_0 : i32, i32
  }
  func.func @transform_4(%arg0: i32) -> (i32, i32) {
    %c0_i32 = arith.constant 0 : i32
    %c0_i32_0 = arith.constant 0 : i32
    return %arg0, %c0_i32 : i32, i32
  }
  func.func @transform_5(%arg0: i32) -> (i32, i32, i32) {
    %c0_i32 = arith.constant 0 : i32
    %c0_i32_0 = arith.constant 0 : i32
    %c0_i32_1 = arith.constant 0 : i32
    return %arg0, %c0_i32, %c0_i32_0 : i32, i32, i32
  }
  func.func @transform_6(%arg0: i32) -> (i32, i32, i32) {
    %c0_i32 = arith.constant 0 : i32
    %c0_i32_0 = arith.constant 0 : i32
    %c0_i32_1 = arith.constant 0 : i32
    return %arg0, %c0_i32, %c0_i32_0 : i32, i32, i32
  }
}

module attributes {stable_mosaic.version = 11 : i64} {
  func.func @_bn_lrelu_conv3_kernel(%arg0: i32, %arg1: memref<1x16x16x128xbf16, #tpu.memory_space<vmem>>, %arg2: memref<1x128xf32, #tpu.memory_space<vmem>>, %arg3: memref<1x128xf32, #tpu.memory_space<vmem>>, %arg4: memref<9x128x128xbf16, #tpu.memory_space<vmem>>, %arg5: memref<1x16x16x128xf32, #tpu.memory_space<vmem>>, %arg6: memref<1x1x128xf32, #tpu.memory_space<vmem>>, %arg7: memref<1x1x128xf32, #tpu.memory_space<vmem>>, %arg8: memref<18x18x128xf32, #tpu.memory_space<vmem>>) attributes {dimension_semantics = [#tpu.dimension_semantics<parallel>], iteration_bounds = array<i64: 2>, scalar_prefetch = 0 : i64, scratch_operands = 1 : i64, tpu.core_type = #tpu.core_type<tc>, window_params = [{transform_indices = @transform_0, window_bounds = array<i64: 1, 16, 16, 128>}, {pipeline_mode = #tpu.pipeline_mode<synchronous>, transform_indices = @transform_1, window_bounds = array<i64: 1, 128>}, {pipeline_mode = #tpu.pipeline_mode<synchronous>, transform_indices = @transform_2, window_bounds = array<i64: 1, 128>}, {pipeline_mode = #tpu.pipeline_mode<synchronous>, transform_indices = @transform_3, window_bounds = array<i64: 9, 128, 128>}, {transform_indices = @transform_4, window_bounds = array<i64: 1, 16, 16, 128>}, {transform_indices = @transform_5, window_bounds = array<i64: 1, 1, 128>}, {transform_indices = @transform_6, window_bounds = array<i64: 1, 1, 128>}]} {
    %c0 = arith.constant 0 : index
    %c0_0 = arith.constant 0 : index
    %c0_1 = arith.constant 0 : index
    %c0_2 = arith.constant 0 : index
    %0 = vector.load %arg1[%c0, %c0_0, %c0_1, %c0_2] : memref<1x16x16x128xbf16, #tpu.memory_space<vmem>>, vector<1x16x16x128xbf16>
    %1 = vector.shape_cast %0 : vector<1x16x16x128xbf16> to vector<16x16x128xbf16>
    %2 = arith.extf %1 : vector<16x16x128xbf16> to vector<16x16x128xf32>
    %c0_3 = arith.constant 0 : index
    %c0_4 = arith.constant 0 : index
    %3 = vector.load %arg2[%c0_3, %c0_4] : memref<1x128xf32, #tpu.memory_space<vmem>>, vector<1x128xf32>
    %4 = vector.shape_cast %3 : vector<1x128xf32> to vector<1x1x128xf32>
    %c0_5 = arith.constant 0 : index
    %c0_6 = arith.constant 0 : index
    %5 = vector.load %arg3[%c0_5, %c0_6] : memref<1x128xf32, #tpu.memory_space<vmem>>, vector<1x128xf32>
    %6 = vector.shape_cast %5 : vector<1x128xf32> to vector<1x1x128xf32>
    %7 = vector.broadcast %4 : vector<1x1x128xf32> to vector<16x16x128xf32>
    %8 = arith.mulf %2, %7 : vector<16x16x128xf32>
    %9 = vector.broadcast %6 : vector<1x1x128xf32> to vector<16x16x128xf32>
    %10 = arith.addf %8, %9 : vector<16x16x128xf32>
    %cst = arith.constant 0.000000e+00 : f32
    %11 = vector.broadcast %cst : f32 to vector<16x16x128xf32>
    %12 = arith.cmpf oge, %10, %11 : vector<16x16x128xf32>
    %cst_7 = arith.constant 2.000000e-01 : f32
    %13 = vector.broadcast %cst_7 : f32 to vector<16x16x128xf32>
    %14 = arith.mulf %13, %10 : vector<16x16x128xf32>
    %15 = arith.select %12, %10, %14 : vector<16x16x128xi1>, vector<16x16x128xf32>
    %cst_8 = arith.constant 0.000000e+00 : f32
    %16 = vector.broadcast %cst_8 : f32 to vector<18x18x128xf32>
    %c0_9 = arith.constant 0 : index
    %c0_10 = arith.constant 0 : index
    %c0_11 = arith.constant 0 : index
    %17 = vector.load %arg8[%c0_9, %c0_10, %c0_11] : memref<18x18x128xf32, #tpu.memory_space<vmem>>, vector<18x18x128xf32>
    tpu.vector_store %arg8[%c0_9, %c0_10, %c0_11], %16 {strides = array<i32>} : memref<18x18x128xf32, #tpu.memory_space<vmem>>, vector<18x18x128xf32>,
    %c1 = arith.constant 1 : index
    %c1_12 = arith.constant 1 : index
    %c0_13 = arith.constant 0 : index
    %18 = vector.load %arg8[%c1, %c1_12, %c0_13] : memref<18x18x128xf32, #tpu.memory_space<vmem>>, vector<16x16x128xf32>
    tpu.vector_store %arg8[%c1, %c1_12, %c0_13], %15 {strides = array<i32>} : memref<18x18x128xf32, #tpu.memory_space<vmem>>, vector<16x16x128xf32>,
    %cst_14 = arith.constant 0.000000e+00 : f32
    %19 = vector.broadcast %cst_14 : f32 to vector<256x128xf32>
    %c0_15 = arith.constant 0 : index
    %c0_16 = arith.constant 0 : index
    %c0_17 = arith.constant 0 : index
    %20 = vector.load %arg8[%c0_15, %c0_16, %c0_17] : memref<18x18x128xf32, #tpu.memory_space<vmem>>, vector<16x16x128xf32>
    %21 = vector.shape_cast %20 : vector<16x16x128xf32> to vector<256x128xf32>
    %22 = arith.truncf %21 : vector<256x128xf32> to vector<256x128xbf16>
    %c0_18 = arith.constant 0 : index
    %c0_19 = arith.constant 0 : index
    %c0_20 = arith.constant 0 : index
    %23 = vector.load %arg4[%c0_18, %c0_19, %c0_20] : memref<9x128x128xbf16, #tpu.memory_space<vmem>>, vector<1x128x128xbf16>
    %24 = vector.shape_cast %23 : vector<1x128x128xbf16> to vector<128x128xbf16>
    %cst_21 = arith.constant dense<0.000000e+00> : vector<256x128xf32>
    %25 = tpu.matmul %22, %24, %cst_21 {dimension_numbers = #tpu.dot_dimension_numbers<[1], [0], [0], [1], [0, 0, 1, 1], [], []>} : vector<256x128xbf16>, vector<128x128xbf16>, vector<256x128xf32> -> vector<256x128xf32>
    %26 = arith.addf %19, %25 : vector<256x128xf32>
    %c0_22 = arith.constant 0 : index
    %c1_23 = arith.constant 1 : index
    %c0_24 = arith.constant 0 : index
    %27 = vector.load %arg8[%c0_22, %c1_23, %c0_24] : memref<18x18x128xf32, #tpu.memory_space<vmem>>, vector<16x16x128xf32>
    %28 = vector.shape_cast %27 : vector<16x16x128xf32> to vector<256x128xf32>
    %29 = arith.truncf %28 : vector<256x128xf32> to vector<256x128xbf16>
    %c1_25 = arith.constant 1 : index
    %c0_26 = arith.constant 0 : index
    %c0_27 = arith.constant 0 : index
    %30 = vector.load %arg4[%c1_25, %c0_26, %c0_27] : memref<9x128x128xbf16, #tpu.memory_space<vmem>>, vector<1x128x128xbf16>
    %31 = vector.shape_cast %30 : vector<1x128x128xbf16> to vector<128x128xbf16>
    %cst_28 = arith.constant dense<0.000000e+00> : vector<256x128xf32>
    %32 = tpu.matmul %29, %31, %cst_28 {dimension_numbers = #tpu.dot_dimension_numbers<[1], [0], [0], [1], [0, 0, 1, 1], [], []>} : vector<256x128xbf16>, vector<128x128xbf16>, vector<256x128xf32> -> vector<256x128xf32>
    %33 = arith.addf %26, %32 : vector<256x128xf32>
    %c0_29 = arith.constant 0 : index
    %c2 = arith.constant 2 : index
    %c0_30 = arith.constant 0 : index
    %34 = vector.load %arg8[%c0_29, %c2, %c0_30] : memref<18x18x128xf32, #tpu.memory_space<vmem>>, vector<16x16x128xf32>
    %35 = vector.shape_cast %34 : vector<16x16x128xf32> to vector<256x128xf32>
    %36 = arith.truncf %35 : vector<256x128xf32> to vector<256x128xbf16>
    %c2_31 = arith.constant 2 : index
    %c0_32 = arith.constant 0 : index
    %c0_33 = arith.constant 0 : index
    %37 = vector.load %arg4[%c2_31, %c0_32, %c0_33] : memref<9x128x128xbf16, #tpu.memory_space<vmem>>, vector<1x128x128xbf16>
    %38 = vector.shape_cast %37 : vector<1x128x128xbf16> to vector<128x128xbf16>
    %cst_34 = arith.constant dense<0.000000e+00> : vector<256x128xf32>
    %39 = tpu.matmul %36, %38, %cst_34 {dimension_numbers = #tpu.dot_dimension_numbers<[1], [0], [0], [1], [0, 0, 1, 1], [], []>} : vector<256x128xbf16>, vector<128x128xbf16>, vector<256x128xf32> -> vector<256x128xf32>
    %40 = arith.addf %33, %39 : vector<256x128xf32>
    %c1_35 = arith.constant 1 : index
    %c0_36 = arith.constant 0 : index
    %c0_37 = arith.constant 0 : index
    %41 = vector.load %arg8[%c1_35, %c0_36, %c0_37] : memref<18x18x128xf32, #tpu.memory_space<vmem>>, vector<16x16x128xf32>
    %42 = vector.shape_cast %41 : vector<16x16x128xf32> to vector<256x128xf32>
    %43 = arith.truncf %42 : vector<256x128xf32> to vector<256x128xbf16>
    %c3 = arith.constant 3 : index
    %c0_38 = arith.constant 0 : index
    %c0_39 = arith.constant 0 : index
    %44 = vector.load %arg4[%c3, %c0_38, %c0_39] : memref<9x128x128xbf16, #tpu.memory_space<vmem>>, vector<1x128x128xbf16>
    %45 = vector.shape_cast %44 : vector<1x128x128xbf16> to vector<128x128xbf16>
    %cst_40 = arith.constant dense<0.000000e+00> : vector<256x128xf32>
    %46 = tpu.matmul %43, %45, %cst_40 {dimension_numbers = #tpu.dot_dimension_numbers<[1], [0], [0], [1], [0, 0, 1, 1], [], []>} : vector<256x128xbf16>, vector<128x128xbf16>, vector<256x128xf32> -> vector<256x128xf32>
    %47 = arith.addf %40, %46 : vector<256x128xf32>
    %c1_41 = arith.constant 1 : index
    %c1_42 = arith.constant 1 : index
    %c0_43 = arith.constant 0 : index
    %48 = vector.load %arg8[%c1_41, %c1_42, %c0_43] : memref<18x18x128xf32, #tpu.memory_space<vmem>>, vector<16x16x128xf32>
    %49 = vector.shape_cast %48 : vector<16x16x128xf32> to vector<256x128xf32>
    %50 = arith.truncf %49 : vector<256x128xf32> to vector<256x128xbf16>
    %c4 = arith.constant 4 : index
    %c0_44 = arith.constant 0 : index
    %c0_45 = arith.constant 0 : index
    %51 = vector.load %arg4[%c4, %c0_44, %c0_45] : memref<9x128x128xbf16, #tpu.memory_space<vmem>>, vector<1x128x128xbf16>
    %52 = vector.shape_cast %51 : vector<1x128x128xbf16> to vector<128x128xbf16>
    %cst_46 = arith.constant dense<0.000000e+00> : vector<256x128xf32>
    %53 = tpu.matmul %50, %52, %cst_46 {dimension_numbers = #tpu.dot_dimension_numbers<[1], [0], [0], [1], [0, 0, 1, 1], [], []>} : vector<256x128xbf16>, vector<128x128xbf16>, vector<256x128xf32> -> vector<256x128xf32>
    %54 = arith.addf %47, %53 : vector<256x128xf32>
    %c1_47 = arith.constant 1 : index
    %c2_48 = arith.constant 2 : index
    %c0_49 = arith.constant 0 : index
    %55 = vector.load %arg8[%c1_47, %c2_48, %c0_49] : memref<18x18x128xf32, #tpu.memory_space<vmem>>, vector<16x16x128xf32>
    %56 = vector.shape_cast %55 : vector<16x16x128xf32> to vector<256x128xf32>
    %57 = arith.truncf %56 : vector<256x128xf32> to vector<256x128xbf16>
    %c5 = arith.constant 5 : index
    %c0_50 = arith.constant 0 : index
    %c0_51 = arith.constant 0 : index
    %58 = vector.load %arg4[%c5, %c0_50, %c0_51] : memref<9x128x128xbf16, #tpu.memory_space<vmem>>, vector<1x128x128xbf16>
    %59 = vector.shape_cast %58 : vector<1x128x128xbf16> to vector<128x128xbf16>
    %cst_52 = arith.constant dense<0.000000e+00> : vector<256x128xf32>
    %60 = tpu.matmul %57, %59, %cst_52 {dimension_numbers = #tpu.dot_dimension_numbers<[1], [0], [0], [1], [0, 0, 1, 1], [], []>} : vector<256x128xbf16>, vector<128x128xbf16>, vector<256x128xf32> -> vector<256x128xf32>
    %61 = arith.addf %54, %60 : vector<256x128xf32>
    %c2_53 = arith.constant 2 : index
    %c0_54 = arith.constant 0 : index
    %c0_55 = arith.constant 0 : index
    %62 = vector.load %arg8[%c2_53, %c0_54, %c0_55] : memref<18x18x128xf32, #tpu.memory_space<vmem>>, vector<16x16x128xf32>
    %63 = vector.shape_cast %62 : vector<16x16x128xf32> to vector<256x128xf32>
    %64 = arith.truncf %63 : vector<256x128xf32> to vector<256x128xbf16>
    %c6 = arith.constant 6 : index
    %c0_56 = arith.constant 0 : index
    %c0_57 = arith.constant 0 : index
    %65 = vector.load %arg4[%c6, %c0_56, %c0_57] : memref<9x128x128xbf16, #tpu.memory_space<vmem>>, vector<1x128x128xbf16>
    %66 = vector.shape_cast %65 : vector<1x128x128xbf16> to vector<128x128xbf16>
    %cst_58 = arith.constant dense<0.000000e+00> : vector<256x128xf32>
    %67 = tpu.matmul %64, %66, %cst_58 {dimension_numbers = #tpu.dot_dimension_numbers<[1], [0], [0], [1], [0, 0, 1, 1], [], []>} : vector<256x128xbf16>, vector<128x128xbf16>, vector<256x128xf32> -> vector<256x128xf32>
    %68 = arith.addf %61, %67 : vector<256x128xf32>
    %c2_59 = arith.constant 2 : index
    %c1_60 = arith.constant 1 : index
    %c0_61 = arith.constant 0 : index
    %69 = vector.load %arg8[%c2_59, %c1_60, %c0_61] : memref<18x18x128xf32, #tpu.memory_space<vmem>>, vector<16x16x128xf32>
    %70 = vector.shape_cast %69 : vector<16x16x128xf32> to vector<256x128xf32>
    %71 = arith.truncf %70 : vector<256x128xf32> to vector<256x128xbf16>
    %c7 = arith.constant 7 : index
    %c0_62 = arith.constant 0 : index
    %c0_63 = arith.constant 0 : index
    %72 = vector.load %arg4[%c7, %c0_62, %c0_63] : memref<9x128x128xbf16, #tpu.memory_space<vmem>>, vector<1x128x128xbf16>
    %73 = vector.shape_cast %72 : vector<1x128x128xbf16> to vector<128x128xbf16>
    %cst_64 = arith.constant dense<0.000000e+00> : vector<256x128xf32>
    %74 = tpu.matmul %71, %73, %cst_64 {dimension_numbers = #tpu.dot_dimension_numbers<[1], [0], [0], [1], [0, 0, 1, 1], [], []>} : vector<256x128xbf16>, vector<128x128xbf16>, vector<256x128xf32> -> vector<256x128xf32>
    %75 = arith.addf %68, %74 : vector<256x128xf32>
    %c2_65 = arith.constant 2 : index
    %c2_66 = arith.constant 2 : index
    %c0_67 = arith.constant 0 : index
    %76 = vector.load %arg8[%c2_65, %c2_66, %c0_67] : memref<18x18x128xf32, #tpu.memory_space<vmem>>, vector<16x16x128xf32>
    %77 = vector.shape_cast %76 : vector<16x16x128xf32> to vector<256x128xf32>
    %78 = arith.truncf %77 : vector<256x128xf32> to vector<256x128xbf16>
    %c8 = arith.constant 8 : index
    %c0_68 = arith.constant 0 : index
    %c0_69 = arith.constant 0 : index
    %79 = vector.load %arg4[%c8, %c0_68, %c0_69] : memref<9x128x128xbf16, #tpu.memory_space<vmem>>, vector<1x128x128xbf16>
    %80 = vector.shape_cast %79 : vector<1x128x128xbf16> to vector<128x128xbf16>
    %cst_70 = arith.constant dense<0.000000e+00> : vector<256x128xf32>
    %81 = tpu.matmul %78, %80, %cst_70 {dimension_numbers = #tpu.dot_dimension_numbers<[1], [0], [0], [1], [0, 0, 1, 1], [], []>} : vector<256x128xbf16>, vector<128x128xbf16>, vector<256x128xf32> -> vector<256x128xf32>
    %82 = arith.addf %75, %81 : vector<256x128xf32>
    %83 = vector.shape_cast %82 : vector<256x128xf32> to vector<1x16x16x128xf32>
    %c0_71 = arith.constant 0 : index
    %c0_72 = arith.constant 0 : index
    %c0_73 = arith.constant 0 : index
    %c0_74 = arith.constant 0 : index
    %84 = vector.load %arg5[%c0_71, %c0_72, %c0_73, %c0_74] : memref<1x16x16x128xf32, #tpu.memory_space<vmem>>, vector<1x16x16x128xf32>
    tpu.vector_store %arg5[%c0_71, %c0_72, %c0_73, %c0_74], %83 {strides = array<i32>} : memref<1x16x16x128xf32, #tpu.memory_space<vmem>>, vector<1x16x16x128xf32>,
    %cst_75 = arith.constant dense<0.000000e+00> : vector<128xf32>
    %85 = vector.multi_reduction <add>, %82, %cst_75 [0] : vector<256x128xf32> to vector<128xf32>
    %86 = vector.shape_cast %85 : vector<128xf32> to vector<1x128xf32>
    %87 = vector.shape_cast %86 : vector<1x128xf32> to vector<1x1x128xf32>
    %c0_76 = arith.constant 0 : index
    %c0_77 = arith.constant 0 : index
    %c0_78 = arith.constant 0 : index
    %88 = vector.load %arg6[%c0_76, %c0_77, %c0_78] : memref<1x1x128xf32, #tpu.memory_space<vmem>>, vector<1x1x128xf32>
    tpu.vector_store %arg6[%c0_76, %c0_77, %c0_78], %87 {strides = array<i32>} : memref<1x1x128xf32, #tpu.memory_space<vmem>>, vector<1x1x128xf32>,
    %89 = arith.mulf %82, %82 : vector<256x128xf32>
    %cst_79 = arith.constant dense<0.000000e+00> : vector<128xf32>
    %90 = vector.multi_reduction <add>, %89, %cst_79 [0] : vector<256x128xf32> to vector<128xf32>
    %91 = vector.shape_cast %90 : vector<128xf32> to vector<1x128xf32>
    %92 = vector.shape_cast %91 : vector<1x128xf32> to vector<1x1x128xf32>
    %c0_80 = arith.constant 0 : index
    %c0_81 = arith.constant 0 : index
    %c0_82 = arith.constant 0 : index
    %93 = vector.load %arg7[%c0_80, %c0_81, %c0_82] : memref<1x1x128xf32, #tpu.memory_space<vmem>>, vector<1x1x128xf32>
    tpu.vector_store %arg7[%c0_80, %c0_81, %c0_82], %92 {strides = array<i32>} : memref<1x1x128xf32, #tpu.memory_space<vmem>>, vector<1x1x128xf32>,
    return
  }
  func.func @transform_0(%arg0: i32) -> (i32, i32, i32, i32) {
    %c0_i32 = arith.constant 0 : i32
    %c0_i32_0 = arith.constant 0 : i32
    %c0_i32_1 = arith.constant 0 : i32
    %c0_i32_2 = arith.constant 0 : i32
    return %arg0, %c0_i32, %c0_i32_0, %c0_i32_1 : i32, i32, i32, i32
  }
  func.func @transform_1(%arg0: i32) -> (i32, i32) {
    %c0_i32 = arith.constant 0 : i32
    %c0_i32_0 = arith.constant 0 : i32
    %c0_i32_1 = arith.constant 0 : i32
    return %c0_i32, %c0_i32_0 : i32, i32
  }
  func.func @transform_2(%arg0: i32) -> (i32, i32) {
    %c0_i32 = arith.constant 0 : i32
    %c0_i32_0 = arith.constant 0 : i32
    %c0_i32_1 = arith.constant 0 : i32
    return %c0_i32, %c0_i32_0 : i32, i32
  }
  func.func @transform_3(%arg0: i32) -> (i32, i32, i32) {
    %c0_i32 = arith.constant 0 : i32
    %c0_i32_0 = arith.constant 0 : i32
    %c0_i32_1 = arith.constant 0 : i32
    %c0_i32_2 = arith.constant 0 : i32
    return %c0_i32, %c0_i32_0, %c0_i32_1 : i32, i32, i32
  }
  func.func @transform_4(%arg0: i32) -> (i32, i32, i32, i32) {
    %c0_i32 = arith.constant 0 : i32
    %c0_i32_0 = arith.constant 0 : i32
    %c0_i32_1 = arith.constant 0 : i32
    %c0_i32_2 = arith.constant 0 : i32
    return %arg0, %c0_i32, %c0_i32_0, %c0_i32_1 : i32, i32, i32, i32
  }
  func.func @transform_5(%arg0: i32) -> (i32, i32, i32) {
    %c0_i32 = arith.constant 0 : i32
    %c0_i32_0 = arith.constant 0 : i32
    %c0_i32_1 = arith.constant 0 : i32
    return %arg0, %c0_i32, %c0_i32_0 : i32, i32, i32
  }
  func.func @transform_6(%arg0: i32) -> (i32, i32, i32) {
    %c0_i32 = arith.constant 0 : i32
    %c0_i32_0 = arith.constant 0 : i32
    %c0_i32_1 = arith.constant 0 : i32
    return %arg0, %c0_i32, %c0_i32_0 : i32, i32, i32
  }
}

</mosaic_0001>

<bundles_post_ra>
// kernel: _lambda_.4
= control target key start
LH: loop header
LB: loop body
LE: loop exit
PB: predicated region body
PF: predicated region fallthrough
CT: control target
= control target key end

     0   :  { %s1378_s21 = smov 0   ;;  %s1556_s0 = inlined_call_operand.vmem [shape: f32[512,4], index: 0, kind: input, shape index: {}]   ;;  %s1557_s1 = inlined_call_operand.vmem [shape: f32[1,4], index: 1, kind: input, shape index: {}]   ;;  %s1558_s2 = inlined_call_operand.vmem [shape: f32[1,4], index: 2, kind: input, shape index: {}]   ;;  %s1559_s3 = inlined_call_operand.vmem [shape: bf16[4,128], index: 3, kind: input, shape index: {}]   ;;  %s1560_s4 = inlined_call_operand.vmem [shape: bf16[512,128], index: 4, kind: output, shape index: {0}]   ;;  %s1561_s5 = inlined_call_operand.vmem [shape: f32[2,1,128], index: 5, kind: output, shape index: {1}]   ;;  %s1562_s6 = inlined_call_operand.vmem [shape: f32[2,1,128], index: 6, kind: output, shape index: {2}]  }
   0x1 LB: > { %s1384_s22 = sadd.s32 4294967295, %s1341_s21   ;;  %p1088_p0 = scmp.ge.s32.totalorder %s1341_s21, 1  ;;  %s1341_s21 = sphi %s1378_s21, %s17_s21  }
   0x2   : > { %p218_p1 = scmp.lt.s32.totalorder %s1341_s21, 3 }
   0x4   : > { %p219_p2 = pnand %p1088_p0, %p218_p1 }
   0x5   : > { %s1089_s25 = sshll.u32 (!%p219_p2), %s1384_s22, 5  ;;  %p266_p4 = scmp.lt.s32.totalorder (!%p219_p2), %s1384_s22, 1 }
   0x6   : > { %222 = sbr.rel (%p219_p2) target bundleno = 301 (0x12d), region = 36  ;;  %p255_p3 = scmp.lt.s32.totalorder (!%p219_p2), %s1089_s25, 63 }
   0xb   : > { %v495_v0 = vld [vmem:[%s1559_s3] sm:$0x3]  ;;  %vm545_vm0 = vcmask 1041408   ;;  %s1564_s25 = smov (!%p255_p3, %s1089_s25), 63  ;;  %vm496_vm1 = vcmask 31744   ;;  %s1566_s22 = smov (!%p266_p4, %s1384_s22), 1 }
   0xc   : > { %1325 = vmatprep.subr.msk.bf16.mxu0 %vm545_vm0, %v495_v0  ;;  %v547_v1 = vsel %vm545_vm0, %v495_v0, 0  ;;  %1326 = vmatprep.subr.msk.bf16.mxu1 %vm545_vm0, %v495_v0  ;;  %s1090_s26 = sshll.u32 %s1564_s25, 3  ;;  %v1398_v2 = vld [vmem:[%s1557_s1] ss:$0 sm:$0xff]  ;;  %s1092_s10 = sshll.u32 %s1564_s25, 2 }
   0xd   : > { %1290 = vmatpush3.bf16.msra.mxu0 %v547_v1  ;;  %1324 = vmatpush3.bf16.msra.mxu1 %v547_v1  ;;  %s1403_s7 = scalar_lea.vmem %s1556_s0, %s1090_s26  ;;  %v1408_v3 = vld [vmem:[%s1558_s2] ss:$0 sm:$0xff]  ;;  %s1527_s13 = scalar_lea.vmem %s1560_s4, %s1092_s10 }
   0xe   : > { %v273_v4 = vld [vmem:[%s1403_s7] sm:$0xff]  ;;  %v274_v5 = vld [vmem:[%s1403_s7 + $0x8] sm:$0xff]  ;;  %v275_v6 = vld [vmem:[%s1403_s7 + $0x10] sm:$0xff]  ;;  %s268_s16 = scalar_lea.vmem %s1561_s5, %s1566_s22  ;;  %s271_s19 = scalar_lea.vmem %s1562_s6, %s1566_s22 }
   0xf   : > { %v312_v7 = vmul.f32 %v1398_v2, %v273_v4  ;;  %v313_v8 = vmul.f32 %v1398_v2, %v274_v5  ;;  %v276_v9 = vld [vmem:[%s1403_s7 + $0x18] sm:$0xff]  ;;  %v314_v10 = vmul.f32 %v1398_v2, %v275_v6  ;;  %v277_v11 = vld [vmem:[%s1403_s7 + $0x20] sm:$0xff]  ;;  %v278_v12 = vld [vmem:[%s1403_s7 + $0x28] sm:$0xff] }
  0x10   : > { %v315_v13 = vmul.f32 %v1398_v2, %v276_v9  ;;  %v316_v14 = vmul.f32 %v1398_v2, %v277_v11  ;;  %v317_v15 = vmul.f32 %v1398_v2, %v278_v12  ;;  %v279_v16 = vld [vmem:[%s1403_s7 + $0x30] sm:$0xff]  ;;  %v280_v17 = vld [vmem:[%s1403_s7 + $0x38] sm:$0xff]  ;;  %v281_v32 = vld [vmem:[%s1403_s7 + $0x40] sm:$0xff] }
  0x11   : > { %v351_v18 = vadd.f32 %v1408_v3, %v312_v7  ;;  %v352_v19 = vadd.f32 %v1408_v3, %v313_v8  ;;  %v353_v20 = vadd.f32 %v1408_v3, %v314_v10  ;;  %v318_v21 = vmul.f32 %v1398_v2, %v279_v16  ;;  %v282_v33 = vld [vmem:[%s1403_s7 + $0x48] sm:$0xff]  ;;  %v283_v34 = vld [vmem:[%s1403_s7 + $0x50] sm:$0xff]  ;;  %v284_v46 = vld [vmem:[%s1403_s7 + $0x58] sm:$0xff] }
  0x12   : > { %v354_v22 = vadd.f32 %v1408_v3, %v315_v13  ;;  %v355_v23 = vadd.f32 %v1408_v3, %v316_v14  ;;  %v356_v24 = vadd.f32 %v1408_v3, %v317_v15  ;;  %v319_v25 = vmul.f32 %v1398_v2, %v280_v17  ;;  %v285_v48 = vld [vmem:[%s1403_s7 + $0x60] sm:$0xff]  ;;  %v286_v58 = vld [vmem:[%s1403_s7 + $0x68] sm:$0xff]  ;;  %v287_v62 = vld [vmem:[%s1403_s7 + $0x70] sm:$0xff] }
  0x13   : > { %vm383_vm2 = vcmp.ge.f32.partialorder %v351_v18, 0.0  ;;  %vm384_vm3 = vcmp.ge.f32.partialorder %v352_v19, 0.0  ;;  %v415_v26 = vmul.f32 0.2, %v351_v18  ;;  %v416_v27 = vmul.f32 0.2, %v352_v19 }
  0x14   : > { %vm385_vm4 = vcmp.ge.f32.partialorder %v353_v20, 0.0  ;;  %vm386_vm5 = vcmp.ge.f32.partialorder %v354_v22, 0.0  ;;  %v417_v28 = vmul.f32 0.2, %v353_v20  ;;  %v418_v29 = vmul.f32 0.2, %v354_v22 }
  0x15   : > { %v447_v30 = vsel %vm383_vm2, %v351_v18, %v415_v26  ;;  %v448_v31 = vsel %vm384_vm3, %v352_v19, %v416_v27  ;;  %vm387_vm6 = vcmp.ge.f32.partialorder %v355_v23, 0.0  ;;  %vm388_vm7 = vcmp.ge.f32.partialorder %v356_v24, 0.0  ;;  %v288_v8 = vld [vmem:[%s1403_s7 + $0x78] sm:$0xff]  ;;  %v289_v12 = vld [vmem:[%s1403_s7 + $0x80] sm:$0xff] }
  0x16   : > { %v479_v35 = vpack.c.bf16 %v448_v31, %v447_v30  ;;  %v449_v36 = vsel %vm385_vm4, %v353_v20, %v417_v28  ;;  %v450_v37 = vsel %vm386_vm5, %v354_v22, %v418_v29  ;;  %v419_v38 = vmul.f32 0.2, %v355_v23  ;;  %v290_v20 = vld [vmem:[%s1403_s7 + $0x88] sm:$0xff]  ;;  %v292_v28 = vld [vmem:[%s1403_s7 + $0x98] sm:$0xff] }
  0x17   : > { %v480_v39 = vpack.c.bf16 %v450_v37, %v449_v36  ;;  %v420_v40 = vmul.f32 0.2, %v356_v24  ;;  %v357_v41 = vadd.f32 %v1408_v3, %v318_v21  ;;  %v358_v42 = vadd.f32 %v1408_v3, %v319_v25  ;;  %v291_v21 = vld [vmem:[%s1403_s7 + $0x90] sm:$0xff] }
  0x18   : > { %1291 = vmatprep.mubr.msk.bf16.mxu0 %vm496_vm1, %v479_v35  ;;  %v451_v43 = vsel %vm387_vm6, %v355_v23, %v419_v38  ;;  %v320_v44 = vmul.f32 %v1398_v2, %v281_v32  ;;  %v321_v45 = vmul.f32 %v1398_v2, %v282_v33  ;;  %v322_v47 = vmul.f32 %v1398_v2, %v283_v34  ;;  %v293_v33 = vld [vmem:[%s1403_s7 + $0xa0] sm:$0xff]  ;;  %v294_v34 = vld [vmem:[%s1403_s7 + $0xa8] sm:$0xff] }
  0x19   : > { %1292 = vmatmul.mubr.msk.bf16.vlgmr.msra.gmra.mxu0 %vm496_vm1, %v480_v39  ;;  %v452_v49 = vsel %vm388_vm7, %v356_v24, %v420_v40  ;;  %vm389_vm8 = vcmp.ge.f32.partialorder %v357_v41, 0.0  ;;  %vm390_vm9 = vcmp.ge.f32.partialorder %v358_v42, 0.0  ;;  %v421_v50 = vmul.f32 0.2, %v357_v41 }
  0x1a   : > { %v481_v51 = vpack.c.bf16 %v452_v49, %v451_v43  ;;  %v422_v52 = vmul.f32 0.2, %v358_v42  ;;  %v359_v53 = vadd.f32 %v1408_v3, %v320_v44  ;;  %v360_v54 = vadd.f32 %v1408_v3, %v321_v45  ;;  %v295_v45 = vld [vmem:[%s1403_s7 + $0xb0] sm:$0xff] }
  0x1b   : > { %v453_v55 = vsel %vm389_vm8, %v357_v41, %v421_v50  ;;  %v323_v56 = vmul.f32 %v1398_v2, %v284_v46  ;;  %v361_v57 = vadd.f32 %v1408_v3, %v322_v47  ;;  %v324_v59 = vmul.f32 %v1398_v2, %v285_v48  ;;  %v296_v46 = vld [vmem:[%s1403_s7 + $0xb8] sm:$0xff] }
  0x1c   : > { %1295 = vmatprep.mubr.msk.bf16.mxu0 %vm496_vm1, %v481_v51  ;;  %v454_v60 = vsel %vm390_vm9, %v358_v42, %v422_v52  ;;  %vm391_vm10 = vcmp.ge.f32.partialorder %v359_v53, 0.0  ;;  %vm392_vm11 = vcmp.ge.f32.partialorder %v360_v54, 0.0  ;;  %v423_v61 = vmul.f32 0.2, %v359_v53 }
  0x1d   : > { %v482_v63 = vpack.c.bf16 %v454_v60, %v453_v55  ;;  %v424_v0 = vmul.f32 0.2, %v360_v54  ;;  %v362_v1 = vadd.f32 %v1408_v3, %v323_v56  ;;  %vm393_vm12 = vcmp.ge.f32.partialorder %v361_v57, 0.0 }
  0x1e   : > { %v455_v4 = vsel %vm391_vm10, %v359_v53, %v423_v61  ;;  %v425_v5 = vmul.f32 0.2, %v361_v57  ;;  %v325_v6 = vmul.f32 %v1398_v2, %v286_v58  ;;  %v363_v7 = vadd.f32 %v1408_v3, %v324_v59  ;;  %v298_v61 = vld [vmem:[%s1403_s7 + $0xc8] sm:$0xff] }
  0x1f   : > { %v456_v9 = vsel %vm392_vm11, %v360_v54, %v424_v0  ;;  %vm394_vm13 = vcmp.ge.f32.partialorder %v362_v1, 0.0  ;;  %v426_v10 = vmul.f32 0.2, %v362_v1  ;;  %v326_v11 = vmul.f32 %v1398_v2, %v287_v62 }
  0x20   : > { %v483_v13 = vpack.c.bf16 %v456_v9, %v455_v4  ;;  %v457_v14 = vsel %vm393_vm12, %v361_v57, %v425_v5  ;;  %v364_v15 = vadd.f32 %v1408_v3, %v325_v6  ;;  %vm395_vm14 = vcmp.ge.f32.partialorder %v363_v7, 0.0  ;;  %v297_v57 = vld [vmem:[%s1403_s7 + $0xc0] sm:$0xff]  ;;  %v299_v6 = vld [vmem:[%s1403_s7 + $0xd0] sm:$0xff] }
  0x21   : > { %1296 = vmatmul.mubr.msk.bf16.gmra.mxu0 %vm496_vm1, %v482_v63  ;;  %v458_v16 = vsel %vm394_vm13, %v362_v1, %v426_v10  ;;  %v427_v17 = vmul.f32 0.2, %v363_v7  ;;  %v327_v18 = vmul.f32 %v1398_v2, %v288_v8  ;;  %v365_v19 = vadd.f32 %v1408_v3, %v326_v11  ;;  %v300_v11 = vld [vmem:[%s1403_s7 + $0xd8] sm:$0xff] }
  0x22   : > { %1299 = vmatprep.mubr.msk.bf16.mxu0 %vm496_vm1, %v483_v13  ;;  %v484_v22 = vpack.c.bf16 %v458_v16, %v457_v14  ;;  %vm396_vm15 = vcmp.ge.f32.partialorder %v364_v15, 0.0  ;;  %v428_v23 = vmul.f32 0.2, %v364_v15  ;;  %v328_v24 = vmul.f32 %v1398_v2, %v289_v12  ;;  %v301_v12 = vld [vmem:[%s1403_s7 + $0xe0] sm:$0xff] }
  0x23   : > { %v459_v25 = vsel %vm395_vm14, %v363_v7, %v427_v17  ;;  %v366_v26 = vadd.f32 %v1408_v3, %v327_v18  ;;  %vm397_vm0 = vcmp.ge.f32.partialorder %v365_v19, 0.0  ;;  %v429_v27 = vmul.f32 0.2, %v365_v19 }
  0x24   : > { %v460_v29 = vsel %vm396_vm15, %v364_v15, %v428_v23  ;;  %v329_v30 = vmul.f32 %v1398_v2, %v290_v20  ;;  %v367_v31 = vadd.f32 %v1408_v3, %v328_v24  ;;  %v330_v32 = vmul.f32 %v1398_v2, %v291_v21  ;;  %v302_v21 = vld [vmem:[%s1403_s7 + $0xe8] sm:$0xff] }
  0x25   : > { %v485_v35 = vpack.c.bf16 %v460_v29, %v459_v25  ;;  %vm398_vm2 = vcmp.ge.f32.partialorder %v366_v26, 0.0  ;;  %v430_v36 = vmul.f32 0.2, %v366_v26  ;;  %v461_v37 = vsel %vm397_vm0, %v365_v19, %v429_v27  ;;  %v303_v25 = vld [vmem:[%s1403_s7 + $0xf0] sm:$0xff] }
  0x26   : > { %v368_v38 = vadd.f32 %v1408_v3, %v329_v30  ;;  %vm399_vm3 = vcmp.ge.f32.partialorder %v367_v31, 0.0  ;;  %v431_v39 = vmul.f32 0.2, %v367_v31  ;;  %v331_v40 = vmul.f32 %v1398_v2, %v292_v28 }
  0x27   : > { %v462_v41 = vsel %vm398_vm2, %v366_v26, %v430_v36  ;;  %v369_v42 = vadd.f32 %v1408_v3, %v330_v32  ;;  %v332_v43 = vmul.f32 %v1398_v2, %v293_v33  ;;  %v333_v44 = vmul.f32 %v1398_v2, %v294_v34  ;;  %v304_v33 = vld [vmem:[%s1403_s7 + $0xf8] sm:$0xff] }
  0x28   : > { %v486_v47 = vpack.c.bf16 %v462_v41, %v461_v37  ;;  %vm400_vm4 = vcmp.ge.f32.partialorder %v368_v38, 0.0  ;;  %v432_v48 = vmul.f32 0.2, %v368_v38  ;;  %v463_v49 = vsel %vm399_vm3, %v367_v31, %v431_v39 }
  0x29   : > { %1300 = vmatmul.mubr.msk.bf16.gmra.mxu0 %vm496_vm1, %v484_v22  ;;  %v370_v50 = vadd.f32 %v1408_v3, %v331_v40  ;;  %vm401_vm5 = vcmp.ge.f32.partialorder %v369_v42, 0.0  ;;  %v433_v51 = vmul.f32 0.2, %v369_v42  ;;  %v371_v52 = vadd.f32 %v1408_v3, %v332_v43 }
  0x2a   : > { %1303 = vmatprep.mubr.msk.bf16.mxu0 %vm496_vm1, %v485_v35  ;;  %v464_v53 = vsel %vm400_vm4, %v368_v38, %v432_v48  ;;  %v372_v54 = vadd.f32 %v1408_v3, %v333_v44  ;;  %v334_v55 = vmul.f32 %v1398_v2, %v295_v45  ;;  %v335_v56 = vmul.f32 %v1398_v2, %v296_v46 }
  0x2b   : > { %v487_v58 = vpack.c.bf16 %v464_v53, %v463_v49  ;;  %vm402_vm6 = vcmp.ge.f32.partialorder %v370_v50, 0.0  ;;  %v434_v59 = vmul.f32 0.2, %v370_v50  ;;  %v465_v60 = vsel %vm401_vm5, %v369_v42, %v433_v51 }
  0x2c   : > { %vm403_vm7 = vcmp.ge.f32.partialorder %v371_v52, 0.0  ;;  %vm404_vm8 = vcmp.ge.f32.partialorder %v372_v54, 0.0  ;;  %v435_v62 = vmul.f32 0.2, %v371_v52  ;;  %v436_v63 = vmul.f32 0.2, %v372_v54 }
  0x2d   : > { %1307 = vmatprep.mubr.msk.bf16.mxu1 %vm496_vm1, %v487_v58  ;;  %v466_v0 = vsel %vm402_vm6, %v370_v50, %v434_v59  ;;  %v373_v1 = vadd.f32 %v1408_v3, %v334_v55  ;;  %v374_v4 = vadd.f32 %v1408_v3, %v335_v56  ;;  %v336_v5 = vmul.f32 %v1398_v2, %v297_v57 }
  0x2e   : > { %v488_v7 = vpack.c.bf16 %v466_v0, %v465_v60  ;;  %v467_v8 = vsel %vm403_vm7, %v371_v52, %v435_v62  ;;  %v468_v9 = vsel %vm404_vm8, %v372_v54, %v436_v63  ;;  %v337_v10 = vmul.f32 %v1398_v2, %v298_v61 }
  0x2f   : > { %v489_v13 = vpack.c.bf16 %v468_v9, %v467_v8  ;;  %vm405_vm9 = vcmp.ge.f32.partialorder %v373_v1, 0.0  ;;  %vm406_vm10 = vcmp.ge.f32.partialorder %v374_v4, 0.0  ;;  %v437_v14 = vmul.f32 0.2, %v373_v1 }
  0x30   : > { %1308 = vmatmul.mubr.msk.bf16.vlgmr.msra.gmra.mxu1 %vm496_vm1, %v488_v7  ;;  %v438_v15 = vmul.f32 0.2, %v374_v4  ;;  %v375_v16 = vadd.f32 %v1408_v3, %v336_v5  ;;  %v376_v17 = vadd.f32 %v1408_v3, %v337_v10  ;;  %v338_v18 = vmul.f32 %v1398_v2, %v299_v6 }
  0x31   : > { %1304 = vmatmul.mubr.msk.bf16.gmra.mxu0 %vm496_vm1, %v486_v47  ;;  %1311 = vmatprep.mubr.msk.bf16.mxu1 %vm496_vm1, %v489_v13  ;;  %v469_v19 = vsel %vm405_vm9, %v373_v1, %v437_v14  ;;  %v339_v20 = vmul.f32 %v1398_v2, %v300_v11  ;;  %v340_v22 = vmul.f32 %v1398_v2, %v301_v12 }
  0x32   : > { %v470_v23 = vsel %vm406_vm10, %v374_v4, %v438_v15  ;;  %vm407_vm11 = vcmp.ge.f32.partialorder %v375_v16, 0.0  ;;  %vm408_vm12 = vcmp.ge.f32.partialorder %v376_v17, 0.0  ;;  %v439_v24 = vmul.f32 0.2, %v375_v16 }
  0x33   : > { %v440_v26 = vmul.f32 0.2, %v376_v17  ;;  %v377_v27 = vadd.f32 %v1408_v3, %v338_v18  ;;  %v378_v28 = vadd.f32 %v1408_v3, %v339_v20  ;;  %v490_v29 = vpack.c.bf16 %v470_v23, %v469_v19 }
  0x34   : > { %v471_v30 = vsel %vm407_vm11, %v375_v16, %v439_v24  ;;  %v341_v31 = vmul.f32 %v1398_v2, %v302_v21  ;;  %v379_v32 = vadd.f32 %v1408_v3, %v340_v22  ;;  %v342_v36 = vmul.f32 %v1398_v2, %v303_v25 }
  0x35   : > { %v472_v34 = vsel %vm408_vm12, %v376_v17, %v440_v26  ;;  %vm409_vm13 = vcmp.ge.f32.partialorder %v377_v27, 0.0  ;;  %v441_v35 = vmul.f32 0.2, %v377_v27  ;;  %vm410_vm14 = vcmp.ge.f32.partialorder %v378_v28, 0.0 }
  0x36   : > { %v491_v37 = vpack.c.bf16 %v472_v34, %v471_v30  ;;  %v442_v38 = vmul.f32 0.2, %v378_v28  ;;  %v380_v39 = vadd.f32 %v1408_v3, %v341_v31  ;;  %vm411_vm15 = vcmp.ge.f32.partialorder %v379_v32, 0.0 }
  0x37   : > { %v443_v40 = vmul.f32 0.2, %v379_v32  ;;  %v343_v41 = vmul.f32 %v1398_v2, %v304_v33  ;;  %v473_v43 = vsel %vm409_vm13, %v377_v27, %v441_v35  ;;  %v381_v45 = vadd.f32 %v1408_v3, %v342_v36 }
  0x38   : > { %1312 = vmatmul.mubr.msk.bf16.gmra.mxu1 %vm496_vm1, %v490_v29  ;;  %vm412_vm0 = vcmp.ge.f32.partialorder %v380_v39, 0.0  ;;  %v444_v42 = vmul.f32 0.2, %v380_v39  ;;  %v474_v44 = vsel %vm410_vm14, %v378_v28, %v442_v38 }
  0x39   : > { %1315 = vmatprep.mubr.msk.bf16.mxu1 %vm496_vm1, %v491_v37  ;;  %v382_v46 = vadd.f32 %v1408_v3, %v343_v41  ;;  %v475_v47 = vsel %vm411_vm15, %v379_v32, %v443_v40  ;;  %v492_v49 = vpack.c.bf16 %v474_v44, %v473_v43  ;;  %v445_v51 = vmul.f32 0.2, %v381_v45 }
  0x3a   : > { %v476_v48 = vsel %vm412_vm0, %v380_v39, %v444_v42  ;;  %vm413_vm2 = vcmp.ge.f32.partialorder %v381_v45, 0.0 }
  0x3b   : > { %v493_v50 = vpack.c.bf16 %v476_v48, %v475_v47  ;;  %v446_v52 = vmul.f32 0.2, %v382_v46  ;;  %vm414_vm3 = vcmp.ge.f32.partialorder %v382_v46, 0.0  ;;  %v477_v2 = vsel %vm413_vm2, %v381_v45, %v445_v51 }
  0x3d   : > { %v478_v53 = vsel %vm414_vm3, %v382_v46, %v446_v52 }
  0x3e   : > { %v494_v54 = vpack.c.bf16 %v478_v53, %v477_v2 }
  0x40   : > { %1316 = vmatmul.mubr.msk.bf16.gmra.mxu1 %vm496_vm1, %v492_v49 }
  0x41   : > { %1319 = vmatprep.mubr.msk.bf16.mxu1 %vm496_vm1, %v493_v50 }
  0x48   : > { %1320 = vmatmul.mubr.msk.bf16.gmra.mxu1 %vm496_vm1, %v494_v54 }
  0xd9   : > { %v1293_v55 = vpop.f32.mrf.mxu0 }
  0xda   : > { %v910_v0 = vmul.f32 %v1293_v55, %v1293_v55 }
  0xdb   : > { %v583_v3 = vpop.f32.mrf.mxu0 }
  0xdc   : > { %v908_v59 = vmul.f32 %v583_v3, %v583_v3 }
  0xdd   : > { %v1294_v56 = vpop.f32.mrf.mxu0 }
  0xde   : > { %v1185_v57 = vpack.c.bf16 %v1294_v56, %v1293_v55  ;;  %v911_v6 = vmul.f32 %v1294_v56, %v1294_v56 }
  0xdf   : > { %v586_v58 = vpop.f32.mrf.mxu0 }
  0xe0   : > { %1257 = vst [vmem:[%s1527_s13 + $0x8] sm:$0xff] %v1185_v57   ;;  %v1180_v60 = vpack.c.bf16 %v586_v58, %v583_v3  ;;  %v870_v61 = vadd.f32 %v586_v58, %v583_v3  ;;  %v909_v62 = vmul.f32 %v586_v58, %v586_v58 }
  0xe1   : > { %v1297_v63 = vpop.f32.mrf.mxu0 }
  0xe2   : > { %1181 = vst [vmem:[%s1527_s13] sm:$0xff] %v1180_v60   ;;  %v871_v1 = vadd.f32 %v1293_v55, %v870_v61  ;;  %v940_v4 = vadd.f32 %v909_v62, %v908_v59  ;;  %v914_v20 = vmul.f32 %v1297_v63, %v1297_v63 }
  0xe3   : > { %v599_v5 = vpop.f32.mrf.mxu0 }
  0xe4   : > { %v941_v7 = vadd.f32 %v940_v4, %v910_v0  ;;  %v872_v8 = vadd.f32 %v1294_v56, %v871_v1  ;;  %v912_v11 = vmul.f32 %v599_v5, %v599_v5 }
  0xe5   : > { %v1298_v9 = vpop.f32.mrf.mxu0 }
  0xe6   : > { %v873_v10 = vadd.f32 %v872_v8, %v599_v5  ;;  %v942_v12 = vadd.f32 %v941_v7, %v911_v6  ;;  %v1195_v13 = vpack.c.bf16 %v1298_v9, %v1297_v63  ;;  %v915_v24 = vmul.f32 %v1298_v9, %v1298_v9 }
  0xe7   : > { %v602_v14 = vpop.f32.mrf.mxu0 }
  0xe8   : > { %v943_v15 = vadd.f32 %v942_v12, %v912_v11  ;;  %1259 = vst [vmem:[%s1527_s13 + $0x18] sm:$0xff] %v1195_v13   ;;  %v1190_v16 = vpack.c.bf16 %v602_v14, %v599_v5  ;;  %v874_v17 = vadd.f32 %v873_v10, %v602_v14  ;;  %v913_v18 = vmul.f32 %v602_v14, %v602_v14 }
  0xe9   : > { %v1301_v19 = vpop.f32.mrf.mxu0 }
  0xea   : > { %1258 = vst [vmem:[%s1527_s13 + $0x10] sm:$0xff] %v1190_v16   ;;  %v875_v21 = vadd.f32 %v1297_v63, %v874_v17  ;;  %v944_v22 = vadd.f32 %v943_v15, %v913_v18  ;;  %v918_v39 = vmul.f32 %v1301_v19, %v1301_v19 }
  0xeb   : > { %v615_v23 = vpop.f32.mrf.mxu0 }
  0xec   : > { %v945_v25 = vadd.f32 %v944_v22, %v914_v20  ;;  %v876_v26 = vadd.f32 %v1298_v9, %v875_v21  ;;  %v916_v29 = vmul.f32 %v615_v23, %v615_v23 }
  0xed   : > { %v1302_v27 = vpop.f32.mrf.mxu0 }
  0xee   : > { %v877_v28 = vadd.f32 %v876_v26, %v615_v23  ;;  %v946_v30 = vadd.f32 %v945_v25, %v915_v24  ;;  %v1205_v31 = vpack.c.bf16 %v1302_v27, %v1301_v19  ;;  %v919_v44 = vmul.f32 %v1302_v27, %v1302_v27 }
  0xef   : > { %v618_v32 = vpop.f32.mrf.mxu0 }
  0xf0   : > { %v947_v33 = vadd.f32 %v946_v30, %v916_v29  ;;  %1261 = vst [vmem:[%s1527_s13 + $0x28] sm:$0xff] %v1205_v31   ;;  %v1200_v34 = vpack.c.bf16 %v618_v32, %v615_v23  ;;  %v878_v35 = vadd.f32 %v877_v28, %v618_v32  ;;  %v917_v36 = vmul.f32 %v618_v32, %v618_v32  ;;  %v1309_v37 = vpop.f32.mrf.mxu1 }
  0xf1   : > { %v1305_v38 = vpop.f32.mrf.mxu0  ;;  %v926_v16 = vmul.f32 %v1309_v37, %v1309_v37 }
  0xf2   : > { %1260 = vst [vmem:[%s1527_s13 + $0x20] sm:$0xff] %v1200_v34   ;;  %v879_v40 = vadd.f32 %v1301_v19, %v878_v35  ;;  %v948_v41 = vadd.f32 %v947_v33, %v917_v36  ;;  %v647_v42 = vpop.f32.mrf.mxu1  ;;  %v922_v60 = vmul.f32 %v1305_v38, %v1305_v38 }
  0xf3   : > { %v631_v43 = vpop.f32.mrf.mxu0  ;;  %v924_v7 = vmul.f32 %v647_v42, %v647_v42 }
  0xf4   : > { %v949_v45 = vadd.f32 %v948_v41, %v918_v39  ;;  %v880_v46 = vadd.f32 %v1302_v27, %v879_v40  ;;  %v1310_v47 = vpop.f32.mrf.mxu1  ;;  %v920_v51 = vmul.f32 %v631_v43, %v631_v43 }
  0xf5   : > { %v1306_v48 = vpop.f32.mrf.mxu0  ;;  %v1225_v49 = vpack.c.bf16 %v1310_v47, %v1309_v37  ;;  %v927_v20 = vmul.f32 %v1310_v47, %v1310_v47 }
  0xf6   : > { %v881_v50 = vadd.f32 %v880_v46, %v631_v43  ;;  %v950_v52 = vadd.f32 %v949_v45, %v919_v44  ;;  %v1215_v2 = vpack.c.bf16 %v1306_v48, %v1305_v38  ;;  %v650_v53 = vpop.f32.mrf.mxu1  ;;  %v923_v0 = vmul.f32 %v1306_v48, %v1306_v48 }
  0xf7   : > { %v634_v54 = vpop.f32.mrf.mxu0  ;;  %1265 = vst [vmem:[%s1527_s13 + $0x48] sm:$0xff] %v1225_v49   ;;  %v1220_v55 = vpack.c.bf16 %v650_v53, %v647_v42  ;;  %v925_v13 = vmul.f32 %v650_v53, %v650_v53 }
  0xf8   : > { %v951_v3 = vadd.f32 %v950_v52, %v920_v51  ;;  %1263 = vst [vmem:[%s1527_s13 + $0x38] sm:$0xff] %v1215_v2   ;;  %v1210_v56 = vpack.c.bf16 %v634_v54, %v631_v43  ;;  %v882_v57 = vadd.f32 %v881_v50, %v634_v54  ;;  %v921_v58 = vmul.f32 %v634_v54, %v634_v54  ;;  %v1313_v59 = vpop.f32.mrf.mxu1 }
  0xf9   : > { %1264 = vst [vmem:[%s1527_s13 + $0x40] sm:$0xff] %v1220_v55   ;;  %v930_v34 = vmul.f32 %v1313_v59, %v1313_v59 }
  0xfa   : > { %1262 = vst [vmem:[%s1527_s13 + $0x30] sm:$0xff] %v1210_v56   ;;  %v883_v61 = vadd.f32 %v1305_v38, %v882_v57  ;;  %v952_v62 = vadd.f32 %v951_v3, %v921_v58  ;;  %v663_v63 = vpop.f32.mrf.mxu1 }
  0xfb   : > { %v928_v26 = vmul.f32 %v663_v63, %v663_v63 }
  0xfc   : > { %v884_v1 = vadd.f32 %v1306_v48, %v883_v61  ;;  %v953_v4 = vadd.f32 %v952_v62, %v922_v60  ;;  %v1314_v5 = vpop.f32.mrf.mxu1 }
  0xfd   : > { %v1235_v6 = vpack.c.bf16 %v1314_v5, %v1313_v59  ;;  %v931_v38 = vmul.f32 %v1314_v5, %v1314_v5 }
  0xfe   : > { %v954_v8 = vadd.f32 %v953_v4, %v923_v0  ;;  %v885_v9 = vadd.f32 %v884_v1, %v647_v42  ;;  %v666_v10 = vpop.f32.mrf.mxu1 }
  0xff   : > { %1267 = vst [vmem:[%s1527_s13 + $0x58] sm:$0xff] %v1235_v6   ;;  %v1230_v11 = vpack.c.bf16 %v666_v10, %v663_v63  ;;  %v929_v32 = vmul.f32 %v666_v10, %v666_v10 }
 0x100   : > { %v886_v12 = vadd.f32 %v885_v9, %v650_v53  ;;  %v955_v14 = vadd.f32 %v954_v8, %v924_v7  ;;  %v1317_v15 = vpop.f32.mrf.mxu1 }
 0x101   : > { %1266 = vst [vmem:[%s1527_s13 + $0x50] sm:$0xff] %v1230_v11   ;;  %v934_v51 = vmul.f32 %v1317_v15, %v1317_v15 }
 0x102   : > { %v887_v17 = vadd.f32 %v1309_v37, %v886_v12  ;;  %v956_v18 = vadd.f32 %v955_v14, %v925_v13  ;;  %v679_v19 = vpop.f32.mrf.mxu1 }
 0x103   : > { %v932_v44 = vmul.f32 %v679_v19, %v679_v19 }
 0x104   : > { %v957_v21 = vadd.f32 %v956_v18, %v926_v16  ;;  %v888_v22 = vadd.f32 %v1310_v47, %v887_v17  ;;  %v1318_v23 = vpop.f32.mrf.mxu1 }
 0x105   : > { %v1245_v24 = vpack.c.bf16 %v1318_v23, %v1317_v15  ;;  %v935_v53 = vmul.f32 %v1318_v23, %v1318_v23 }
 0x106   : > { %v889_v25 = vadd.f32 %v888_v22, %v663_v63  ;;  %v958_v27 = vadd.f32 %v957_v21, %v927_v20  ;;  %v682_v28 = vpop.f32.mrf.mxu1 }
 0x107   : > { %1269 = vst [vmem:[%s1527_s13 + $0x68] sm:$0xff] %v1245_v24   ;;  %v1240_v29 = vpack.c.bf16 %v682_v28, %v679_v19  ;;  %v933_v50 = vmul.f32 %v682_v28, %v682_v28 }
 0x108   : > { %v959_v30 = vadd.f32 %v958_v27, %v928_v26  ;;  %v890_v31 = vadd.f32 %v889_v25, %v666_v10  ;;  %v1321_v33 = vpop.f32.mrf.mxu1 }
 0x109   : > { %1268 = vst [vmem:[%s1527_s13 + $0x60] sm:$0xff] %v1240_v29   ;;  %v938_v61 = vmul.f32 %v1321_v33, %v1321_v33 }
 0x10a   : > { %v891_v35 = vadd.f32 %v1313_v59, %v890_v31  ;;  %v960_v36 = vadd.f32 %v959_v30, %v929_v32  ;;  %v695_v37 = vpop.f32.mrf.mxu1 }
 0x10b   : > { %v936_v56 = vmul.f32 %v695_v37, %v695_v37 }
 0x10c   : > { %v961_v39 = vadd.f32 %v960_v36, %v930_v34  ;;  %v892_v40 = vadd.f32 %v1314_v5, %v891_v35  ;;  %v1322_v41 = vpop.f32.mrf.mxu1 }
 0x10d   : > { %v1255_v42 = vpack.c.bf16 %v1322_v41, %v1321_v33  ;;  %v939_v0 = vmul.f32 %v1322_v41, %v1322_v41 }
 0x10e   : > { %v893_v43 = vadd.f32 %v892_v40, %v679_v19  ;;  %v962_v45 = vadd.f32 %v961_v39, %v931_v38  ;;  %v698_v46 = vpop.f32.mrf.mxu1 }
 0x10f   : > { %1271 = vst [vmem:[%s1527_s13 + $0x78] sm:$0xff] %v1255_v42   ;;  %v1250_v47 = vpack.c.bf16 %v698_v46, %v695_v37  ;;  %v937_v60 = vmul.f32 %v698_v46, %v698_v46 }
 0x110   : > { %v963_v48 = vadd.f32 %v962_v45, %v932_v44  ;;  %v894_v49 = vadd.f32 %v893_v43, %v682_v28 }
 0x111   : > { %1270 = vst [vmem:[%s1527_s13 + $0x70] sm:$0xff] %v1250_v47  }
 0x112   : > { %v895_v52 = vadd.f32 %v1317_v15, %v894_v49  ;;  %v964_v2 = vadd.f32 %v963_v48, %v933_v50 }
 0x114   : > { %v965_v54 = vadd.f32 %v964_v2, %v934_v51  ;;  %v896_v55 = vadd.f32 %v1318_v23, %v895_v52 }
 0x116   : > { %v897_v3 = vadd.f32 %v896_v55, %v695_v37  ;;  %v966_v57 = vadd.f32 %v965_v54, %v935_v53 }
 0x118   : > { %v967_v58 = vadd.f32 %v966_v57, %v936_v56  ;;  %v898_v59 = vadd.f32 %v897_v3, %v698_v46 }
 0x11a   : > { %v899_v62 = vadd.f32 %v1321_v33, %v898_v59  ;;  %v968_v63 = vadd.f32 %v967_v58, %v937_v60 }
 0x11c   : > { %v900_v1 = vadd.f32 %v1322_v41, %v899_v62  ;;  %v969_v4 = vadd.f32 %v968_v63, %v938_v61 }
 0x11e   : > { %v901_v5 = vrot.slane %v900_v1, 4  ;;  %v970_v6 = vadd.f32 %v969_v4, %v939_v0 }
 0x120   : > { %v902_v7 = vadd.f32 %v901_v5, %v900_v1  ;;  %v971_v8 = vrot.slane %v970_v6, 4 }
 0x122   : > { %v903_v9 = vrot.slane %v902_v7, 2  ;;  %v972_v10 = vadd.f32 %v971_v8, %v970_v6 }
 0x124   : > { %v904_v11 = vadd.f32 %v903_v9, %v902_v7  ;;  %v973_v12 = vrot.slane %v972_v10, 2 }
 0x126   : > { %v905_v13 = vrot.slane %v904_v11, 1  ;;  %v974_v14 = vadd.f32 %v973_v12, %v972_v10 }
 0x128   : > { %v906_v15 = vadd.f32 %v905_v13, %v904_v11  ;;  %v975_v16 = vrot.slane %v974_v14, 1 }
 0x12a   : > { %907 = vst [vmem:[%s268_s16] sm:$0x1] %v906_v15  ;;  %v976_v17 = vadd.f32 %v975_v16, %v974_v14 }
 0x12c   : > { %977 = vst [vmem:[%s271_s19] sm:$0x1] %v976_v17 }
 0x12d PF: > { %s17_s21 = sadd.s32 1, %s1341_s21  }
 0x12e   : > { %p14_p5 = scmp.ge.s32.totalorder %s17_s21, 4  }
 0x130   :  { %16 = sbr.rel (!%p14_p5) target bundleno = 1 (0x1), region = 90 }

// kernel: _lambda_.6
= control target key start
LH: loop header
LB: loop body
LE: loop exit
PB: predicated region body
PF: predicated region fallthrough
CT: control target
= control target key end

     0   :  { %s1386_s21 = smov 0   ;;  %s1564_s0 = inlined_call_operand.vmem [shape: f32[512,12], index: 0, kind: input, shape index: {}]   ;;  %s1565_s1 = inlined_call_operand.vmem [shape: f32[1,12], index: 1, kind: input, shape index: {}]   ;;  %s1566_s2 = inlined_call_operand.vmem [shape: f32[1,12], index: 2, kind: input, shape index: {}]   ;;  %s1567_s3 = inlined_call_operand.vmem [shape: bf16[12,128], index: 3, kind: input, shape index: {}]   ;;  %s1568_s4 = inlined_call_operand.vmem [shape: bf16[512,128], index: 4, kind: output, shape index: {0}]   ;;  %s1569_s5 = inlined_call_operand.vmem [shape: f32[2,1,128], index: 5, kind: output, shape index: {1}]   ;;  %s1570_s6 = inlined_call_operand.vmem [shape: f32[2,1,128], index: 6, kind: output, shape index: {2}]  }
   0x1 LB: > { %s1392_s22 = sadd.s32 4294967295, %s1349_s21   ;;  %p1094_p0 = scmp.ge.s32.totalorder %s1349_s21, 1  ;;  %s1349_s21 = sphi %s1386_s21, %s17_s21  }
   0x2   : > { %p218_p1 = scmp.lt.s32.totalorder %s1349_s21, 3 }
   0x4   : > { %p219_p2 = pnand %p1094_p0, %p218_p1 }
   0x5   : > { %s1095_s25 = sshll.u32 (!%p219_p2), %s1392_s22, 5  ;;  %p266_p4 = scmp.lt.s32.totalorder (!%p219_p2), %s1392_s22, 1 }
   0x6   : > { %222 = sbr.rel (%p219_p2) target bundleno = 301 (0x12d), region = 36  ;;  %p255_p3 = scmp.lt.s32.totalorder (!%p219_p2), %s1095_s25, 63 }
   0xb   : > { %v1342_v0 = vld [vmem:[%s1567_s3] sm:$0x3f]   ;;  %vm551_vm0 = vcmask 1045504   ;;  %s1572_s25 = smov (!%p255_p3, %s1095_s25), 63  ;;  %vm502_vm1 = vcmask 97280   ;;  %s1574_s22 = smov (!%p266_p4, %s1392_s22), 1 }
   0xc   : > { %1332 = vmatprep.subr.msk.bf16.mxu0 %vm551_vm0, %v1342_v0  ;;  %v553_v1 = vsel %vm551_vm0, %v1342_v0, 0  ;;  %1333 = vmatprep.subr.msk.bf16.mxu1 %vm551_vm0, %v1342_v0  ;;  %s1096_s26 = sshll.u32 %s1572_s25, 3  ;;  %v1406_v2 = vld [vmem:[%s1565_s1] ss:$0 sm:$0xff]  ;;  %s1098_s10 = sshll.u32 %s1572_s25, 2 }
   0xd   : > { %1297 = vmatpush3.bf16.msra.mxu0 %v553_v1  ;;  %1331 = vmatpush3.bf16.msra.mxu1 %v553_v1  ;;  %s1411_s7 = scalar_lea.vmem %s1564_s0, %s1096_s26  ;;  %v1416_v3 = vld [vmem:[%s1566_s2] ss:$0 sm:$0xff]  ;;  %s1535_s13 = scalar_lea.vmem %s1568_s4, %s1098_s10 }
   0xe   : > { %v273_v4 = vld [vmem:[%s1411_s7] sm:$0xff]  ;;  %v274_v5 = vld [vmem:[%s1411_s7 + $0x8] sm:$0xff]  ;;  %v275_v6 = vld [vmem:[%s1411_s7 + $0x10] sm:$0xff]  ;;  %s268_s16 = scalar_lea.vmem %s1569_s5, %s1574_s22  ;;  %s271_s19 = scalar_lea.vmem %s1570_s6, %s1574_s22 }
   0xf   : > { %v312_v7 = vmul.f32 %v1406_v2, %v273_v4  ;;  %v313_v8 = vmul.f32 %v1406_v2, %v274_v5  ;;  %v276_v9 = vld [vmem:[%s1411_s7 + $0x18] sm:$0xff]  ;;  %v314_v10 = vmul.f32 %v1406_v2, %v275_v6  ;;  %v277_v11 = vld [vmem:[%s1411_s7 + $0x20] sm:$0xff]  ;;  %v278_v12 = vld [vmem:[%s1411_s7 + $0x28] sm:$0xff] }
  0x10   : > { %v315_v13 = vmul.f32 %v1406_v2, %v276_v9  ;;  %v316_v14 = vmul.f32 %v1406_v2, %v277_v11  ;;  %v317_v15 = vmul.f32 %v1406_v2, %v278_v12  ;;  %v279_v16 = vld [vmem:[%s1411_s7 + $0x30] sm:$0xff]  ;;  %v280_v17 = vld [vmem:[%s1411_s7 + $0x38] sm:$0xff]  ;;  %v281_v32 = vld [vmem:[%s1411_s7 + $0x40] sm:$0xff] }
  0x11   : > { %v351_v18 = vadd.f32 %v1416_v3, %v312_v7  ;;  %v352_v19 = vadd.f32 %v1416_v3, %v313_v8  ;;  %v353_v20 = vadd.f32 %v1416_v3, %v314_v10  ;;  %v318_v21 = vmul.f32 %v1406_v2, %v279_v16  ;;  %v282_v33 = vld [vmem:[%s1411_s7 + $0x48] sm:$0xff]  ;;  %v283_v34 = vld [vmem:[%s1411_s7 + $0x50] sm:$0xff]  ;;  %v284_v46 = vld [vmem:[%s1411_s7 + $0x58] sm:$0xff] }
  0x12   : > { %v354_v22 = vadd.f32 %v1416_v3, %v315_v13  ;;  %v355_v23 = vadd.f32 %v1416_v3, %v316_v14  ;;  %v356_v24 = vadd.f32 %v1416_v3, %v317_v15  ;;  %v319_v25 = vmul.f32 %v1406_v2, %v280_v17  ;;  %v285_v48 = vld [vmem:[%s1411_s7 + $0x60] sm:$0xff]  ;;  %v286_v58 = vld [vmem:[%s1411_s7 + $0x68] sm:$0xff]  ;;  %v287_v62 = vld [vmem:[%s1411_s7 + $0x70] sm:$0xff] }
  0x13   : > { %vm383_vm2 = vcmp.ge.f32.partialorder %v351_v18, 0.0  ;;  %vm384_vm3 = vcmp.ge.f32.partialorder %v352_v19, 0.0  ;;  %v415_v26 = vmul.f32 0.2, %v351_v18  ;;  %v416_v27 = vmul.f32 0.2, %v352_v19 }
  0x14   : > { %vm385_vm4 = vcmp.ge.f32.partialorder %v353_v20, 0.0  ;;  %vm386_vm5 = vcmp.ge.f32.partialorder %v354_v22, 0.0  ;;  %v417_v28 = vmul.f32 0.2, %v353_v20  ;;  %v418_v29 = vmul.f32 0.2, %v354_v22 }
  0x15   : > { %v447_v30 = vsel %vm383_vm2, %v351_v18, %v415_v26  ;;  %v448_v31 = vsel %vm384_vm3, %v352_v19, %v416_v27  ;;  %vm387_vm6 = vcmp.ge.f32.partialorder %v355_v23, 0.0  ;;  %vm388_vm7 = vcmp.ge.f32.partialorder %v356_v24, 0.0  ;;  %v288_v8 = vld [vmem:[%s1411_s7 + $0x78] sm:$0xff]  ;;  %v289_v12 = vld [vmem:[%s1411_s7 + $0x80] sm:$0xff] }
  0x16   : > { %v479_v35 = vpack.c.bf16 %v448_v31, %v447_v30  ;;  %v449_v36 = vsel %vm385_vm4, %v353_v20, %v417_v28  ;;  %v450_v37 = vsel %vm386_vm5, %v354_v22, %v418_v29  ;;  %v419_v38 = vmul.f32 0.2, %v355_v23  ;;  %v290_v20 = vld [vmem:[%s1411_s7 + $0x88] sm:$0xff]  ;;  %v292_v28 = vld [vmem:[%s1411_s7 + $0x98] sm:$0xff] }
  0x17   : > { %v480_v39 = vpack.c.bf16 %v450_v37, %v449_v36  ;;  %v420_v40 = vmul.f32 0.2, %v356_v24  ;;  %v357_v41 = vadd.f32 %v1416_v3, %v318_v21  ;;  %v358_v42 = vadd.f32 %v1416_v3, %v319_v25  ;;  %v291_v21 = vld [vmem:[%s1411_s7 + $0x90] sm:$0xff] }
  0x18   : > { %1298 = vmatprep.mubr.msk.bf16.mxu0 %vm502_vm1, %v479_v35  ;;  %v451_v43 = vsel %vm387_vm6, %v355_v23, %v419_v38  ;;  %v320_v44 = vmul.f32 %v1406_v2, %v281_v32  ;;  %v321_v45 = vmul.f32 %v1406_v2, %v282_v33  ;;  %v322_v47 = vmul.f32 %v1406_v2, %v283_v34  ;;  %v293_v33 = vld [vmem:[%s1411_s7 + $0xa0] sm:$0xff]  ;;  %v294_v34 = vld [vmem:[%s1411_s7 + $0xa8] sm:$0xff] }
  0x19   : > { %1299 = vmatmul.mubr.msk.bf16.vlgmr.msra.gmra.mxu0 %vm502_vm1, %v480_v39  ;;  %v452_v49 = vsel %vm388_vm7, %v356_v24, %v420_v40  ;;  %vm389_vm8 = vcmp.ge.f32.partialorder %v357_v41, 0.0  ;;  %vm390_vm9 = vcmp.ge.f32.partialorder %v358_v42, 0.0  ;;  %v421_v50 = vmul.f32 0.2, %v357_v41 }
  0x1a   : > { %v481_v51 = vpack.c.bf16 %v452_v49, %v451_v43  ;;  %v422_v52 = vmul.f32 0.2, %v358_v42  ;;  %v359_v53 = vadd.f32 %v1416_v3, %v320_v44  ;;  %v360_v54 = vadd.f32 %v1416_v3, %v321_v45  ;;  %v295_v45 = vld [vmem:[%s1411_s7 + $0xb0] sm:$0xff] }
  0x1b   : > { %v453_v55 = vsel %vm389_vm8, %v357_v41, %v421_v50  ;;  %v323_v56 = vmul.f32 %v1406_v2, %v284_v46  ;;  %v361_v57 = vadd.f32 %v1416_v3, %v322_v47  ;;  %v324_v59 = vmul.f32 %v1406_v2, %v285_v48  ;;  %v296_v46 = vld [vmem:[%s1411_s7 + $0xb8] sm:$0xff] }
  0x1c   : > { %1302 = vmatprep.mubr.msk.bf16.mxu0 %vm502_vm1, %v481_v51  ;;  %v454_v60 = vsel %vm390_vm9, %v358_v42, %v422_v52  ;;  %vm391_vm10 = vcmp.ge.f32.partialorder %v359_v53, 0.0  ;;  %vm392_vm11 = vcmp.ge.f32.partialorder %v360_v54, 0.0  ;;  %v423_v61 = vmul.f32 0.2, %v359_v53 }
  0x1d   : > { %v482_v63 = vpack.c.bf16 %v454_v60, %v453_v55  ;;  %v424_v0 = vmul.f32 0.2, %v360_v54  ;;  %v362_v1 = vadd.f32 %v1416_v3, %v323_v56  ;;  %vm393_vm12 = vcmp.ge.f32.partialorder %v361_v57, 0.0 }
  0x1e   : > { %v455_v4 = vsel %vm391_vm10, %v359_v53, %v423_v61  ;;  %v425_v5 = vmul.f32 0.2, %v361_v57  ;;  %v325_v6 = vmul.f32 %v1406_v2, %v286_v58  ;;  %v363_v7 = vadd.f32 %v1416_v3, %v324_v59  ;;  %v298_v61 = vld [vmem:[%s1411_s7 + $0xc8] sm:$0xff] }
  0x1f   : > { %v456_v9 = vsel %vm392_vm11, %v360_v54, %v424_v0  ;;  %vm394_vm13 = vcmp.ge.f32.partialorder %v362_v1, 0.0  ;;  %v426_v10 = vmul.f32 0.2, %v362_v1  ;;  %v326_v11 = vmul.f32 %v1406_v2, %v287_v62 }
  0x20   : > { %v483_v13 = vpack.c.bf16 %v456_v9, %v455_v4  ;;  %v457_v14 = vsel %vm393_vm12, %v361_v57, %v425_v5  ;;  %v364_v15 = vadd.f32 %v1416_v3, %v325_v6  ;;  %vm395_vm14 = vcmp.ge.f32.partialorder %v363_v7, 0.0  ;;  %v297_v57 = vld [vmem:[%s1411_s7 + $0xc0] sm:$0xff]  ;;  %v299_v6 = vld [vmem:[%s1411_s7 + $0xd0] sm:$0xff] }
  0x21   : > { %1303 = vmatmul.mubr.msk.bf16.gmra.mxu0 %vm502_vm1, %v482_v63  ;;  %v458_v16 = vsel %vm394_vm13, %v362_v1, %v426_v10  ;;  %v427_v17 = vmul.f32 0.2, %v363_v7  ;;  %v327_v18 = vmul.f32 %v1406_v2, %v288_v8  ;;  %v365_v19 = vadd.f32 %v1416_v3, %v326_v11  ;;  %v300_v11 = vld [vmem:[%s1411_s7 + $0xd8] sm:$0xff] }
  0x22   : > { %1306 = vmatprep.mubr.msk.bf16.mxu0 %vm502_vm1, %v483_v13  ;;  %v484_v22 = vpack.c.bf16 %v458_v16, %v457_v14  ;;  %vm396_vm15 = vcmp.ge.f32.partialorder %v364_v15, 0.0  ;;  %v428_v23 = vmul.f32 0.2, %v364_v15  ;;  %v328_v24 = vmul.f32 %v1406_v2, %v289_v12  ;;  %v301_v12 = vld [vmem:[%s1411_s7 + $0xe0] sm:$0xff] }
  0x23   : > { %v459_v25 = vsel %vm395_vm14, %v363_v7, %v427_v17  ;;  %v366_v26 = vadd.f32 %v1416_v3, %v327_v18  ;;  %vm397_vm0 = vcmp.ge.f32.partialorder %v365_v19, 0.0  ;;  %v429_v27 = vmul.f32 0.2, %v365_v19 }
  0x24   : > { %v460_v29 = vsel %vm396_vm15, %v364_v15, %v428_v23  ;;  %v329_v30 = vmul.f32 %v1406_v2, %v290_v20  ;;  %v367_v31 = vadd.f32 %v1416_v3, %v328_v24  ;;  %v330_v32 = vmul.f32 %v1406_v2, %v291_v21  ;;  %v302_v21 = vld [vmem:[%s1411_s7 + $0xe8] sm:$0xff] }
  0x25   : > { %v485_v35 = vpack.c.bf16 %v460_v29, %v459_v25  ;;  %vm398_vm2 = vcmp.ge.f32.partialorder %v366_v26, 0.0  ;;  %v430_v36 = vmul.f32 0.2, %v366_v26  ;;  %v461_v37 = vsel %vm397_vm0, %v365_v19, %v429_v27  ;;  %v303_v25 = vld [vmem:[%s1411_s7 + $0xf0] sm:$0xff] }
  0x26   : > { %v368_v38 = vadd.f32 %v1416_v3, %v329_v30  ;;  %vm399_vm3 = vcmp.ge.f32.partialorder %v367_v31, 0.0  ;;  %v431_v39 = vmul.f32 0.2, %v367_v31  ;;  %v331_v40 = vmul.f32 %v1406_v2, %v292_v28 }
  0x27   : > { %v462_v41 = vsel %vm398_vm2, %v366_v26, %v430_v36  ;;  %v369_v42 = vadd.f32 %v1416_v3, %v330_v32  ;;  %v332_v43 = vmul.f32 %v1406_v2, %v293_v33  ;;  %v333_v44 = vmul.f32 %v1406_v2, %v294_v34  ;;  %v304_v33 = vld [vmem:[%s1411_s7 + $0xf8] sm:$0xff] }
  0x28   : > { %v486_v47 = vpack.c.bf16 %v462_v41, %v461_v37  ;;  %vm400_vm4 = vcmp.ge.f32.partialorder %v368_v38, 0.0  ;;  %v432_v48 = vmul.f32 0.2, %v368_v38  ;;  %v463_v49 = vsel %vm399_vm3, %v367_v31, %v431_v39 }
  0x29   : > { %1307 = vmatmul.mubr.msk.bf16.gmra.mxu0 %vm502_vm1, %v484_v22  ;;  %v370_v50 = vadd.f32 %v1416_v3, %v331_v40  ;;  %vm401_vm5 = vcmp.ge.f32.partialorder %v369_v42, 0.0  ;;  %v433_v51 = vmul.f32 0.2, %v369_v42  ;;  %v371_v52 = vadd.f32 %v1416_v3, %v332_v43 }
  0x2a   : > { %1310 = vmatprep.mubr.msk.bf16.mxu0 %vm502_vm1, %v485_v35  ;;  %v464_v53 = vsel %vm400_vm4, %v368_v38, %v432_v48  ;;  %v372_v54 = vadd.f32 %v1416_v3, %v333_v44  ;;  %v334_v55 = vmul.f32 %v1406_v2, %v295_v45  ;;  %v335_v56 = vmul.f32 %v1406_v2, %v296_v46 }
  0x2b   : > { %v487_v58 = vpack.c.bf16 %v464_v53, %v463_v49  ;;  %vm402_vm6 = vcmp.ge.f32.partialorder %v370_v50, 0.0  ;;  %v434_v59 = vmul.f32 0.2, %v370_v50  ;;  %v465_v60 = vsel %vm401_vm5, %v369_v42, %v433_v51 }
  0x2c   : > { %vm403_vm7 = vcmp.ge.f32.partialorder %v371_v52, 0.0  ;;  %vm404_vm8 = vcmp.ge.f32.partialorder %v372_v54, 0.0  ;;  %v435_v62 = vmul.f32 0.2, %v371_v52  ;;  %v436_v63 = vmul.f32 0.2, %v372_v54 }
  0x2d   : > { %1314 = vmatprep.mubr.msk.bf16.mxu1 %vm502_vm1, %v487_v58  ;;  %v466_v0 = vsel %vm402_vm6, %v370_v50, %v434_v59  ;;  %v373_v1 = vadd.f32 %v1416_v3, %v334_v55  ;;  %v374_v4 = vadd.f32 %v1416_v3, %v335_v56  ;;  %v336_v5 = vmul.f32 %v1406_v2, %v297_v57 }
  0x2e   : > { %v488_v7 = vpack.c.bf16 %v466_v0, %v465_v60  ;;  %v467_v8 = vsel %vm403_vm7, %v371_v52, %v435_v62  ;;  %v468_v9 = vsel %vm404_vm8, %v372_v54, %v436_v63  ;;  %v337_v10 = vmul.f32 %v1406_v2, %v298_v61 }
  0x2f   : > { %v489_v13 = vpack.c.bf16 %v468_v9, %v467_v8  ;;  %vm405_vm9 = vcmp.ge.f32.partialorder %v373_v1, 0.0  ;;  %vm406_vm10 = vcmp.ge.f32.partialorder %v374_v4, 0.0  ;;  %v437_v14 = vmul.f32 0.2, %v373_v1 }
  0x30   : > { %1315 = vmatmul.mubr.msk.bf16.vlgmr.msra.gmra.mxu1 %vm502_vm1, %v488_v7  ;;  %v438_v15 = vmul.f32 0.2, %v374_v4  ;;  %v375_v16 = vadd.f32 %v1416_v3, %v336_v5  ;;  %v376_v17 = vadd.f32 %v1416_v3, %v337_v10  ;;  %v338_v18 = vmul.f32 %v1406_v2, %v299_v6 }
  0x31   : > { %1311 = vmatmul.mubr.msk.bf16.gmra.mxu0 %vm502_vm1, %v486_v47  ;;  %1318 = vmatprep.mubr.msk.bf16.mxu1 %vm502_vm1, %v489_v13  ;;  %v469_v19 = vsel %vm405_vm9, %v373_v1, %v437_v14  ;;  %v339_v20 = vmul.f32 %v1406_v2, %v300_v11  ;;  %v340_v22 = vmul.f32 %v1406_v2, %v301_v12 }
  0x32   : > { %v470_v23 = vsel %vm406_vm10, %v374_v4, %v438_v15  ;;  %vm407_vm11 = vcmp.ge.f32.partialorder %v375_v16, 0.0  ;;  %vm408_vm12 = vcmp.ge.f32.partialorder %v376_v17, 0.0  ;;  %v439_v24 = vmul.f32 0.2, %v375_v16 }
  0x33   : > { %v440_v26 = vmul.f32 0.2, %v376_v17  ;;  %v377_v27 = vadd.f32 %v1416_v3, %v338_v18  ;;  %v378_v28 = vadd.f32 %v1416_v3, %v339_v20  ;;  %v490_v29 = vpack.c.bf16 %v470_v23, %v469_v19 }
  0x34   : > { %v471_v30 = vsel %vm407_vm11, %v375_v16, %v439_v24  ;;  %v341_v31 = vmul.f32 %v1406_v2, %v302_v21  ;;  %v379_v32 = vadd.f32 %v1416_v3, %v340_v22  ;;  %v342_v36 = vmul.f32 %v1406_v2, %v303_v25 }
  0x35   : > { %v472_v34 = vsel %vm408_vm12, %v376_v17, %v440_v26  ;;  %vm409_vm13 = vcmp.ge.f32.partialorder %v377_v27, 0.0  ;;  %v441_v35 = vmul.f32 0.2, %v377_v27  ;;  %vm410_vm14 = vcmp.ge.f32.partialorder %v378_v28, 0.0 }
  0x36   : > { %v491_v37 = vpack.c.bf16 %v472_v34, %v471_v30  ;;  %v442_v38 = vmul.f32 0.2, %v378_v28  ;;  %v380_v39 = vadd.f32 %v1416_v3, %v341_v31  ;;  %vm411_vm15 = vcmp.ge.f32.partialorder %v379_v32, 0.0 }
  0x37   : > { %v443_v40 = vmul.f32 0.2, %v379_v32  ;;  %v343_v41 = vmul.f32 %v1406_v2, %v304_v33  ;;  %v473_v43 = vsel %vm409_vm13, %v377_v27, %v441_v35  ;;  %v381_v45 = vadd.f32 %v1416_v3, %v342_v36 }
  0x38   : > { %1319 = vmatmul.mubr.msk.bf16.gmra.mxu1 %vm502_vm1, %v490_v29  ;;  %vm412_vm0 = vcmp.ge.f32.partialorder %v380_v39, 0.0  ;;  %v444_v42 = vmul.f32 0.2, %v380_v39  ;;  %v474_v44 = vsel %vm410_vm14, %v378_v28, %v442_v38 }
  0x39   : > { %1322 = vmatprep.mubr.msk.bf16.mxu1 %vm502_vm1, %v491_v37  ;;  %v382_v46 = vadd.f32 %v1416_v3, %v343_v41  ;;  %v475_v47 = vsel %vm411_vm15, %v379_v32, %v443_v40  ;;  %v492_v49 = vpack.c.bf16 %v474_v44, %v473_v43  ;;  %v445_v51 = vmul.f32 0.2, %v381_v45 }
  0x3a   : > { %v476_v48 = vsel %vm412_vm0, %v380_v39, %v444_v42  ;;  %vm413_vm2 = vcmp.ge.f32.partialorder %v381_v45, 0.0 }
  0x3b   : > { %v493_v50 = vpack.c.bf16 %v476_v48, %v475_v47  ;;  %v446_v52 = vmul.f32 0.2, %v382_v46  ;;  %vm414_vm3 = vcmp.ge.f32.partialorder %v382_v46, 0.0  ;;  %v477_v2 = vsel %vm413_vm2, %v381_v45, %v445_v51 }
  0x3d   : > { %v478_v53 = vsel %vm414_vm3, %v382_v46, %v446_v52 }
  0x3e   : > { %v494_v54 = vpack.c.bf16 %v478_v53, %v477_v2 }
  0x40   : > { %1323 = vmatmul.mubr.msk.bf16.gmra.mxu1 %vm502_vm1, %v492_v49 }
  0x41   : > { %1326 = vmatprep.mubr.msk.bf16.mxu1 %vm502_vm1, %v493_v50 }
  0x48   : > { %1327 = vmatmul.mubr.msk.bf16.gmra.mxu1 %vm502_vm1, %v494_v54 }
  0xd9   : > { %v1300_v55 = vpop.f32.mrf.mxu0 }
  0xda   : > { %v916_v0 = vmul.f32 %v1300_v55, %v1300_v55 }
  0xdb   : > { %v589_v3 = vpop.f32.mrf.mxu0 }
  0xdc   : > { %v914_v59 = vmul.f32 %v589_v3, %v589_v3 }
  0xdd   : > { %v1301_v56 = vpop.f32.mrf.mxu0 }
  0xde   : > { %v1192_v57 = vpack.c.bf16 %v1301_v56, %v1300_v55  ;;  %v917_v6 = vmul.f32 %v1301_v56, %v1301_v56 }
  0xdf   : > { %v592_v58 = vpop.f32.mrf.mxu0 }
  0xe0   : > { %1264 = vst [vmem:[%s1535_s13 + $0x8] sm:$0xff] %v1192_v57   ;;  %v1187_v60 = vpack.c.bf16 %v592_v58, %v589_v3  ;;  %v876_v61 = vadd.f32 %v592_v58, %v589_v3  ;;  %v915_v62 = vmul.f32 %v592_v58, %v592_v58 }
  0xe1   : > { %v1304_v63 = vpop.f32.mrf.mxu0 }
  0xe2   : > { %1188 = vst [vmem:[%s1535_s13] sm:$0xff] %v1187_v60   ;;  %v877_v1 = vadd.f32 %v1300_v55, %v876_v61  ;;  %v946_v4 = vadd.f32 %v915_v62, %v914_v59  ;;  %v920_v20 = vmul.f32 %v1304_v63, %v1304_v63 }
  0xe3   : > { %v605_v5 = vpop.f32.mrf.mxu0 }
  0xe4   : > { %v947_v7 = vadd.f32 %v946_v4, %v916_v0  ;;  %v878_v8 = vadd.f32 %v1301_v56, %v877_v1  ;;  %v918_v11 = vmul.f32 %v605_v5, %v605_v5 }
  0xe5   : > { %v1305_v9 = vpop.f32.mrf.mxu0 }
  0xe6   : > { %v879_v10 = vadd.f32 %v878_v8, %v605_v5  ;;  %v948_v12 = vadd.f32 %v947_v7, %v917_v6  ;;  %v1202_v13 = vpack.c.bf16 %v1305_v9, %v1304_v63  ;;  %v921_v24 = vmul.f32 %v1305_v9, %v1305_v9 }
  0xe7   : > { %v608_v14 = vpop.f32.mrf.mxu0 }
  0xe8   : > { %v949_v15 = vadd.f32 %v948_v12, %v918_v11  ;;  %1266 = vst [vmem:[%s1535_s13 + $0x18] sm:$0xff] %v1202_v13   ;;  %v1197_v16 = vpack.c.bf16 %v608_v14, %v605_v5  ;;  %v880_v17 = vadd.f32 %v879_v10, %v608_v14  ;;  %v919_v18 = vmul.f32 %v608_v14, %v608_v14 }
  0xe9   : > { %v1308_v19 = vpop.f32.mrf.mxu0 }
  0xea   : > { %1265 = vst [vmem:[%s1535_s13 + $0x10] sm:$0xff] %v1197_v16   ;;  %v881_v21 = vadd.f32 %v1304_v63, %v880_v17  ;;  %v950_v22 = vadd.f32 %v949_v15, %v919_v18  ;;  %v924_v39 = vmul.f32 %v1308_v19, %v1308_v19 }
  0xeb   : > { %v621_v23 = vpop.f32.mrf.mxu0 }
  0xec   : > { %v951_v25 = vadd.f32 %v950_v22, %v920_v20  ;;  %v882_v26 = vadd.f32 %v1305_v9, %v881_v21  ;;  %v922_v29 = vmul.f32 %v621_v23, %v621_v23 }
  0xed   : > { %v1309_v27 = vpop.f32.mrf.mxu0 }
  0xee   : > { %v883_v28 = vadd.f32 %v882_v26, %v621_v23  ;;  %v952_v30 = vadd.f32 %v951_v25, %v921_v24  ;;  %v1212_v31 = vpack.c.bf16 %v1309_v27, %v1308_v19  ;;  %v925_v44 = vmul.f32 %v1309_v27, %v1309_v27 }
  0xef   : > { %v624_v32 = vpop.f32.mrf.mxu0 }
  0xf0   : > { %v953_v33 = vadd.f32 %v952_v30, %v922_v29  ;;  %1268 = vst [vmem:[%s1535_s13 + $0x28] sm:$0xff] %v1212_v31   ;;  %v1207_v34 = vpack.c.bf16 %v624_v32, %v621_v23  ;;  %v884_v35 = vadd.f32 %v883_v28, %v624_v32  ;;  %v923_v36 = vmul.f32 %v624_v32, %v624_v32  ;;  %v1316_v37 = vpop.f32.mrf.mxu1 }
  0xf1   : > { %v1312_v38 = vpop.f32.mrf.mxu0  ;;  %v932_v16 = vmul.f32 %v1316_v37, %v1316_v37 }
  0xf2   : > { %1267 = vst [vmem:[%s1535_s13 + $0x20] sm:$0xff] %v1207_v34   ;;  %v885_v40 = vadd.f32 %v1308_v19, %v884_v35  ;;  %v954_v41 = vadd.f32 %v953_v33, %v923_v36  ;;  %v653_v42 = vpop.f32.mrf.mxu1  ;;  %v928_v60 = vmul.f32 %v1312_v38, %v1312_v38 }
  0xf3   : > { %v637_v43 = vpop.f32.mrf.mxu0  ;;  %v930_v7 = vmul.f32 %v653_v42, %v653_v42 }
  0xf4   : > { %v955_v45 = vadd.f32 %v954_v41, %v924_v39  ;;  %v886_v46 = vadd.f32 %v1309_v27, %v885_v40  ;;  %v1317_v47 = vpop.f32.mrf.mxu1  ;;  %v926_v51 = vmul.f32 %v637_v43, %v637_v43 }
  0xf5   : > { %v1313_v48 = vpop.f32.mrf.mxu0  ;;  %v1232_v49 = vpack.c.bf16 %v1317_v47, %v1316_v37  ;;  %v933_v20 = vmul.f32 %v1317_v47, %v1317_v47 }
  0xf6   : > { %v887_v50 = vadd.f32 %v886_v46, %v637_v43  ;;  %v956_v52 = vadd.f32 %v955_v45, %v925_v44  ;;  %v1222_v2 = vpack.c.bf16 %v1313_v48, %v1312_v38  ;;  %v656_v53 = vpop.f32.mrf.mxu1  ;;  %v929_v0 = vmul.f32 %v1313_v48, %v1313_v48 }
  0xf7   : > { %v640_v54 = vpop.f32.mrf.mxu0  ;;  %1272 = vst [vmem:[%s1535_s13 + $0x48] sm:$0xff] %v1232_v49   ;;  %v1227_v55 = vpack.c.bf16 %v656_v53, %v653_v42  ;;  %v931_v13 = vmul.f32 %v656_v53, %v656_v53 }
  0xf8   : > { %v957_v3 = vadd.f32 %v956_v52, %v926_v51  ;;  %1270 = vst [vmem:[%s1535_s13 + $0x38] sm:$0xff] %v1222_v2   ;;  %v1217_v56 = vpack.c.bf16 %v640_v54, %v637_v43  ;;  %v888_v57 = vadd.f32 %v887_v50, %v640_v54  ;;  %v927_v58 = vmul.f32 %v640_v54, %v640_v54  ;;  %v1320_v59 = vpop.f32.mrf.mxu1 }
  0xf9   : > { %1271 = vst [vmem:[%s1535_s13 + $0x40] sm:$0xff] %v1227_v55   ;;  %v936_v34 = vmul.f32 %v1320_v59, %v1320_v59 }
  0xfa   : > { %1269 = vst [vmem:[%s1535_s13 + $0x30] sm:$0xff] %v1217_v56   ;;  %v889_v61 = vadd.f32 %v1312_v38, %v888_v57  ;;  %v958_v62 = vadd.f32 %v957_v3, %v927_v58  ;;  %v669_v63 = vpop.f32.mrf.mxu1 }
  0xfb   : > { %v934_v26 = vmul.f32 %v669_v63, %v669_v63 }
  0xfc   : > { %v890_v1 = vadd.f32 %v1313_v48, %v889_v61  ;;  %v959_v4 = vadd.f32 %v958_v62, %v928_v60  ;;  %v1321_v5 = vpop.f32.mrf.mxu1 }
  0xfd   : > { %v1242_v6 = vpack.c.bf16 %v1321_v5, %v1320_v59  ;;  %v937_v38 = vmul.f32 %v1321_v5, %v1321_v5 }
  0xfe   : > { %v960_v8 = vadd.f32 %v959_v4, %v929_v0  ;;  %v891_v9 = vadd.f32 %v890_v1, %v653_v42  ;;  %v672_v10 = vpop.f32.mrf.mxu1 }
  0xff   : > { %1274 = vst [vmem:[%s1535_s13 + $0x58] sm:$0xff] %v1242_v6   ;;  %v1237_v11 = vpack.c.bf16 %v672_v10, %v669_v63  ;;  %v935_v32 = vmul.f32 %v672_v10, %v672_v10 }
 0x100   : > { %v892_v12 = vadd.f32 %v891_v9, %v656_v53  ;;  %v961_v14 = vadd.f32 %v960_v8, %v930_v7  ;;  %v1324_v15 = vpop.f32.mrf.mxu1 }
 0x101   : > { %1273 = vst [vmem:[%s1535_s13 + $0x50] sm:$0xff] %v1237_v11   ;;  %v940_v51 = vmul.f32 %v1324_v15, %v1324_v15 }
 0x102   : > { %v893_v17 = vadd.f32 %v1316_v37, %v892_v12  ;;  %v962_v18 = vadd.f32 %v961_v14, %v931_v13  ;;  %v685_v19 = vpop.f32.mrf.mxu1 }
 0x103   : > { %v938_v44 = vmul.f32 %v685_v19, %v685_v19 }
 0x104   : > { %v963_v21 = vadd.f32 %v962_v18, %v932_v16  ;;  %v894_v22 = vadd.f32 %v1317_v47, %v893_v17  ;;  %v1325_v23 = vpop.f32.mrf.mxu1 }
 0x105   : > { %v1252_v24 = vpack.c.bf16 %v1325_v23, %v1324_v15  ;;  %v941_v53 = vmul.f32 %v1325_v23, %v1325_v23 }
 0x106   : > { %v895_v25 = vadd.f32 %v894_v22, %v669_v63  ;;  %v964_v27 = vadd.f32 %v963_v21, %v933_v20  ;;  %v688_v28 = vpop.f32.mrf.mxu1 }
 0x107   : > { %1276 = vst [vmem:[%s1535_s13 + $0x68] sm:$0xff] %v1252_v24   ;;  %v1247_v29 = vpack.c.bf16 %v688_v28, %v685_v19  ;;  %v939_v50 = vmul.f32 %v688_v28, %v688_v28 }
 0x108   : > { %v965_v30 = vadd.f32 %v964_v27, %v934_v26  ;;  %v896_v31 = vadd.f32 %v895_v25, %v672_v10  ;;  %v1328_v33 = vpop.f32.mrf.mxu1 }
 0x109   : > { %1275 = vst [vmem:[%s1535_s13 + $0x60] sm:$0xff] %v1247_v29   ;;  %v944_v61 = vmul.f32 %v1328_v33, %v1328_v33 }
 0x10a   : > { %v897_v35 = vadd.f32 %v1320_v59, %v896_v31  ;;  %v966_v36 = vadd.f32 %v965_v30, %v935_v32  ;;  %v701_v37 = vpop.f32.mrf.mxu1 }
 0x10b   : > { %v942_v56 = vmul.f32 %v701_v37, %v701_v37 }
 0x10c   : > { %v967_v39 = vadd.f32 %v966_v36, %v936_v34  ;;  %v898_v40 = vadd.f32 %v1321_v5, %v897_v35  ;;  %v1329_v41 = vpop.f32.mrf.mxu1 }
 0x10d   : > { %v1262_v42 = vpack.c.bf16 %v1329_v41, %v1328_v33  ;;  %v945_v0 = vmul.f32 %v1329_v41, %v1329_v41 }
 0x10e   : > { %v899_v43 = vadd.f32 %v898_v40, %v685_v19  ;;  %v968_v45 = vadd.f32 %v967_v39, %v937_v38  ;;  %v704_v46 = vpop.f32.mrf.mxu1 }
 0x10f   : > { %1278 = vst [vmem:[%s1535_s13 + $0x78] sm:$0xff] %v1262_v42   ;;  %v1257_v47 = vpack.c.bf16 %v704_v46, %v701_v37  ;;  %v943_v60 = vmul.f32 %v704_v46, %v704_v46 }
 0x110   : > { %v969_v48 = vadd.f32 %v968_v45, %v938_v44  ;;  %v900_v49 = vadd.f32 %v899_v43, %v688_v28 }
 0x111   : > { %1277 = vst [vmem:[%s1535_s13 + $0x70] sm:$0xff] %v1257_v47  }
 0x112   : > { %v901_v52 = vadd.f32 %v1324_v15, %v900_v49  ;;  %v970_v2 = vadd.f32 %v969_v48, %v939_v50 }
 0x114   : > { %v971_v54 = vadd.f32 %v970_v2, %v940_v51  ;;  %v902_v55 = vadd.f32 %v1325_v23, %v901_v52 }
 0x116   : > { %v903_v3 = vadd.f32 %v902_v55, %v701_v37  ;;  %v972_v57 = vadd.f32 %v971_v54, %v941_v53 }
 0x118   : > { %v973_v58 = vadd.f32 %v972_v57, %v942_v56  ;;  %v904_v59 = vadd.f32 %v903_v3, %v704_v46 }
 0x11a   : > { %v905_v62 = vadd.f32 %v1328_v33, %v904_v59  ;;  %v974_v63 = vadd.f32 %v973_v58, %v943_v60 }
 0x11c   : > { %v906_v1 = vadd.f32 %v1329_v41, %v905_v62  ;;  %v975_v4 = vadd.f32 %v974_v63, %v944_v61 }
 0x11e   : > { %v907_v5 = vrot.slane %v906_v1, 4  ;;  %v976_v6 = vadd.f32 %v975_v4, %v945_v0 }
 0x120   : > { %v908_v7 = vadd.f32 %v907_v5, %v906_v1  ;;  %v977_v8 = vrot.slane %v976_v6, 4 }
 0x122   : > { %v909_v9 = vrot.slane %v908_v7, 2  ;;  %v978_v10 = vadd.f32 %v977_v8, %v976_v6 }
 0x124   : > { %v910_v11 = vadd.f32 %v909_v9, %v908_v7  ;;  %v979_v12 = vrot.slane %v978_v10, 2 }
 0x126   : > { %v911_v13 = vrot.slane %v910_v11, 1  ;;  %v980_v14 = vadd.f32 %v979_v12, %v978_v10 }
 0x128   : > { %v912_v15 = vadd.f32 %v911_v13, %v910_v11  ;;  %v981_v16 = vrot.slane %v980_v14, 1 }
 0x12a   : > { %913 = vst [vmem:[%s268_s16] sm:$0x1] %v912_v15  ;;  %v982_v17 = vadd.f32 %v981_v16, %v980_v14 }
 0x12c   : > { %983 = vst [vmem:[%s271_s19] sm:$0x1] %v982_v17 }
 0x12d PF: > { %s17_s21 = sadd.s32 1, %s1349_s21  }
 0x12e   : > { %p14_p5 = scmp.ge.s32.totalorder %s17_s21, 4  }
 0x130   :  { %16 = sbr.rel (!%p14_p5) target bundleno = 1 (0x1), region = 90 }

// kernel: _lambda_.5
= control target key start
LH: loop header
LB: loop body
LE: loop exit
PB: predicated region body
PF: predicated region fallthrough
CT: control target
= control target key end

     0   :  { %s4617_s21 = smov 0   ;;  %s5712_s0 = inlined_call_operand.vmem [shape: bf16[2,16,16,128], index: 0, kind: input, shape index: {}]   ;;  %s5713_s1 = inlined_call_operand.vmem [shape: f32[1,128], index: 1, kind: input, shape index: {}]   ;;  %s5714_s2 = inlined_call_operand.vmem [shape: f32[1,128], index: 2, kind: input, shape index: {}]   ;;  %s5715_s3 = inlined_call_operand.vmem [shape: bf16[9,128,128], index: 3, kind: input, shape index: {}]   ;;  %s5716_s4 = inlined_call_operand.vmem [shape: f32[2,16,16,128], index: 4, kind: output, shape index: {0}]   ;;  %s5717_s5 = inlined_call_operand.vmem [shape: f32[2,1,128], index: 5, kind: output, shape index: {1}]   ;;  %s5718_s6 = inlined_call_operand.vmem [shape: f32[2,1,128], index: 6, kind: output, shape index: {2}]  }
   0x1 LB: > { %s3530_s22 = sadd.s32 4294967295, %s4578_s21   ;;  %p3534_p0 = scmp.ge.s32.totalorder %s4578_s21, 1  ;;  %s4578_s21 = sphi %s4617_s21, %s17_s21  }
   0x2   : > { %p217_p1 = scmp.lt.s32.totalorder %s4578_s21, 3 }
   0x4   : > { %p218_p2 = pnand %p3534_p0, %p217_p1 }
   0x6   : > { %221 = sbr.rel (%p218_p2) target bundleno = 553 (0x229), region = 36 }
   0xb   : > { %v4497_v0 = vld [vmem:[%s5715_s3 + $0x78] sm:$0xff]   ;;  %v4631_v1 = vld [vmem:[%s5715_s3 + $0x70] sm:$0xff]   ;;  %v4580_v2 = vmov 0.0   ;;  %p253_p3 = scmp.lt.s32.totalorder %s3530_s22, 1  ;;  %v4499_v3 = vld [vmem:[%s5715_s3 + $0x68] sm:$0xff]  }
   0xc   : > { %508 = vst [vmem:[#allocation2] sm:$0xff] %v4580_v2  ;;  %509 = vst [vmem:[#allocation2 + $0x8] sm:$0xff] %v4580_v2  ;;  %4040 = vmatprep.subr.bf16.mxu0 %v4497_v0  ;;  %4472 = vmatprep.subr.bf16.mxu1 %v4497_v0  ;;  %v4500_v4 = vld [vmem:[%s5715_s3 + $0x60] sm:$0xff]   ;;  %v4501_v21 = vld [vmem:[%s5715_s3 + $0x58] sm:$0xff]  }
   0xd   : > { %510 = vst [vmem:[#allocation2 + $0x10] sm:$0x3] %v4580_v2  ;;  %511 = vst [vmem:[#allocation2 + $0x18] sm:$0xff] %v4580_v2  ;;  %4041 = vmatpush3.bf16.msra.mxu0 %v4497_v0  ;;  %4480 = vmatpush3.bf16.msra.mxu1 %v4497_v0  ;;  %s5802_s22 = smov (!%p253_p3, %s3530_s22), 1  ;;  %v4659_v11 = vld [vmem:[%s5713_s1] ss:$0 sm:$0xff] }
   0xe   : > { %512 = vst [vmem:[#allocation2 + $0x20] sm:$0xff] %v4580_v2  ;;  %513 = vst [vmem:[#allocation2 + $0x28] sm:$0x3] %v4580_v2  ;;  %4042 = vmatprep.subr.bf16.mxu0 %v4631_v1  ;;  %4473 = vmatprep.subr.bf16.mxu1 %v4631_v1  ;;  %s3743_s29 = sshll.u32 %s5802_s22, 7  ;;  %v4664_v12 = vld [vmem:[%s5714_s2] ss:$0 sm:$0xff]  ;;  %s265_s10 = scalar_lea.vmem %s5717_s5, %s5802_s22 }
   0xf   : > { %514 = vst [vmem:[#allocation2 + $0x30] sm:$0xff] %v4580_v2  ;;  %515 = vst [vmem:[#allocation2 + $0x38] sm:$0xff] %v4580_v2  ;;  %s4648_s8 = scalar_lea.vmem %s5712_s0, %s3743_s29  ;;  %v4502_v28 = vld [vmem:[%s5715_s3 + $0x50] sm:$0xff]   ;;  %v4503_v48 = vld [vmem:[%s5715_s3 + $0x48] sm:$0xff]   ;;  %s268_s13 = scalar_lea.vmem %s5718_s6, %s5802_s22 }
  0x10   : > { %516 = vst [vmem:[#allocation2 + $0x40] sm:$0x3] %v4580_v2  ;;  %517 = vst [vmem:[#allocation2 + $0x48] sm:$0xff] %v4580_v2  ;;  %v3815_v7 = vld [vmem:[%s4648_s8 + $0x38] sm:$0xff]   ;;  %v3746_v13 = vld [vmem:[%s4648_s8] sm:$0xff]  }
  0x11   : > { %518 = vst [vmem:[#allocation2 + $0x50] sm:$0xff] %v4580_v2  ;;  %519 = vst [vmem:[#allocation2 + $0x58] sm:$0x3] %v4580_v2  ;;  %4043 = vmatpush3.bf16.msra.mxu0 %v4631_v1  ;;  %4481 = vmatpush3.bf16.msra.mxu1 %v4631_v1  ;;  %v3775_v9 = vunpack.c.l.bf16 %v3815_v7  ;;  %v3776_v10 = vunpack.c.h.bf16 %v3815_v7  ;;  %v3747_v14 = vunpack.c.l.bf16 %v3746_v13  ;;  %v3748_v15 = vunpack.c.h.bf16 %v3746_v13  ;;  %v3816_v16 = vld [vmem:[%s4648_s8 + $0x40] sm:$0xff]   ;;  %v3809_v31 = vld [vmem:[%s4648_s8 + $0x8] sm:$0xff]  }
  0x12   : > { %520 = vst [vmem:[#allocation2 + $0x60] sm:$0xff] %v4580_v2  ;;  %521 = vst [vmem:[#allocation2 + $0x68] sm:$0xff] %v4580_v2  ;;  %4044 = vmatprep.subr.bf16.mxu0 %v4499_v3  ;;  %4474 = vmatprep.subr.bf16.mxu1 %v4499_v3  ;;  %v3779_v19 = vunpack.c.l.bf16 %v3816_v16  ;;  %v3780_v20 = vunpack.c.h.bf16 %v3816_v16  ;;  %v3817_v40 = vld [vmem:[%s4648_s8 + $0x48] sm:$0xff]   ;;  %v3751_v44 = vunpack.c.l.bf16 %v3809_v31  ;;  %v3810_v45 = vld [vmem:[%s4648_s8 + $0x10] sm:$0xff]   ;;  %v3752_v50 = vunpack.c.h.bf16 %v3809_v31 }
  0x13   : > { %522 = vst [vmem:[#allocation2 + $0x70] sm:$0x3] %v4580_v2  ;;  %523 = vst [vmem:[#allocation2 + $0x78] sm:$0xff] %v4580_v2  ;;  %v659_v5 = vld [vmem:[#allocation2 + $0x1] sm:$0xff]  ;;  %v356_v17 = vmul.f32 %v3775_v9, %v4659_v11  ;;  %v357_v18 = vmul.f32 %v3776_v10, %v4659_v11  ;;  %v342_v22 = vmul.f32 %v3747_v14, %v4659_v11  ;;  %v3783_v52 = vunpack.c.l.bf16 %v3817_v40  ;;  %v3818_v53 = vld [vmem:[%s4648_s8 + $0x50] sm:$0xff]  }
  0x14   : > { %524 = vst [vmem:[#allocation2 + $0x80] sm:$0xff] %v4580_v2  ;;  %525 = vst [vmem:[#allocation2 + $0x88] sm:$0x3] %v4580_v2  ;;  %v660_v6 = vld [vmem:[#allocation2 + $0x9] sm:$0xff]  ;;  %v343_v23 = vmul.f32 %v3748_v15, %v4659_v11  ;;  %v358_v26 = vmul.f32 %v3779_v19, %v4659_v11  ;;  %v359_v27 = vmul.f32 %v3780_v20, %v4659_v11  ;;  %v3784_v55 = vunpack.c.h.bf16 %v3817_v40  ;;  %v4505_v10 = vld [vmem:[%s5715_s3 + $0x38] sm:$0xff]  }
  0x15   : > { %526 = vst [vmem:[#allocation2 + $0x90] sm:$0xff] %v4580_v2  ;;  %527 = vst [vmem:[#allocation2 + $0x98] sm:$0xff] %v4580_v2  ;;  %v691_v8 = vpack.c.bf16 %v660_v6, %v659_v5  ;;  %4045 = vmatpush3.bf16.msra.mxu0 %v4499_v3  ;;  %4482 = vmatpush3.bf16.msra.mxu1 %v4499_v3  ;;  %v394_v24 = vadd.f32 %v4664_v12, %v356_v17  ;;  %v3755_v56 = vunpack.c.l.bf16 %v3810_v45  ;;  %v4506_v13 = vld [vmem:[%s5715_s3 + $0xb8] sm:$0xff]  }
  0x16   : > { %528 = vst [vmem:[#allocation2 + $0xa0] sm:$0x3] %v4580_v2  ;;  %529 = vst [vmem:[#allocation2 + $0xa8] sm:$0xff] %v4580_v2  ;;  %4046 = vmatprep.subr.bf16.mxu0 %v4500_v4  ;;  %4475 = vmatprep.subr.bf16.mxu1 %v4500_v4  ;;  %v395_v25 = vadd.f32 %v4664_v12, %v357_v18  ;;  %v380_v29 = vadd.f32 %v4664_v12, %v342_v22  ;;  %v3756_v57 = vunpack.c.h.bf16 %v3810_v45  ;;  %v3811_v19 = vld [vmem:[%s4648_s8 + $0x18] sm:$0xff]  }
  0x17   : > { %530 = vst [vmem:[#allocation2 + $0xb0] sm:$0xff] %v4580_v2  ;;  %531 = vst [vmem:[#allocation2 + $0xb8] sm:$0x3] %v4580_v2  ;;  %4056 = vmatprep.mubr.bf16.mxu0 %v691_v8  ;;  %v381_v30 = vadd.f32 %v4664_v12, %v343_v23  ;;  %vm426_vm0 = vcmp.ge.f32.partialorder %v394_v24, 0.0  ;;  %v458_v32 = vmul.f32 0.2, %v394_v24  ;;  %v396_v38 = vadd.f32 %v4664_v12, %v358_v26 }
  0x18   : > { %532 = vst [vmem:[#allocation2 + $0xc0] sm:$0xff] %v4580_v2  ;;  %533 = vst [vmem:[#allocation2 + $0xc8] sm:$0xff] %v4580_v2  ;;  %vm427_vm1 = vcmp.ge.f32.partialorder %v395_v25, 0.0  ;;  %v459_v33 = vmul.f32 0.2, %v395_v25  ;;  %vm412_vm2 = vcmp.ge.f32.partialorder %v380_v29, 0.0  ;;  %v397_v39 = vadd.f32 %v4664_v12, %v359_v27 }
  0x19   : > { %534 = vst [vmem:[#allocation2 + $0xd0] sm:$0x3] %v4580_v2  ;;  %535 = vst [vmem:[#allocation2 + $0xd8] sm:$0xff] %v4580_v2  ;;  %4047 = vmatpush3.bf16.msra.mxu0 %v4500_v4  ;;  %4483 = vmatpush3.bf16.msra.mxu1 %v4500_v4  ;;  %vm413_vm3 = vcmp.ge.f32.partialorder %v381_v30, 0.0  ;;  %v444_v34 = vmul.f32 0.2, %v380_v29  ;;  %v490_v36 = vsel %vm426_vm0, %v394_v24, %v458_v32  ;;  %v3787_v1 = vunpack.c.l.bf16 %v3818_v53 }
  0x1a   : > { %536 = vst [vmem:[#allocation2 + $0xe0] sm:$0xff] %v4580_v2  ;;  %537 = vst [vmem:[#allocation2 + $0xe8] sm:$0x3] %v4580_v2  ;;  %4048 = vmatprep.subr.bf16.mxu0 %v4501_v21  ;;  %4476 = vmatprep.subr.bf16.mxu1 %v4501_v21  ;;  %v445_v35 = vmul.f32 0.2, %v381_v30  ;;  %v491_v37 = vsel %vm427_vm1, %v395_v25, %v459_v33  ;;  %vm428_vm4 = vcmp.ge.f32.partialorder %v396_v38, 0.0  ;;  %v3788_v9 = vunpack.c.h.bf16 %v3818_v53 }
  0x1b   : > { %538 = vst [vmem:[#allocation2 + $0xf0] sm:$0xff] %v4580_v2  ;;  %539 = vst [vmem:[#allocation2 + $0xf8] sm:$0xff] %v4580_v2  ;;  %v699_v41 = vpack.c.bf16 %v491_v37, %v490_v36  ;;  %v4688_v42 = vsel %vm412_vm2, %v380_v29, %v444_v34  ;;  %vm429_vm5 = vcmp.ge.f32.partialorder %v397_v39, 0.0  ;;  %v460_v47 = vmul.f32 0.2, %v396_v38  ;;  %v3819_v23 = vld [vmem:[%s4648_s8 + $0x58] sm:$0xff]  }
  0x1c   : > { %540 = vst [vmem:[#allocation2 + $0x100] sm:$0x3] %v4580_v2  ;;  %541 = vst [vmem:[#allocation2 + $0x108] sm:$0xff] %v4580_v2  ;;  %v4690_v43 = vsel %vm413_vm3, %v381_v30, %v445_v35  ;;  %v461_v49 = vmul.f32 0.2, %v397_v39  ;;  %v344_v51 = vmul.f32 %v3751_v44, %v4659_v11  ;;  %v345_v59 = vmul.f32 %v3752_v50, %v4659_v11  ;;  %v4737_v27 = vld [vmem:[%s4648_s8 + $0x20] sm:$0xff]  }
  0x1d   : > { %542 = vst [vmem:[#allocation2 + $0x110] sm:$0xff] %v4580_v2  ;;  %543 = vst [vmem:[#allocation2 + $0x118] sm:$0x3] %v4580_v2  ;;  %4049 = vmatpush3.bf16.msra.mxu0 %v4501_v21  ;;  %4484 = vmatpush3.bf16.msra.mxu1 %v4501_v21  ;;  %v692_v46 = vpack.c.bf16 %v4690_v43, %v4688_v42  ;;  %v4702_v54 = vsel %vm428_vm4, %v396_v38, %v460_v47  ;;  %v4507_v32 = vld [vmem:[%s5715_s3 + $0x30] sm:$0xff]   ;;  %v3759_v34 = vunpack.c.l.bf16 %v3811_v19 }
  0x1e   : > { %544 = vst [vmem:[#allocation2 + $0x120] sm:$0xff] %v4580_v2  ;;  %545 = vst [vmem:[#allocation2 + $0x128] sm:$0xff] %v4580_v2  ;;  %4050 = vmatprep.subr.bf16.mxu0 %v4502_v28  ;;  %4477 = vmatprep.subr.bf16.mxu1 %v4502_v28  ;;  %v4704_v58 = vsel %vm429_vm5, %v397_v39, %v461_v49  ;;  %v382_v60 = vadd.f32 %v4664_v12, %v344_v51  ;;  %v3760_v35 = vunpack.c.h.bf16 %v3811_v19 }
  0x1f   : > { %546 = vst [vmem:[#allocation2 + $0x130] sm:$0x3] %v4580_v2  ;;  %547 = vst [vmem:[#allocation2 + $0x138] sm:$0xff] %v4580_v2  ;;  %4072 = vmatprep.mubr.bf16.mxu1 %v699_v41  ;;  %v360_v61 = vmul.f32 %v3783_v52, %v4659_v11  ;;  %v700_v62 = vpack.c.bf16 %v4704_v58, %v4702_v54  ;;  %v361_v63 = vmul.f32 %v3784_v55, %v4659_v11 }
  0x20   : > { %548 = vst [vmem:[#allocation2 + $0x140] sm:$0xff] %v4580_v2  ;;  %549 = vst [vmem:[#allocation2 + $0x148] sm:$0x3] %v4580_v2  ;;  %v346_v0 = vmul.f32 %v3755_v56, %v4659_v11  ;;  %v383_v3 = vadd.f32 %v4664_v12, %v345_v59  ;;  %vm414_vm6 = vcmp.ge.f32.partialorder %v382_v60, 0.0  ;;  %v446_v4 = vmul.f32 0.2, %v382_v60 }
  0x21   : > { %550 = vst [vmem:[#allocation2 + $0x150] sm:$0xff] %v4580_v2  ;;  %551 = vst [vmem:[#allocation2 + $0x158] sm:$0xff] %v4580_v2  ;;  %4051 = vmatpush3.bf16.msra.mxu0 %v4502_v28  ;;  %4485 = vmatpush3.bf16.msra.mxu1 %v4502_v28  ;;  %v398_v5 = vadd.f32 %v4664_v12, %v360_v61  ;;  %v399_v6 = vadd.f32 %v4664_v12, %v361_v63  ;;  %v3792_v40 = vunpack.c.h.bf16 %v3819_v23  ;;  %v4512_v63 = vld [vmem:[%s5715_s3 + $0xa0] sm:$0xff]  }
  0x22   : > { %552 = vst [vmem:[#allocation2 + $0x160] sm:$0x3] %v4580_v2  ;;  %553 = vst [vmem:[#allocation2 + $0x168] sm:$0xff] %v4580_v2  ;;  %4052 = vmatprep.subr.bf16.mxu0 %v4503_v48  ;;  %4478 = vmatprep.subr.bf16.mxu1 %v4503_v48  ;;  %v347_v7 = vmul.f32 %v3756_v57, %v4659_v11  ;;  %v384_v8 = vadd.f32 %v4664_v12, %v346_v0  ;;  %vm415_vm7 = vcmp.ge.f32.partialorder %v383_v3, 0.0 }
  0x23   : > { %554 = vst [vmem:[#allocation2 + $0x170] sm:$0xff] %v4580_v2  ;;  %555 = vst [vmem:[#allocation2 + $0x178] sm:$0x3] %v4580_v2  ;;  %v447_v14 = vmul.f32 0.2, %v383_v3  ;;  %v478_v15 = vsel %vm414_vm6, %v382_v60, %v446_v4  ;;  %vm430_vm8 = vcmp.ge.f32.partialorder %v398_v5, 0.0  ;;  %v362_v22 = vmul.f32 %v3787_v1, %v4659_v11 }
  0x24   : > { %556 = vst [vmem:[#allocation2 + $0x180] sm:$0xff] %v4580_v2  ;;  %557 = vst [vmem:[#allocation2 + $0x188] sm:$0xff] %v4580_v2  ;;  %vm431_vm9 = vcmp.ge.f32.partialorder %v399_v6, 0.0  ;;  %v462_v16 = vmul.f32 0.2, %v398_v5  ;;  %v385_v18 = vadd.f32 %v4664_v12, %v347_v7  ;;  %vm416_vm10 = vcmp.ge.f32.partialorder %v384_v8, 0.0 }
  0x25   : > { %558 = vst [vmem:[#allocation2 + $0x190] sm:$0x3] %v4580_v2  ;;  %559 = vst [vmem:[#allocation2 + $0x198] sm:$0xff] %v4580_v2  ;;  %4053 = vmatpush3.bf16.msra.mxu0 %v4503_v48  ;;  %4486 = vmatpush3.bf16.msra.mxu1 %v4503_v48  ;;  %v463_v17 = vmul.f32 0.2, %v399_v6  ;;  %v479_v20 = vsel %vm415_vm7, %v383_v3, %v447_v14  ;;  %v363_v31 = vmul.f32 %v3788_v9, %v4659_v11  ;;  %v3820_v48 = vld [vmem:[%s4648_s8 + $0x60] sm:$0xff]  }
  0x26   : > { %560 = vst [vmem:[#allocation2 + $0x1a0] sm:$0xff] %v4580_v2  ;;  %561 = vst [vmem:[#allocation2 + $0x1a8] sm:$0x3] %v4580_v2  ;;  %v4504_v2 = vld [vmem:[%s5715_s3 + $0x40] sm:$0xff]   ;;  %v448_v21 = vmul.f32 0.2, %v384_v8  ;;  %v4733_v24 = vpack.c.bf16 %v479_v20, %v478_v15  ;;  %v494_v25 = vsel %vm430_vm8, %v398_v5, %v462_v16  ;;  %v400_v33 = vadd.f32 %v4664_v12, %v362_v22 }
  0x27   : > { %577 = vst [vmem:[#allocation2 + $0xc1] sm:$0xff] %v490_v36  ;;  %578 = vst [vmem:[#allocation2 + $0xc9] sm:$0xff] %v491_v37  ;;  %4054 = vmatprep.subr.bf16.mxu0 %v4504_v2  ;;  %4479 = vmatprep.subr.bf16.mxu1 %v4504_v2  ;;  %v495_v26 = vsel %vm431_vm9, %v399_v6, %v463_v17  ;;  %vm417_vm11 = vcmp.ge.f32.partialorder %v385_v18, 0.0  ;;  %v449_v29 = vmul.f32 0.2, %v385_v18  ;;  %v3791_v36 = vunpack.c.l.bf16 %v3819_v23  ;;  %v4508_v37 = vld [vmem:[%s5715_s3 + $0xb0] sm:$0xff]  }
  0x28   : > { %563 = vst [vmem:[#allocation2 + $0x19] sm:$0xff] %v4688_v42  ;;  %564 = vst [vmem:[#allocation2 + $0x21] sm:$0xff] %v4690_v43  ;;  %v701_v28 = vpack.c.bf16 %v495_v26, %v494_v25  ;;  %v480_v30 = vsel %vm416_vm10, %v384_v8, %v448_v21  ;;  %v401_v39 = vadd.f32 %v4664_v12, %v363_v31  ;;  %v3763_v41 = vunpack.c.l.bf16 %v4737_v27  ;;  %v3813_v5 = vld [vmem:[%s4648_s8 + $0x28] sm:$0xff]   ;;  %v4513_v22 = vld [vmem:[%s5715_s3 + $0x18] sm:$0xff]  }
  0x29   : > { %579 = vst [vmem:[#allocation2 + $0xd9] sm:$0xff] %v4702_v54  ;;  %580 = vst [vmem:[#allocation2 + $0xe1] sm:$0xff] %v4704_v58  ;;  %4055 = vmatpush3.bf16.msra.mxu0 %v4504_v2  ;;  %4487 = vmatpush3.bf16.msra.mxu1 %v4504_v2  ;;  %v481_v38 = vsel %vm417_vm11, %v385_v18, %v449_v29  ;;  %vm432_vm12 = vcmp.ge.f32.partialorder %v400_v33, 0.0  ;;  %v464_v45 = vmul.f32 0.2, %v400_v33  ;;  %v3764_v42 = vunpack.c.h.bf16 %v4737_v27  ;;  %v4510_v54 = vld [vmem:[%s5715_s3 + $0xa8] sm:$0xff]  }
  0x2a   : > { %565 = vst [vmem:[#allocation2 + $0x31] sm:$0xff] %v478_v15  ;;  %566 = vst [vmem:[#allocation2 + $0x39] sm:$0xff] %v479_v20  ;;  %4088 = vmatprep.subr.bf16.mxu1 %v4505_v10  ;;  %4136 = vmatprep.subr.bf16.mxu0 %v4506_v13  ;;  %v4750_v44 = vpack.c.bf16 %v481_v38, %v480_v30  ;;  %v348_v47 = vmul.f32 %v3759_v34, %v4659_v11  ;;  %vm433_vm13 = vcmp.ge.f32.partialorder %v401_v39, 0.0  ;;  %v4514_v23 = vld [vmem:[%s5715_s3 + $0x98] sm:$0xff]   ;;  %v3821_v29 = vld [vmem:[%s4648_s8 + $0x68] sm:$0xff]  }
  0x2b   : > { %581 = vst [vmem:[#allocation2 + $0xf1] sm:$0xff] %v494_v25  ;;  %582 = vst [vmem:[#allocation2 + $0xf9] sm:$0xff] %v495_v26  ;;  %v465_v49 = vmul.f32 0.2, %v401_v39  ;;  %v349_v50 = vmul.f32 %v3760_v35, %v4659_v11  ;;  %v364_v51 = vmul.f32 %v3791_v36, %v4659_v11  ;;  %v496_v52 = vsel %vm432_vm12, %v400_v33, %v464_v45  ;;  %v4516_v45 = vld [vmem:[%s5715_s3 + $0x90] sm:$0xff]  }
  0x2c   : > { %567 = vst [vmem:[#allocation2 + $0x49] sm:$0xff] %v480_v30  ;;  %568 = vst [vmem:[#allocation2 + $0x51] sm:$0xff] %v481_v38  ;;  %4057 = vmatmul.mubr.bf16.vlgmr.msra.gmra.mxu0 %v692_v46  ;;  %4073 = vmatmul.mubr.bf16.vlgmr.msra.gmra.mxu1 %v700_v62  ;;  %v386_v53 = vadd.f32 %v4664_v12, %v348_v47  ;;  %v365_v55 = vmul.f32 %v3792_v40, %v4659_v11  ;;  %v4509_v46 = vld [vmem:[%s5715_s3 + $0x28] sm:$0xff]   ;;  %v3795_v58 = vunpack.c.l.bf16 %v3820_v48  ;;  %v4511_v62 = vld [vmem:[%s5715_s3 + $0x20] sm:$0xff]  }
  0x2d   : > { %4089 = vmatpush3.bf16.msra.mxu1 %v4505_v10  ;;  %4137 = vmatpush3.bf16.msra.mxu0 %v4506_v13  ;;  %v497_v43 = vsel %vm433_vm13, %v401_v39, %v465_v49  ;;  %583 = vst [vmem:[#allocation2 + $0x109] sm:$0xff] %v496_v52  ;;  %v387_v56 = vadd.f32 %v4664_v12, %v349_v50  ;;  %v3796_v9 = vunpack.c.h.bf16 %v3820_v48  ;;  %v3767_v19 = vunpack.c.l.bf16 %v3813_v5  ;;  %v3814_v40 = vld [vmem:[%s4648_s8 + $0x30] sm:$0xff]  }
  0x2e   : > { %4090 = vmatprep.subr.bf16.mxu1 %v4507_v32  ;;  %4138 = vmatprep.subr.bf16.mxu0 %v4508_v37  ;;  %v402_v57 = vadd.f32 %v4664_v12, %v364_v51  ;;  %584 = vst [vmem:[#allocation2 + $0x111] sm:$0xff] %v497_v43  ;;  %v702_v59 = vpack.c.bf16 %v497_v43, %v496_v52  ;;  %vm418_vm14 = vcmp.ge.f32.partialorder %v386_v53, 0.0  ;;  %v450_v60 = vmul.f32 0.2, %v386_v53  ;;  %v3822_v49 = vld [vmem:[%s4648_s8 + $0x70] sm:$0xff]  }
  0x2f   : > { %4060 = vmatprep.mubr.bf16.mxu0 %v4733_v24  ;;  %4076 = vmatprep.mubr.bf16.mxu1 %v701_v28  ;;  %v403_v61 = vadd.f32 %v4664_v12, %v365_v55  ;;  %vm419_vm15 = vcmp.ge.f32.partialorder %v387_v56, 0.0  ;;  %v451_v0 = vmul.f32 0.2, %v387_v56  ;;  %v350_v4 = vmul.f32 %v3763_v41, %v4659_v11  ;;  %v4515_v51 = vld [vmem:[%s5715_s3 + $0x10] sm:$0xff]  }
  0x30   : > { %vm434_vm0 = vcmp.ge.f32.partialorder %v402_v57, 0.0  ;;  %v466_v1 = vmul.f32 0.2, %v402_v57  ;;  %v482_v2 = vsel %vm418_vm14, %v386_v53, %v450_v60  ;;  %v351_v8 = vmul.f32 %v3764_v42, %v4659_v11 }
  0x31   : > { %4091 = vmatpush3.bf16.msra.mxu1 %v4507_v32  ;;  %4139 = vmatpush3.bf16.msra.mxu0 %v4508_v37  ;;  %vm435_vm1 = vcmp.ge.f32.partialorder %v403_v61, 0.0  ;;  %v467_v3 = vmul.f32 0.2, %v403_v61  ;;  %v483_v6 = vsel %vm419_vm15, %v387_v56, %v451_v0  ;;  %569 = vst [vmem:[#allocation2 + $0x61] sm:$0xff] %v482_v2  ;;  %v388_v14 = vadd.f32 %v4664_v12, %v350_v4 }
  0x32   : > { %4092 = vmatprep.subr.bf16.mxu1 %v4509_v46  ;;  %4140 = vmatprep.subr.bf16.mxu0 %v4510_v54  ;;  %v498_v7 = vsel %vm434_vm0, %v402_v57, %v466_v1  ;;  %570 = vst [vmem:[#allocation2 + $0x69] sm:$0xff] %v483_v6  ;;  %v4784_v10 = vpack.c.bf16 %v483_v6, %v482_v2  ;;  %v3768_v25 = vunpack.c.h.bf16 %v3813_v5  ;;  %v3799_v39 = vunpack.c.l.bf16 %v3821_v29  ;;  %v4517_v2 = vld [vmem:[%s5715_s3 + $0x8] sm:$0xff]  }
  0x33   : > { %v499_v13 = vsel %vm435_vm1, %v403_v61, %v467_v3  ;;  %585 = vst [vmem:[#allocation2 + $0x121] sm:$0xff] %v498_v7  ;;  %v366_v15 = vmul.f32 %v3795_v58, %v4659_v11  ;;  %v389_v17 = vadd.f32 %v4664_v12, %v351_v8  ;;  %v367_v18 = vmul.f32 %v3796_v9, %v4659_v11  ;;  %v4519_v9 = vld [vmem:[%s5715_s3] sm:$0xff]  }
  0x34   : > { %4061 = vmatmul.mubr.bf16.gmra.mxu0 %v4750_v44  ;;  %4077 = vmatmul.mubr.bf16.gmra.mxu1 %v702_v59  ;;  %586 = vst [vmem:[#allocation2 + $0x129] sm:$0xff] %v499_v13  ;;  %v4789_v16 = vpack.c.bf16 %v499_v13, %v498_v7  ;;  %vm420_vm2 = vcmp.ge.f32.partialorder %v388_v14, 0.0  ;;  %v452_v20 = vmul.f32 0.2, %v388_v14  ;;  %v352_v28 = vmul.f32 %v3767_v19, %v4659_v11  ;;  %v4520_v13 = vld [vmem:[%s5715_s3 + $0x80] sm:$0xff]  }
  0x35   : > { %4093 = vmatpush3.bf16.msra.mxu1 %v4509_v46  ;;  %4141 = vmatpush3.bf16.msra.mxu0 %v4510_v54  ;;  %v404_v21 = vadd.f32 %v4664_v12, %v366_v15  ;;  %vm421_vm3 = vcmp.ge.f32.partialorder %v389_v17, 0.0  ;;  %v453_v26 = vmul.f32 0.2, %v389_v17  ;;  %v405_v27 = vadd.f32 %v4664_v12, %v367_v18 }
  0x36   : > { %4094 = vmatprep.subr.bf16.mxu1 %v4511_v62  ;;  %4142 = vmatprep.subr.bf16.mxu0 %v4512_v63  ;;  %v484_v30 = vsel %vm420_vm2, %v388_v14, %v452_v20  ;;  %v353_v32 = vmul.f32 %v3768_v25, %v4659_v11  ;;  %v390_v35 = vadd.f32 %v4664_v12, %v352_v28  ;;  %v3800_v48 = vunpack.c.h.bf16 %v3821_v29 }
  0x37   : > { %4064 = vmatprep.mubr.bf16.mxu0 %v4784_v10  ;;  %4080 = vmatprep.mubr.bf16.mxu1 %v4789_v16  ;;  %vm436_vm4 = vcmp.ge.f32.partialorder %v404_v21, 0.0  ;;  %v468_v31 = vmul.f32 0.2, %v404_v21  ;;  %v485_v33 = vsel %vm421_vm3, %v389_v17, %v453_v26  ;;  %571 = vst [vmem:[#allocation2 + $0x79] sm:$0xff] %v484_v30  ;;  %vm437_vm5 = vcmp.ge.f32.partialorder %v405_v27, 0.0  ;;  %v1142_v17 = vld [vmem:[#allocation2 + $0x2] sm:$0xff] }
  0x38   : > { %v469_v34 = vmul.f32 0.2, %v405_v27  ;;  %572 = vst [vmem:[#allocation2 + $0x81] sm:$0xff] %v485_v33  ;;  %v4807_v36 = vpack.c.bf16 %v485_v33, %v484_v30  ;;  %v391_v38 = vadd.f32 %v4664_v12, %v353_v32  ;;  %vm422_vm6 = vcmp.ge.f32.partialorder %v390_v35, 0.0  ;;  %v4521_v30 = vld [vmem:[%s5715_s3 + $0xf8] sm:$0xff]   ;;  %v598_v33 = vld [vmem:[#allocation2 + $0x20] sm:$0xff] }
  0x39   : > { %4095 = vmatpush3.bf16.msra.mxu1 %v4511_v62  ;;  %4143 = vmatpush3.bf16.msra.mxu0 %v4512_v63  ;;  %v500_v37 = vsel %vm436_vm4, %v404_v21, %v468_v31  ;;  %v454_v47 = vmul.f32 0.2, %v390_v35  ;;  %v368_v53 = vmul.f32 %v3799_v39, %v4659_v11  ;;  %v369_v42 = vmul.f32 %v3800_v48, %v4659_v11  ;;  %v4518_v62 = vld [vmem:[%s5715_s3 + $0x88] sm:$0xff]   ;;  %v597_v31 = vld [vmem:[#allocation2 + $0x18] sm:$0xff] }
  0x3a   : > { %v501_v41 = vsel %vm437_vm5, %v405_v27, %v469_v34  ;;  %587 = vst [vmem:[#allocation2 + $0x139] sm:$0xff] %v500_v37  ;;  %4096 = vmatprep.subr.bf16.mxu1 %v4513_v22  ;;  %4144 = vmatprep.subr.bf16.mxu0 %v4514_v23  ;;  %vm423_vm7 = vcmp.ge.f32.partialorder %v391_v38, 0.0  ;;  %v455_v52 = vmul.f32 0.2, %v391_v38  ;;  %v3771_v43 = vunpack.c.l.bf16 %v3814_v40  ;;  %v4522_v32 = vld [vmem:[%s5715_s3 + $0x138] sm:$0xff]  }
  0x3b   : > { %588 = vst [vmem:[#allocation2 + $0x141] sm:$0xff] %v501_v41  ;;  %v4815_v50 = vpack.c.bf16 %v501_v41, %v500_v37  ;;  %v486_v55 = vsel %vm422_vm6, %v390_v35, %v454_v47  ;;  %v3772_v46 = vunpack.c.h.bf16 %v3814_v40  ;;  %v406_v56 = vadd.f32 %v4664_v12, %v368_v53  ;;  %v1144_v34 = vld [vmem:[#allocation2 + $0x1a] sm:$0xff]  ;;  %v1145_v35 = vld [vmem:[#allocation2 + $0x22] sm:$0xff]  ;;  %v1146_v41 = vld [vmem:[#allocation2 + $0x32] sm:$0xff] }
  0x3c   : > { %4065 = vmatmul.mubr.bf16.gmra.mxu0 %v4807_v36  ;;  %v487_v54 = vsel %vm423_vm7, %v391_v38, %v455_v52  ;;  %573 = vst [vmem:[#allocation2 + $0x91] sm:$0xff] %v486_v55  ;;  %v3803_v57 = vunpack.c.l.bf16 %v3822_v49  ;;  %v3804_v58 = vunpack.c.h.bf16 %v3822_v49  ;;  %v407_v60 = vadd.f32 %v4664_v12, %v369_v42  ;;  %v599_v38 = vld [vmem:[#allocation2 + $0x30] sm:$0xff]  ;;  %v600_v39 = vld [vmem:[#allocation2 + $0x38] sm:$0xff]  ;;  %v601_v53 = vld [vmem:[#allocation2 + $0x48] sm:$0xff] }
  0x3d   : > { %4081 = vmatmul.mubr.bf16.gmra.mxu1 %v4815_v50  ;;  %4145 = vmatpush3.bf16.msra.mxu0 %v4514_v23  ;;  %574 = vst [vmem:[#allocation2 + $0x99] sm:$0xff] %v487_v54  ;;  %v4825_v59 = vpack.c.bf16 %v487_v54, %v486_v55  ;;  %v354_v61 = vmul.f32 %v3771_v43, %v4659_v11  ;;  %vm438_vm8 = vcmp.ge.f32.partialorder %v406_v56, 0.0  ;;  %v470_v63 = vmul.f32 0.2, %v406_v56  ;;  %v1143_v23 = vld [vmem:[#allocation2 + $0xa] sm:$0xff]  ;;  %v1149_v43 = vld [vmem:[#allocation2 + $0x52] sm:$0xff] }
  0x3e   : > { %4097 = vmatpush3.bf16.msra.mxu1 %v4513_v22  ;;  %4146 = vmatprep.subr.bf16.mxu0 %v4516_v45  ;;  %v355_v0 = vmul.f32 %v3772_v46, %v4659_v11  ;;  %v370_v1 = vmul.f32 %v3803_v57, %v4659_v11  ;;  %vm439_vm9 = vcmp.ge.f32.partialorder %v407_v60, 0.0  ;;  %v471_v3 = vmul.f32 0.2, %v407_v60  ;;  %v4523_v52 = vld [vmem:[%s5715_s3 + $0xf0] sm:$0xff]   ;;  %v1150_v46 = vld [vmem:[#allocation2 + $0x62] sm:$0xff] }
  0x3f   : > { %4098 = vmatprep.subr.bf16.mxu1 %v4515_v51  ;;  %4068 = vmatprep.mubr.bf16.mxu0 %v4825_v59  ;;  %v392_v4 = vadd.f32 %v4664_v12, %v354_v61  ;;  %v371_v5 = vmul.f32 %v3804_v58, %v4659_v11  ;;  %v502_v6 = vsel %vm438_vm8, %v406_v56, %v470_v63  ;;  %v4581_v37 = vmov 0.0|0.0   ;;  %v602_v55 = vld [vmem:[#allocation2 + $0x50] sm:$0xff]  ;;  %v4526_v56 = vld [vmem:[%s5715_s3 + $0x128] sm:$0xff]   ;;  %v603_v57 = vld [vmem:[#allocation2 + $0x60] sm:$0xff] }
  0x40   : > { %v393_v7 = vadd.f32 %v4664_v12, %v355_v0  ;;  %v408_v8 = vadd.f32 %v4664_v12, %v370_v1  ;;  %v503_v14 = vsel %vm439_vm9, %v407_v60, %v471_v3  ;;  %589 = vst [vmem:[#allocation2 + $0x151] sm:$0xff] %v502_v6  ;;  %v1174_v29 = vpack.c.bf16 %v1143_v23, %v1142_v17  ;;  %v4524_v42 = vld [vmem:[%s5715_s3 + $0x130] sm:$0xff]   ;;  %v604_v58 = vld [vmem:[#allocation2 + $0x68] sm:$0xff]  ;;  %v4527_v1 = vld [vmem:[%s5715_s3 + $0xe0] sm:$0xff]  }
  0x41   : > { %4147 = vmatpush3.bf16.msra.mxu0 %v4516_v45  ;;  %vm424_vm10 = vcmp.ge.f32.partialorder %v392_v4, 0.0  ;;  %v456_v15 = vmul.f32 0.2, %v392_v4  ;;  %v409_v11 = vadd.f32 %v4664_v12, %v371_v5  ;;  %590 = vst [vmem:[#allocation2 + $0x159] sm:$0xff] %v503_v14  ;;  %v4849_v18 = vpack.c.bf16 %v503_v14, %v502_v6  ;;  %v1147_v45 = vld [vmem:[#allocation2 + $0x3a] sm:$0xff]  ;;  %v1151_v54 = vld [vmem:[#allocation2 + $0x6a] sm:$0xff] }
  0x42   : > { %4099 = vmatpush3.bf16.msra.mxu1 %v4515_v51  ;;  %4148 = vmatprep.subr.bf16.mxu0 %v4518_v62  ;;  %vm425_vm11 = vcmp.ge.f32.partialorder %v393_v7, 0.0  ;;  %v457_v19 = vmul.f32 0.2, %v393_v7  ;;  %vm440_vm12 = vcmp.ge.f32.partialorder %v408_v8, 0.0  ;;  %v472_v21 = vmul.f32 0.2, %v408_v8 }
  0x43   : > { %4100 = vmatprep.subr.bf16.mxu1 %v4517_v2  ;;  %v488_v20 = vsel %vm424_vm10, %v392_v4, %v456_v15  ;;  %vm441_vm13 = vcmp.ge.f32.partialorder %v409_v11, 0.0  ;;  %v473_v22 = vmul.f32 0.2, %v409_v11  ;;  %4084 = vmatprep.mubr.bf16.mxu1 %v4849_v18  ;;  %v4864_v40 = vpack.c.bf16 %v1145_v35, %v1144_v34  ;;  %v1148_v51 = vld [vmem:[#allocation2 + $0x4a] sm:$0xff]  ;;  %v1152_v3 = vld [vmem:[#allocation2 + $0x7a] sm:$0xff]  ;;  %v1153_v6 = vld [vmem:[#allocation2 + $0x82] sm:$0xff] }
  0x44   : > { %v489_v25 = vsel %vm425_vm11, %v393_v7, %v457_v19  ;;  %575 = vst [vmem:[#allocation2 + $0xa9] sm:$0xff] %v488_v20  ;;  %v504_v26 = vsel %vm440_vm12, %v408_v8, %v472_v21  ;;  %v4866_v47 = vpack.c.bf16 %v598_v33, %v597_v31  ;;  %v4868_v48 = vpack.c.bf16 %v600_v39, %v599_v38  ;;  %v4525_v60 = vld [vmem:[%s5715_s3 + $0xe8] sm:$0xff]   ;;  %v605_v4 = vld [vmem:[#allocation2 + $0x78] sm:$0xff]  ;;  %v606_v5 = vld [vmem:[#allocation2 + $0x80] sm:$0xff] }
  0x45   : > { %4149 = vmatpush3.bf16.msra.mxu0 %v4518_v62  ;;  %576 = vst [vmem:[#allocation2 + $0xb1] sm:$0xff] %v489_v25  ;;  %v4852_v12 = vpack.c.bf16 %v489_v25, %v488_v20  ;;  %v505_v27 = vsel %vm441_vm13, %v409_v11, %v473_v22  ;;  %591 = vst [vmem:[#allocation2 + $0x169] sm:$0xff] %v504_v26  ;;  %v4870_v49 = vpack.c.bf16 %v1147_v45, %v1146_v41  ;;  %v607_v7 = vld [vmem:[#allocation2 + $0x90] sm:$0xff]  ;;  %v608_v8 = vld [vmem:[#allocation2 + $0x98] sm:$0xff] }
  0x46   : > { %4101 = vmatpush3.bf16.msra.mxu1 %v4517_v2  ;;  %4150 = vmatprep.subr.bf16.mxu0 %v4520_v13  ;;  %592 = vst [vmem:[#allocation2 + $0x171] sm:$0xff] %v505_v27  ;;  %v4854_v28 = vpack.c.bf16 %v505_v27, %v504_v26  ;;  %v4888_v61 = vpack.c.bf16 %v1149_v43, %v1148_v51  ;;  %v4528_v2 = vld [vmem:[%s5715_s3 + $0x120] sm:$0xff]   ;;  %v4529_v14 = vld [vmem:[%s5715_s3 + $0xd8] sm:$0xff]   ;;  %v4531_v21 = vld [vmem:[%s5715_s3 + $0xd0] sm:$0xff]  }
  0x47   : > { %4102 = vmatprep.subr.bf16.mxu1 %v4519_v9  ;;  %4069 = vmatmul.mubr.bf16.gmra.mxu0 %v4852_v12  ;;  %v4890_v62 = vpack.c.bf16 %v602_v55, %v601_v53  ;;  %v4892_v63 = vpack.c.bf16 %v1151_v54, %v1150_v46  ;;  %v4894_v0 = vpack.c.bf16 %v604_v58, %v603_v57  ;;  %v4530_v11 = vld [vmem:[%s5715_s3 + $0x118] sm:$0xff]   ;;  %v1158_v25 = vld [vmem:[#allocation2 + $0xc2] sm:$0xff]  ;;  %v1159_v26 = vld [vmem:[#allocation2 + $0xca] sm:$0xff] }
  0x48   : > { %4085 = vmatmul.mubr.bf16.gmra.mxu1 %v4854_v28  ;;  %4152 = vmatprep.mubr.bf16.mxu0 %v1174_v29  ;;  %v4909_v15 = vpack.c.bf16 %v1153_v6, %v1152_v3  ;;  %v4914_v17 = vpack.c.bf16 %v606_v5, %v605_v4  ;;  %v4918_v20 = vpack.c.bf16 %v608_v8, %v607_v7  ;;  %v4532_v27 = vld [vmem:[%s5715_s3 + $0x110] sm:$0xff]   ;;  %v611_v31 = vld [vmem:[#allocation2 + $0xc0] sm:$0xff]  ;;  %v4533_v33 = vld [vmem:[%s5715_s3 + $0xc8] sm:$0xff]  }
  0x49   : > { %4151 = vmatpush3.bf16.msra.mxu0 %v4520_v13  ;;  %4104 = vmatprep.mubr.bf16.mxu1 %v4581_v37  ;;  %v1155_v13 = vld [vmem:[#allocation2 + $0x9a] sm:$0xff]  ;;  %v4534_v35 = vld [vmem:[%s5715_s3 + $0x108] sm:$0xff]   ;;  %v4940_v38 = vpack.c.bf16 %v1159_v26, %v1158_v25  ;;  %v615_v43 = vld [vmem:[#allocation2 + $0xf0] sm:$0xff] }
  0x4a   : > { %4103 = vmatpush3.bf16.msra.mxu1 %v4519_v9  ;;  %4232 = vmatprep.subr.bf16.mxu0 %v4522_v32  ;;  %v1154_v9 = vld [vmem:[#allocation2 + $0x92] sm:$0xff]  ;;  %v4535_v41 = vld [vmem:[%s5715_s3 + $0xc0] sm:$0xff]  }
  0x4b   : > { %4184 = vmatprep.subr.bf16.mxu1 %v4521_v30  ;;  %v4916_v19 = vpack.c.bf16 %v1155_v13, %v1154_v9  ;;  %v609_v22 = vld [vmem:[#allocation2 + $0xa8] sm:$0xff]  ;;  %v1160_v45 = vld [vmem:[#allocation2 + $0xda] sm:$0xff]  ;;  %v1162_v54 = vld [vmem:[#allocation2 + $0xf2] sm:$0xff] }
  0x4c   : > { %v1156_v23 = vld [vmem:[#allocation2 + $0xaa] sm:$0xff]  ;;  %v1157_v29 = vld [vmem:[#allocation2 + $0xb2] sm:$0xff]  ;;  %v1161_v51 = vld [vmem:[#allocation2 + $0xe2] sm:$0xff] }
  0x4d   : > { %v4933_v34 = vpack.c.bf16 %v1157_v29, %v1156_v23  ;;  %v613_v53 = vld [vmem:[#allocation2 + $0xd8] sm:$0xff]  ;;  %v614_v55 = vld [vmem:[#allocation2 + $0xe0] sm:$0xff]  ;;  %v4963_v4 = vpack.c.bf16 %v1161_v51, %v1160_v45  ;;  %v617_v23 = vld [vmem:[#allocation2 + $0x108] sm:$0xff] }
  0x4e   : > { %v616_v46 = vld [vmem:[#allocation2 + $0xf8] sm:$0xff]  ;;  %v4970_v6 = vpack.c.bf16 %v614_v55, %v613_v53  ;;  %v4570_v8 = vld [vmem:[%s5714_s2] ss:$0 sm:$0xff]  ;;  %v618_v25 = vld [vmem:[#allocation2 + $0x110] sm:$0xff] }
  0x4f   : > { %4153 = vmatmul.mubr.bf16.vlgmr.msra.gmra.mxu0 %v4864_v40  ;;  %v1163_v58 = vld [vmem:[#allocation2 + $0xfa] sm:$0xff]  ;;  %v1165_v26 = vld [vmem:[#allocation2 + $0x112] sm:$0xff]  ;;  %v1166_v29 = vld [vmem:[#allocation2 + $0x122] sm:$0xff]  ;;  %v4989_v45 = vpack.c.bf16 %v618_v25, %v617_v23 }
  0x50   : > { %4105 = vmatmul.mubr.bf16.vlgmr.msra.gmra.mxu1 %v4866_v47  ;;  %4233 = vmatpush3.bf16.msra.mxu0 %v4522_v32  ;;  %v612_v32 = vld [vmem:[#allocation2 + $0xc8] sm:$0xff]  ;;  %v4968_v5 = vld [vmem:[%s5715_s3 + $0x1b8] sm:$0xff]   ;;  %v4972_v7 = vpack.c.bf16 %v1163_v58, %v1162_v54  ;;  %v622_v55 = vld [vmem:[#allocation2 + $0x140] sm:$0xff] }
  0x51   : > { %4185 = vmatpush3.bf16.msra.mxu1 %v4521_v30  ;;  %4108 = vmatprep.mubr.bf16.mxu1 %v4868_v48  ;;  %v610_v30 = vld [vmem:[#allocation2 + $0xb0] sm:$0xff]  ;;  %v4942_v39 = vpack.c.bf16 %v612_v32, %v611_v31  ;;  %v621_v53 = vld [vmem:[#allocation2 + $0x138] sm:$0xff] }
  0x52   : > { %4156 = vmatprep.mubr.bf16.mxu0 %v4870_v49  ;;  %4186 = vmatprep.subr.bf16.mxu1 %v4523_v52  ;;  %v4938_v37 = vpack.c.bf16 %v610_v30, %v609_v22  ;;  %v1167_v32 = vld [vmem:[#allocation2 + $0x12a] sm:$0xff]  ;;  %v1171_v54 = vld [vmem:[#allocation2 + $0x15a] sm:$0xff] }
  0x53   : > { %4234 = vmatprep.subr.bf16.mxu0 %v4524_v42  ;;  %v4991_v51 = vpack.c.bf16 %v1167_v32, %v1166_v29  ;;  %v4540_v29 = vld [vmem:[%s5715_s3 + $0x1b0] sm:$0xff]  }
  0x54   : > { %4235 = vmatpush3.bf16.msra.mxu0 %v4524_v42  ;;  %v3823_v42 = vld [vmem:[%s4648_s8 + $0x78] sm:$0xff]   ;;  %v1769_v32 = vld [vmem:[#allocation2 + $0xc9] sm:$0xff]  ;;  %s3744_s8 = sshll.u32 %s5802_s22, 8 }
  0x55   : > { %4187 = vmatpush3.bf16.msra.mxu1 %v4523_v52  ;;  %4236 = vmatprep.subr.bf16.mxu0 %v4526_v56  ;;  %v4536_v52 = vld [vmem:[%s5715_s3 + $0x100] sm:$0xff]   ;;  %v3808_v57 = vunpack.c.h.bf16 %v3823_v42  ;;  %s5581_s30 = scalar_lea.vmem %s5716_s4, %s3744_s8 }
  0x56   : > { %4188 = vmatprep.subr.bf16.mxu1 %v4525_v60 }
  0x57   : > { %4157 = vmatmul.mubr.bf16.gmra.mxu0 %v4888_v61 }
  0x58   : > { %4109 = vmatmul.mubr.bf16.gmra.mxu1 %v4890_v62  ;;  %4160 = vmatprep.mubr.bf16.mxu0 %v4892_v63 }
  0x59   : > { %4112 = vmatprep.mubr.bf16.mxu1 %v4894_v0  ;;  %4189 = vmatpush3.bf16.msra.mxu1 %v4525_v60  ;;  %v4958_v60 = vld [vmem:[%s5715_s3 + $0x178] sm:$0xff]  }
  0x5a   : > { %4237 = vmatpush3.bf16.msra.mxu0 %v4526_v56  ;;  %4190 = vmatprep.subr.bf16.mxu1 %v4527_v1  ;;  %v3807_v56 = vunpack.c.l.bf16 %v3823_v42  ;;  %v1168_v42 = vld [vmem:[#allocation2 + $0x13a] sm:$0xff] }
  0x5b   : > { %4238 = vmatprep.subr.bf16.mxu0 %v4528_v2 }
  0x5d   : > { %4191 = vmatpush3.bf16.msra.mxu1 %v4527_v1  ;;  %v4569_v1 = vld [vmem:[%s5713_s1] ss:$0 sm:$0xff] }
  0x5e   : > { %4239 = vmatpush3.bf16.msra.mxu0 %v4528_v2  ;;  %4192 = vmatprep.subr.bf16.mxu1 %v4529_v14  ;;  %v372_v2 = vmul.f32 %v4569_v1, %v3807_v56  ;;  %v373_v3 = vmul.f32 %v4569_v1, %v3808_v57  ;;  %v623_v56 = vld [vmem:[#allocation2 + $0x150] sm:$0xff]  ;;  %v624_v57 = vld [vmem:[#allocation2 + $0x158] sm:$0xff]  ;;  %v5001_v1 = vpack.c.bf16 %v622_v55, %v621_v53  ;;  %v1771_v53 = vld [vmem:[#allocation2 + $0xe1] sm:$0xff] }
  0x5f   : > { %4161 = vmatmul.mubr.bf16.gmra.mxu0 %v4909_v15  ;;  %4240 = vmatprep.subr.bf16.mxu0 %v4530_v11 }
  0x60   : > { %4113 = vmatmul.mubr.bf16.gmra.mxu1 %v4914_v17  ;;  %4164 = vmatprep.mubr.bf16.mxu0 %v4916_v19  ;;  %v410_v9 = vadd.f32 %v4570_v8, %v372_v2  ;;  %v411_v13 = vadd.f32 %v4570_v8, %v373_v3  ;;  %v5005_v3 = vpack.c.bf16 %v624_v57, %v623_v56  ;;  %v625_v8 = vld [vmem:[#allocation2 + $0x168] sm:$0xff]  ;;  %v1773_v56 = vld [vmem:[#allocation2 + $0xf9] sm:$0xff] }
  0x61   : > { %4116 = vmatprep.mubr.bf16.mxu1 %v4918_v20  ;;  %4193 = vmatpush3.bf16.msra.mxu1 %v4529_v14  ;;  %v4977_v14 = vpack.c.bf16 %v616_v46, %v615_v43  ;;  %v1169_v43 = vld [vmem:[#allocation2 + $0x142] sm:$0xff]  ;;  %v1170_v46 = vld [vmem:[#allocation2 + $0x152] sm:$0xff] }
  0x62   : > { %4241 = vmatpush3.bf16.msra.mxu0 %v4530_v11  ;;  %4194 = vmatprep.subr.bf16.mxu1 %v4531_v21  ;;  %v1164_v11 = vld [vmem:[#allocation2 + $0x10a] sm:$0xff]  ;;  %vm442_vm14 = vcmp.ge.f32.partialorder %v410_v9, 0.0  ;;  %vm443_vm15 = vcmp.ge.f32.partialorder %v411_v13, 0.0  ;;  %v475_v22 = vmul.f32 0.2, %v411_v13  ;;  %v4999_v58 = vpack.c.bf16 %v1169_v43, %v1168_v42  ;;  %v4551_v43 = vld [vmem:[%s5715_s3 + $0x140] sm:$0xff]  }
  0x63   : > { %4242 = vmatprep.subr.bf16.mxu0 %v4532_v27  ;;  %v5003_v2 = vpack.c.bf16 %v1171_v54, %v1170_v46  ;;  %v4552_v46 = vld [vmem:[%s5715_s3 + $0x180] sm:$0xff]   ;;  %v1772_v54 = vld [vmem:[#allocation2 + $0xf1] sm:$0xff]  ;;  %v1774_v57 = vld [vmem:[#allocation2 + $0x109] sm:$0xff] }
  0x64   : > { %v507_v31 = vsel %vm443_vm15, %v411_v13, %v475_v22  ;;  %v1173_v13 = vld [vmem:[#allocation2 + $0x172] sm:$0xff]  ;;  %v1755_v22 = vld [vmem:[#allocation2 + $0x21] sm:$0xff] }
  0x65   : > { %4195 = vmatpush3.bf16.msra.mxu1 %v4531_v21  ;;  %v474_v21 = vmul.f32 0.2, %v410_v9  ;;  %594 = vst [vmem:[#allocation2 + $0x189] sm:$0xff] %v507_v31 }
  0x66   : > { %4243 = vmatpush3.bf16.msra.mxu0 %v4532_v27  ;;  %4196 = vmatprep.subr.bf16.mxu1 %v4533_v33  ;;  %v619_v27 = vld [vmem:[#allocation2 + $0x120] sm:$0xff] }
  0x67   : > { %4165 = vmatmul.mubr.bf16.gmra.mxu0 %v4933_v34  ;;  %4244 = vmatprep.subr.bf16.mxu0 %v4534_v35  ;;  %v506_v30 = vsel %vm442_vm14, %v410_v9, %v474_v21  ;;  %v1172_v9 = vld [vmem:[#allocation2 + $0x16a] sm:$0xff]  ;;  %v1754_v21 = vld [vmem:[#allocation2 + $0x19] sm:$0xff] }
  0x68   : > { %4117 = vmatmul.mubr.bf16.gmra.mxu1 %v4938_v37  ;;  %4168 = vmatprep.mubr.bf16.mxu0 %v4940_v38  ;;  %593 = vst [vmem:[#allocation2 + $0x181] sm:$0xff] %v506_v30  ;;  %v5011_v23 = vpack.c.bf16 %v1173_v13, %v1172_v9  ;;  %v4553_v9 = vld [vmem:[%s5715_s3 + $0x1f8] sm:$0xff]   ;;  %v5085_v13 = vpack.c.bf16 %v1773_v56, %v1772_v54 }
  0x69   : > { %4120 = vmatprep.mubr.bf16.mxu1 %v4942_v39  ;;  %4197 = vmatpush3.bf16.msra.mxu1 %v4533_v33  ;;  %v4985_v33 = vpack.c.bf16 %v507_v31, %v506_v30  ;;  %v4548_v30 = vld [vmem:[%s5715_s3 + $0x190] sm:$0xff]   ;;  %v1768_v31 = vld [vmem:[#allocation2 + $0xc1] sm:$0xff] }
  0x6a   : > { %4245 = vmatpush3.bf16.msra.mxu0 %v4534_v35  ;;  %4198 = vmatprep.subr.bf16.mxu1 %v4535_v41  ;;  %v620_v35 = vld [vmem:[#allocation2 + $0x128] sm:$0xff]  ;;  %v5065_v55 = vpack.c.bf16 %v1769_v32, %v1768_v31  ;;  %v2980_v31 = vld [vmem:[#allocation2 + $0x3a] sm:$0xff]  ;;  %v2673_v32 = vld [vmem:[#allocation2 + $0x31] sm:$0xff] }
  0x6b   : > { %4246 = vmatprep.subr.bf16.mxu0 %v4536_v52 }
  0x6d   : > { %4199 = vmatpush3.bf16.msra.mxu1 %v4535_v41  ;;  %v4987_v41 = vpack.c.bf16 %v1165_v26, %v1164_v11  ;;  %v626_v11 = vld [vmem:[#allocation2 + $0x170] sm:$0xff]  ;;  %v1786_v26 = vpack.c.bf16 %v1755_v22, %v1754_v21 }
  0x6e   : > { %4247 = vmatpush3.bf16.msra.mxu0 %v4536_v52  ;;  %4280 = vmatprep.subr.bf16.mxu1 %v4958_v60  ;;  %v4993_v52 = vpack.c.bf16 %v620_v35, %v619_v27  ;;  %v5013_v25 = vpack.c.bf16 %v626_v11, %v625_v8  ;;  %v4539_v27 = vld [vmem:[%s5715_s3 + $0x170] sm:$0xff]   ;;  %v1770_v35 = vld [vmem:[#allocation2 + $0xd9] sm:$0xff] }
  0x6f   : > { %4169 = vmatmul.mubr.bf16.gmra.mxu0 %v4963_v4  ;;  %4328 = vmatprep.subr.bf16.mxu0 %v4968_v5  ;;  %v5070_v42 = vpack.c.bf16 %v1771_v53, %v1770_v35  ;;  %v1775_v8 = vld [vmem:[#allocation2 + $0x111] sm:$0xff]  ;;  %v1478_v22 = vld [vmem:[#allocation2 + $0x180] sm:$0xff] }
  0x70   : > { %4121 = vmatmul.mubr.bf16.gmra.mxu1 %v4970_v6  ;;  %4172 = vmatprep.mubr.bf16.mxu0 %v4972_v7  ;;  %v4554_v11 = vld [vmem:[%s5715_s3 + $0x238] sm:$0xff]   ;;  %v5090_v21 = vpack.c.bf16 %v1775_v8, %v1774_v57  ;;  %v2981_v57 = vld [vmem:[#allocation2 + $0x4a] sm:$0xff] }
  0x71   : > { %4124 = vmatprep.mubr.bf16.mxu1 %v4977_v14  ;;  %v2674_v35 = vld [vmem:[#allocation2 + $0x39] sm:$0xff] }
  0x72   : > { %v2982_v8 = vld [vmem:[#allocation2 + $0x52] sm:$0xff] }
  0x77   : > { %4173 = vmatmul.mubr.bf16.gmra.mxu0 %v4987_v41 }
  0x78   : > { %4125 = vmatmul.mubr.bf16.gmra.mxu1 %v4989_v45  ;;  %4176 = vmatprep.mubr.bf16.mxu0 %v4991_v51 }
  0x79   : > { %4128 = vmatprep.mubr.bf16.mxu1 %v4993_v52 }
  0x7f   : > { %4177 = vmatmul.mubr.bf16.gmra.mxu0 %v4999_v58 }
  0x80   : > { %4129 = vmatmul.mubr.bf16.gmra.mxu1 %v5001_v1  ;;  %4180 = vmatprep.mubr.bf16.mxu0 %v5003_v2 }
  0x81   : > { %4132 = vmatprep.mubr.bf16.mxu1 %v5005_v3 }
  0x87   : > { %4181 = vmatmul.mubr.bf16.gmra.mxu0 %v5011_v23 }
  0x88   : > { %4133 = vmatmul.mubr.bf16.gmra.mxu1 %v5013_v25  ;;  %4248 = vmatprep.mubr.bf16.mxu0 %v1786_v26  ;;  %v1479_v26 = vld [vmem:[#allocation2 + $0x188] sm:$0xff] }
  0x89   : > { %4200 = vmatprep.mubr.bf16.mxu1 %v4866_v47  ;;  %v4542_v47 = vld [vmem:[%s5715_s3 + $0x1a8] sm:$0xff]  }
  0x8f   : > { %4249 = vmatmul.mubr.bf16.vlgmr.msra.gmra.mxu0 %v4733_v24  ;;  %v4541_v24 = vld [vmem:[%s5715_s3 + $0x168] sm:$0xff]  }
  0x90   : > { %4201 = vmatmul.mubr.bf16.vlgmr.msra.gmra.mxu1 %v4868_v48  ;;  %4329 = vmatpush3.bf16.msra.mxu0 %v4968_v5  ;;  %v4545_v5 = vld [vmem:[%s5715_s3 + $0x158] sm:$0xff]  }
  0x91   : > { %4281 = vmatpush3.bf16.msra.mxu1 %v4958_v60  ;;  %4204 = vmatprep.mubr.bf16.mxu1 %v4890_v62  ;;  %v4543_v60 = vld [vmem:[%s5715_s3 + $0x160] sm:$0xff]  }
  0x92   : > { %4252 = vmatprep.mubr.bf16.mxu0 %v4750_v44  ;;  %4282 = vmatprep.subr.bf16.mxu1 %v4539_v27  ;;  %v4544_v44 = vld [vmem:[%s5715_s3 + $0x1a0] sm:$0xff]  }
  0x93   : > { %4330 = vmatprep.subr.bf16.mxu0 %v4540_v29 }
  0x94   : > { %4331 = vmatpush3.bf16.msra.mxu0 %v4540_v29 }
  0x95   : > { %4283 = vmatpush3.bf16.msra.mxu1 %v4539_v27  ;;  %4332 = vmatprep.subr.bf16.mxu0 %v4542_v47  ;;  %v5104_v27 = vpack.c.bf16 %v1479_v26, %v1478_v22  ;;  %v2983_v22 = vld [vmem:[#allocation2 + $0x62] sm:$0xff]  ;;  %v2984_v26 = vld [vmem:[#allocation2 + $0x6a] sm:$0xff] }
  0x96   : > { %4284 = vmatprep.subr.bf16.mxu1 %v4541_v24 }
  0x97   : > { %4253 = vmatmul.mubr.bf16.gmra.mxu0 %v4784_v10  ;;  %v4546_v10 = vld [vmem:[%s5715_s3 + $0x198] sm:$0xff]  }
  0x98   : > { %4205 = vmatmul.mubr.bf16.gmra.mxu1 %v4894_v0  ;;  %4256 = vmatprep.mubr.bf16.mxu0 %v4807_v36  ;;  %v4547_v36 = vld [vmem:[%s5715_s3 + $0x150] sm:$0xff]  }
  0x99   : > { %4208 = vmatprep.mubr.bf16.mxu1 %v4914_v17  ;;  %4285 = vmatpush3.bf16.msra.mxu1 %v4541_v24 }
  0x9a   : > { %4333 = vmatpush3.bf16.msra.mxu0 %v4542_v47  ;;  %4286 = vmatprep.subr.bf16.mxu1 %v4543_v60 }
  0x9b   : > { %4334 = vmatprep.subr.bf16.mxu0 %v4544_v44 }
  0x9d   : > { %4287 = vmatpush3.bf16.msra.mxu1 %v4543_v60 }
  0x9e   : > { %4335 = vmatpush3.bf16.msra.mxu0 %v4544_v44  ;;  %4288 = vmatprep.subr.bf16.mxu1 %v4545_v5 }
  0x9f   : > { %4257 = vmatmul.mubr.bf16.gmra.mxu0 %v4825_v59  ;;  %4336 = vmatprep.subr.bf16.mxu0 %v4546_v10  ;;  %v4549_v59 = vld [vmem:[%s5715_s3 + $0x148] sm:$0xff]  }
  0xa0   : > { %4209 = vmatmul.mubr.bf16.gmra.mxu1 %v4918_v20  ;;  %4260 = vmatprep.mubr.bf16.mxu0 %v4852_v12  ;;  %v4550_v12 = vld [vmem:[%s5715_s3 + $0x188] sm:$0xff]  }
  0xa1   : > { %4212 = vmatprep.mubr.bf16.mxu1 %v4938_v37  ;;  %4289 = vmatpush3.bf16.msra.mxu1 %v4545_v5 }
  0xa2   : > { %4337 = vmatpush3.bf16.msra.mxu0 %v4546_v10  ;;  %4290 = vmatprep.subr.bf16.mxu1 %v4547_v36 }
  0xa3   : > { %4338 = vmatprep.subr.bf16.mxu0 %v4548_v30 }
  0xa5   : > { %4291 = vmatpush3.bf16.msra.mxu1 %v4547_v36 }
  0xa6   : > { %4339 = vmatpush3.bf16.msra.mxu0 %v4548_v30  ;;  %4292 = vmatprep.subr.bf16.mxu1 %v4549_v59  ;;  %v2979_v30 = vld [vmem:[#allocation2 + $0x32] sm:$0xff] }
  0xa7   : > { %4261 = vmatmul.mubr.bf16.gmra.mxu0 %v5065_v55  ;;  %4340 = vmatprep.subr.bf16.mxu0 %v4550_v12 }
  0xa8   : > { %4213 = vmatmul.mubr.bf16.gmra.mxu1 %v4942_v39  ;;  %4264 = vmatprep.mubr.bf16.mxu0 %v5070_v42 }
  0xa9   : > { %4216 = vmatprep.mubr.bf16.mxu1 %v4970_v6  ;;  %4293 = vmatpush3.bf16.msra.mxu1 %v4549_v59  ;;  %v4571_v59 = vld [vmem:[#allocation2] sm:$0xff] }
  0xaa   : > { %4341 = vmatpush3.bf16.msra.mxu0 %v4550_v12  ;;  %4294 = vmatprep.subr.bf16.mxu1 %v4551_v43 }
  0xab   : > { %4342 = vmatprep.subr.bf16.mxu0 %v4552_v46 }
  0xad   : > { %4295 = vmatpush3.bf16.msra.mxu1 %v4551_v43 }
  0xae   : > { %4343 = vmatpush3.bf16.msra.mxu0 %v4552_v46  ;;  %4376 = vmatprep.subr.bf16.mxu1 %v4553_v9  ;;  %v2705_v46 = vpack.c.bf16 %v2674_v35, %v2673_v32  ;;  %v2987_v32 = vld [vmem:[#allocation2 + $0x92] sm:$0xff]  ;;  %v2988_v35 = vld [vmem:[#allocation2 + $0x9a] sm:$0xff] }
  0xaf   : > { %4265 = vmatmul.mubr.bf16.gmra.mxu0 %v5085_v13  ;;  %4424 = vmatprep.subr.bf16.mxu0 %v4554_v11 }
  0xb0   : > { %4217 = vmatmul.mubr.bf16.gmra.mxu1 %v4977_v14  ;;  %4268 = vmatprep.mubr.bf16.mxu0 %v5090_v21 }
  0xb1   : > { %4220 = vmatprep.mubr.bf16.mxu1 %v4989_v45 }
  0xb7   : > { %4269 = vmatmul.mubr.bf16.gmra.mxu0 %v4789_v16  ;;  %v4555_v16 = vld [vmem:[%s5715_s3 + $0x1f0] sm:$0xff]  }
  0xb8   : > { %4221 = vmatmul.mubr.bf16.gmra.mxu1 %v4993_v52  ;;  %4272 = vmatprep.mubr.bf16.mxu0 %v4815_v50  ;;  %v4556_v50 = vld [vmem:[%s5715_s3 + $0x230] sm:$0xff]  }
  0xb9   : > { %4224 = vmatprep.mubr.bf16.mxu1 %v5001_v1 }
  0xbf   : > { %4273 = vmatmul.mubr.bf16.gmra.mxu0 %v4849_v18  ;;  %v4558_v18 = vld [vmem:[%s5715_s3 + $0x228] sm:$0xff]  }
  0xc0   : > { %4225 = vmatmul.mubr.bf16.gmra.mxu1 %v5005_v3  ;;  %4276 = vmatprep.mubr.bf16.mxu0 %v4854_v28  ;;  %v4557_v28 = vld [vmem:[%s5715_s3 + $0x1e8] sm:$0xff]  }
  0xc1   : > { %4228 = vmatprep.mubr.bf16.mxu1 %v5013_v25 }
  0xc7   : > { %4277 = vmatmul.mubr.bf16.gmra.mxu0 %v4985_v33 }
  0xc8   : > { %4229 = vmatmul.mubr.bf16.gmra.mxu1 %v5104_v27  ;;  %4344 = vmatprep.mubr.bf16.mxu0 %v4868_v48  ;;  %v4560_v48 = vld [vmem:[%s5715_s3 + $0x220] sm:$0xff]  }
  0xc9   : > { %4296 = vmatprep.mubr.bf16.mxu1 %v4864_v40  ;;  %v4559_v40 = vld [vmem:[%s5715_s3 + $0x1e0] sm:$0xff]  }
  0xcf   : > { %4345 = vmatmul.mubr.bf16.vlgmr.msra.gmra.mxu0 %v4890_v62  ;;  %v4563_v62 = vld [vmem:[%s5715_s3 + $0x1d0] sm:$0xff]  }
  0xd0   : > { %4297 = vmatmul.mubr.bf16.vlgmr.msra.gmra.mxu1 %v4870_v49  ;;  %4425 = vmatpush3.bf16.msra.mxu0 %v4554_v11  ;;  %v4561_v49 = vld [vmem:[%s5715_s3 + $0x1d8] sm:$0xff]  }
  0xd1   : > { %4377 = vmatpush3.bf16.msra.mxu1 %v4553_v9  ;;  %4300 = vmatprep.mubr.bf16.mxu1 %v4888_v61  ;;  %v4562_v61 = vld [vmem:[%s5715_s3 + $0x218] sm:$0xff]  }
  0xd2   : > { %4348 = vmatprep.mubr.bf16.mxu0 %v4894_v0  ;;  %4378 = vmatprep.subr.bf16.mxu1 %v4555_v16  ;;  %v4565_v0 = vld [vmem:[%s5715_s3 + $0x1c8] sm:$0xff]   ;;  %v2676_v11 = vld [vmem:[#allocation2 + $0x51] sm:$0xff] }
  0xd3   : > { %4426 = vmatprep.subr.bf16.mxu0 %v4556_v50 }
  0xd4   : > { %4427 = vmatpush3.bf16.msra.mxu0 %v4556_v50  ;;  %v2678_v50 = vld [vmem:[#allocation2 + $0x69] sm:$0xff] }
  0xd5   : > { %4379 = vmatpush3.bf16.msra.mxu1 %v4555_v16  ;;  %4428 = vmatprep.subr.bf16.mxu0 %v4558_v18  ;;  %v2677_v16 = vld [vmem:[#allocation2 + $0x61] sm:$0xff] }
  0xd6   : > { %4380 = vmatprep.subr.bf16.mxu1 %v4557_v28 }
  0xd7   : > { %4349 = vmatmul.mubr.bf16.gmra.mxu0 %v4914_v17  ;;  %v4567_v17 = vld [vmem:[%s5715_s3 + $0x1c0] sm:$0xff]  }
  0xd8   : > { %4301 = vmatmul.mubr.bf16.gmra.mxu1 %v4892_v63  ;;  %4352 = vmatprep.mubr.bf16.mxu0 %v4918_v20  ;;  %v4564_v63 = vld [vmem:[%s5715_s3 + $0x210] sm:$0xff]  }
  0xd9   : > { %4304 = vmatprep.mubr.bf16.mxu1 %v4909_v15  ;;  %4381 = vmatpush3.bf16.msra.mxu1 %v4557_v28  ;;  %v4566_v15 = vld [vmem:[%s5715_s3 + $0x208] sm:$0xff]   ;;  %v3012_v28 = vpack.c.bf16 %v2982_v8, %v2981_v57 }
  0xda   : > { %4429 = vmatpush3.bf16.msra.mxu0 %v4558_v18  ;;  %4382 = vmatprep.subr.bf16.mxu1 %v4559_v40 }
  0xdb   : > { %4430 = vmatprep.subr.bf16.mxu0 %v4560_v48 }
  0xdd   : > { %4383 = vmatpush3.bf16.msra.mxu1 %v4559_v40 }
  0xde   : > { %4431 = vmatpush3.bf16.msra.mxu0 %v4560_v48  ;;  %4384 = vmatprep.subr.bf16.mxu1 %v4561_v49 }
  0xdf   : > { %4353 = vmatmul.mubr.bf16.gmra.mxu0 %v4938_v37  ;;  %4432 = vmatprep.subr.bf16.mxu0 %v4562_v61 }
  0xe0   : > { %4305 = vmatmul.mubr.bf16.gmra.mxu1 %v4916_v19  ;;  %4356 = vmatprep.mubr.bf16.mxu0 %v4942_v39  ;;  %v4568_v19 = vld [vmem:[%s5715_s3 + $0x200] sm:$0xff]  }
  0xe1   : > { %4308 = vmatprep.mubr.bf16.mxu1 %v4933_v34  ;;  %4385 = vmatpush3.bf16.msra.mxu1 %v4561_v49  ;;  %v3013_v49 = vpack.c.bf16 %v2984_v26, %v2983_v22  ;;  %v3015_v26 = vpack.c.bf16 %v2988_v35, %v2987_v32  ;;  %v2992_v32 = vld [vmem:[#allocation2 + $0xca] sm:$0xff] }
  0xe2   : > { %4433 = vmatpush3.bf16.msra.mxu0 %v4562_v61  ;;  %4386 = vmatprep.subr.bf16.mxu1 %v4563_v62 }
  0xe3   : > { %4434 = vmatprep.subr.bf16.mxu0 %v4564_v63 }
  0xe5   : > { %4387 = vmatpush3.bf16.msra.mxu1 %v4563_v62  ;;  %v2707_v62 = vpack.c.bf16 %v2678_v50, %v2677_v16 }
  0xe6   : > { %4435 = vmatpush3.bf16.msra.mxu0 %v4564_v63  ;;  %4388 = vmatprep.subr.bf16.mxu1 %v4565_v0 }
  0xe7   : > { %4357 = vmatmul.mubr.bf16.gmra.mxu0 %v4970_v6  ;;  %4436 = vmatprep.subr.bf16.mxu0 %v4566_v15 }
  0xe8   : > { %4309 = vmatmul.mubr.bf16.gmra.mxu1 %v4940_v38  ;;  %4360 = vmatprep.mubr.bf16.mxu0 %v4977_v14 }
  0xe9   : > { %4312 = vmatprep.mubr.bf16.mxu1 %v4963_v4  ;;  %4389 = vmatpush3.bf16.msra.mxu1 %v4565_v0 }
  0xea   : > { %4437 = vmatpush3.bf16.msra.mxu0 %v4566_v15  ;;  %4390 = vmatprep.subr.bf16.mxu1 %v4567_v17 }
  0xeb   : > { %4438 = vmatprep.subr.bf16.mxu0 %v4568_v19 }
  0xec   : > { %v5168_v20 = vpop.f32.mrf.mxu0  ;;  %v5170_v34 = vpop.f32.mrf.mxu1 }
  0xed   : > { %4391 = vmatpush3.bf16.msra.mxu1 %v4567_v17  ;;  %v2679_v17 = vld [vmem:[#allocation2 + $0x79] sm:$0xff] }
  0xee   : > { %v5172_v37 = vpop.f32.mrf.mxu0  ;;  %v5174_v39 = vpop.f32.mrf.mxu1  ;;  %4439 = vmatpush3.bf16.msra.mxu0 %v4568_v19  ;;  %v2985_v19 = vld [vmem:[#allocation2 + $0x7a] sm:$0xff] }
  0xef   : > { %4361 = vmatmul.mubr.bf16.gmra.mxu0 %v4989_v45 }
  0xf0   : > { %v5177_v38 = vpop.f32.mrf.mxu0  ;;  %v5179_v6 = vpop.f32.mrf.mxu1  ;;  %4313 = vmatmul.mubr.bf16.gmra.mxu1 %v4972_v7  ;;  %4364 = vmatprep.mubr.bf16.mxu0 %v4993_v52 }
  0xf1   : > { %4316 = vmatprep.mubr.bf16.mxu1 %v4987_v41 }
  0xf2   : > { %v5183_v4 = vpop.f32.mrf.mxu0  ;;  %v5185_v14 = vpop.f32.mrf.mxu1 }
  0xf4   : > { %v5188_v29 = vpop.f32.mrf.mxu0  ;;  %v5190_v47 = vpop.f32.mrf.mxu1 }
  0xf6   : > { %v5192_v24 = vpop.f32.mrf.mxu0  ;;  %v5194_v45 = vpop.f32.mrf.mxu1 }
  0xf7   : > { %4365 = vmatmul.mubr.bf16.gmra.mxu0 %v5001_v1 }
  0xf8   : > { %v5197_v60 = vpop.f32.mrf.mxu0  ;;  %v5199_v7 = vpop.f32.mrf.mxu1  ;;  %4317 = vmatmul.mubr.bf16.gmra.mxu1 %v4991_v51  ;;  %4368 = vmatprep.mubr.bf16.mxu0 %v5005_v3  ;;  %v2090_v3 = vld [vmem:[#allocation2 + $0x182] sm:$0xff] }
  0xf9   : > { %4320 = vmatprep.mubr.bf16.mxu1 %v4999_v58  ;;  %v2091_v58 = vld [vmem:[#allocation2 + $0x18a] sm:$0xff] }
  0xfa   : > { %v5203_v52 = vpop.f32.mrf.mxu0  ;;  %v5205_v41 = vpop.f32.mrf.mxu1  ;;  %v5228_v43 = vpack.c.bf16 %v2091_v58, %v2090_v3  ;;  %v2986_v3 = vld [vmem:[#allocation2 + $0x82] sm:$0xff] }
  0xfb   : > { %v3014_v8 = vpack.c.bf16 %v2986_v3, %v2985_v19  ;;  %v2989_v19 = vld [vmem:[#allocation2 + $0xaa] sm:$0xff] }
  0xfc   : > { %v5208_v44 = vpop.f32.mrf.mxu0 }
  0xfd   : > { %v5210_v5 = vpop.f32.mrf.mxu1 }
  0xfe   : > { %v5212_v10 = vpop.f32.mrf.mxu0 }
  0xff   : > { %v5214_v1 = vpop.f32.mrf.mxu1  ;;  %4369 = vmatmul.mubr.bf16.gmra.mxu0 %v5013_v25  ;;  %v2414_v25 = vpack.c.bf16 %v4571_v59, %v4571_v59 }
 0x100   : > { %v5217_v36 = vpop.f32.mrf.mxu0  ;;  %4321 = vmatmul.mubr.bf16.gmra.mxu1 %v5003_v2  ;;  %4372 = vmatprep.mubr.bf16.mxu0 %v5104_v27  ;;  %v3011_v2 = vpack.c.bf16 %v2980_v31, %v2979_v30  ;;  %v2680_v31 = vld [vmem:[#allocation2 + $0x81] sm:$0xff] }
 0x101   : > { %v5220_v51 = vpop.f32.mrf.mxu1  ;;  %4324 = vmatprep.mubr.bf16.mxu1 %v5011_v23  ;;  %v2675_v23 = vld [vmem:[#allocation2 + $0x49] sm:$0xff]  ;;  %v2708_v22 = vpack.c.bf16 %v2680_v31, %v2679_v17  ;;  %v2990_v17 = vld [vmem:[#allocation2 + $0xb2] sm:$0xff] }
 0x102   : > { %v5224_v53 = vpop.f32.mrf.mxu0  ;;  %v2706_v48 = vpack.c.bf16 %v2676_v11, %v2675_v23  ;;  %v2991_v31 = vld [vmem:[#allocation2 + $0xc2] sm:$0xff] }
 0x103   : > { %v5226_v12 = vpop.f32.mrf.mxu1 }
 0x107   : > { %v5230_v54 = vpop.f32.mrf.mxu0  ;;  %4373 = vmatmul.mubr.bf16.gmra.mxu0 %v2414_v25  ;;  %v2681_v25 = vld [vmem:[#allocation2 + $0x91] sm:$0xff] }
 0x108   : > { %v5232_v56 = vpop.f32.mrf.mxu1  ;;  %4325 = vmatmul.mubr.bf16.gmra.mxu1 %v5228_v43  ;;  %4440 = vmatprep.mubr.bf16.mxu0 %v3011_v2  ;;  %v2682_v2 = vld [vmem:[#allocation2 + $0x99] sm:$0xff] }
 0x109   : > { %v5235_v9 = vpop.f32.mrf.mxu0  ;;  %4392 = vmatprep.mubr.bf16.mxu1 %v2705_v46 }
 0x10a   : > { %v5237_v27 = vpop.f32.mrf.mxu1 }
 0x10b   : > { %v5239_v18 = vpop.f32.mrf.mxu0 }
 0x10c   : > { %v5241_v40 = vpop.f32.mrf.mxu1 }
 0x10d   : > { %v5243_v61 = vpop.f32.mrf.mxu0 }
 0x10e   : > { %v5245_v63 = vpop.f32.mrf.mxu1 }
 0x10f   : > { %v4154_v0 = vpop.f32.mrf.mxu0  ;;  %4441 = vmatmul.mubr.bf16.vlgmr.msra.gmra.mxu0 %v3012_v28  ;;  %v2709_v28 = vpack.c.bf16 %v2682_v2, %v2681_v25  ;;  %v3016_v2 = vpack.c.bf16 %v2990_v17, %v2989_v19  ;;  %v2996_v19 = vld [vmem:[#allocation2 + $0xfa] sm:$0xff] }
 0x110   : > { %v4106_v15 = vpop.f32.mrf.mxu1  ;;  %4393 = vmatmul.mubr.bf16.vlgmr.msra.gmra.mxu1 %v2706_v48  ;;  %4444 = vmatprep.mubr.bf16.mxu0 %v3013_v49 }
 0x111   : > { %v1024_v58 = vadd.f32 %v4106_v15, %v5168_v20  ;;  %v1289_v30 = vpop.f32.mrf.mxu0  ;;  %4396 = vmatprep.mubr.bf16.mxu1 %v2707_v62 }
 0x112   : > { %v1015_v59 = vpop.f32.mrf.mxu1 }
 0x113   : > { %v5248_v46 = vadd.f32 %v4154_v0, %v1024_v58  ;;  %v1016_v23 = vadd.f32 %v1015_v59, %v5172_v37  ;;  %v4155_v57 = vpop.f32.mrf.mxu0  ;;  %v2683_v37 = vld [vmem:[#allocation2 + $0xa9] sm:$0xff] }
 0x114   : > { %v4107_v11 = vpop.f32.mrf.mxu1 }
 0x115   : > { %v5251_v16 = vadd.f32 %v1289_v30, %v1016_v23  ;;  %v1027_v20 = vadd.f32 %v4107_v11, %v5177_v38  ;;  %v1292_v50 = vpop.f32.mrf.mxu0  ;;  %v2684_v30 = vld [vmem:[#allocation2 + $0xb1] sm:$0xff] }
 0x116   : > { %v1018_v48 = vpop.f32.mrf.mxu1 }
 0x117   : > { %v5254_v49 = vadd.f32 %v4155_v57, %v1027_v20  ;;  %v1019_v62 = vadd.f32 %v1018_v48, %v5183_v4  ;;  %v4158_v0 = vpop.f32.mrf.mxu0  ;;  %4445 = vmatmul.mubr.bf16.gmra.mxu0 %v3014_v8  ;;  %v2710_v57 = vpack.c.bf16 %v2684_v30, %v2683_v37  ;;  %v3017_v8 = vpack.c.bf16 %v2992_v32, %v2991_v31 }
 0x118   : > { %v4110_v15 = vpop.f32.mrf.mxu1  ;;  %4397 = vmatmul.mubr.bf16.gmra.mxu1 %v2708_v22  ;;  %4448 = vmatprep.mubr.bf16.mxu0 %v3015_v26 }
 0x119   : > { %v5257_v3 = vadd.f32 %v1292_v50, %v1019_v62  ;;  %v1040_v58 = vadd.f32 %v4110_v15, %v5188_v29  ;;  %v1305_v38 = vpop.f32.mrf.mxu0  ;;  %4400 = vmatprep.mubr.bf16.mxu1 %v2709_v28  ;;  %v2994_v62 = vld [vmem:[#allocation2 + $0xe2] sm:$0xff] }
 0x11a   : > { %v1031_v35 = vpop.f32.mrf.mxu1 }
 0x11b   : > { %v5260_v59 = vadd.f32 %v4158_v0, %v1040_v58  ;;  %v1032_v4 = vadd.f32 %v1031_v35, %v5192_v24  ;;  %v4159_v25 = vpop.f32.mrf.mxu0  ;;  %v2993_v24 = vld [vmem:[#allocation2 + $0xda] sm:$0xff] }
 0x11c   : > { %v4111_v23 = vpop.f32.mrf.mxu1  ;;  %v3018_v30 = vpack.c.bf16 %v2994_v62, %v2993_v24 }
 0x11d   : > { %v5263_v11 = vadd.f32 %v1305_v38, %v1032_v4  ;;  %v1043_v22 = vadd.f32 %v4111_v23, %v5197_v60  ;;  %v1308_v29 = vpop.f32.mrf.mxu0  ;;  %v2995_v60 = vld [vmem:[#allocation2 + $0xf2] sm:$0xff] }
 0x11e   : > { %v1034_v26 = vpop.f32.mrf.mxu1  ;;  %v3019_v32 = vpack.c.bf16 %v2996_v19, %v2995_v60 }
 0x11f   : > { %v5266_v20 = vadd.f32 %v4159_v25, %v1043_v22  ;;  %v1035_v50 = vadd.f32 %v1034_v26, %v5203_v52  ;;  %v4162_v28 = vpop.f32.mrf.mxu0  ;;  %4449 = vmatmul.mubr.bf16.gmra.mxu0 %v3016_v2 }
 0x120   : > { %v4114_v48 = vpop.f32.mrf.mxu1  ;;  %4401 = vmatmul.mubr.bf16.gmra.mxu1 %v2710_v57  ;;  %4452 = vmatprep.mubr.bf16.mxu0 %v3017_v8  ;;  %v2998_v8 = vld [vmem:[#allocation2 + $0x112] sm:$0xff] }
 0x121   : > { %v5269_v0 = vadd.f32 %v1308_v29, %v1035_v50  ;;  %v1056_v15 = vadd.f32 %v4114_v48, %v5208_v44  ;;  %v1321_v37 = vpop.f32.mrf.mxu0  ;;  %4404 = vmatprep.mubr.bf16.mxu1 %v5065_v55  ;;  %v3000_v50 = vld [vmem:[#allocation2 + $0x12a] sm:$0xff]  ;;  %v2693_v48 = vld [vmem:[#allocation2 + $0x121] sm:$0xff] }
 0x122   : > { %v1047_v17 = vpop.f32.mrf.mxu1 }
 0x123   : > { %v5273_v58 = vadd.f32 %v4162_v28, %v1056_v15  ;;  %v1048_v52 = vadd.f32 %v1047_v17, %v5212_v10  ;;  %v4163_v38 = vpop.f32.mrf.mxu0  ;;  %v2997_v10 = vld [vmem:[#allocation2 + $0x10a] sm:$0xff] }
 0x124   : > { %v4115_v31 = vpop.f32.mrf.mxu1  ;;  %v3020_v15 = vpack.c.bf16 %v2998_v8, %v2997_v10  ;;  %v3004_v10 = vld [vmem:[#allocation2 + $0x15a] sm:$0xff] }
 0x125   : > { %v5276_v35 = vadd.f32 %v1321_v37, %v1048_v52  ;;  %v1059_v4 = vadd.f32 %v4115_v31, %v5217_v36  ;;  %v1324_v25 = vpop.f32.mrf.mxu0  ;;  %v2999_v36 = vld [vmem:[#allocation2 + $0x122] sm:$0xff] }
 0x126   : > { %v1050_v44 = vpop.f32.mrf.mxu1  ;;  %v3021_v60 = vpack.c.bf16 %v3000_v50, %v2999_v36 }
 0x127   : > { %v5279_v2 = vadd.f32 %v4163_v38, %v1059_v4  ;;  %v1051_v55 = vadd.f32 %v1050_v44, %v5224_v53  ;;  %v4166_v23 = vpop.f32.mrf.mxu0  ;;  %4453 = vmatmul.mubr.bf16.gmra.mxu0 %v3018_v30  ;;  %v2694_v53 = vld [vmem:[#allocation2 + $0x129] sm:$0xff]  ;;  %v3001_v4 = vld [vmem:[#allocation2 + $0x13a] sm:$0xff] }
 0x128   : > { %v4118_v57 = vpop.f32.mrf.mxu1  ;;  %4405 = vmatmul.mubr.bf16.gmra.mxu1 %v5070_v42  ;;  %4456 = vmatprep.mubr.bf16.mxu0 %v3019_v32  ;;  %v2715_v52 = vpack.c.bf16 %v2694_v53, %v2693_v48 }
 0x129   : > { %v5283_v22 = vadd.f32 %v1324_v25, %v1051_v55  ;;  %v1072_v29 = vadd.f32 %v4118_v57, %v5230_v54  ;;  %v1337_v26 = vpop.f32.mrf.mxu0  ;;  %4408 = vmatprep.mubr.bf16.mxu1 %v5085_v13  ;;  %v3002_v25 = vld [vmem:[#allocation2 + $0x142] sm:$0xff]  ;;  %v3003_v57 = vld [vmem:[#allocation2 + $0x152] sm:$0xff] }
 0x12a   : > { %v1063_v28 = vpop.f32.mrf.mxu1  ;;  %v3022_v50 = vpack.c.bf16 %v3002_v25, %v3001_v4  ;;  %v3023_v53 = vpack.c.bf16 %v3004_v10, %v3003_v57 }
 0x12b   : > { %v5287_v24 = vadd.f32 %v4166_v23, %v1072_v29  ;;  %v1064_v62 = vadd.f32 %v1063_v28, %v5235_v9  ;;  %v4167_v42 = vpop.f32.mrf.mxu0  ;;  %v2695_v9 = vld [vmem:[#allocation2 + $0x139] sm:$0xff]  ;;  %v2696_v23 = vld [vmem:[#allocation2 + $0x141] sm:$0xff] }
 0x12c   : > { %v4119_v37 = vpop.f32.mrf.mxu1  ;;  %v2698_v29 = vld [vmem:[#allocation2 + $0x159] sm:$0xff]  ;;  %v2716_v48 = vpack.c.bf16 %v2696_v23, %v2695_v9  ;;  %v2700_v9 = vld [vmem:[#allocation2 + $0x171] sm:$0xff] }
 0x12d   : > { %v5290_v19 = vadd.f32 %v1337_v26, %v1064_v62  ;;  %v1075_v54 = vadd.f32 %v4119_v37, %v5239_v18  ;;  %v1340_v17 = vpop.f32.mrf.mxu0 }
 0x12e   : > { %v1066_v13 = vpop.f32.mrf.mxu1 }
 0x12f   : > { %v5293_v38 = vadd.f32 %v4167_v42, %v1075_v54  ;;  %v1067_v30 = vadd.f32 %v1066_v13, %v5243_v61  ;;  %v4170_v31 = vpop.f32.mrf.mxu0  ;;  %4457 = vmatmul.mubr.bf16.gmra.mxu0 %v3020_v15  ;;  %v2697_v61 = vld [vmem:[#allocation2 + $0x151] sm:$0xff] }
 0x130   : > { %v4122_v32 = vpop.f32.mrf.mxu1  ;;  %4409 = vmatmul.mubr.bf16.gmra.mxu1 %v5090_v21  ;;  %4460 = vmatprep.mubr.bf16.mxu0 %v3021_v60  ;;  %v2717_v15 = vpack.c.bf16 %v2698_v29, %v2697_v61  ;;  %v3006_v13 = vld [vmem:[#allocation2 + $0x172] sm:$0xff] }
 0x131   : > { %v5297_v44 = vadd.f32 %v1340_v17, %v1067_v30  ;;  %v1088_v18 = vadd.f32 %v4122_v32, %v5170_v34  ;;  %v1353_v55 = vpop.f32.mrf.mxu0  ;;  %4412 = vmatprep.mubr.bf16.mxu1 %v2715_v52 }
 0x132   : > { %v1079_v8 = vpop.f32.mrf.mxu1 }
 0x133   : > { %v5300_v26 = vadd.f32 %v4170_v31, %v1088_v18  ;;  %v1080_v21 = vadd.f32 %v1079_v8, %v5174_v39  ;;  %v4171_v36 = vpop.f32.mrf.mxu0  ;;  %v3005_v39 = vld [vmem:[#allocation2 + $0x16a] sm:$0xff] }
 0x134   : > { %v4123_v28 = vpop.f32.mrf.mxu1 }
 0x135   : > { %v5303_v62 = vadd.f32 %v1353_v55, %v1080_v21  ;;  %v1091_v34 = vadd.f32 %v4123_v28, %v5179_v6  ;;  %v1356_v42 = vpop.f32.mrf.mxu0  ;;  %v2699_v6 = vld [vmem:[#allocation2 + $0x169] sm:$0xff]  ;;  %v3024_v55 = vpack.c.bf16 %v3006_v13, %v3005_v39 }
 0x136   : > { %v1082_v37 = vpop.f32.mrf.mxu1  ;;  %v2718_v57 = vpack.c.bf16 %v2700_v9, %v2699_v6  ;;  %v3010_v28 = vld [vmem:[#allocation2 + $0x1a2] sm:$0xff] }
 0x137   : > { %v5306_v60 = vadd.f32 %v4171_v36, %v1091_v34  ;;  %v1083_v54 = vadd.f32 %v1082_v37, %v5185_v14  ;;  %v4174_v17 = vpop.f32.mrf.mxu0  ;;  %4461 = vmatmul.mubr.bf16.gmra.mxu0 %v3022_v50 }
 0x138   : > { %v4126_v52 = vpop.f32.mrf.mxu1  ;;  %4413 = vmatmul.mubr.bf16.gmra.mxu1 %v2716_v48  ;;  %4464 = vmatprep.mubr.bf16.mxu0 %v3023_v53 }
 0x139   : > { %v5309_v30 = vadd.f32 %v1356_v42, %v1083_v54  ;;  %v1104_v31 = vadd.f32 %v4126_v52, %v5190_v47  ;;  %v1369_v32 = vpop.f32.mrf.mxu0  ;;  %4416 = vmatprep.mubr.bf16.mxu1 %v2717_v15  ;;  %v2704_v42 = vld [vmem:[#allocation2 + $0x1a1] sm:$0xff] }
 0x13a   : > { %v1095_v4 = vpop.f32.mrf.mxu1 }
 0x13b   : > { %v5312_v25 = vadd.f32 %v4174_v17, %v1104_v31  ;;  %v1096_v14 = vadd.f32 %v1095_v4, %v5194_v45  ;;  %v4175_v18 = vpop.f32.mrf.mxu0  ;;  %v3009_v45 = vld [vmem:[#allocation2 + $0x19a] sm:$0xff] }
 0x13c   : > { %v4127_v23 = vpop.f32.mrf.mxu1  ;;  %v3026_v17 = vpack.c.bf16 %v3010_v28, %v3009_v45 }
 0x13d   : > { %v5315_v10 = vadd.f32 %v1369_v32, %v1096_v14  ;;  %v1107_v8 = vadd.f32 %v4127_v23, %v5199_v7  ;;  %v1372_v61 = vpop.f32.mrf.mxu0  ;;  %v2703_v7 = vld [vmem:[#allocation2 + $0x199] sm:$0xff] }
 0x13e   : > { %v1098_v29 = vpop.f32.mrf.mxu1 }
 0x13f   : > { %v5318_v47 = vadd.f32 %v4175_v18, %v1107_v8  ;;  %v1099_v21 = vadd.f32 %v1098_v29, %v5205_v41  ;;  %v4178_v36 = vpop.f32.mrf.mxu0  ;;  %4465 = vmatmul.mubr.bf16.gmra.mxu0 %v3024_v55 }
 0x140   : > { %v4130_v50 = vpop.f32.mrf.mxu1  ;;  %4417 = vmatmul.mubr.bf16.gmra.mxu1 %v2718_v57  ;;  %4468 = vmatprep.mubr.bf16.mxu0 %v5228_v43  ;;  %v2720_v43 = vpack.c.bf16 %v2704_v42, %v2703_v7 }
 0x141   : > { %v5322_v48 = vadd.f32 %v1372_v61, %v1099_v21  ;;  %v1120_v53 = vadd.f32 %v4130_v50, %v5210_v5  ;;  %v1385_v34 = vpop.f32.mrf.mxu0  ;;  %4420 = vmatprep.mubr.bf16.mxu1 %v4985_v33 }
 0x142   : > { %v1111_v15 = vpop.f32.mrf.mxu1 }
 0x143   : > { %v5326_v37 = vadd.f32 %v4178_v36, %v1120_v53  ;;  %v1112_v41 = vadd.f32 %v1111_v15, %v5214_v1  ;;  %v4179_v54 = vpop.f32.mrf.mxu0 }
 0x144   : > { %v4131_v52 = vpop.f32.mrf.mxu1 }
 0x145   : > { %v5329_v39 = vadd.f32 %v1385_v34, %v1112_v41  ;;  %v1123_v13 = vadd.f32 %v4131_v52, %v5220_v51  ;;  %v1388_v31 = vpop.f32.mrf.mxu0 }
 0x146   : > { %v1114_v5 = vpop.f32.mrf.mxu1 }
 0x147   : > { %v5332_v32 = vadd.f32 %v4179_v54, %v1123_v13  ;;  %v1115_v33 = vadd.f32 %v1114_v5, %v5226_v12  ;;  %v4182_v6 = vpop.f32.mrf.mxu0  ;;  %4469 = vmatmul.mubr.bf16.gmra.mxu0 %v3026_v17 }
 0x148   : > { %v4134_v9 = vpop.f32.mrf.mxu1  ;;  %4421 = vmatmul.mubr.bf16.gmra.mxu1 %v2720_v43 }
 0x149   : > { %v5335_v4 = vadd.f32 %v1388_v31, %v1115_v33  ;;  %v1136_v1 = vadd.f32 %v4134_v9, %v5232_v56  ;;  %v1401_v14 = vpop.f32.mrf.mxu0 }
 0x14a   : > { %v1127_v18 = vpop.f32.mrf.mxu1 }
 0x14b   : > { %v5338_v55 = vadd.f32 %v4182_v6, %v1136_v1  ;;  %v1128_v51 = vadd.f32 %v1127_v18, %v5237_v27  ;;  %v4183_v23 = vpop.f32.mrf.mxu0 }
 0x14c   : > { %v4135_v57 = vpop.f32.mrf.mxu1 }
 0x14d   : > { %v5341_v8 = vadd.f32 %v1401_v14, %v1128_v51  ;;  %v1139_v12 = vadd.f32 %v4135_v57, %v5241_v40  ;;  %v1404_v61 = vpop.f32.mrf.mxu0 }
 0x14e   : > { %v1130_v29 = vpop.f32.mrf.mxu1 }
 0x14f   : > { %v5344_v21 = vadd.f32 %v4183_v23, %v1139_v12  ;;  %v1131_v36 = vadd.f32 %v1130_v29, %v5245_v63  ;;  %v4250_v50 = vpop.f32.mrf.mxu0 }
 0x150   : > { %v4202_v56 = vpop.f32.mrf.mxu1 }
 0x151   : > { %v5347_v45 = vadd.f32 %v1404_v61, %v1131_v36  ;;  %v1724_v28 = vadd.f32 %v4202_v56, %v5248_v46  ;;  %v1901_v53 = vpop.f32.mrf.mxu0 }
 0x152   : > { %v1595_v27 = vpop.f32.mrf.mxu1 }
 0x153   : > { %v5350_v34 = vadd.f32 %v4250_v50, %v1724_v28  ;;  %v1722_v7 = vadd.f32 %v1595_v27, %v5251_v16  ;;  %v4251_v42 = vpop.f32.mrf.mxu0 }
 0x154   : > { %v4203_v40 = vpop.f32.mrf.mxu1 }
 0x155   : > { %v5353_v15 = vadd.f32 %v1901_v53, %v1722_v7  ;;  %v1725_v41 = vadd.f32 %v4203_v40, %v5254_v49  ;;  %v1904_v54 = vpop.f32.mrf.mxu0 }
 0x156   : > { %v1598_v63 = vpop.f32.mrf.mxu1 }
 0x157   : > { %v5356_v17 = vadd.f32 %v4251_v42, %v1725_v41  ;;  %v1723_v52 = vadd.f32 %v1598_v63, %v5257_v3  ;;  %v4254_v43 = vpop.f32.mrf.mxu0 }
 0x158   : > { %v4206_v46 = vpop.f32.mrf.mxu1 }
 0x159   : > { %v5359_v13 = vadd.f32 %v1904_v54, %v1723_v52  ;;  %v1728_v31 = vadd.f32 %v4206_v46, %v5260_v59  ;;  %v1917_v5 = vpop.f32.mrf.mxu0 }
 0x15a   : > { %v1611_v16 = vpop.f32.mrf.mxu1 }
 0x15b   : > { %v5362_v33 = vadd.f32 %v4254_v43, %v1728_v31  ;;  %v1726_v6 = vadd.f32 %v1611_v16, %v5263_v11  ;;  %v4255_v9 = vpop.f32.mrf.mxu0 }
 0x15c   : > { %v4207_v49 = vpop.f32.mrf.mxu1 }
 0x15d   : > { %v5365_v1 = vadd.f32 %v1917_v5, %v1726_v6  ;;  %v1729_v14 = vadd.f32 %v4207_v49, %v5266_v20  ;;  %v1920_v18 = vpop.f32.mrf.mxu0 }
 0x15e   : > { %v1614_v3 = vpop.f32.mrf.mxu1 }
 0x15f   : > { %v5368_v51 = vadd.f32 %v4255_v9, %v1729_v14  ;;  %v1727_v23 = vadd.f32 %v1614_v3, %v5269_v0  ;;  %v4258_v57 = vpop.f32.mrf.mxu0 }
 0x160   : > { %v4210_v59 = vpop.f32.mrf.mxu1 }
 0x161   : > { %v5371_v12 = vadd.f32 %v1920_v18, %v1727_v23  ;;  %v1732_v61 = vadd.f32 %v4210_v59, %v5273_v58  ;;  %v1933_v29 = vpop.f32.mrf.mxu0 }
 0x162   : > { %v1627_v11 = vpop.f32.mrf.mxu1 }
 0x163   : > { %v5374_v36 = vadd.f32 %v4258_v57, %v1732_v61  ;;  %v1730_v50 = vadd.f32 %v1627_v11, %v5276_v35  ;;  %v4259_v56 = vpop.f32.mrf.mxu0 }
 0x164   : > { %v4211_v20 = vpop.f32.mrf.mxu1 }
 0x165   : > { %v5377_v28 = vadd.f32 %v1933_v29, %v1730_v50  ;;  %v1733_v53 = vadd.f32 %v4211_v20, %v5279_v2  ;;  %v1936_v27 = vpop.f32.mrf.mxu0 }
 0x166   : > { %v1630_v0 = vpop.f32.mrf.mxu1 }
 0x167   : > { %v5380_v7 = vadd.f32 %v4259_v56, %v1733_v53  ;;  %v1731_v42 = vadd.f32 %v1630_v0, %v5283_v22  ;;  %v4262_v40 = vpop.f32.mrf.mxu0 }
 0x168   : > { %v4214_v58 = vpop.f32.mrf.mxu1 }
 0x169   : > { %v5383_v41 = vadd.f32 %v1936_v27, %v1731_v42  ;;  %v1736_v54 = vadd.f32 %v4214_v58, %v5287_v24  ;;  %v1949_v63 = vpop.f32.mrf.mxu0 }
 0x16a   : > { %v1643_v35 = vpop.f32.mrf.mxu1 }
 0x16b   : > { %v5386_v52 = vadd.f32 %v4262_v40, %v1736_v54  ;;  %v1734_v43 = vadd.f32 %v1643_v35, %v5290_v19  ;;  %v4263_v46 = vpop.f32.mrf.mxu0 }
 0x16c   : > { %v4215_v2 = vpop.f32.mrf.mxu1 }
 0x16d   : > { %v5389_v31 = vadd.f32 %v1949_v63, %v1734_v43  ;;  %v1737_v5 = vadd.f32 %v4215_v2, %v5293_v38  ;;  %v1952_v16 = vpop.f32.mrf.mxu0 }
 0x16e   : > { %v1646_v22 = vpop.f32.mrf.mxu1 }
 0x16f   : > { %v5392_v6 = vadd.f32 %v4263_v46, %v1737_v5  ;;  %v1735_v9 = vadd.f32 %v1646_v22, %v5297_v44  ;;  %v4266_v49 = vpop.f32.mrf.mxu0 }
 0x170   : > { %v4218_v24 = vpop.f32.mrf.mxu1 }
 0x171   : > { %v5395_v14 = vadd.f32 %v1952_v16, %v1735_v9  ;;  %v1740_v18 = vadd.f32 %v4218_v24, %v5300_v26  ;;  %v1965_v3 = vpop.f32.mrf.mxu0 }
 0x172   : > { %v1659_v19 = vpop.f32.mrf.mxu1 }
 0x173   : > { %v5398_v23 = vadd.f32 %v4266_v49, %v1740_v18  ;;  %v1738_v57 = vadd.f32 %v1659_v19, %v5303_v62  ;;  %v4267_v59 = vpop.f32.mrf.mxu0 }
 0x174   : > { %v4219_v38 = vpop.f32.mrf.mxu1 }
 0x175   : > { %v5401_v61 = vadd.f32 %v1965_v3, %v1738_v57  ;;  %v1741_v29 = vadd.f32 %v4219_v38, %v5306_v60  ;;  %v1968_v11 = vpop.f32.mrf.mxu0 }
 0x176   : > { %v1662_v44 = vpop.f32.mrf.mxu1 }
 0x177   : > { %v5404_v50 = vadd.f32 %v4267_v59, %v1741_v29  ;;  %v1739_v56 = vadd.f32 %v1662_v44, %v5309_v30  ;;  %v4270_v20 = vpop.f32.mrf.mxu0 }
 0x178   : > { %v4222_v26 = vpop.f32.mrf.mxu1 }
 0x179   : > { %5719 = vst [vmem:[#allocation3_spill] sm:$0xff] %v5404_v50  ;;  %v5407_v53 = vadd.f32 %v1968_v11, %v1739_v56  ;;  %v1744_v27 = vadd.f32 %v4222_v26, %v5312_v25  ;;  %v1981_v0 = vpop.f32.mrf.mxu0 }
 0x17a   : > { %v1675_v62 = vpop.f32.mrf.mxu1 }
 0x17b   : > { %5720 = vst [vmem:[#allocation4_spill] sm:$0xff] %v5407_v53  ;;  %v5410_v42 = vadd.f32 %v4270_v20, %v1744_v27  ;;  %v1742_v40 = vadd.f32 %v1675_v62, %v5315_v10  ;;  %v4271_v58 = vpop.f32.mrf.mxu0 }
 0x17c   : > { %v4223_v60 = vpop.f32.mrf.mxu1 }
 0x17d   : > { %5721 = vst [vmem:[#allocation5_spill] sm:$0xff] %v5410_v42  ;;  %v5413_v54 = vadd.f32 %v1981_v0, %v1742_v40  ;;  %v1745_v63 = vadd.f32 %v4223_v60, %v5318_v47  ;;  %v1984_v35 = vpop.f32.mrf.mxu0 }
 0x17e   : > { %v1678_v30 = vpop.f32.mrf.mxu1 }
 0x17f   : > { %5722 = vst [vmem:[#allocation6_spill] sm:$0xff] %v5413_v54  ;;  %v5416_v43 = vadd.f32 %v4271_v58, %v1745_v63  ;;  %v1743_v46 = vadd.f32 %v1678_v30, %v5322_v48  ;;  %v4274_v2 = vpop.f32.mrf.mxu0 }
 0x180   : > { %v4226_v25 = vpop.f32.mrf.mxu1 }
 0x181   : > { %5723 = vst [vmem:[#allocation7_spill] sm:$0xff] %v5416_v43  ;;  %v5419_v5 = vadd.f32 %v1984_v35, %v1743_v46  ;;  %v1748_v16 = vadd.f32 %v4226_v25, %v5326_v37  ;;  %v1997_v22 = vpop.f32.mrf.mxu0 }
 0x182   : > { %v1691_v10 = vpop.f32.mrf.mxu1 }
 0x183   : > { %5724 = vst [vmem:[#allocation8_spill] sm:$0xff] %v5419_v5  ;;  %v5422_v9 = vadd.f32 %v4274_v2, %v1748_v16  ;;  %v1746_v49 = vadd.f32 %v1691_v10, %v5329_v39  ;;  %v4275_v24 = vpop.f32.mrf.mxu0 }
 0x184   : > { %v4227_v47 = vpop.f32.mrf.mxu1 }
 0x185   : > { %5725 = vst [vmem:[#allocation9_spill] sm:$0xff] %v5422_v9  ;;  %v5425_v18 = vadd.f32 %v1997_v22, %v1746_v49  ;;  %v1749_v3 = vadd.f32 %v4227_v47, %v5332_v32  ;;  %v2000_v19 = vpop.f32.mrf.mxu0 }
 0x186   : > { %v1694_v48 = vpop.f32.mrf.mxu1 }
 0x187   : > { %5726 = vst [vmem:[#allocation10_spill] sm:$0xff] %v5425_v18  ;;  %v5428_v57 = vadd.f32 %v4275_v24, %v1749_v3  ;;  %v1747_v59 = vadd.f32 %v1694_v48, %v5335_v4  ;;  %v4278_v38 = vpop.f32.mrf.mxu0 }
 0x188   : > { %v4230_v37 = vpop.f32.mrf.mxu1 }
 0x189   : > { %5727 = vst [vmem:[#allocation11_spill] sm:$0xff] %v5428_v57  ;;  %v5431_v29 = vadd.f32 %v2000_v19, %v1747_v59  ;;  %v1752_v11 = vadd.f32 %v4230_v37, %v5338_v55  ;;  %v2013_v44 = vpop.f32.mrf.mxu0 }
 0x18a   : > { %v1707_v39 = vpop.f32.mrf.mxu1 }
 0x18b   : > { %5728 = vst [vmem:[#allocation12_spill] sm:$0xff] %v5431_v29  ;;  %v5434_v56 = vadd.f32 %v4278_v38, %v1752_v11  ;;  %v1750_v20 = vadd.f32 %v1707_v39, %v5341_v8  ;;  %v4279_v26 = vpop.f32.mrf.mxu0 }
 0x18c   : > { %v4231_v32 = vpop.f32.mrf.mxu1 }
 0x18d   : > { %5729 = vst [vmem:[#allocation13_spill] sm:$0xff] %v5434_v56  ;;  %v5437_v27 = vadd.f32 %v2013_v44, %v1750_v20  ;;  %v1753_v0 = vadd.f32 %v4231_v32, %v5344_v21  ;;  %v2016_v62 = vpop.f32.mrf.mxu0 }
 0x18e   : > { %v1710_v4 = vpop.f32.mrf.mxu1 }
 0x18f   : > { %5730 = vst [vmem:[#allocation14_spill] sm:$0xff] %v5437_v27  ;;  %v5440_v40 = vadd.f32 %v4279_v26, %v1753_v0  ;;  %v1751_v58 = vadd.f32 %v1710_v4, %v5347_v45  ;;  %v5443_v60 = vpop.f32.mrf.mxu0 }
 0x190   : > { %v4298_v55 = vpop.f32.mrf.mxu1 }
 0x191   : > { %5731 = vst [vmem:[#allocation15_spill] sm:$0xff] %v5440_v40  ;;  %v5445_v63 = vadd.f32 %v2016_v62, %v1751_v58  ;;  %v5447_v35 = vpop.f32.mrf.mxu0 }
 0x192   : > { %v2207_v8 = vpop.f32.mrf.mxu1 }
 0x193   : > { %5732 = vst [vmem:[#allocation16_spill] sm:$0xff] %v5445_v63  ;;  %v5449_v30 = vpop.f32.mrf.mxu0 }
 0x194   : > { %v5451_v46 = vpop.f32.mrf.mxu1 }
 0x195   : > { %v5453_v2 = vpop.f32.mrf.mxu0 }
 0x196   : > { %v5455_v21 = vpop.f32.mrf.mxu1 }
 0x197   : > { %v5457_v25 = vpop.f32.mrf.mxu0 }
 0x198   : > { %v5459_v16 = vpop.f32.mrf.mxu1 }
 0x199   : > { %v5461_v45 = vpop.f32.mrf.mxu0 }
 0x19a   : > { %v5463_v22 = vpop.f32.mrf.mxu1 }
 0x19b   : > { %v5465_v10 = vpop.f32.mrf.mxu0 }
 0x19c   : > { %v5467_v49 = vpop.f32.mrf.mxu1 }
 0x19d   : > { %v5469_v24 = vpop.f32.mrf.mxu0 }
 0x19e   : > { %v5471_v47 = vpop.f32.mrf.mxu1 }
 0x19f   : > { %v5473_v3 = vpop.f32.mrf.mxu0 }
 0x1a0   : > { %v5475_v19 = vpop.f32.mrf.mxu1 }
 0x1a1   : > { %v5477_v48 = vpop.f32.mrf.mxu0 }
 0x1a2   : > { %v5479_v59 = vpop.f32.mrf.mxu1 }
 0x1a3   : > { %v5481_v38 = vpop.f32.mrf.mxu0 }
 0x1a4   : > { %v5483_v37 = vpop.f32.mrf.mxu1 }
 0x1a5   : > { %v5485_v11 = vpop.f32.mrf.mxu0 }
 0x1a6   : > { %v5487_v44 = vpop.f32.mrf.mxu1 }
 0x1a7   : > { %v5489_v39 = vpop.f32.mrf.mxu0 }
 0x1a8   : > { %v5491_v20 = vpop.f32.mrf.mxu1 }
 0x1a9   : > { %v5493_v26 = vpop.f32.mrf.mxu0 }
 0x1aa   : > { %v5495_v32 = vpop.f32.mrf.mxu1 }
 0x1ab   : > { %v5497_v0 = vpop.f32.mrf.mxu0 }
 0x1ac   : > { %v5499_v62 = vpop.f32.mrf.mxu1 }
 0x1ad   : > { %v5501_v4 = vpop.f32.mrf.mxu0 }
 0x1ae   : > { %v5503_v58 = vpop.f32.mrf.mxu1 }
 0x1af   : > { %v5505_v63 = vpop.f32.mrf.mxu0 }
 0x1b0   : > { %v5507_v40 = vpop.f32.mrf.mxu1 }
 0x1b1   : > { %v5509_v27 = vpop.f32.mrf.mxu0 }
 0x1b2   : > { %5733 = vst [vmem:[#allocation17_spill] sm:$0xff] %v5509_v27  ;;  %v5511_v56 = vpop.f32.mrf.mxu1 }
 0x1b3   : > { %v5513_v29 = vpop.f32.mrf.mxu0 }
 0x1b4   : > { %5734 = vst [vmem:[#allocation18_spill] sm:$0xff] %v5513_v29  ;;  %v5515_v57 = vpop.f32.mrf.mxu1 }
 0x1b5   : > { %5735 = vst [vmem:[#allocation19_spill] sm:$0xff] %v5515_v57  ;;  %v5517_v18 = vpop.f32.mrf.mxu0 }
 0x1b6   : > { %5736 = vst [vmem:[#allocation20_spill] sm:$0xff] %v5517_v18  ;;  %v5519_v9 = vpop.f32.mrf.mxu1 }
 0x1b7   : > { %5737 = vst [vmem:[#allocation21_spill] sm:$0xff] %v5519_v9  ;;  %v5521_v5 = vpop.f32.mrf.mxu0 }
 0x1b8   : > { %5738 = vst [vmem:[#allocation22_spill] sm:$0xff] %v5521_v5  ;;  %v5523_v43 = vpop.f32.mrf.mxu1 }
 0x1b9   : > { %5739 = vst [vmem:[#allocation23_spill] sm:$0xff] %v5523_v43  ;;  %v5525_v54 = vpop.f32.mrf.mxu0 }
 0x1ba   : > { %5740 = vst [vmem:[#allocation24_spill] sm:$0xff] %v5525_v54  ;;  %v5527_v42 = vpop.f32.mrf.mxu1 }
 0x1bb   : > { %5741 = vst [vmem:[#allocation25_spill] sm:$0xff] %v5527_v42  ;;  %v5529_v53 = vpop.f32.mrf.mxu0 }
 0x1bc   : > { %5742 = vst [vmem:[#allocation26_spill] sm:$0xff] %v5529_v53  ;;  %v5531_v27 = vpop.f32.mrf.mxu1 }
 0x1bd   : > { %5743 = vst [vmem:[#allocation27_spill] sm:$0xff] %v5531_v27  ;;  %v5533_v50 = vpop.f32.mrf.mxu0 }
 0x1be   : > { %5744 = vst [vmem:[#allocation28_spill] sm:$0xff] %v5533_v50  ;;  %v5535_v29 = vpop.f32.mrf.mxu1 }
 0x1bf   : > { %5745 = vst [vmem:[#allocation29_spill] sm:$0xff] %v5535_v29  ;;  %v5537_v57 = vpop.f32.mrf.mxu0 }
 0x1c0   : > { %5746 = vst [vmem:[#allocation30_spill] sm:$0xff] %v5537_v57  ;;  %v5539_v18 = vpop.f32.mrf.mxu1 }
 0x1c1   : > { %5747 = vst [vmem:[#allocation31_spill] sm:$0xff] %v5539_v18  ;;  %v5541_v9 = vpop.f32.mrf.mxu0 }
 0x1c2   : > { %5748 = vst [vmem:[#allocation32_spill] sm:$0xff] %v5541_v9  ;;  %v5543_v5 = vpop.f32.mrf.mxu1  ;;  %v2336_v9 = vadd.f32 %v4298_v55, %v5350_v34  ;;  %v2335_v55 = vadd.f32 %v5455_v21, %v5359_v13 }
 0x1c3   : > { %5749 = vst [vmem:[#allocation33_spill] sm:$0xff] %v5543_v5  ;;  %v5545_v54 = vpop.f32.mrf.mxu0 }
 0x1c4   : > { %5750 = vst [vmem:[#allocation34_spill] sm:$0xff] %v5545_v54  ;;  %v5547_v42 = vpop.f32.mrf.mxu1  ;;  %v2334_v54 = vadd.f32 %v2207_v8, %v5353_v15  ;;  %v2642_v13 = vadd.f32 %v5453_v2, %v2335_v55  ;;  %v2339_v2 = vadd.f32 %v5471_v47, %v5371_v12 }
 0x1c5   : > { %5751 = vst [vmem:[#allocation35_spill] sm:$0xff] %v5547_v42  ;;  %v5549_v53 = vpop.f32.mrf.mxu0 }
 0x1c6   : > { %5752 = vst [vmem:[#allocation36_spill] sm:$0xff] %v5549_v53  ;;  %v5551_v27 = vpop.f32.mrf.mxu1  ;;  %v2641_v34 = vadd.f32 %v5447_v35, %v2334_v54 }
 0x1c7   : > { %v5553_v50 = vpop.f32.mrf.mxu0 }
 0x1c8   : > { %5753 = vst [vmem:[#allocation37_spill] sm:$0xff] %v5553_v50  ;;  %v5555_v29 = vpop.f32.mrf.mxu1  ;;  %v2643_v50 = vadd.f32 %v5443_v60, %v2336_v9 }
 0x1c9   : > { %5754 = vst [vmem:[#allocation38_spill] sm:$0xff] %v5555_v29  ;;  %v5557_v57 = vpop.f32.mrf.mxu0 }
 0x1ca   : > { %5755 = vst [vmem:[#allocation39_spill] sm:$0xff] %v5557_v57  ;;  %v5559_v18 = vpop.f32.mrf.mxu1  ;;  %v2337_v57 = vadd.f32 %v5451_v46, %v5356_v17  ;;  %v2340_v17 = vadd.f32 %v5459_v16, %v5362_v33 }
 0x1cb   : > { %5756 = vst [vmem:[#allocation40_spill] sm:$0xff] %v5559_v18  ;;  %v5562_v43 = vpop.f32.mrf.mxu0 }
 0x1cc   : > { %5757 = vst [vmem:[#allocation41_spill] sm:$0xff] %v5562_v43  ;;  %v5564_v5 = vpop.f32.mrf.mxu1  ;;  %v2644_v9 = vadd.f32 %v5449_v30, %v2337_v57  ;;  %v2647_v57 = vadd.f32 %v5457_v25, %v2340_v17  ;;  %v2341_v30 = vadd.f32 %v5467_v49, %v5368_v51  ;;  %v2344_v25 = vadd.f32 %v5475_v19, %v5374_v36 }
 0x1cd   : > { %5758 = vst [vmem:[#allocation42_spill] sm:$0xff] %v5564_v5  ;;  %v5567_v42 = vpop.f32.mrf.mxu0 }
 0x1ce   : > { %5759 = vst [vmem:[#allocation43_spill] sm:$0xff] %v5567_v42  ;;  %v5569_v53 = vpop.f32.mrf.mxu1  ;;  %v2648_v12 = vadd.f32 %v5465_v10, %v2341_v30  ;;  %v2651_v19 = vadd.f32 %v5473_v3, %v2344_v25 }
 0x1cf   : > { %v4442_v29 = vpop.f32.mrf.mxu0 }
 0x1d0   : > { %v4394_v18 = vpop.f32.mrf.mxu1 }
 0x1d1   : > { %v2949_v43 = vadd.f32 %v4394_v18, %v2643_v50  ;;  %v3126_v5 = vpop.f32.mrf.mxu0  ;;  %v2338_v50 = vadd.f32 %v5463_v22, %v5365_v1 }
 0x1d2   : > { %v2820_v15 = vpop.f32.mrf.mxu1 }
 0x1d3   : > { %v3255_v60 = vadd.f32 %v4442_v29, %v2949_v43  ;;  %v2947_v54 = vadd.f32 %v2820_v15, %v2641_v34  ;;  %v4443_v35 = vpop.f32.mrf.mxu0  ;;  %v2645_v1 = vadd.f32 %v5461_v45, %v2338_v50  ;;  %v2646_v45 = vadd.f32 %v5469_v24, %v2339_v2 }
 0x1d4   : > { %v4395_v8 = vpop.f32.mrf.mxu1  ;;  %v2342_v50 = vadd.f32 %v5479_v59, %v5377_v28 }
 0x1d5   : > { %3287 = vst [vmem:[%s5581_s30 + $0x10] sm:$0xff] %v3255_v60  ;;  %v3253_v18 = vadd.f32 %v3126_v5, %v2947_v54  ;;  %v2950_v46 = vadd.f32 %v4395_v8, %v2644_v9  ;;  %v3129_v21 = vpop.f32.mrf.mxu0  ;;  %v3357_v54 = vmul.f32 %v3255_v60, %v3255_v60 }
 0x1d6   : > { %v2823_v42 = vpop.f32.mrf.mxu1 }
 0x1d7   : > { %3285 = vst [vmem:[%s5581_s30] sm:$0xff] %v3253_v18  ;;  %v3256_v33 = vadd.f32 %v4443_v35, %v2950_v46  ;;  %v2948_v43 = vadd.f32 %v2823_v42, %v2642_v13  ;;  %v4446_v29 = vpop.f32.mrf.mxu0  ;;  %v3355_v55 = vmul.f32 %v3253_v18, %v3253_v18 }
 0x1d8   : > { %v4398_v16 = vpop.f32.mrf.mxu1 }
 0x1d9   : > { %3288 = vst [vmem:[%s5581_s30 + $0x18] sm:$0xff] %v3256_v33  ;;  %v3254_v5 = vadd.f32 %v3129_v21, %v2948_v43  ;;  %v2953_v22 = vadd.f32 %v4398_v16, %v2647_v57  ;;  %v3142_v34 = vpop.f32.mrf.mxu0  ;;  %v3358_v21 = vmul.f32 %v3256_v33, %v3256_v33 }
 0x1da   : > { %v2836_v42 = vpop.f32.mrf.mxu1 }
 0x1db   : > { %3286 = vst [vmem:[%s5581_s30 + $0x8] sm:$0xff] %v3254_v5  ;;  %v3317_v15 = vadd.f32 %v3254_v5, %v3253_v18  ;;  %v3356_v9 = vmul.f32 %v3254_v5, %v3254_v5  ;;  %v3259_v51 = vadd.f32 %v4446_v29, %v2953_v22  ;;  %v2951_v49 = vadd.f32 %v2836_v42, %v2645_v1  ;;  %v4447_v17 = vpop.f32.mrf.mxu0 }
 0x1dc   : > { %v4399_v47 = vpop.f32.mrf.mxu1  ;;  %v2345_v18 = vadd.f32 %v5483_v37, %v5380_v7  ;;  %v2343_v29 = vadd.f32 %v5487_v44, %v5383_v41  ;;  %v2649_v1 = vadd.f32 %v5477_v48, %v2342_v50  ;;  %v2348_v42 = vadd.f32 %v5491_v20, %v5386_v52 }
 0x1dd   : > { %v3318_v35 = vadd.f32 %v3317_v15, %v3255_v60  ;;  %v3387_v8 = vadd.f32 %v3356_v9, %v3355_v55  ;;  %3291 = vst [vmem:[%s5581_s30 + $0x30] sm:$0xff] %v3259_v51  ;;  %v3257_v13 = vadd.f32 %v3142_v34, %v2951_v49  ;;  %v3145_v36 = vpop.f32.mrf.mxu0  ;;  %v2954_v46 = vadd.f32 %v4399_v47, %v2648_v12 }
 0x1de   : > { %v2839_v10 = vpop.f32.mrf.mxu1  ;;  %v2652_v5 = vadd.f32 %v5481_v38, %v2345_v18  ;;  %v2650_v55 = vadd.f32 %v5485_v11, %v2343_v29  ;;  %v2346_v15 = vadd.f32 %v5495_v32, %v5389_v31  ;;  %v3361_v38 = vmul.f32 %v3259_v51, %v3259_v51 }
 0x1df   : > { %v3388_v57 = vadd.f32 %v3387_v8, %v3357_v54  ;;  %3289 = vst [vmem:[%s5581_s30 + $0x20] sm:$0xff] %v3257_v13  ;;  %v3319_v24 = vadd.f32 %v3318_v35, %v3256_v33  ;;  %v2952_v60 = vadd.f32 %v2839_v10, %v2646_v45  ;;  %v4450_v43 = vpop.f32.mrf.mxu0  ;;  %v3359_v3 = vmul.f32 %v3257_v13, %v3257_v13 }
 0x1e0   : > { %v3260_v30 = vadd.f32 %v4447_v17, %v2954_v46  ;;  %v4402_v2 = vpop.f32.mrf.mxu1  ;;  %v2349_v47 = vadd.f32 %v5499_v62, %v5392_v6  ;;  %v2347_v10 = vadd.f32 %v5503_v58, %v5395_v14 }
 0x1e1   : > { %v3320_v28 = vadd.f32 %v3319_v24, %v3257_v13  ;;  %v3389_v59 = vadd.f32 %v3388_v57, %v3358_v21  ;;  %v3258_v16 = vadd.f32 %v3145_v36, %v2952_v60  ;;  %v2957_v7 = vadd.f32 %v4402_v2, %v2651_v19  ;;  %v3158_v37 = vpop.f32.mrf.mxu0 }
 0x1e2   : > { %3292 = vst [vmem:[%s5581_s30 + $0x38] sm:$0xff] %v3260_v30  ;;  %v2852_v33 = vpop.f32.mrf.mxu1  ;;  %v3362_v11 = vmul.f32 %v3260_v30, %v3260_v30  ;;  %v2655_v13 = vadd.f32 %v5489_v39, %v2348_v42  ;;  %v2656_v46 = vadd.f32 %v5497_v0, %v2349_v47  ;;  %v2352_v21 = vadd.f32 %v5507_v40, %v5398_v23 }
 0x1e3   : > { %v3390_v22 = vadd.f32 %v3389_v59, %v3359_v3  ;;  %3290 = vst [vmem:[%s5581_s30 + $0x28] sm:$0xff] %v3258_v16  ;;  %v3321_v34 = vadd.f32 %v3320_v28, %v3258_v16  ;;  %v3360_v25 = vmul.f32 %v3258_v16, %v3258_v16  ;;  %v3263_v41 = vadd.f32 %v4450_v43, %v2957_v7  ;;  %v4451_v44 = vpop.f32.mrf.mxu0  ;;  %v5760_v7 = vld [vmem:[#allocation3_spill] sm:$0xff] }
 0x1e4   : > { %v2955_v48 = vadd.f32 %v2852_v33, %v2649_v1  ;;  %v4403_v9 = vpop.f32.mrf.mxu1  ;;  %v2350_v3 = vadd.f32 %v5511_v56, %v5401_v61  ;;  %v2654_v59 = vadd.f32 %v5501_v4, %v2347_v10  ;;  %v2659_v16 = vadd.f32 %v5505_v63, %v2352_v21  ;;  %v5771_v21 = vld [vmem:[#allocation7_spill] sm:$0xff] }
 0x1e5   : > { %v3322_v49 = vadd.f32 %v3321_v34, %v3259_v51  ;;  %v3391_v17 = vadd.f32 %v3390_v22, %v3360_v25  ;;  %3295 = vst [vmem:[%s5581_s30 + $0x50] sm:$0xff] %v3263_v41  ;;  %v2958_v12 = vadd.f32 %v4403_v9, %v2652_v5  ;;  %v3161_v45 = vpop.f32.mrf.mxu0  ;;  %v2653_v51 = vadd.f32 %v5493_v26, %v2346_v15  ;;  %v5762_v25 = vld [vmem:[#allocation17_spill] sm:$0xff] }
 0x1e6   : > { %v3261_v54 = vadd.f32 %v3158_v37, %v2955_v48  ;;  %v2855_v35 = vpop.f32.mrf.mxu1  ;;  %v3365_v0 = vmul.f32 %v3263_v41, %v3263_v41  ;;  %v5761_v37 = vld [vmem:[#allocation19_spill] sm:$0xff] }
 0x1e7   : > { %v3392_v52 = vadd.f32 %v3391_v17, %v3361_v38  ;;  %v3323_v20 = vadd.f32 %v3322_v49, %v3260_v30  ;;  %v3264_v8 = vadd.f32 %v4451_v44, %v2958_v12  ;;  %v2956_v31 = vadd.f32 %v2855_v35, %v2650_v55  ;;  %v4454_v32 = vpop.f32.mrf.mxu0  ;;  %v5763_v44 = vld [vmem:[#allocation4_spill] sm:$0xff]  ;;  %v5764_v55 = vld [vmem:[#allocation21_spill] sm:$0xff]  ;;  %v5765_v17 = vld [vmem:[#allocation18_spill] sm:$0xff] }
 0x1e8   : > { %3293 = vst [vmem:[%s5581_s30 + $0x40] sm:$0xff] %v3261_v54  ;;  %v4406_v36 = vpop.f32.mrf.mxu1  ;;  %v3363_v50 = vmul.f32 %v3261_v54, %v3261_v54  ;;  %v2353_v1 = vadd.f32 %v5761_v37, %v5760_v7  ;;  %v2351_v42 = vadd.f32 %v5764_v55, %v5763_v44  ;;  %v5775_v7 = vld [vmem:[#allocation8_spill] sm:$0xff]  ;;  %v5776_v37 = vld [vmem:[#allocation29_spill] sm:$0xff] }
 0x1e9   : > { %v3324_v19 = vadd.f32 %v3323_v20, %v3261_v54  ;;  %v3393_v18 = vadd.f32 %v3392_v52, %v3362_v11  ;;  %3296 = vst [vmem:[%s5581_s30 + $0x58] sm:$0xff] %v3264_v8  ;;  %v3262_v6 = vadd.f32 %v3161_v45, %v2956_v31  ;;  %v3174_v62 = vpop.f32.mrf.mxu0  ;;  %v2961_v39 = vadd.f32 %v4406_v36, %v2655_v13  ;;  %v5766_v11 = vld [vmem:[#allocation5_spill] sm:$0xff]  ;;  %v5767_v54 = vld [vmem:[#allocation23_spill] sm:$0xff]  ;;  %v5768_v36 = vld [vmem:[#allocation20_spill] sm:$0xff] }
 0x1ea   : > { %v2868_v57 = vpop.f32.mrf.mxu1  ;;  %v3366_v61 = vmul.f32 %v3264_v8, %v3264_v8  ;;  %v2660_v12 = vadd.f32 %v5765_v17, %v2353_v1  ;;  %v2356_v35 = vadd.f32 %v5767_v54, %v5766_v11  ;;  %v2355_v1 = vadd.f32 %v5776_v37, %v5775_v7  ;;  %v5778_v55 = vld [vmem:[#allocation9_spill] sm:$0xff]  ;;  %v5780_v17 = vld [vmem:[#allocation28_spill] sm:$0xff] }
 0x1eb   : > { %v3394_v24 = vadd.f32 %v3393_v18, %v3363_v50  ;;  %3294 = vst [vmem:[%s5581_s30 + $0x48] sm:$0xff] %v3262_v6  ;;  %v3325_v26 = vadd.f32 %v3324_v19, %v3262_v6  ;;  %v3364_v60 = vmul.f32 %v3262_v6, %v3262_v6  ;;  %v2959_v43 = vadd.f32 %v2868_v57, %v2653_v51  ;;  %v4455_v29 = vpop.f32.mrf.mxu0  ;;  %v5769_v50 = vld [vmem:[#allocation6_spill] sm:$0xff]  ;;  %v5770_v18 = vld [vmem:[#allocation25_spill] sm:$0xff] }
 0x1ec   : > { %v3267_v30 = vadd.f32 %v4454_v32, %v2961_v39  ;;  %v4407_v2 = vpop.f32.mrf.mxu1  ;;  %v2658_v19 = vadd.f32 %v5768_v36, %v2351_v42  ;;  %v2354_v6 = vadd.f32 %v5770_v18, %v5769_v50  ;;  %v5772_v39 = vld [vmem:[#allocation27_spill] sm:$0xff]  ;;  %v5785_v50 = vld [vmem:[#allocation30_spill] sm:$0xff] }
 0x1ed   : > { %v3326_v14 = vadd.f32 %v3325_v26, %v3263_v41  ;;  %v3395_v58 = vadd.f32 %v3394_v24, %v3364_v60  ;;  %v3265_v28 = vadd.f32 %v3174_v62, %v2959_v43  ;;  %v2962_v23 = vadd.f32 %v4407_v2, %v2656_v46  ;;  %v3177_v40 = vpop.f32.mrf.mxu0  ;;  %v5779_v42 = vld [vmem:[#allocation31_spill] sm:$0xff] }
 0x1ee   : > { %3299 = vst [vmem:[%s5581_s30 + $0x70] sm:$0xff] %v3267_v30  ;;  %v2871_v5 = vpop.f32.mrf.mxu1  ;;  %v2657_v41 = vadd.f32 %v5762_v25, %v2350_v3  ;;  %v2357_v57 = vadd.f32 %v5772_v39, %v5771_v21  ;;  %v3369_v24 = vmul.f32 %v3267_v30, %v3267_v30 }
 0x1ef   : > { %v3396_v56 = vadd.f32 %v3395_v58, %v3365_v0  ;;  %3297 = vst [vmem:[%s5581_s30 + $0x60] sm:$0xff] %v3265_v28  ;;  %v3327_v33 = vadd.f32 %v3326_v14, %v3264_v8  ;;  %v3268_v22 = vadd.f32 %v4455_v29, %v2962_v23  ;;  %v4458_v34 = vpop.f32.mrf.mxu0  ;;  %v2960_v4 = vadd.f32 %v2871_v5, %v2654_v59  ;;  %v5773_v29 = vld [vmem:[#allocation22_spill] sm:$0xff]  ;;  %v5774_v59 = vld [vmem:[#allocation24_spill] sm:$0xff] }
 0x1f0   : > { %v4410_v63 = vpop.f32.mrf.mxu1  ;;  %v3367_v48 = vmul.f32 %v3265_v28, %v3265_v28  ;;  %v2663_v3 = vadd.f32 %v5773_v29, %v2356_v35 }
 0x1f1   : > { %v3328_v15 = vadd.f32 %v3327_v33, %v3265_v28  ;;  %v3397_v9 = vadd.f32 %v3396_v56, %v3366_v61  ;;  %3300 = vst [vmem:[%s5581_s30 + $0x78] sm:$0xff] %v3268_v22  ;;  %v2965_v38 = vadd.f32 %v4410_v63, %v2659_v16  ;;  %v3190_v49 = vpop.f32.mrf.mxu0  ;;  %v3266_v45 = vadd.f32 %v3177_v40, %v2960_v4  ;;  %v5777_v56 = vld [vmem:[#allocation26_spill] sm:$0xff] }
 0x1f2   : > { %v2884_v47 = vpop.f32.mrf.mxu1  ;;  %v3370_v58 = vmul.f32 %v3268_v22, %v3268_v22  ;;  %v2661_v16 = vadd.f32 %v5774_v59, %v2354_v6  ;;  %v2664_v33 = vadd.f32 %v5777_v56, %v2357_v57  ;;  %v5789_v59 = vld [vmem:[#allocation13_spill] sm:$0xff]  ;;  %v5791_v56 = vld [vmem:[#allocation36_spill] sm:$0xff] }
 0x1f3   : > { %v3398_v52 = vadd.f32 %v3397_v9, %v3367_v48  ;;  %v3271_v20 = vadd.f32 %v4458_v34, %v2965_v38  ;;  %v2963_v8 = vadd.f32 %v2884_v47, %v2657_v41  ;;  %v4459_v31 = vpop.f32.mrf.mxu0  ;;  %3298 = vst [vmem:[%s5581_s30 + $0x68] sm:$0xff] %v3266_v45  ;;  %v3329_v32 = vadd.f32 %v3328_v15, %v3266_v45  ;;  %v5782_v47 = vld [vmem:[#allocation33_spill] sm:$0xff] }
 0x1f4   : > { %v3368_v13 = vmul.f32 %v3266_v45, %v3266_v45  ;;  %v4411_v51 = vpop.f32.mrf.mxu1  ;;  %v5781_v45 = vld [vmem:[#allocation10_spill] sm:$0xff] }
 0x1f5   : > { %3303 = vst [vmem:[%s5581_s30 + $0x90] sm:$0xff] %v3271_v20  ;;  %v3269_v62 = vadd.f32 %v3190_v49, %v2963_v8  ;;  %v2966_v46 = vadd.f32 %v4411_v51, %v2660_v12  ;;  %v3193_v10 = vpop.f32.mrf.mxu0  ;;  %v3330_v26 = vadd.f32 %v3329_v32, %v3267_v30  ;;  %v2662_v12 = vadd.f32 %v5780_v17, %v2355_v1  ;;  %v5783_v8 = vld [vmem:[#allocation11_spill] sm:$0xff]  ;;  %v5796_v17 = vld [vmem:[#allocation42_spill] sm:$0xff] }
 0x1f6   : > { %v3399_v60 = vadd.f32 %v3398_v52, %v3368_v13  ;;  %v2887_v43 = vpop.f32.mrf.mxu1  ;;  %v2358_v11 = vadd.f32 %v5782_v47, %v5781_v45  ;;  %v3373_v13 = vmul.f32 %v3271_v20, %v3271_v20 }
 0x1f7   : > { %3301 = vst [vmem:[%s5581_s30 + $0x80] sm:$0xff] %v3269_v62  ;;  %v3272_v0 = vadd.f32 %v4459_v31, %v2966_v46  ;;  %v2964_v2 = vadd.f32 %v2887_v43, %v2658_v19  ;;  %v4462_v14 = vpop.f32.mrf.mxu0  ;;  %v3331_v23 = vadd.f32 %v3330_v26, %v3268_v22  ;;  %v3371_v25 = vmul.f32 %v3269_v62, %v3269_v62  ;;  %v5784_v31 = vld [vmem:[#allocation35_spill] sm:$0xff] }
 0x1f8   : > { %v3400_v28 = vadd.f32 %v3399_v60, %v3369_v24  ;;  %v4414_v40 = vpop.f32.mrf.mxu1  ;;  %v2360_v22 = vadd.f32 %v5779_v42, %v5778_v55  ;;  %v2361_v32 = vadd.f32 %v5784_v31, %v5783_v8  ;;  %v5786_v24 = vld [vmem:[#allocation32_spill] sm:$0xff]  ;;  %v5797_v31 = vld [vmem:[#allocation39_spill] sm:$0xff] }
 0x1f9   : > { %3304 = vst [vmem:[%s5581_s30 + $0x98] sm:$0xff] %v3272_v0  ;;  %v3270_v30 = vadd.f32 %v3193_v10, %v2964_v2  ;;  %v2969_v5 = vadd.f32 %v4414_v40, %v2663_v3  ;;  %v3206_v61 = vpop.f32.mrf.mxu0  ;;  %v3332_v34 = vadd.f32 %v3331_v23, %v3269_v62  ;;  %v3374_v10 = vmul.f32 %v3272_v0, %v3272_v0  ;;  %v5787_v60 = vld [vmem:[#allocation12_spill] sm:$0xff]  ;;  %v5788_v2 = vld [vmem:[#allocation34_spill] sm:$0xff] }
 0x1fa   : > { %v3401_v41 = vadd.f32 %v3400_v28, %v3370_v58  ;;  %v2900_v44 = vpop.f32.mrf.mxu1  ;;  %v2667_v18 = vadd.f32 %v5785_v50, %v2360_v22  ;;  %v2665_v26 = vadd.f32 %v5786_v24, %v2358_v11  ;;  %v2359_v43 = vadd.f32 %v5551_v27, %v5787_v60 }
 0x1fb   : > { %3302 = vst [vmem:[%s5581_s30 + $0x88] sm:$0xff] %v3270_v30  ;;  %v3372_v4 = vmul.f32 %v3270_v30, %v3270_v30  ;;  %v3275_v63 = vadd.f32 %v4462_v14, %v2969_v5  ;;  %v2967_v15 = vadd.f32 %v2900_v44, %v2661_v16  ;;  %v4463_v48 = vpop.f32.mrf.mxu0  ;;  %v3333_v38 = vadd.f32 %v3332_v34, %v3270_v30  ;;  %v5790_v16 = vld [vmem:[#allocation38_spill] sm:$0xff] }
 0x1fc   : > { %v3402_v9 = vadd.f32 %v3401_v41, %v3371_v25  ;;  %v4415_v49 = vpop.f32.mrf.mxu1  ;;  %v2668_v14 = vadd.f32 %v5788_v2, %v2361_v32  ;;  %v5792_v34 = vld [vmem:[#allocation14_spill] sm:$0xff]  ;;  %v5793_v25 = vld [vmem:[#allocation40_spill] sm:$0xff] }
 0x1fd   : > { %3307 = vst [vmem:[%s5581_s30 + $0xb0] sm:$0xff] %v3275_v63  ;;  %v3273_v54 = vadd.f32 %v3206_v61, %v2967_v15  ;;  %v2970_v35 = vadd.f32 %v4415_v49, %v2664_v33  ;;  %v3209_v52 = vpop.f32.mrf.mxu0  ;;  %v3334_v51 = vadd.f32 %v3333_v38, %v3271_v20  ;;  %v2666_v33 = vadd.f32 %v5791_v56, %v2359_v43  ;;  %v5795_v49 = vld [vmem:[#allocation15_spill] sm:$0xff] }
 0x1fe   : > { %v3403_v36 = vadd.f32 %v3402_v9, %v3372_v4  ;;  %v2903_v19 = vpop.f32.mrf.mxu1  ;;  %v2362_v41 = vadd.f32 %v5793_v25, %v5792_v34  ;;  %v3377_v22 = vmul.f32 %v3275_v63, %v3275_v63  ;;  %v5794_v9 = vld [vmem:[#allocation37_spill] sm:$0xff]  ;;  %v5800_v43 = vld [vmem:[#allocation43_spill] sm:$0xff] }
 0x1ff   : > { %3305 = vst [vmem:[%s5581_s30 + $0xa0] sm:$0xff] %v3273_v54  ;;  %v3276_v6 = vadd.f32 %v4463_v48, %v2970_v35  ;;  %v2968_v62 = vadd.f32 %v2903_v19, %v2662_v12  ;;  %v4466_v46 = vpop.f32.mrf.mxu0  ;;  %v3335_v39 = vadd.f32 %v3334_v51, %v3272_v0  ;;  %v3375_v28 = vmul.f32 %v3273_v54, %v3273_v54 }
 0x200   : > { %v3404_v21 = vadd.f32 %v3403_v36, %v3373_v13  ;;  %v4418_v57 = vpop.f32.mrf.mxu1  ;;  %v2364_v0 = vadd.f32 %v5790_v16, %v5789_v59  ;;  %v2365_v12 = vadd.f32 %v5796_v17, %v5795_v49  ;;  %v2669_v32 = vadd.f32 %v5797_v31, %v2362_v41  ;;  %v5798_v13 = vld [vmem:[#allocation16_spill] sm:$0xff] }
 0x201   : > { %3308 = vst [vmem:[%s5581_s30 + $0xb8] sm:$0xff] %v3276_v6  ;;  %v3274_v20 = vadd.f32 %v3209_v52, %v2968_v62  ;;  %v2973_v29 = vadd.f32 %v4418_v57, %v2667_v18  ;;  %v3222_v3 = vpop.f32.mrf.mxu0  ;;  %v3336_v58 = vadd.f32 %v3335_v39, %v3273_v54  ;;  %v3378_v54 = vmul.f32 %v3276_v6, %v3276_v6 }
 0x202   : > { %v3405_v23 = vadd.f32 %v3404_v21, %v3374_v10  ;;  %v2916_v40 = vpop.f32.mrf.mxu1  ;;  %v2671_v38 = vadd.f32 %v5794_v9, %v2364_v0  ;;  %v5799_v10 = vld [vmem:[#allocation41_spill] sm:$0xff] }
 0x203   : > { %3306 = vst [vmem:[%s5581_s30 + $0xa8] sm:$0xff] %v3274_v20  ;;  %v3376_v7 = vmul.f32 %v3274_v20, %v3274_v20  ;;  %v3279_v37 = vadd.f32 %v4466_v46, %v2973_v29  ;;  %v2971_v1 = vadd.f32 %v2916_v40, %v2665_v26  ;;  %v4467_v30 = vpop.f32.mrf.mxu0  ;;  %v3337_v5 = vadd.f32 %v3336_v58, %v3274_v20 }
 0x204   : > { %v3406_v27 = vadd.f32 %v3405_v23, %v3375_v28  ;;  %v4419_v61 = vpop.f32.mrf.mxu1  ;;  %v2672_v21 = vadd.f32 %v5799_v10, %v2365_v12 }
 0x205   : > { %3311 = vst [vmem:[%s5581_s30 + $0xd0] sm:$0xff] %v3279_v37  ;;  %v3277_v44 = vadd.f32 %v3222_v3, %v2971_v1  ;;  %v2974_v55 = vadd.f32 %v4419_v61, %v2668_v14  ;;  %v3225_v42 = vpop.f32.mrf.mxu0  ;;  %v3338_v4 = vadd.f32 %v3337_v5, %v3275_v63  ;;  %v2363_v63 = vadd.f32 %v5569_v53, %v5798_v13 }
 0x206   : > { %v3407_v15 = vadd.f32 %v3406_v27, %v3376_v7  ;;  %v2919_v48 = vpop.f32.mrf.mxu1  ;;  %v3381_v2 = vmul.f32 %v3279_v37, %v3279_v37 }
 0x207   : > { %3309 = vst [vmem:[%s5581_s30 + $0xc0] sm:$0xff] %v3277_v44  ;;  %v3280_v45 = vadd.f32 %v4467_v30, %v2974_v55  ;;  %v2972_v47 = vadd.f32 %v2919_v48, %v2666_v33  ;;  %v4470_v11 = vpop.f32.mrf.mxu0  ;;  %v3339_v52 = vadd.f32 %v3338_v4, %v3276_v6  ;;  %v3379_v18 = vmul.f32 %v3277_v44, %v3277_v44 }
 0x208   : > { %v3408_v35 = vadd.f32 %v3407_v15, %v3377_v22  ;;  %v4422_v8 = vpop.f32.mrf.mxu1  ;;  %v2670_v20 = vadd.f32 %v5800_v43, %v2363_v63 }
 0x209   : > { %3312 = vst [vmem:[%s5581_s30 + $0xd8] sm:$0xff] %v3280_v45  ;;  %v3278_v51 = vadd.f32 %v3225_v42, %v2972_v47  ;;  %v2977_v36 = vadd.f32 %v4422_v8, %v2671_v38  ;;  %v3238_v19 = vpop.f32.mrf.mxu0  ;;  %v3340_v50 = vadd.f32 %v3339_v52, %v3277_v44  ;;  %v3382_v59 = vmul.f32 %v3280_v45, %v3280_v45 }
 0x20a   : > { %v3409_v62 = vadd.f32 %v3408_v35, %v3378_v54  ;;  %v2932_v46 = vpop.f32.mrf.mxu1 }
 0x20b   : > { %3310 = vst [vmem:[%s5581_s30 + $0xc8] sm:$0xff] %v3278_v51  ;;  %v3380_v6 = vmul.f32 %v3278_v51, %v3278_v51  ;;  %v3283_v39 = vadd.f32 %v4470_v11, %v2977_v36  ;;  %v2975_v57 = vadd.f32 %v2932_v46, %v2669_v32  ;;  %v3341_v26 = vadd.f32 %v3340_v50, %v3278_v51  ;;  %v4471_v53 = vpop.f32.mrf.mxu0 }
 0x20c   : > { %v3410_v24 = vadd.f32 %v3409_v62, %v3379_v18  ;;  %v4423_v60 = vpop.f32.mrf.mxu1 }
 0x20d   : > { %3315 = vst [vmem:[%s5581_s30 + $0xf0] sm:$0xff] %v3283_v39  ;;  %v3281_v29 = vadd.f32 %v3238_v19, %v2975_v57  ;;  %v2978_v3 = vadd.f32 %v4423_v60, %v2672_v21  ;;  %v3342_v14 = vadd.f32 %v3341_v26, %v3279_v37  ;;  %v3241_v7 = vpop.f32.mrf.mxu0  ;;  %v3385_v34 = vmul.f32 %v3283_v39, %v3283_v39 }
 0x20e   : > { %v3411_v58 = vadd.f32 %v3410_v24, %v3380_v6  ;;  %v2935_v28 = vpop.f32.mrf.mxu1 }
 0x20f   : > { %3313 = vst [vmem:[%s5581_s30 + $0xe0] sm:$0xff] %v3281_v29  ;;  %v3284_v23 = vadd.f32 %v4471_v53, %v2978_v3  ;;  %v2976_v40 = vadd.f32 %v2935_v28, %v2670_v20  ;;  %v3343_v0 = vadd.f32 %v3342_v14, %v3280_v45  ;;  %v3383_v27 = vmul.f32 %v3281_v29, %v3281_v29 }
 0x210   : > { %v3412_v16 = vadd.f32 %v3411_v58, %v3381_v2 }
 0x211   : > { %3316 = vst [vmem:[%s5581_s30 + $0xf8] sm:$0xff] %v3284_v23  ;;  %v3282_v1 = vadd.f32 %v3241_v7, %v2976_v40  ;;  %v3344_v30 = vadd.f32 %v3343_v0, %v3281_v29  ;;  %v3386_v41 = vmul.f32 %v3284_v23, %v3284_v23 }
 0x212   : > { %v3413_v5 = vadd.f32 %v3412_v16, %v3382_v59 }
 0x213   : > { %3314 = vst [vmem:[%s5581_s30 + $0xe8] sm:$0xff] %v3282_v1  ;;  %v3384_v61 = vmul.f32 %v3282_v1, %v3282_v1  ;;  %v3345_v33 = vadd.f32 %v3344_v30, %v3282_v1 }
 0x214   : > { %v3414_v56 = vadd.f32 %v3413_v5, %v3383_v27 }
 0x215   : > { %v3346_v37 = vadd.f32 %v3345_v33, %v3283_v39 }
 0x216   : > { %v3415_v25 = vadd.f32 %v3414_v56, %v3384_v61 }
 0x217   : > { %v3347_v44 = vadd.f32 %v3346_v37, %v3284_v23 }
 0x218   : > { %v3416_v55 = vadd.f32 %v3415_v25, %v3385_v34 }
 0x219   : > { %v3348_v42 = vrot.slane %v3347_v44, 4 }
 0x21a   : > { %v3417_v22 = vadd.f32 %v3416_v55, %v3386_v41 }
 0x21b   : > { %v3349_v4 = vadd.f32 %v3348_v42, %v3347_v44 }
 0x21c   : > { %v3418_v15 = vrot.slane %v3417_v22, 4 }
 0x21d   : > { %v3350_v48 = vrot.slane %v3349_v4, 2 }
 0x21e   : > { %v3419_v9 = vadd.f32 %v3418_v15, %v3417_v22 }
 0x21f   : > { %v3351_v38 = vadd.f32 %v3350_v48, %v3349_v4 }
 0x220   : > { %v3420_v49 = vrot.slane %v3419_v9, 2 }
 0x221   : > { %v3352_v17 = vrot.slane %v3351_v38, 1 }
 0x222   : > { %v3421_v12 = vadd.f32 %v3420_v49, %v3419_v9 }
 0x223   : > { %v3353_v45 = vadd.f32 %v3352_v17, %v3351_v38 }
 0x224   : > { %v3422_v47 = vrot.slane %v3421_v12, 1 }
 0x225   : > { %3354 = vst [vmem:[%s265_s10] sm:$0x1] %v3353_v45 }
 0x226   : > { %v3423_v11 = vadd.f32 %v3422_v47, %v3421_v12 }
 0x228   : > { %3424 = vst [vmem:[%s268_s13] sm:$0x1] %v3423_v11 }
 0x229 PF: > { %s17_s21 = sadd.s32 1, %s4578_s21  }
 0x22a   : > { %p14_p4 = scmp.ge.s32.totalorder %s17_s21, 4  }
 0x22c   :  { %16 = sbr.rel (!%p14_p4) target bundleno = 1 (0x1), region = 100 }

// kernel: _lambda_.7
= control target key start
LH: loop header
LB: loop body
LE: loop exit
PB: predicated region body
PF: predicated region fallthrough
CT: control target
= control target key end

     0   :  { %12 = vsyncpa [#allocation4], 0  ;;  %s5988_s0 = inlined_call_operand.vmem [shape: bf16[2,16,16,128], index: 0, kind: input, shape index: {}]   ;;  %s5989_s1 = inlined_call_operand.vmem [shape: f32[1,128], index: 1, kind: input, shape index: {}]   ;;  %s5990_s2 = inlined_call_operand.vmem [shape: f32[1,128], index: 2, kind: input, shape index: {}]   ;;  %s5991_s3 = inlined_call_operand.vmem [shape: bf16[9,128,128], index: 3, kind: input, shape index: {}]   ;;  %s5992_s4 = inlined_call_operand.vmem [shape: f32[2,16,16,128], index: 4, kind: output, shape index: {0}]   ;;  %s5993_s5 = inlined_call_operand.hbm [shape: f32[2,1,128], index: 5, kind: output, shape index: {1}]   ;;  %s5994_s6 = inlined_call_operand.hbm [shape: f32[2,1,128], index: 6, kind: output, shape index: {2}]  }
   0x1   :  { %14 = vsyncpa [#allocation4 + $0x1], 0 }
   0x2   :  { %15 = vsyncpa [#allocation6], 0 }
   0x3   :  { %17 = vsyncpa [#allocation6 + $0x1], 0  ;;  %s4783_s21 = smov 0   ;;  %s4785_s22 = smov 0  }
   0x4   :  { %s4787_s23 = smov 0   ;;  %s4789_s24 = smov 0  }
   0x5 LB: > { %s4804_s25 = sadd.s32 4294967295, %s4742_s24   ;;  %s3573_s26 = sadd.s32 4294967294, %s4742_s24   ;;  %s4742_s24 = sphi %s4789_s24, %s6082_s24   ;;  %s4738_s23 = sphi %s4787_s23, %s6081_s23   ;;  %s4734_s22 = sphi %s4785_s22, %s6080_s22   ;;  %s4730_s21 = sphi %s4783_s21, %s6079_s21  }
   0x6   : > { %s4808_s27 = sadd.s32 1, %s4742_s24   ;;  %s145_s28 = sadd.s32 1, %s4738_s23 }
   0x7   : > { %s142_s29 = ssub.s32 %s4742_s24, %s4808_s27  ;;  %p155_p0 = scmp.ne.s32.totalorder %s4738_s23, %s4734_s22 }
   0x8   : > { %p143_p1 = scmp.eq.s32.totalorder %s142_s29, 0  ;;  %p156_p2 = scmp.eq.s32.totalorder %s4804_s25, 1 }
   0x9   : > { %p161_p3 = scmp.ne.s32.totalorder %s4734_s22, %s4730_s21  ;;  %p162_p4 = scmp.eq.s32.totalorder %s3573_s26, 1 }
   0xa   : > { %s4819_s30 = scalar_select %p143_p1, %s4738_s23, %s145_s28  }
   0xb   : > { %p4821_p5 = por %p156_p2, %p155_p0  ;;  %p4825_p6 = por %p162_p4, %p161_p3 }
   0xc   : > { %p3576_p7 = scmp.ge.s32.totalorder %s4742_s24, 1  ;;  %p223_p8 = scmp.lt.s32.totalorder %s4742_s24, 3 }
   0xe   : > { %p224_p9 = pnand %p3576_p7, %p223_p8 }
  0x10   : > { %227 = sbr.rel (%p224_p9) target bundleno = 596 (0x254), region = 36 }
  0x15   : > { %v4577_v0 = vld [vmem:[%s5991_s3 + $0x78] sm:$0xff]   ;;  %v4837_v1 = vld [vmem:[%s5991_s3 + $0x70] sm:$0xff]   ;;  %v4744_v2 = vmov 0.0   ;;  %p261_p10 = scmp.lt.s32.totalorder %s4804_s25, 1  ;;  %v4579_v3 = vld [vmem:[%s5991_s3 + $0x68] sm:$0xff]   ;;  %s4746_s20 = smov [#allocation3]  }
  0x16   : > { %510 = vst [vmem:[#allocation2] sm:$0xff] %v4744_v2  ;;  %511 = vst [vmem:[#allocation2 + $0x8] sm:$0xff] %v4744_v2  ;;  %4084 = vmatprep.subr.bf16.mxu0 %v4577_v0  ;;  %4516 = vmatprep.subr.bf16.mxu1 %v4577_v0  ;;  %v4580_v4 = vld [vmem:[%s5991_s3 + $0x60] sm:$0xff]   ;;  %v4581_v21 = vld [vmem:[%s5991_s3 + $0x58] sm:$0xff]  }
  0x17   : > { %512 = vst [vmem:[#allocation2 + $0x10] sm:$0x3] %v4744_v2  ;;  %513 = vst [vmem:[#allocation2 + $0x18] sm:$0xff] %v4744_v2  ;;  %4085 = vmatpush3.bf16.msra.mxu0 %v4577_v0  ;;  %4524 = vmatpush3.bf16.msra.mxu1 %v4577_v0  ;;  %s4841_s13 = scalar_select %p261_p10, %s4804_s25, 1  ;;  %v4863_v11 = vld [vmem:[%s5989_s1] ss:$0 sm:$0xff] }
  0x18   : > { %514 = vst [vmem:[#allocation2 + $0x20] sm:$0xff] %v4744_v2  ;;  %515 = vst [vmem:[#allocation2 + $0x28] sm:$0x3] %v4744_v2  ;;  %4086 = vmatprep.subr.bf16.mxu0 %v4837_v1  ;;  %4517 = vmatprep.subr.bf16.mxu1 %v4837_v1  ;;  %v4868_v12 = vld [vmem:[%s5990_s2] ss:$0 sm:$0xff]  ;;  %v4582_v28 = vld [vmem:[%s5991_s3 + $0x50] sm:$0xff]  }
  0x19   : > { %516 = vst [vmem:[#allocation2 + $0x30] sm:$0xff] %v4744_v2  ;;  %517 = vst [vmem:[#allocation2 + $0x38] sm:$0xff] %v4744_v2  ;;  %s3787_s16 = sshll.u32 %s4841_s13, 7  ;;  %v4583_v48 = vld [vmem:[%s5991_s3 + $0x48] sm:$0xff]   ;;  %s3788_s17 = sshll.u32 %s4841_s13, 8 }
  0x1a   : > { %518 = vst [vmem:[#allocation2 + $0x40] sm:$0x3] %v4744_v2  ;;  %519 = vst [vmem:[#allocation2 + $0x48] sm:$0xff] %v4744_v2  ;;  %s4852_s19 = scalar_lea.vmem %s5988_s0, %s3787_s16  ;;  %s5785_s26 = scalar_lea.vmem %s5992_s4, %s3788_s17 }
  0x1b   : > { %520 = vst [vmem:[#allocation2 + $0x50] sm:$0xff] %v4744_v2  ;;  %521 = vst [vmem:[#allocation2 + $0x58] sm:$0x3] %v4744_v2  ;;  %4087 = vmatpush3.bf16.msra.mxu0 %v4837_v1  ;;  %4525 = vmatpush3.bf16.msra.mxu1 %v4837_v1  ;;  %v3859_v7 = vld [vmem:[%s4852_s19 + $0x38] sm:$0xff]   ;;  %v3790_v13 = vld [vmem:[%s4852_s19] sm:$0xff]   ;;  %s5906_s13 = sand.u32 1, %s4734_s22  }
  0x1c   : > { %522 = vst [vmem:[#allocation2 + $0x60] sm:$0xff] %v4744_v2  ;;  %523 = vst [vmem:[#allocation2 + $0x68] sm:$0xff] %v4744_v2  ;;  %4088 = vmatprep.subr.bf16.mxu0 %v4579_v3  ;;  %4518 = vmatprep.subr.bf16.mxu1 %v4579_v3  ;;  %v3819_v9 = vunpack.c.l.bf16 %v3859_v7  ;;  %v3820_v10 = vunpack.c.h.bf16 %v3859_v7  ;;  %v3791_v14 = vunpack.c.l.bf16 %v3790_v13  ;;  %v3792_v15 = vunpack.c.h.bf16 %v3790_v13  ;;  %v3860_v16 = vld [vmem:[%s4852_s19 + $0x40] sm:$0xff]   ;;  %v3853_v31 = vld [vmem:[%s4852_s19 + $0x8] sm:$0xff]   ;;  %s254_s28 = scalar_lea.vmem [#allocation3], %s5906_s13  ;;  %s260_s9 = scalar_lea.vmem [#allocation5], %s5906_s13 }
  0x1d   : > { %524 = vst [vmem:[#allocation2 + $0x70] sm:$0x3] %v4744_v2  ;;  %525 = vst [vmem:[#allocation2 + $0x78] sm:$0xff] %v4744_v2  ;;  %v661_v5 = vld [vmem:[#allocation2 + $0x1] sm:$0xff]  ;;  %v3823_v19 = vunpack.c.l.bf16 %v3860_v16  ;;  %v3824_v20 = vunpack.c.h.bf16 %v3860_v16  ;;  %v3795_v44 = vunpack.c.l.bf16 %v3853_v31  ;;  %v3854_v45 = vld [vmem:[%s4852_s19 + $0x10] sm:$0xff]   ;;  %v3796_v50 = vunpack.c.h.bf16 %v3853_v31  ;;  %s3452_s29 = sshll.u32 %s254_s28, 4  ;;  %s5918_s29 = int_to_ptr.vmem [resolvable:$true] %s3452_s29 }
  0x1e   : > { %526 = vst [vmem:[#allocation2 + $0x80] sm:$0xff] %v4744_v2  ;;  %527 = vst [vmem:[#allocation2 + $0x88] sm:$0x3] %v4744_v2  ;;  %v662_v6 = vld [vmem:[#allocation2 + $0x9] sm:$0xff]  ;;  %v358_v17 = vmul.f32 %v3819_v9, %v4863_v11  ;;  %v359_v18 = vmul.f32 %v3820_v10, %v4863_v11  ;;  %v344_v22 = vmul.f32 %v3791_v14, %v4863_v11  ;;  %v3799_v56 = vunpack.c.l.bf16 %v3854_v45  ;;  %v4585_v10 = vld [vmem:[%s5991_s3 + $0x38] sm:$0xff]   ;;  %s3465_s10 = sshll.u32 %s260_s9, 4  ;;  %s5925_s10 = int_to_ptr.vmem [resolvable:$true] %s3465_s10 }
  0x1f   : > { %528 = vst [vmem:[#allocation2 + $0x90] sm:$0xff] %v4744_v2  ;;  %529 = vst [vmem:[#allocation2 + $0x98] sm:$0xff] %v4744_v2  ;;  %v693_v8 = vpack.c.bf16 %v662_v6, %v661_v5  ;;  %4089 = vmatpush3.bf16.msra.mxu0 %v4579_v3  ;;  %4526 = vmatpush3.bf16.msra.mxu1 %v4579_v3  ;;  %v345_v23 = vmul.f32 %v3792_v15, %v4863_v11  ;;  %v3861_v40 = vld [vmem:[%s4852_s19 + $0x48] sm:$0xff]   ;;  %v3862_v53 = vld [vmem:[%s4852_s19 + $0x50] sm:$0xff]   ;;  %v3800_v57 = vunpack.c.h.bf16 %v3854_v45  ;;  %s3433_s17 = scalar_lea.sflag [#allocation4], %s5906_s13  ;;  %s4652_s18 = scalar_lea.vmem %s5918_s29, 16 }
  0x20   : > { %530 = vst [vmem:[#allocation2 + $0xa0] sm:$0x3] %v4744_v2  ;;  %531 = vst [vmem:[#allocation2 + $0xa8] sm:$0xff] %v4744_v2  ;;  %4090 = vmatprep.subr.bf16.mxu0 %v4580_v4  ;;  %4519 = vmatprep.subr.bf16.mxu1 %v4580_v4  ;;  %v396_v24 = vadd.f32 %v4868_v12, %v358_v17  ;;  %v397_v25 = vadd.f32 %v4868_v12, %v359_v18  ;;  %v3827_v52 = vunpack.c.l.bf16 %v3861_v40  ;;  %v4586_v13 = vld [vmem:[%s5991_s3 + $0xb8] sm:$0xff]   ;;  %p4653_p11 = scmp.ne.s32.totalorder %s5918_s29, %s4652_s18 }
  0x21   : > { %532 = vst [vmem:[#allocation2 + $0xb0] sm:$0xff] %v4744_v2  ;;  %533 = vst [vmem:[#allocation2 + $0xb8] sm:$0x3] %v4744_v2  ;;  %4100 = vmatprep.mubr.bf16.mxu0 %v693_v8  ;;  %v360_v26 = vmul.f32 %v3823_v19, %v4863_v11  ;;  %v361_v27 = vmul.f32 %v3824_v20, %v4863_v11  ;;  %v382_v29 = vadd.f32 %v4868_v12, %v344_v22  ;;  %v3855_v19 = vld [vmem:[%s4852_s19 + $0x18] sm:$0xff]  }
  0x22   : > { %534 = vst [vmem:[#allocation2 + $0xc0] sm:$0xff] %v4744_v2  ;;  %535 = vst [vmem:[#allocation2 + $0xc8] sm:$0xff] %v4744_v2  ;;  %v383_v30 = vadd.f32 %v4868_v12, %v345_v23  ;;  %vm428_vm0 = vcmp.ge.f32.partialorder %v396_v24, 0.0  ;;  %vm429_vm1 = vcmp.ge.f32.partialorder %v397_v25, 0.0  ;;  %v460_v32 = vmul.f32 0.2, %v396_v24  ;;  %p4654_p12 = pnand %p4653_p11, %p4821_p5 }
  0x23   : > { %536 = vst [vmem:[#allocation2 + $0xd0] sm:$0x3] %v4744_v2  ;;  %537 = vst [vmem:[#allocation2 + $0xd8] sm:$0xff] %v4744_v2  ;;  %4091 = vmatpush3.bf16.msra.mxu0 %v4580_v4  ;;  %4527 = vmatpush3.bf16.msra.mxu1 %v4580_v4  ;;  %v461_v33 = vmul.f32 0.2, %v397_v25  ;;  %vm414_vm2 = vcmp.ge.f32.partialorder %v382_v29, 0.0  ;;  %v398_v38 = vadd.f32 %v4868_v12, %v360_v26  ;;  %v3828_v55 = vunpack.c.h.bf16 %v3861_v40 }
  0x24   : > { %538 = vst [vmem:[#allocation2 + $0xe0] sm:$0xff] %v4744_v2  ;;  %539 = vst [vmem:[#allocation2 + $0xe8] sm:$0x3] %v4744_v2  ;;  %4092 = vmatprep.subr.bf16.mxu0 %v4581_v21  ;;  %4520 = vmatprep.subr.bf16.mxu1 %v4581_v21  ;;  %vm415_vm3 = vcmp.ge.f32.partialorder %v383_v30, 0.0  ;;  %v446_v34 = vmul.f32 0.2, %v382_v29  ;;  %v492_v36 = vsel %vm428_vm0, %v396_v24, %v460_v32  ;;  %v3831_v1 = vunpack.c.l.bf16 %v3862_v53  ;;  %p4655_p13 = pneg %p4654_p12 }
  0x25   : > { %540 = vst [vmem:[#allocation2 + $0xf0] sm:$0xff] %v4744_v2  ;;  %541 = vst [vmem:[#allocation2 + $0xf8] sm:$0xff] %v4744_v2  ;;  %v447_v35 = vmul.f32 0.2, %v383_v30  ;;  %v493_v37 = vsel %vm429_vm1, %v397_v25, %v461_v33  ;;  %v399_v39 = vadd.f32 %v4868_v12, %v361_v27  ;;  %vm430_vm4 = vcmp.ge.f32.partialorder %v398_v38, 0.0  ;;  %v3863_v23 = vld [vmem:[%s4852_s19 + $0x58] sm:$0xff]  }
  0x26   : > { %542 = vst [vmem:[#allocation2 + $0x100] sm:$0x3] %v4744_v2  ;;  %543 = vst [vmem:[#allocation2 + $0x108] sm:$0xff] %v4744_v2  ;;  %v701_v41 = vpack.c.bf16 %v493_v37, %v492_v36  ;;  %v4892_v42 = vsel %vm414_vm2, %v382_v29, %v446_v34  ;;  %v462_v47 = vmul.f32 0.2, %v398_v38  ;;  %v346_v51 = vmul.f32 %v3795_v44, %v4863_v11  ;;  %v4941_v27 = vld [vmem:[%s4852_s19 + $0x20] sm:$0xff]  }
  0x27   : > { %544 = vst [vmem:[#allocation2 + $0x110] sm:$0xff] %v4744_v2  ;;  %545 = vst [vmem:[#allocation2 + $0x118] sm:$0x3] %v4744_v2  ;;  %v4894_v43 = vsel %vm415_vm3, %v383_v30, %v447_v35  ;;  %4093 = vmatpush3.bf16.msra.mxu0 %v4581_v21  ;;  %4528 = vmatpush3.bf16.msra.mxu1 %v4581_v21  ;;  %vm431_vm5 = vcmp.ge.f32.partialorder %v399_v39, 0.0  ;;  %v463_v49 = vmul.f32 0.2, %v399_v39  ;;  %v3832_v9 = vunpack.c.h.bf16 %v3862_v53 }
  0x28   : > { %546 = vst [vmem:[#allocation2 + $0x120] sm:$0xff] %v4744_v2  ;;  %547 = vst [vmem:[#allocation2 + $0x128] sm:$0xff] %v4744_v2  ;;  %v694_v46 = vpack.c.bf16 %v4894_v43, %v4892_v42  ;;  %4094 = vmatprep.subr.bf16.mxu0 %v4582_v28  ;;  %4521 = vmatprep.subr.bf16.mxu1 %v4582_v28  ;;  %v4906_v54 = vsel %vm430_vm4, %v398_v38, %v462_v47  ;;  %v4587_v32 = vld [vmem:[%s5991_s3 + $0x30] sm:$0xff]   ;;  %v3803_v34 = vunpack.c.l.bf16 %v3855_v19 }
  0x29   : > { %548 = vst [vmem:[#allocation2 + $0x130] sm:$0x3] %v4744_v2  ;;  %549 = vst [vmem:[#allocation2 + $0x138] sm:$0xff] %v4744_v2  ;;  %4116 = vmatprep.mubr.bf16.mxu1 %v701_v41  ;;  %v4908_v58 = vsel %vm431_vm5, %v399_v39, %v463_v49  ;;  %v347_v59 = vmul.f32 %v3796_v50, %v4863_v11  ;;  %v384_v60 = vadd.f32 %v4868_v12, %v346_v51 }
  0x2a   : > { %550 = vst [vmem:[#allocation2 + $0x140] sm:$0xff] %v4744_v2  ;;  %551 = vst [vmem:[#allocation2 + $0x148] sm:$0x3] %v4744_v2  ;;  %v362_v61 = vmul.f32 %v3827_v52, %v4863_v11  ;;  %v702_v62 = vpack.c.bf16 %v4908_v58, %v4906_v54  ;;  %v363_v63 = vmul.f32 %v3828_v55, %v4863_v11  ;;  %v3804_v35 = vunpack.c.h.bf16 %v3855_v19 }
  0x2b   : > { %552 = vst [vmem:[#allocation2 + $0x150] sm:$0xff] %v4744_v2  ;;  %553 = vst [vmem:[#allocation2 + $0x158] sm:$0xff] %v4744_v2  ;;  %4095 = vmatpush3.bf16.msra.mxu0 %v4582_v28  ;;  %4529 = vmatpush3.bf16.msra.mxu1 %v4582_v28  ;;  %v348_v0 = vmul.f32 %v3799_v56, %v4863_v11  ;;  %v385_v3 = vadd.f32 %v4868_v12, %v347_v59  ;;  %vm416_vm6 = vcmp.ge.f32.partialorder %v384_v60, 0.0 }
  0x2c   : > { %554 = vst [vmem:[#allocation2 + $0x160] sm:$0x3] %v4744_v2  ;;  %555 = vst [vmem:[#allocation2 + $0x168] sm:$0xff] %v4744_v2  ;;  %4096 = vmatprep.subr.bf16.mxu0 %v4583_v48  ;;  %4522 = vmatprep.subr.bf16.mxu1 %v4583_v48  ;;  %v448_v4 = vmul.f32 0.2, %v384_v60  ;;  %v400_v5 = vadd.f32 %v4868_v12, %v362_v61  ;;  %v401_v6 = vadd.f32 %v4868_v12, %v363_v63  ;;  %v4592_v63 = vld [vmem:[%s5991_s3 + $0xa0] sm:$0xff]  }
  0x2d   : > { %556 = vst [vmem:[#allocation2 + $0x170] sm:$0xff] %v4744_v2  ;;  %557 = vst [vmem:[#allocation2 + $0x178] sm:$0x3] %v4744_v2  ;;  %v349_v7 = vmul.f32 %v3800_v57, %v4863_v11  ;;  %v386_v8 = vadd.f32 %v4868_v12, %v348_v0  ;;  %vm417_vm7 = vcmp.ge.f32.partialorder %v385_v3, 0.0  ;;  %v449_v14 = vmul.f32 0.2, %v385_v3 }
  0x2e   : > { %558 = vst [vmem:[#allocation2 + $0x180] sm:$0xff] %v4744_v2  ;;  %559 = vst [vmem:[#allocation2 + $0x188] sm:$0xff] %v4744_v2  ;;  %v480_v15 = vsel %vm416_vm6, %v384_v60, %v448_v4  ;;  %vm432_vm8 = vcmp.ge.f32.partialorder %v400_v5, 0.0  ;;  %vm433_vm9 = vcmp.ge.f32.partialorder %v401_v6, 0.0  ;;  %v464_v16 = vmul.f32 0.2, %v400_v5 }
  0x2f   : > { %560 = vst [vmem:[#allocation2 + $0x190] sm:$0x3] %v4744_v2  ;;  %561 = vst [vmem:[#allocation2 + $0x198] sm:$0xff] %v4744_v2  ;;  %4097 = vmatpush3.bf16.msra.mxu0 %v4583_v48  ;;  %4530 = vmatpush3.bf16.msra.mxu1 %v4583_v48  ;;  %v465_v17 = vmul.f32 0.2, %v401_v6  ;;  %v387_v18 = vadd.f32 %v4868_v12, %v349_v7  ;;  %v481_v20 = vsel %vm417_vm7, %v385_v3, %v449_v14  ;;  %v3864_v48 = vld [vmem:[%s4852_s19 + $0x60] sm:$0xff]  }
  0x30   : > { %562 = vst [vmem:[#allocation2 + $0x1a0] sm:$0xff] %v4744_v2  ;;  %563 = vst [vmem:[#allocation2 + $0x1a8] sm:$0x3] %v4744_v2  ;;  %v4584_v2 = vld [vmem:[%s5991_s3 + $0x40] sm:$0xff]   ;;  %vm418_vm10 = vcmp.ge.f32.partialorder %v386_v8, 0.0  ;;  %v364_v22 = vmul.f32 %v3831_v1, %v4863_v11  ;;  %v4937_v24 = vpack.c.bf16 %v481_v20, %v480_v15  ;;  %v496_v25 = vsel %vm432_vm8, %v400_v5, %v464_v16  ;;  %v3857_v5 = vld [vmem:[%s4852_s19 + $0x28] sm:$0xff]  }
  0x31   : > { %579 = vst [vmem:[#allocation2 + $0xc1] sm:$0xff] %v492_v36  ;;  %580 = vst [vmem:[#allocation2 + $0xc9] sm:$0xff] %v493_v37  ;;  %4098 = vmatprep.subr.bf16.mxu0 %v4584_v2  ;;  %4523 = vmatprep.subr.bf16.mxu1 %v4584_v2  ;;  %v450_v21 = vmul.f32 0.2, %v386_v8  ;;  %v497_v26 = vsel %vm433_vm9, %v401_v6, %v465_v17  ;;  %vm419_vm11 = vcmp.ge.f32.partialorder %v387_v18, 0.0  ;;  %v3835_v36 = vunpack.c.l.bf16 %v3863_v23  ;;  %v4588_v37 = vld [vmem:[%s5991_s3 + $0xb0] sm:$0xff]  }
  0x32   : > { %565 = vst [vmem:[#allocation2 + $0x19] sm:$0xff] %v4892_v42  ;;  %566 = vst [vmem:[#allocation2 + $0x21] sm:$0xff] %v4894_v43  ;;  %v703_v28 = vpack.c.bf16 %v497_v26, %v496_v25  ;;  %v451_v29 = vmul.f32 0.2, %v387_v18  ;;  %v365_v31 = vmul.f32 %v3832_v9, %v4863_v11  ;;  %v402_v33 = vadd.f32 %v4868_v12, %v364_v22  ;;  %v4593_v22 = vld [vmem:[%s5991_s3 + $0x18] sm:$0xff]  }
  0x33   : > { %581 = vst [vmem:[#allocation2 + $0xd9] sm:$0xff] %v4906_v54  ;;  %582 = vst [vmem:[#allocation2 + $0xe1] sm:$0xff] %v4908_v58  ;;  %v482_v30 = vsel %vm418_vm10, %v386_v8, %v450_v21  ;;  %4099 = vmatpush3.bf16.msra.mxu0 %v4584_v2  ;;  %4531 = vmatpush3.bf16.msra.mxu1 %v4584_v2  ;;  %v3836_v40 = vunpack.c.h.bf16 %v3863_v23  ;;  %v3807_v41 = vunpack.c.l.bf16 %v4941_v27  ;;  %v3808_v42 = vunpack.c.h.bf16 %v4941_v27  ;;  %v4590_v54 = vld [vmem:[%s5991_s3 + $0xa8] sm:$0xff]   ;;  %v4594_v23 = vld [vmem:[%s5991_s3 + $0x98] sm:$0xff]  }
  0x34   : > { %567 = vst [vmem:[#allocation2 + $0x31] sm:$0xff] %v480_v15  ;;  %568 = vst [vmem:[#allocation2 + $0x39] sm:$0xff] %v481_v20  ;;  %4132 = vmatprep.subr.bf16.mxu1 %v4585_v10  ;;  %4180 = vmatprep.subr.bf16.mxu0 %v4586_v13  ;;  %v483_v38 = vsel %vm419_vm11, %v387_v18, %v451_v29  ;;  %v403_v39 = vadd.f32 %v4868_v12, %v365_v31  ;;  %vm434_vm12 = vcmp.ge.f32.partialorder %v402_v33, 0.0  ;;  %v3865_v29 = vld [vmem:[%s4852_s19 + $0x68] sm:$0xff]  }
  0x35   : > { %583 = vst [vmem:[#allocation2 + $0xf1] sm:$0xff] %v496_v25  ;;  %584 = vst [vmem:[#allocation2 + $0xf9] sm:$0xff] %v497_v26  ;;  %v4954_v44 = vpack.c.bf16 %v483_v38, %v482_v30  ;;  %v466_v45 = vmul.f32 0.2, %v402_v33  ;;  %v350_v47 = vmul.f32 %v3803_v34, %v4863_v11  ;;  %v351_v50 = vmul.f32 %v3804_v35, %v4863_v11 }
  0x36   : > { %569 = vst [vmem:[#allocation2 + $0x49] sm:$0xff] %v482_v30  ;;  %570 = vst [vmem:[#allocation2 + $0x51] sm:$0xff] %v483_v38  ;;  %4101 = vmatmul.mubr.bf16.vlgmr.msra.gmra.mxu0 %v694_v46  ;;  %4117 = vmatmul.mubr.bf16.vlgmr.msra.gmra.mxu1 %v702_v62  ;;  %vm435_vm13 = vcmp.ge.f32.partialorder %v403_v39, 0.0  ;;  %v467_v49 = vmul.f32 0.2, %v403_v39  ;;  %v366_v51 = vmul.f32 %v3835_v36, %v4863_v11  ;;  %v4589_v46 = vld [vmem:[%s5991_s3 + $0x28] sm:$0xff]   ;;  %v3839_v58 = vunpack.c.l.bf16 %v3864_v48 }
  0x37   : > { %4133 = vmatpush3.bf16.msra.mxu1 %v4585_v10  ;;  %4181 = vmatpush3.bf16.msra.mxu0 %v4586_v13  ;;  %v498_v52 = vsel %vm434_vm12, %v402_v33, %v466_v45  ;;  %v388_v53 = vadd.f32 %v4868_v12, %v350_v47  ;;  %v367_v55 = vmul.f32 %v3836_v40, %v4863_v11  ;;  %v4591_v62 = vld [vmem:[%s5991_s3 + $0x20] sm:$0xff]   ;;  %v3840_v9 = vunpack.c.h.bf16 %v3864_v48  ;;  %v3858_v40 = vld [vmem:[%s4852_s19 + $0x30] sm:$0xff]  }
  0x38   : > { %4134 = vmatprep.subr.bf16.mxu1 %v4587_v32  ;;  %4182 = vmatprep.subr.bf16.mxu0 %v4588_v37  ;;  %v499_v43 = vsel %vm435_vm13, %v403_v39, %v467_v49  ;;  %585 = vst [vmem:[#allocation2 + $0x109] sm:$0xff] %v498_v52  ;;  %v389_v56 = vadd.f32 %v4868_v12, %v351_v50  ;;  %v3811_v19 = vunpack.c.l.bf16 %v3857_v5  ;;  %v3812_v25 = vunpack.c.h.bf16 %v3857_v5  ;;  %v4596_v45 = vld [vmem:[%s5991_s3 + $0x90] sm:$0xff]  }
  0x39   : > { %v404_v57 = vadd.f32 %v4868_v12, %v366_v51  ;;  %4104 = vmatprep.mubr.bf16.mxu0 %v4937_v24  ;;  %4120 = vmatprep.mubr.bf16.mxu1 %v703_v28  ;;  %586 = vst [vmem:[#allocation2 + $0x111] sm:$0xff] %v499_v43  ;;  %v704_v59 = vpack.c.bf16 %v499_v43, %v498_v52  ;;  %vm420_vm14 = vcmp.ge.f32.partialorder %v388_v53, 0.0  ;;  %v452_v60 = vmul.f32 0.2, %v388_v53  ;;  %v3866_v49 = vld [vmem:[%s4852_s19 + $0x70] sm:$0xff]  }
  0x3a   : > { %v405_v61 = vadd.f32 %v4868_v12, %v367_v55  ;;  %vm421_vm15 = vcmp.ge.f32.partialorder %v389_v56, 0.0  ;;  %v453_v0 = vmul.f32 0.2, %v389_v56  ;;  %v352_v4 = vmul.f32 %v3807_v41, %v4863_v11  ;;  %v4595_v51 = vld [vmem:[%s5991_s3 + $0x10] sm:$0xff]  }
  0x3b   : > { %vm436_vm0 = vcmp.ge.f32.partialorder %v404_v57, 0.0  ;;  %v468_v1 = vmul.f32 0.2, %v404_v57  ;;  %4135 = vmatpush3.bf16.msra.mxu1 %v4587_v32  ;;  %4183 = vmatpush3.bf16.msra.mxu0 %v4588_v37  ;;  %v484_v2 = vsel %vm420_vm14, %v388_v53, %v452_v60  ;;  %v353_v8 = vmul.f32 %v3808_v42, %v4863_v11 }
  0x3c   : > { %vm437_vm1 = vcmp.ge.f32.partialorder %v405_v61, 0.0  ;;  %v469_v3 = vmul.f32 0.2, %v405_v61  ;;  %4136 = vmatprep.subr.bf16.mxu1 %v4589_v46  ;;  %4184 = vmatprep.subr.bf16.mxu0 %v4590_v54  ;;  %v485_v6 = vsel %vm421_vm15, %v389_v56, %v453_v0  ;;  %571 = vst [vmem:[#allocation2 + $0x61] sm:$0xff] %v484_v2  ;;  %v390_v14 = vadd.f32 %v4868_v12, %v352_v4 }
  0x3d   : > { %v500_v7 = vsel %vm436_vm0, %v404_v57, %v468_v1  ;;  %572 = vst [vmem:[#allocation2 + $0x69] sm:$0xff] %v485_v6  ;;  %v4988_v10 = vpack.c.bf16 %v485_v6, %v484_v2  ;;  %v368_v15 = vmul.f32 %v3839_v58, %v4863_v11  ;;  %v391_v17 = vadd.f32 %v4868_v12, %v353_v8  ;;  %v4597_v2 = vld [vmem:[%s5991_s3 + $0x8] sm:$0xff]  }
  0x3e   : > { %v501_v13 = vsel %vm437_vm1, %v405_v61, %v469_v3  ;;  %587 = vst [vmem:[#allocation2 + $0x121] sm:$0xff] %v500_v7  ;;  %4105 = vmatmul.mubr.bf16.gmra.mxu0 %v4954_v44  ;;  %4121 = vmatmul.mubr.bf16.gmra.mxu1 %v704_v59  ;;  %v369_v18 = vmul.f32 %v3840_v9, %v4863_v11  ;;  %vm422_vm2 = vcmp.ge.f32.partialorder %v390_v14, 0.0  ;;  %v454_v20 = vmul.f32 0.2, %v390_v14  ;;  %v4599_v9 = vld [vmem:[%s5991_s3] sm:$0xff]  }
  0x3f   : > { %588 = vst [vmem:[#allocation2 + $0x129] sm:$0xff] %v501_v13  ;;  %v4993_v16 = vpack.c.bf16 %v501_v13, %v500_v7  ;;  %4137 = vmatpush3.bf16.msra.mxu1 %v4589_v46  ;;  %4185 = vmatpush3.bf16.msra.mxu0 %v4590_v54  ;;  %v406_v21 = vadd.f32 %v4868_v12, %v368_v15  ;;  %vm423_vm3 = vcmp.ge.f32.partialorder %v391_v17, 0.0  ;;  %v455_v26 = vmul.f32 0.2, %v391_v17  ;;  %v4600_v13 = vld [vmem:[%s5991_s3 + $0x80] sm:$0xff]  }
  0x40   : > { %4138 = vmatprep.subr.bf16.mxu1 %v4591_v62  ;;  %4186 = vmatprep.subr.bf16.mxu0 %v4592_v63  ;;  %v407_v27 = vadd.f32 %v4868_v12, %v369_v18  ;;  %v354_v28 = vmul.f32 %v3811_v19, %v4863_v11  ;;  %v486_v30 = vsel %vm422_vm2, %v390_v14, %v454_v20  ;;  %v3843_v39 = vunpack.c.l.bf16 %v3865_v29 }
  0x41   : > { %4108 = vmatprep.mubr.bf16.mxu0 %v4988_v10  ;;  %4124 = vmatprep.mubr.bf16.mxu1 %v4993_v16  ;;  %vm438_vm4 = vcmp.ge.f32.partialorder %v406_v21, 0.0  ;;  %v470_v31 = vmul.f32 0.2, %v406_v21  ;;  %v355_v32 = vmul.f32 %v3812_v25, %v4863_v11  ;;  %v487_v33 = vsel %vm423_vm3, %v391_v17, %v455_v26  ;;  %573 = vst [vmem:[#allocation2 + $0x79] sm:$0xff] %v486_v30  ;;  %v1144_v17 = vld [vmem:[#allocation2 + $0x2] sm:$0xff] }
  0x42   : > { %vm439_vm5 = vcmp.ge.f32.partialorder %v407_v27, 0.0  ;;  %v471_v34 = vmul.f32 0.2, %v407_v27  ;;  %v392_v35 = vadd.f32 %v4868_v12, %v354_v28  ;;  %574 = vst [vmem:[#allocation2 + $0x81] sm:$0xff] %v487_v33  ;;  %v5011_v36 = vpack.c.bf16 %v487_v33, %v486_v30  ;;  %v4601_v30 = vld [vmem:[%s5991_s3 + $0xf8] sm:$0xff]   ;;  %v600_v33 = vld [vmem:[#allocation2 + $0x20] sm:$0xff] }
  0x43   : > { %4139 = vmatpush3.bf16.msra.mxu1 %v4591_v62  ;;  %4187 = vmatpush3.bf16.msra.mxu0 %v4592_v63  ;;  %v502_v37 = vsel %vm438_vm4, %v406_v21, %v470_v31  ;;  %v393_v38 = vadd.f32 %v4868_v12, %v355_v32  ;;  %v3844_v48 = vunpack.c.h.bf16 %v3865_v29  ;;  %v370_v53 = vmul.f32 %v3843_v39, %v4863_v11  ;;  %v4598_v62 = vld [vmem:[%s5991_s3 + $0x88] sm:$0xff]   ;;  %v599_v31 = vld [vmem:[#allocation2 + $0x18] sm:$0xff] }
  0x44   : > { %v503_v41 = vsel %vm439_vm5, %v407_v27, %v471_v34  ;;  %589 = vst [vmem:[#allocation2 + $0x139] sm:$0xff] %v502_v37  ;;  %4140 = vmatprep.subr.bf16.mxu1 %v4593_v22  ;;  %4188 = vmatprep.subr.bf16.mxu0 %v4594_v23  ;;  %vm424_vm6 = vcmp.ge.f32.partialorder %v392_v35, 0.0  ;;  %v456_v47 = vmul.f32 0.2, %v392_v35  ;;  %v3815_v43 = vunpack.c.l.bf16 %v3858_v40  ;;  %v4602_v32 = vld [vmem:[%s5991_s3 + $0x138] sm:$0xff]  }
  0x45   : > { %590 = vst [vmem:[#allocation2 + $0x141] sm:$0xff] %v503_v41  ;;  %v5019_v50 = vpack.c.bf16 %v503_v41, %v502_v37  ;;  %vm425_vm7 = vcmp.ge.f32.partialorder %v393_v38, 0.0  ;;  %v457_v52 = vmul.f32 0.2, %v393_v38  ;;  %v371_v42 = vmul.f32 %v3844_v48, %v4863_v11  ;;  %v1146_v34 = vld [vmem:[#allocation2 + $0x1a] sm:$0xff]  ;;  %v1148_v41 = vld [vmem:[#allocation2 + $0x32] sm:$0xff] }
  0x46   : > { %4109 = vmatmul.mubr.bf16.gmra.mxu0 %v5011_v36  ;;  %v488_v55 = vsel %vm424_vm6, %v392_v35, %v456_v47  ;;  %v3816_v46 = vunpack.c.h.bf16 %v3858_v40  ;;  %v408_v56 = vadd.f32 %v4868_v12, %v370_v53  ;;  %v3847_v57 = vunpack.c.l.bf16 %v3866_v49  ;;  %v1147_v35 = vld [vmem:[#allocation2 + $0x22] sm:$0xff]  ;;  %v602_v39 = vld [vmem:[#allocation2 + $0x38] sm:$0xff] }
  0x47   : > { %4125 = vmatmul.mubr.bf16.gmra.mxu1 %v5019_v50  ;;  %4189 = vmatpush3.bf16.msra.mxu0 %v4594_v23  ;;  %v489_v54 = vsel %vm425_vm7, %v393_v38, %v457_v52  ;;  %575 = vst [vmem:[#allocation2 + $0x91] sm:$0xff] %v488_v55  ;;  %v3848_v58 = vunpack.c.h.bf16 %v3866_v49  ;;  %v409_v60 = vadd.f32 %v4868_v12, %v371_v42  ;;  %v1145_v23 = vld [vmem:[#allocation2 + $0xa] sm:$0xff]  ;;  %v4745_v37 = vmov 0.0|0.0  }
  0x48   : > { %4141 = vmatpush3.bf16.msra.mxu1 %v4593_v22  ;;  %4190 = vmatprep.subr.bf16.mxu0 %v4596_v45  ;;  %576 = vst [vmem:[#allocation2 + $0x99] sm:$0xff] %v489_v54  ;;  %v5029_v59 = vpack.c.bf16 %v489_v54, %v488_v55  ;;  %v356_v61 = vmul.f32 %v3815_v43, %v4863_v11  ;;  %vm440_vm8 = vcmp.ge.f32.partialorder %v408_v56, 0.0  ;;  %v472_v63 = vmul.f32 0.2, %v408_v56  ;;  %v601_v38 = vld [vmem:[#allocation2 + $0x30] sm:$0xff]  ;;  %v603_v53 = vld [vmem:[#allocation2 + $0x48] sm:$0xff] }
  0x49   : > { %4142 = vmatprep.subr.bf16.mxu1 %v4595_v51  ;;  %v357_v0 = vmul.f32 %v3816_v46, %v4863_v11  ;;  %v372_v1 = vmul.f32 %v3847_v57, %v4863_v11  ;;  %vm441_vm9 = vcmp.ge.f32.partialorder %v409_v60, 0.0  ;;  %v473_v3 = vmul.f32 0.2, %v409_v60  ;;  %v4603_v52 = vld [vmem:[%s5991_s3 + $0xf0] sm:$0xff]   ;;  %v1152_v46 = vld [vmem:[#allocation2 + $0x62] sm:$0xff] }
  0x4a   : > { %4112 = vmatprep.mubr.bf16.mxu0 %v5029_v59  ;;  %v394_v4 = vadd.f32 %v4868_v12, %v356_v61  ;;  %v373_v5 = vmul.f32 %v3848_v58, %v4863_v11  ;;  %v504_v6 = vsel %vm440_vm8, %v408_v56, %v472_v63  ;;  %v1176_v29 = vpack.c.bf16 %v1145_v23, %v1144_v17  ;;  %v604_v55 = vld [vmem:[#allocation2 + $0x50] sm:$0xff]  ;;  %v4606_v56 = vld [vmem:[%s5991_s3 + $0x128] sm:$0xff]   ;;  %v605_v57 = vld [vmem:[#allocation2 + $0x60] sm:$0xff] }
  0x4b   : > { %4191 = vmatpush3.bf16.msra.mxu0 %v4596_v45  ;;  %v395_v7 = vadd.f32 %v4868_v12, %v357_v0  ;;  %v410_v8 = vadd.f32 %v4868_v12, %v372_v1  ;;  %v505_v14 = vsel %vm441_vm9, %v409_v60, %v473_v3  ;;  %591 = vst [vmem:[#allocation2 + $0x151] sm:$0xff] %v504_v6  ;;  %v1149_v45 = vld [vmem:[#allocation2 + $0x3a] sm:$0xff]  ;;  %v4604_v42 = vld [vmem:[%s5991_s3 + $0x130] sm:$0xff]   ;;  %v606_v58 = vld [vmem:[#allocation2 + $0x68] sm:$0xff] }
  0x4c   : > { %4143 = vmatpush3.bf16.msra.mxu1 %v4595_v51  ;;  %vm426_vm10 = vcmp.ge.f32.partialorder %v394_v4, 0.0  ;;  %v458_v15 = vmul.f32 0.2, %v394_v4  ;;  %v411_v11 = vadd.f32 %v4868_v12, %v373_v5  ;;  %4192 = vmatprep.subr.bf16.mxu0 %v4598_v62  ;;  %592 = vst [vmem:[#allocation2 + $0x159] sm:$0xff] %v505_v14  ;;  %v5053_v18 = vpack.c.bf16 %v505_v14, %v504_v6  ;;  %v1150_v51 = vld [vmem:[#allocation2 + $0x4a] sm:$0xff]  ;;  %v1151_v43 = vld [vmem:[#allocation2 + $0x52] sm:$0xff] }
  0x4d   : > { %vm427_vm11 = vcmp.ge.f32.partialorder %v395_v7, 0.0  ;;  %v459_v19 = vmul.f32 0.2, %v395_v7  ;;  %vm442_vm12 = vcmp.ge.f32.partialorder %v410_v8, 0.0  ;;  %4144 = vmatprep.subr.bf16.mxu1 %v4597_v2  ;;  %v474_v21 = vmul.f32 0.2, %v410_v8 }
  0x4e   : > { %v490_v20 = vsel %vm426_vm10, %v394_v4, %v458_v15  ;;  %vm443_vm13 = vcmp.ge.f32.partialorder %v411_v11, 0.0  ;;  %v475_v22 = vmul.f32 0.2, %v411_v11  ;;  %4128 = vmatprep.mubr.bf16.mxu1 %v5053_v18  ;;  %v5068_v40 = vpack.c.bf16 %v1147_v35, %v1146_v34  ;;  %v1153_v54 = vld [vmem:[#allocation2 + $0x6a] sm:$0xff]  ;;  %v4607_v1 = vld [vmem:[%s5991_s3 + $0xe0] sm:$0xff]   ;;  %v607_v4 = vld [vmem:[#allocation2 + $0x78] sm:$0xff] }
  0x4f   : > { %v491_v25 = vsel %vm427_vm11, %v395_v7, %v459_v19  ;;  %577 = vst [vmem:[#allocation2 + $0xa9] sm:$0xff] %v490_v20  ;;  %4193 = vmatpush3.bf16.msra.mxu0 %v4598_v62  ;;  %v506_v26 = vsel %vm442_vm12, %v410_v8, %v474_v21  ;;  %v5070_v47 = vpack.c.bf16 %v600_v33, %v599_v31  ;;  %v4605_v60 = vld [vmem:[%s5991_s3 + $0xe8] sm:$0xff]   ;;  %v1154_v3 = vld [vmem:[#allocation2 + $0x7a] sm:$0xff]  ;;  %v609_v7 = vld [vmem:[#allocation2 + $0x90] sm:$0xff] }
  0x50   : > { %578 = vst [vmem:[#allocation2 + $0xb1] sm:$0xff] %v491_v25  ;;  %v5056_v12 = vpack.c.bf16 %v491_v25, %v490_v20  ;;  %v507_v27 = vsel %vm443_vm13, %v411_v11, %v475_v22  ;;  %4145 = vmatpush3.bf16.msra.mxu1 %v4597_v2  ;;  %4194 = vmatprep.subr.bf16.mxu0 %v4600_v13  ;;  %593 = vst [vmem:[#allocation2 + $0x169] sm:$0xff] %v506_v26  ;;  %v4608_v2 = vld [vmem:[%s5991_s3 + $0x120] sm:$0xff]   ;;  %v610_v8 = vld [vmem:[#allocation2 + $0x98] sm:$0xff] }
  0x51   : > { %594 = vst [vmem:[#allocation2 + $0x171] sm:$0xff] %v507_v27  ;;  %v5058_v28 = vpack.c.bf16 %v507_v27, %v506_v26  ;;  %4146 = vmatprep.subr.bf16.mxu1 %v4599_v9  ;;  %v5072_v48 = vpack.c.bf16 %v602_v39, %v601_v38  ;;  %v5074_v49 = vpack.c.bf16 %v1149_v45, %v1148_v41  ;;  %v608_v5 = vld [vmem:[#allocation2 + $0x80] sm:$0xff]  ;;  %v4609_v14 = vld [vmem:[%s5991_s3 + $0xd8] sm:$0xff]   ;;  %v4611_v21 = vld [vmem:[%s5991_s3 + $0xd0] sm:$0xff]  }
  0x52   : > { %4113 = vmatmul.mubr.bf16.gmra.mxu0 %v5056_v12  ;;  %v5092_v61 = vpack.c.bf16 %v1151_v43, %v1150_v51  ;;  %v5094_v62 = vpack.c.bf16 %v604_v55, %v603_v53  ;;  %v5096_v63 = vpack.c.bf16 %v1153_v54, %v1152_v46  ;;  %v5098_v0 = vpack.c.bf16 %v606_v58, %v605_v57  ;;  %v1155_v6 = vld [vmem:[#allocation2 + $0x82] sm:$0xff]  ;;  %v4610_v11 = vld [vmem:[%s5991_s3 + $0x118] sm:$0xff]   ;;  %v1161_v26 = vld [vmem:[#allocation2 + $0xca] sm:$0xff] }
  0x53   : > { %4129 = vmatmul.mubr.bf16.gmra.mxu1 %v5058_v28  ;;  %4195 = vmatpush3.bf16.msra.mxu0 %v4600_v13  ;;  %v1157_v13 = vld [vmem:[#allocation2 + $0x9a] sm:$0xff]  ;;  %v5113_v15 = vpack.c.bf16 %v1155_v6, %v1154_v3  ;;  %v5118_v17 = vpack.c.bf16 %v608_v5, %v607_v4  ;;  %v5122_v20 = vpack.c.bf16 %v610_v8, %v609_v7  ;;  %v1160_v25 = vld [vmem:[#allocation2 + $0xc2] sm:$0xff]  ;;  %v4612_v27 = vld [vmem:[%s5991_s3 + $0x110] sm:$0xff]  }
  0x54   : > { %4147 = vmatpush3.bf16.msra.mxu1 %v4599_v9  ;;  %4148 = vmatprep.mubr.bf16.mxu1 %v4745_v37  ;;  %v1156_v9 = vld [vmem:[#allocation2 + $0x92] sm:$0xff]  ;;  %v613_v31 = vld [vmem:[#allocation2 + $0xc0] sm:$0xff]  ;;  %v4613_v33 = vld [vmem:[%s5991_s3 + $0xc8] sm:$0xff]   ;;  %v5144_v38 = vpack.c.bf16 %v1161_v26, %v1160_v25 }
  0x55   : > { %4196 = vmatprep.mubr.bf16.mxu0 %v1176_v29  ;;  %4228 = vmatprep.subr.bf16.mxu1 %v4601_v30  ;;  %v5120_v19 = vpack.c.bf16 %v1157_v13, %v1156_v9  ;;  %v4614_v35 = vld [vmem:[%s5991_s3 + $0x108] sm:$0xff]   ;;  %v4615_v41 = vld [vmem:[%s5991_s3 + $0xc0] sm:$0xff]   ;;  %v615_v53 = vld [vmem:[#allocation2 + $0xd8] sm:$0xff] }
  0x56   : > { %4276 = vmatprep.subr.bf16.mxu0 %v4602_v32  ;;  %v611_v22 = vld [vmem:[#allocation2 + $0xa8] sm:$0xff]  ;;  %v1162_v45 = vld [vmem:[#allocation2 + $0xda] sm:$0xff]  ;;  %v617_v43 = vld [vmem:[#allocation2 + $0xf0] sm:$0xff] }
  0x57   : > { %v1158_v23 = vld [vmem:[#allocation2 + $0xaa] sm:$0xff]  ;;  %v1159_v29 = vld [vmem:[#allocation2 + $0xb2] sm:$0xff]  ;;  %v1163_v51 = vld [vmem:[#allocation2 + $0xe2] sm:$0xff] }
  0x58   : > { %v5137_v34 = vpack.c.bf16 %v1159_v29, %v1158_v23  ;;  %v616_v55 = vld [vmem:[#allocation2 + $0xe0] sm:$0xff]  ;;  %v618_v46 = vld [vmem:[#allocation2 + $0xf8] sm:$0xff]  ;;  %v5167_v4 = vpack.c.bf16 %v1163_v51, %v1162_v45  ;;  %v619_v23 = vld [vmem:[#allocation2 + $0x108] sm:$0xff] }
  0x59   : > { %v1164_v54 = vld [vmem:[#allocation2 + $0xf2] sm:$0xff]  ;;  %v1165_v58 = vld [vmem:[#allocation2 + $0xfa] sm:$0xff]  ;;  %v5174_v6 = vpack.c.bf16 %v616_v55, %v615_v53  ;;  %v1168_v29 = vld [vmem:[#allocation2 + $0x122] sm:$0xff] }
  0x5a   : > { %4197 = vmatmul.mubr.bf16.vlgmr.msra.gmra.mxu0 %v5068_v40  ;;  %v5172_v5 = vld [vmem:[%s5991_s3 + $0x1b8] sm:$0xff]   ;;  %v5176_v7 = vpack.c.bf16 %v1165_v58, %v1164_v54  ;;  %v4650_v8 = vld [vmem:[%s5990_s2] ss:$0 sm:$0xff]  ;;  %v620_v25 = vld [vmem:[#allocation2 + $0x110] sm:$0xff] }
  0x5b   : > { %4149 = vmatmul.mubr.bf16.vlgmr.msra.gmra.mxu1 %v5070_v47  ;;  %4277 = vmatpush3.bf16.msra.mxu0 %v4602_v32  ;;  %v614_v32 = vld [vmem:[#allocation2 + $0xc8] sm:$0xff]  ;;  %v1167_v26 = vld [vmem:[#allocation2 + $0x112] sm:$0xff]  ;;  %v5193_v45 = vpack.c.bf16 %v620_v25, %v619_v23  ;;  %v624_v55 = vld [vmem:[#allocation2 + $0x140] sm:$0xff] }
  0x5c   : > { %4229 = vmatpush3.bf16.msra.mxu1 %v4601_v30  ;;  %4152 = vmatprep.mubr.bf16.mxu1 %v5072_v48  ;;  %v612_v30 = vld [vmem:[#allocation2 + $0xb0] sm:$0xff]  ;;  %v5146_v39 = vpack.c.bf16 %v614_v32, %v613_v31  ;;  %v623_v53 = vld [vmem:[#allocation2 + $0x138] sm:$0xff] }
  0x5d   : > { %4200 = vmatprep.mubr.bf16.mxu0 %v5074_v49  ;;  %4230 = vmatprep.subr.bf16.mxu1 %v4603_v52  ;;  %v5142_v37 = vpack.c.bf16 %v612_v30, %v611_v22  ;;  %v1169_v32 = vld [vmem:[#allocation2 + $0x12a] sm:$0xff]  ;;  %v1173_v54 = vld [vmem:[#allocation2 + $0x15a] sm:$0xff] }
  0x5e   : > { %4278 = vmatprep.subr.bf16.mxu0 %v4604_v42  ;;  %v5195_v51 = vpack.c.bf16 %v1169_v32, %v1168_v29  ;;  %v4620_v29 = vld [vmem:[%s5991_s3 + $0x1b0] sm:$0xff]  }
  0x5f   : > { %4279 = vmatpush3.bf16.msra.mxu0 %v4604_v42  ;;  %v3867_v42 = vld [vmem:[%s4852_s19 + $0x78] sm:$0xff]   ;;  %v1771_v32 = vld [vmem:[#allocation2 + $0xc9] sm:$0xff]  ;;  %s3783_s19 = sshll.u32 %s4804_s25, 4 }
  0x60   : > { %4231 = vmatpush3.bf16.msra.mxu1 %v4603_v52  ;;  %4280 = vmatprep.subr.bf16.mxu0 %v4606_v56  ;;  %v4616_v52 = vld [vmem:[%s5991_s3 + $0x100] sm:$0xff]   ;;  %v3852_v57 = vunpack.c.h.bf16 %v3867_v42  ;;  %s5916_s14 = scalar_lea.hbm %s5993_s5, %s3783_s19  ;;  %s5923_s16 = scalar_lea.hbm %s5994_s6, %s3783_s19 }
  0x61   : > { %4232 = vmatprep.subr.bf16.mxu1 %v4605_v60 }
  0x62   : > { %4201 = vmatmul.mubr.bf16.gmra.mxu0 %v5092_v61 }
  0x63   : > { %4153 = vmatmul.mubr.bf16.gmra.mxu1 %v5094_v62  ;;  %4204 = vmatprep.mubr.bf16.mxu0 %v5096_v63 }
  0x64   : > { %4156 = vmatprep.mubr.bf16.mxu1 %v5098_v0  ;;  %4233 = vmatpush3.bf16.msra.mxu1 %v4605_v60  ;;  %v5162_v60 = vld [vmem:[%s5991_s3 + $0x178] sm:$0xff]  }
  0x65   : > { %4281 = vmatpush3.bf16.msra.mxu0 %v4606_v56  ;;  %4234 = vmatprep.subr.bf16.mxu1 %v4607_v1  ;;  %v3851_v56 = vunpack.c.l.bf16 %v3867_v42  ;;  %v1170_v42 = vld [vmem:[#allocation2 + $0x13a] sm:$0xff] }
  0x66   : > { %4282 = vmatprep.subr.bf16.mxu0 %v4608_v2 }
  0x68   : > { %4235 = vmatpush3.bf16.msra.mxu1 %v4607_v1  ;;  %v4649_v1 = vld [vmem:[%s5989_s1] ss:$0 sm:$0xff] }
  0x69   : > { %4283 = vmatpush3.bf16.msra.mxu0 %v4608_v2  ;;  %4236 = vmatprep.subr.bf16.mxu1 %v4609_v14  ;;  %v374_v2 = vmul.f32 %v4649_v1, %v3851_v56  ;;  %v375_v3 = vmul.f32 %v4649_v1, %v3852_v57  ;;  %v625_v56 = vld [vmem:[#allocation2 + $0x150] sm:$0xff]  ;;  %v626_v57 = vld [vmem:[#allocation2 + $0x158] sm:$0xff]  ;;  %v5205_v1 = vpack.c.bf16 %v624_v55, %v623_v53  ;;  %v1773_v53 = vld [vmem:[#allocation2 + $0xe1] sm:$0xff] }
  0x6a   : > { %4205 = vmatmul.mubr.bf16.gmra.mxu0 %v5113_v15  ;;  %4284 = vmatprep.subr.bf16.mxu0 %v4610_v11 }
  0x6b   : > { %4157 = vmatmul.mubr.bf16.gmra.mxu1 %v5118_v17  ;;  %4208 = vmatprep.mubr.bf16.mxu0 %v5120_v19  ;;  %v412_v9 = vadd.f32 %v4650_v8, %v374_v2  ;;  %v413_v13 = vadd.f32 %v4650_v8, %v375_v3  ;;  %v5209_v3 = vpack.c.bf16 %v626_v57, %v625_v56  ;;  %v627_v8 = vld [vmem:[#allocation2 + $0x168] sm:$0xff]  ;;  %v1775_v56 = vld [vmem:[#allocation2 + $0xf9] sm:$0xff] }
  0x6c   : > { %4160 = vmatprep.mubr.bf16.mxu1 %v5122_v20  ;;  %4237 = vmatpush3.bf16.msra.mxu1 %v4609_v14  ;;  %v5181_v14 = vpack.c.bf16 %v618_v46, %v617_v43  ;;  %v1171_v43 = vld [vmem:[#allocation2 + $0x142] sm:$0xff]  ;;  %v1172_v46 = vld [vmem:[#allocation2 + $0x152] sm:$0xff] }
  0x6d   : > { %4285 = vmatpush3.bf16.msra.mxu0 %v4610_v11  ;;  %4238 = vmatprep.subr.bf16.mxu1 %v4611_v21  ;;  %v1166_v11 = vld [vmem:[#allocation2 + $0x10a] sm:$0xff]  ;;  %vm444_vm14 = vcmp.ge.f32.partialorder %v412_v9, 0.0  ;;  %vm445_vm15 = vcmp.ge.f32.partialorder %v413_v13, 0.0  ;;  %v477_v22 = vmul.f32 0.2, %v413_v13  ;;  %v5203_v58 = vpack.c.bf16 %v1171_v43, %v1170_v42  ;;  %v4631_v43 = vld [vmem:[%s5991_s3 + $0x140] sm:$0xff]  }
  0x6e   : > { %4286 = vmatprep.subr.bf16.mxu0 %v4612_v27  ;;  %v5207_v2 = vpack.c.bf16 %v1173_v54, %v1172_v46  ;;  %v4632_v46 = vld [vmem:[%s5991_s3 + $0x180] sm:$0xff]   ;;  %v1774_v54 = vld [vmem:[#allocation2 + $0xf1] sm:$0xff]  ;;  %v1776_v57 = vld [vmem:[#allocation2 + $0x109] sm:$0xff] }
  0x6f   : > { %v509_v31 = vsel %vm445_vm15, %v413_v13, %v477_v22  ;;  %v1175_v13 = vld [vmem:[#allocation2 + $0x172] sm:$0xff]  ;;  %v1757_v22 = vld [vmem:[#allocation2 + $0x21] sm:$0xff] }
  0x70   : > { %4239 = vmatpush3.bf16.msra.mxu1 %v4611_v21  ;;  %v476_v21 = vmul.f32 0.2, %v412_v9  ;;  %596 = vst [vmem:[#allocation2 + $0x189] sm:$0xff] %v509_v31 }
  0x71   : > { %4287 = vmatpush3.bf16.msra.mxu0 %v4612_v27  ;;  %4240 = vmatprep.subr.bf16.mxu1 %v4613_v33  ;;  %v621_v27 = vld [vmem:[#allocation2 + $0x120] sm:$0xff] }
  0x72   : > { %4209 = vmatmul.mubr.bf16.gmra.mxu0 %v5137_v34  ;;  %4288 = vmatprep.subr.bf16.mxu0 %v4614_v35  ;;  %v508_v30 = vsel %vm444_vm14, %v412_v9, %v476_v21  ;;  %v1174_v9 = vld [vmem:[#allocation2 + $0x16a] sm:$0xff]  ;;  %v1756_v21 = vld [vmem:[#allocation2 + $0x19] sm:$0xff] }
  0x73   : > { %4161 = vmatmul.mubr.bf16.gmra.mxu1 %v5142_v37  ;;  %4212 = vmatprep.mubr.bf16.mxu0 %v5144_v38  ;;  %595 = vst [vmem:[#allocation2 + $0x181] sm:$0xff] %v508_v30  ;;  %v5215_v23 = vpack.c.bf16 %v1175_v13, %v1174_v9  ;;  %v4633_v9 = vld [vmem:[%s5991_s3 + $0x1f8] sm:$0xff]   ;;  %v5289_v13 = vpack.c.bf16 %v1775_v56, %v1774_v54 }
  0x74   : > { %4164 = vmatprep.mubr.bf16.mxu1 %v5146_v39  ;;  %4241 = vmatpush3.bf16.msra.mxu1 %v4613_v33  ;;  %v5189_v33 = vpack.c.bf16 %v509_v31, %v508_v30  ;;  %v4628_v30 = vld [vmem:[%s5991_s3 + $0x190] sm:$0xff]   ;;  %v1770_v31 = vld [vmem:[#allocation2 + $0xc1] sm:$0xff] }
  0x75   : > { %4289 = vmatpush3.bf16.msra.mxu0 %v4614_v35  ;;  %4242 = vmatprep.subr.bf16.mxu1 %v4615_v41  ;;  %v622_v35 = vld [vmem:[#allocation2 + $0x128] sm:$0xff]  ;;  %v5269_v55 = vpack.c.bf16 %v1771_v32, %v1770_v31  ;;  %v2982_v31 = vld [vmem:[#allocation2 + $0x3a] sm:$0xff]  ;;  %v2675_v32 = vld [vmem:[#allocation2 + $0x31] sm:$0xff] }
  0x76   : > { %4290 = vmatprep.subr.bf16.mxu0 %v4616_v52 }
  0x78   : > { %4243 = vmatpush3.bf16.msra.mxu1 %v4615_v41  ;;  %v5191_v41 = vpack.c.bf16 %v1167_v26, %v1166_v11  ;;  %v628_v11 = vld [vmem:[#allocation2 + $0x170] sm:$0xff]  ;;  %v1788_v26 = vpack.c.bf16 %v1757_v22, %v1756_v21 }
  0x79   : > { %4291 = vmatpush3.bf16.msra.mxu0 %v4616_v52  ;;  %4324 = vmatprep.subr.bf16.mxu1 %v5162_v60  ;;  %v5197_v52 = vpack.c.bf16 %v622_v35, %v621_v27  ;;  %v5217_v25 = vpack.c.bf16 %v628_v11, %v627_v8  ;;  %v4619_v27 = vld [vmem:[%s5991_s3 + $0x170] sm:$0xff]   ;;  %v1772_v35 = vld [vmem:[#allocation2 + $0xd9] sm:$0xff] }
  0x7a   : > { %4213 = vmatmul.mubr.bf16.gmra.mxu0 %v5167_v4  ;;  %4372 = vmatprep.subr.bf16.mxu0 %v5172_v5  ;;  %v5274_v42 = vpack.c.bf16 %v1773_v53, %v1772_v35  ;;  %v1777_v8 = vld [vmem:[#allocation2 + $0x111] sm:$0xff]  ;;  %v1480_v22 = vld [vmem:[#allocation2 + $0x180] sm:$0xff] }
  0x7b   : > { %4165 = vmatmul.mubr.bf16.gmra.mxu1 %v5174_v6  ;;  %4216 = vmatprep.mubr.bf16.mxu0 %v5176_v7  ;;  %v4634_v11 = vld [vmem:[%s5991_s3 + $0x238] sm:$0xff]   ;;  %v5294_v21 = vpack.c.bf16 %v1777_v8, %v1776_v57  ;;  %v2983_v57 = vld [vmem:[#allocation2 + $0x4a] sm:$0xff] }
  0x7c   : > { %4168 = vmatprep.mubr.bf16.mxu1 %v5181_v14  ;;  %v2676_v35 = vld [vmem:[#allocation2 + $0x39] sm:$0xff] }
  0x7d   : > { %v2984_v8 = vld [vmem:[#allocation2 + $0x52] sm:$0xff] }
  0x82   : > { %4217 = vmatmul.mubr.bf16.gmra.mxu0 %v5191_v41 }
  0x83   : > { %4169 = vmatmul.mubr.bf16.gmra.mxu1 %v5193_v45  ;;  %4220 = vmatprep.mubr.bf16.mxu0 %v5195_v51 }
  0x84   : > { %4172 = vmatprep.mubr.bf16.mxu1 %v5197_v52 }
  0x8a   : > { %4221 = vmatmul.mubr.bf16.gmra.mxu0 %v5203_v58 }
  0x8b   : > { %4173 = vmatmul.mubr.bf16.gmra.mxu1 %v5205_v1  ;;  %4224 = vmatprep.mubr.bf16.mxu0 %v5207_v2 }
  0x8c   : > { %4176 = vmatprep.mubr.bf16.mxu1 %v5209_v3 }
  0x92   : > { %4225 = vmatmul.mubr.bf16.gmra.mxu0 %v5215_v23 }
  0x93   : > { %4177 = vmatmul.mubr.bf16.gmra.mxu1 %v5217_v25  ;;  %4292 = vmatprep.mubr.bf16.mxu0 %v1788_v26  ;;  %v1481_v26 = vld [vmem:[#allocation2 + $0x188] sm:$0xff] }
  0x94   : > { %4244 = vmatprep.mubr.bf16.mxu1 %v5070_v47  ;;  %v4622_v47 = vld [vmem:[%s5991_s3 + $0x1a8] sm:$0xff]  }
  0x9a   : > { %4293 = vmatmul.mubr.bf16.vlgmr.msra.gmra.mxu0 %v4937_v24  ;;  %v4621_v24 = vld [vmem:[%s5991_s3 + $0x168] sm:$0xff]  }
  0x9b   : > { %4245 = vmatmul.mubr.bf16.vlgmr.msra.gmra.mxu1 %v5072_v48  ;;  %4373 = vmatpush3.bf16.msra.mxu0 %v5172_v5  ;;  %v4625_v5 = vld [vmem:[%s5991_s3 + $0x158] sm:$0xff]  }
  0x9c   : > { %4325 = vmatpush3.bf16.msra.mxu1 %v5162_v60  ;;  %4248 = vmatprep.mubr.bf16.mxu1 %v5094_v62  ;;  %v4623_v60 = vld [vmem:[%s5991_s3 + $0x160] sm:$0xff]  }
  0x9d   : > { %4296 = vmatprep.mubr.bf16.mxu0 %v4954_v44  ;;  %4326 = vmatprep.subr.bf16.mxu1 %v4619_v27  ;;  %v4624_v44 = vld [vmem:[%s5991_s3 + $0x1a0] sm:$0xff]  }
  0x9e   : > { %4374 = vmatprep.subr.bf16.mxu0 %v4620_v29 }
  0x9f   : > { %4375 = vmatpush3.bf16.msra.mxu0 %v4620_v29 }
  0xa0   : > { %4327 = vmatpush3.bf16.msra.mxu1 %v4619_v27  ;;  %4376 = vmatprep.subr.bf16.mxu0 %v4622_v47  ;;  %v5308_v27 = vpack.c.bf16 %v1481_v26, %v1480_v22  ;;  %v2985_v22 = vld [vmem:[#allocation2 + $0x62] sm:$0xff]  ;;  %v2986_v26 = vld [vmem:[#allocation2 + $0x6a] sm:$0xff] }
  0xa1   : > { %4328 = vmatprep.subr.bf16.mxu1 %v4621_v24 }
  0xa2   : > { %4297 = vmatmul.mubr.bf16.gmra.mxu0 %v4988_v10  ;;  %v4626_v10 = vld [vmem:[%s5991_s3 + $0x198] sm:$0xff]  }
  0xa3   : > { %4249 = vmatmul.mubr.bf16.gmra.mxu1 %v5098_v0  ;;  %4300 = vmatprep.mubr.bf16.mxu0 %v5011_v36  ;;  %v4627_v36 = vld [vmem:[%s5991_s3 + $0x150] sm:$0xff]  }
  0xa4   : > { %4252 = vmatprep.mubr.bf16.mxu1 %v5118_v17  ;;  %4329 = vmatpush3.bf16.msra.mxu1 %v4621_v24 }
  0xa5   : > { %4377 = vmatpush3.bf16.msra.mxu0 %v4622_v47  ;;  %4330 = vmatprep.subr.bf16.mxu1 %v4623_v60 }
  0xa6   : > { %4378 = vmatprep.subr.bf16.mxu0 %v4624_v44 }
  0xa8   : > { %4331 = vmatpush3.bf16.msra.mxu1 %v4623_v60 }
  0xa9   : > { %4379 = vmatpush3.bf16.msra.mxu0 %v4624_v44  ;;  %4332 = vmatprep.subr.bf16.mxu1 %v4625_v5 }
  0xaa   : > { %4301 = vmatmul.mubr.bf16.gmra.mxu0 %v5029_v59  ;;  %4380 = vmatprep.subr.bf16.mxu0 %v4626_v10  ;;  %v4629_v59 = vld [vmem:[%s5991_s3 + $0x148] sm:$0xff]  }
  0xab   : > { %4253 = vmatmul.mubr.bf16.gmra.mxu1 %v5122_v20  ;;  %4304 = vmatprep.mubr.bf16.mxu0 %v5056_v12  ;;  %v4630_v12 = vld [vmem:[%s5991_s3 + $0x188] sm:$0xff]  }
  0xac   : > { %4256 = vmatprep.mubr.bf16.mxu1 %v5142_v37  ;;  %4333 = vmatpush3.bf16.msra.mxu1 %v4625_v5 }
  0xad   : > { %4381 = vmatpush3.bf16.msra.mxu0 %v4626_v10  ;;  %4334 = vmatprep.subr.bf16.mxu1 %v4627_v36 }
  0xae   : > { %4382 = vmatprep.subr.bf16.mxu0 %v4628_v30 }
  0xb0   : > { %4335 = vmatpush3.bf16.msra.mxu1 %v4627_v36 }
  0xb1   : > { %4383 = vmatpush3.bf16.msra.mxu0 %v4628_v30  ;;  %4336 = vmatprep.subr.bf16.mxu1 %v4629_v59  ;;  %v2981_v30 = vld [vmem:[#allocation2 + $0x32] sm:$0xff] }
  0xb2   : > { %4305 = vmatmul.mubr.bf16.gmra.mxu0 %v5269_v55  ;;  %4384 = vmatprep.subr.bf16.mxu0 %v4630_v12 }
  0xb3   : > { %4257 = vmatmul.mubr.bf16.gmra.mxu1 %v5146_v39  ;;  %4308 = vmatprep.mubr.bf16.mxu0 %v5274_v42 }
  0xb4   : > { %4260 = vmatprep.mubr.bf16.mxu1 %v5174_v6  ;;  %4337 = vmatpush3.bf16.msra.mxu1 %v4629_v59  ;;  %v4651_v59 = vld [vmem:[#allocation2] sm:$0xff] }
  0xb5   : > { %4385 = vmatpush3.bf16.msra.mxu0 %v4630_v12  ;;  %4338 = vmatprep.subr.bf16.mxu1 %v4631_v43 }
  0xb6   : > { %4386 = vmatprep.subr.bf16.mxu0 %v4632_v46 }
  0xb8   : > { %4339 = vmatpush3.bf16.msra.mxu1 %v4631_v43 }
  0xb9   : > { %4387 = vmatpush3.bf16.msra.mxu0 %v4632_v46  ;;  %4420 = vmatprep.subr.bf16.mxu1 %v4633_v9  ;;  %v2707_v46 = vpack.c.bf16 %v2676_v35, %v2675_v32  ;;  %v2989_v32 = vld [vmem:[#allocation2 + $0x92] sm:$0xff]  ;;  %v2990_v35 = vld [vmem:[#allocation2 + $0x9a] sm:$0xff] }
  0xba   : > { %4309 = vmatmul.mubr.bf16.gmra.mxu0 %v5289_v13  ;;  %4468 = vmatprep.subr.bf16.mxu0 %v4634_v11 }
  0xbb   : > { %4261 = vmatmul.mubr.bf16.gmra.mxu1 %v5181_v14  ;;  %4312 = vmatprep.mubr.bf16.mxu0 %v5294_v21 }
  0xbc   : > { %4264 = vmatprep.mubr.bf16.mxu1 %v5193_v45 }
  0xc2   : > { %4313 = vmatmul.mubr.bf16.gmra.mxu0 %v4993_v16  ;;  %v4635_v16 = vld [vmem:[%s5991_s3 + $0x1f0] sm:$0xff]  }
  0xc3   : > { %4265 = vmatmul.mubr.bf16.gmra.mxu1 %v5197_v52  ;;  %4316 = vmatprep.mubr.bf16.mxu0 %v5019_v50  ;;  %v4636_v50 = vld [vmem:[%s5991_s3 + $0x230] sm:$0xff]  }
  0xc4   : > { %4268 = vmatprep.mubr.bf16.mxu1 %v5205_v1 }
  0xca   : > { %4317 = vmatmul.mubr.bf16.gmra.mxu0 %v5053_v18  ;;  %v4638_v18 = vld [vmem:[%s5991_s3 + $0x228] sm:$0xff]  }
  0xcb   : > { %4269 = vmatmul.mubr.bf16.gmra.mxu1 %v5209_v3  ;;  %4320 = vmatprep.mubr.bf16.mxu0 %v5058_v28  ;;  %v4637_v28 = vld [vmem:[%s5991_s3 + $0x1e8] sm:$0xff]  }
  0xcc   : > { %4272 = vmatprep.mubr.bf16.mxu1 %v5217_v25 }
  0xd2   : > { %4321 = vmatmul.mubr.bf16.gmra.mxu0 %v5189_v33 }
  0xd3   : > { %4273 = vmatmul.mubr.bf16.gmra.mxu1 %v5308_v27  ;;  %4388 = vmatprep.mubr.bf16.mxu0 %v5072_v48  ;;  %v4640_v48 = vld [vmem:[%s5991_s3 + $0x220] sm:$0xff]  }
  0xd4   : > { %4340 = vmatprep.mubr.bf16.mxu1 %v5068_v40  ;;  %v4639_v40 = vld [vmem:[%s5991_s3 + $0x1e0] sm:$0xff]  }
  0xda   : > { %4389 = vmatmul.mubr.bf16.vlgmr.msra.gmra.mxu0 %v5094_v62  ;;  %v4643_v62 = vld [vmem:[%s5991_s3 + $0x1d0] sm:$0xff]  }
  0xdb   : > { %4341 = vmatmul.mubr.bf16.vlgmr.msra.gmra.mxu1 %v5074_v49  ;;  %4469 = vmatpush3.bf16.msra.mxu0 %v4634_v11  ;;  %v4641_v49 = vld [vmem:[%s5991_s3 + $0x1d8] sm:$0xff]  }
  0xdc   : > { %4421 = vmatpush3.bf16.msra.mxu1 %v4633_v9  ;;  %4344 = vmatprep.mubr.bf16.mxu1 %v5092_v61  ;;  %v4642_v61 = vld [vmem:[%s5991_s3 + $0x218] sm:$0xff]  }
  0xdd   : > { %4392 = vmatprep.mubr.bf16.mxu0 %v5098_v0  ;;  %4422 = vmatprep.subr.bf16.mxu1 %v4635_v16  ;;  %v4645_v0 = vld [vmem:[%s5991_s3 + $0x1c8] sm:$0xff]   ;;  %v2678_v11 = vld [vmem:[#allocation2 + $0x51] sm:$0xff] }
  0xde   : > { %4470 = vmatprep.subr.bf16.mxu0 %v4636_v50 }
  0xdf   : > { %4471 = vmatpush3.bf16.msra.mxu0 %v4636_v50  ;;  %v2680_v50 = vld [vmem:[#allocation2 + $0x69] sm:$0xff] }
  0xe0   : > { %4423 = vmatpush3.bf16.msra.mxu1 %v4635_v16  ;;  %4472 = vmatprep.subr.bf16.mxu0 %v4638_v18  ;;  %v2679_v16 = vld [vmem:[#allocation2 + $0x61] sm:$0xff] }
  0xe1   : > { %4424 = vmatprep.subr.bf16.mxu1 %v4637_v28 }
  0xe2   : > { %4393 = vmatmul.mubr.bf16.gmra.mxu0 %v5118_v17  ;;  %v4647_v17 = vld [vmem:[%s5991_s3 + $0x1c0] sm:$0xff]  }
  0xe3   : > { %4345 = vmatmul.mubr.bf16.gmra.mxu1 %v5096_v63  ;;  %4396 = vmatprep.mubr.bf16.mxu0 %v5122_v20  ;;  %v4644_v63 = vld [vmem:[%s5991_s3 + $0x210] sm:$0xff]  }
  0xe4   : > { %4348 = vmatprep.mubr.bf16.mxu1 %v5113_v15  ;;  %4425 = vmatpush3.bf16.msra.mxu1 %v4637_v28  ;;  %v4646_v15 = vld [vmem:[%s5991_s3 + $0x208] sm:$0xff]   ;;  %v3014_v28 = vpack.c.bf16 %v2984_v8, %v2983_v57 }
  0xe5   : > { %4473 = vmatpush3.bf16.msra.mxu0 %v4638_v18  ;;  %4426 = vmatprep.subr.bf16.mxu1 %v4639_v40 }
  0xe6   : > { %4474 = vmatprep.subr.bf16.mxu0 %v4640_v48 }
  0xe8   : > { %4427 = vmatpush3.bf16.msra.mxu1 %v4639_v40 }
  0xe9   : > { %4475 = vmatpush3.bf16.msra.mxu0 %v4640_v48  ;;  %4428 = vmatprep.subr.bf16.mxu1 %v4641_v49 }
  0xea   : > { %4397 = vmatmul.mubr.bf16.gmra.mxu0 %v5142_v37  ;;  %4476 = vmatprep.subr.bf16.mxu0 %v4642_v61 }
  0xeb   : > { %4349 = vmatmul.mubr.bf16.gmra.mxu1 %v5120_v19  ;;  %4400 = vmatprep.mubr.bf16.mxu0 %v5146_v39  ;;  %v4648_v19 = vld [vmem:[%s5991_s3 + $0x200] sm:$0xff]  }
  0xec   : > { %4352 = vmatprep.mubr.bf16.mxu1 %v5137_v34  ;;  %4429 = vmatpush3.bf16.msra.mxu1 %v4641_v49  ;;  %v3015_v49 = vpack.c.bf16 %v2986_v26, %v2985_v22  ;;  %v3017_v26 = vpack.c.bf16 %v2990_v35, %v2989_v32  ;;  %v2994_v32 = vld [vmem:[#allocation2 + $0xca] sm:$0xff] }
  0xed   : > { %4477 = vmatpush3.bf16.msra.mxu0 %v4642_v61  ;;  %4430 = vmatprep.subr.bf16.mxu1 %v4643_v62 }
  0xee   : > { %4478 = vmatprep.subr.bf16.mxu0 %v4644_v63 }
  0xf0   : > { %4431 = vmatpush3.bf16.msra.mxu1 %v4643_v62  ;;  %v2709_v62 = vpack.c.bf16 %v2680_v50, %v2679_v16 }
  0xf1   : > { %4479 = vmatpush3.bf16.msra.mxu0 %v4644_v63  ;;  %4432 = vmatprep.subr.bf16.mxu1 %v4645_v0 }
  0xf2   : > { %4401 = vmatmul.mubr.bf16.gmra.mxu0 %v5174_v6  ;;  %4480 = vmatprep.subr.bf16.mxu0 %v4646_v15 }
  0xf3   : > { %4353 = vmatmul.mubr.bf16.gmra.mxu1 %v5144_v38  ;;  %4404 = vmatprep.mubr.bf16.mxu0 %v5181_v14 }
  0xf4   : > { %4356 = vmatprep.mubr.bf16.mxu1 %v5167_v4  ;;  %4433 = vmatpush3.bf16.msra.mxu1 %v4645_v0 }
  0xf5   : > { %4481 = vmatpush3.bf16.msra.mxu0 %v4646_v15  ;;  %4434 = vmatprep.subr.bf16.mxu1 %v4647_v17 }
  0xf6   : > { %v5372_v20 = vpop.f32.mrf.mxu0  ;;  %v5374_v34 = vpop.f32.mrf.mxu1  ;;  %4482 = vmatprep.subr.bf16.mxu0 %v4648_v19 }
  0xf8   : > { %v5376_v37 = vpop.f32.mrf.mxu0  ;;  %v5378_v39 = vpop.f32.mrf.mxu1  ;;  %4435 = vmatpush3.bf16.msra.mxu1 %v4647_v17  ;;  %v2681_v17 = vld [vmem:[#allocation2 + $0x79] sm:$0xff] }
  0xf9   : > { %4483 = vmatpush3.bf16.msra.mxu0 %v4648_v19  ;;  %v2987_v19 = vld [vmem:[#allocation2 + $0x7a] sm:$0xff] }
  0xfa   : > { %4405 = vmatmul.mubr.bf16.gmra.mxu0 %v5193_v45  ;;  %v5381_v38 = vpop.f32.mrf.mxu0  ;;  %v5383_v6 = vpop.f32.mrf.mxu1 }
  0xfb   : > { %4357 = vmatmul.mubr.bf16.gmra.mxu1 %v5176_v7  ;;  %4408 = vmatprep.mubr.bf16.mxu0 %v5197_v52 }
  0xfc   : > { %v5387_v4 = vpop.f32.mrf.mxu0  ;;  %v5389_v14 = vpop.f32.mrf.mxu1  ;;  %4360 = vmatprep.mubr.bf16.mxu1 %v5191_v41 }
  0xfe   : > { %v5392_v29 = vpop.f32.mrf.mxu0  ;;  %v5394_v47 = vpop.f32.mrf.mxu1 }
 0x100   : > { %v5396_v24 = vpop.f32.mrf.mxu0  ;;  %v5398_v45 = vpop.f32.mrf.mxu1 }
 0x102   : > { %4409 = vmatmul.mubr.bf16.gmra.mxu0 %v5205_v1  ;;  %v5401_v60 = vpop.f32.mrf.mxu0  ;;  %v5403_v7 = vpop.f32.mrf.mxu1 }
 0x103   : > { %4361 = vmatmul.mubr.bf16.gmra.mxu1 %v5195_v51  ;;  %4412 = vmatprep.mubr.bf16.mxu0 %v5209_v3  ;;  %v2092_v3 = vld [vmem:[#allocation2 + $0x182] sm:$0xff] }
 0x104   : > { %v5407_v52 = vpop.f32.mrf.mxu0  ;;  %v5409_v41 = vpop.f32.mrf.mxu1  ;;  %4364 = vmatprep.mubr.bf16.mxu1 %v5203_v58  ;;  %v2093_v58 = vld [vmem:[#allocation2 + $0x18a] sm:$0xff] }
 0x105   : > { %v5432_v43 = vpack.c.bf16 %v2093_v58, %v2092_v3  ;;  %v2988_v3 = vld [vmem:[#allocation2 + $0x82] sm:$0xff] }
 0x106   : > { %v5412_v44 = vpop.f32.mrf.mxu0  ;;  %v3016_v8 = vpack.c.bf16 %v2988_v3, %v2987_v19  ;;  %v2991_v19 = vld [vmem:[#allocation2 + $0xaa] sm:$0xff] }
 0x107   : > { %v5414_v5 = vpop.f32.mrf.mxu1 }
 0x108   : > { %v5416_v10 = vpop.f32.mrf.mxu0 }
 0x109   : > { %v5418_v1 = vpop.f32.mrf.mxu1 }
 0x10a   : > { %4413 = vmatmul.mubr.bf16.gmra.mxu0 %v5217_v25  ;;  %v5421_v36 = vpop.f32.mrf.mxu0  ;;  %v2416_v25 = vpack.c.bf16 %v4651_v59, %v4651_v59 }
 0x10b   : > { %4365 = vmatmul.mubr.bf16.gmra.mxu1 %v5207_v2  ;;  %v5424_v51 = vpop.f32.mrf.mxu1  ;;  %4416 = vmatprep.mubr.bf16.mxu0 %v5308_v27  ;;  %v3013_v2 = vpack.c.bf16 %v2982_v31, %v2981_v30  ;;  %v2682_v31 = vld [vmem:[#allocation2 + $0x81] sm:$0xff] }
 0x10c   : > { %4368 = vmatprep.mubr.bf16.mxu1 %v5215_v23  ;;  %v5428_v53 = vpop.f32.mrf.mxu0  ;;  %v2677_v23 = vld [vmem:[#allocation2 + $0x49] sm:$0xff]  ;;  %v2710_v22 = vpack.c.bf16 %v2682_v31, %v2681_v17  ;;  %v2992_v17 = vld [vmem:[#allocation2 + $0xb2] sm:$0xff] }
 0x10d   : > { %v5430_v12 = vpop.f32.mrf.mxu1  ;;  %v2708_v48 = vpack.c.bf16 %v2678_v11, %v2677_v23  ;;  %v2993_v31 = vld [vmem:[#allocation2 + $0xc2] sm:$0xff] }
 0x112   : > { %v5434_v54 = vpop.f32.mrf.mxu0  ;;  %4417 = vmatmul.mubr.bf16.gmra.mxu0 %v2416_v25  ;;  %v2683_v25 = vld [vmem:[#allocation2 + $0x91] sm:$0xff] }
 0x113   : > { %v5436_v56 = vpop.f32.mrf.mxu1  ;;  %4369 = vmatmul.mubr.bf16.gmra.mxu1 %v5432_v43  ;;  %4484 = vmatprep.mubr.bf16.mxu0 %v3013_v2  ;;  %v2684_v2 = vld [vmem:[#allocation2 + $0x99] sm:$0xff] }
 0x114   : > { %v5439_v9 = vpop.f32.mrf.mxu0  ;;  %4436 = vmatprep.mubr.bf16.mxu1 %v2707_v46 }
 0x115   : > { %v5441_v27 = vpop.f32.mrf.mxu1 }
 0x116   : > { %v5443_v18 = vpop.f32.mrf.mxu0 }
 0x117   : > { %v5445_v40 = vpop.f32.mrf.mxu1 }
 0x118   : > { %v5447_v61 = vpop.f32.mrf.mxu0 }
 0x119   : > { %v5449_v63 = vpop.f32.mrf.mxu1 }
 0x11a   : > { %v4198_v0 = vpop.f32.mrf.mxu0  ;;  %4485 = vmatmul.mubr.bf16.vlgmr.msra.gmra.mxu0 %v3014_v28  ;;  %v2711_v28 = vpack.c.bf16 %v2684_v2, %v2683_v25  ;;  %v3018_v2 = vpack.c.bf16 %v2992_v17, %v2991_v19  ;;  %v2998_v19 = vld [vmem:[#allocation2 + $0xfa] sm:$0xff] }
 0x11b   : > { %v4150_v15 = vpop.f32.mrf.mxu1  ;;  %4437 = vmatmul.mubr.bf16.vlgmr.msra.gmra.mxu1 %v2708_v48  ;;  %4488 = vmatprep.mubr.bf16.mxu0 %v3015_v49 }
 0x11c   : > { %v1026_v58 = vadd.f32 %v4150_v15, %v5372_v20  ;;  %v1291_v30 = vpop.f32.mrf.mxu0  ;;  %4440 = vmatprep.mubr.bf16.mxu1 %v2709_v62 }
 0x11d   : > { %v1017_v59 = vpop.f32.mrf.mxu1 }
 0x11e   : > { %v5452_v46 = vadd.f32 %v4198_v0, %v1026_v58  ;;  %v1018_v23 = vadd.f32 %v1017_v59, %v5376_v37  ;;  %v4199_v57 = vpop.f32.mrf.mxu0  ;;  %v2685_v37 = vld [vmem:[#allocation2 + $0xa9] sm:$0xff] }
 0x11f   : > { %v4151_v11 = vpop.f32.mrf.mxu1 }
 0x120   : > { %v5455_v16 = vadd.f32 %v1291_v30, %v1018_v23  ;;  %v1029_v20 = vadd.f32 %v4151_v11, %v5381_v38  ;;  %v1294_v50 = vpop.f32.mrf.mxu0  ;;  %v2686_v30 = vld [vmem:[#allocation2 + $0xb1] sm:$0xff] }
 0x121   : > { %v1020_v48 = vpop.f32.mrf.mxu1 }
 0x122   : > { %v5458_v49 = vadd.f32 %v4199_v57, %v1029_v20  ;;  %v1021_v62 = vadd.f32 %v1020_v48, %v5387_v4  ;;  %v4202_v0 = vpop.f32.mrf.mxu0  ;;  %4489 = vmatmul.mubr.bf16.gmra.mxu0 %v3016_v8  ;;  %v2712_v57 = vpack.c.bf16 %v2686_v30, %v2685_v37  ;;  %v3019_v8 = vpack.c.bf16 %v2994_v32, %v2993_v31 }
 0x123   : > { %v4154_v15 = vpop.f32.mrf.mxu1  ;;  %4441 = vmatmul.mubr.bf16.gmra.mxu1 %v2710_v22  ;;  %4492 = vmatprep.mubr.bf16.mxu0 %v3017_v26 }
 0x124   : > { %v5461_v3 = vadd.f32 %v1294_v50, %v1021_v62  ;;  %v1042_v58 = vadd.f32 %v4154_v15, %v5392_v29  ;;  %v1307_v38 = vpop.f32.mrf.mxu0  ;;  %4444 = vmatprep.mubr.bf16.mxu1 %v2711_v28  ;;  %v2996_v62 = vld [vmem:[#allocation2 + $0xe2] sm:$0xff] }
 0x125   : > { %v1033_v35 = vpop.f32.mrf.mxu1 }
 0x126   : > { %v5464_v59 = vadd.f32 %v4202_v0, %v1042_v58  ;;  %v1034_v4 = vadd.f32 %v1033_v35, %v5396_v24  ;;  %v4203_v25 = vpop.f32.mrf.mxu0  ;;  %v2995_v24 = vld [vmem:[#allocation2 + $0xda] sm:$0xff] }
 0x127   : > { %v4155_v23 = vpop.f32.mrf.mxu1  ;;  %v3020_v30 = vpack.c.bf16 %v2996_v62, %v2995_v24 }
 0x128   : > { %v5467_v11 = vadd.f32 %v1307_v38, %v1034_v4  ;;  %v1045_v22 = vadd.f32 %v4155_v23, %v5401_v60  ;;  %v1310_v29 = vpop.f32.mrf.mxu0  ;;  %v2997_v60 = vld [vmem:[#allocation2 + $0xf2] sm:$0xff] }
 0x129   : > { %v1036_v26 = vpop.f32.mrf.mxu1  ;;  %v3021_v32 = vpack.c.bf16 %v2998_v19, %v2997_v60 }
 0x12a   : > { %v5470_v20 = vadd.f32 %v4203_v25, %v1045_v22  ;;  %v1037_v50 = vadd.f32 %v1036_v26, %v5407_v52  ;;  %v4206_v28 = vpop.f32.mrf.mxu0  ;;  %4493 = vmatmul.mubr.bf16.gmra.mxu0 %v3018_v2 }
 0x12b   : > { %v4158_v48 = vpop.f32.mrf.mxu1  ;;  %4445 = vmatmul.mubr.bf16.gmra.mxu1 %v2712_v57  ;;  %4496 = vmatprep.mubr.bf16.mxu0 %v3019_v8  ;;  %v3000_v8 = vld [vmem:[#allocation2 + $0x112] sm:$0xff] }
 0x12c   : > { %v5473_v0 = vadd.f32 %v1310_v29, %v1037_v50  ;;  %v1058_v15 = vadd.f32 %v4158_v48, %v5412_v44  ;;  %v1323_v37 = vpop.f32.mrf.mxu0  ;;  %4448 = vmatprep.mubr.bf16.mxu1 %v5269_v55  ;;  %v3002_v50 = vld [vmem:[#allocation2 + $0x12a] sm:$0xff]  ;;  %v2695_v48 = vld [vmem:[#allocation2 + $0x121] sm:$0xff] }
 0x12d   : > { %v1049_v17 = vpop.f32.mrf.mxu1 }
 0x12e   : > { %v5477_v58 = vadd.f32 %v4206_v28, %v1058_v15  ;;  %v1050_v52 = vadd.f32 %v1049_v17, %v5416_v10  ;;  %v4207_v38 = vpop.f32.mrf.mxu0  ;;  %v2999_v10 = vld [vmem:[#allocation2 + $0x10a] sm:$0xff] }
 0x12f   : > { %v4159_v31 = vpop.f32.mrf.mxu1  ;;  %v3022_v15 = vpack.c.bf16 %v3000_v8, %v2999_v10  ;;  %v3006_v10 = vld [vmem:[#allocation2 + $0x15a] sm:$0xff] }
 0x130   : > { %v5480_v35 = vadd.f32 %v1323_v37, %v1050_v52  ;;  %v1061_v4 = vadd.f32 %v4159_v31, %v5421_v36  ;;  %v1326_v25 = vpop.f32.mrf.mxu0  ;;  %v3001_v36 = vld [vmem:[#allocation2 + $0x122] sm:$0xff] }
 0x131   : > { %v1052_v44 = vpop.f32.mrf.mxu1  ;;  %v3023_v60 = vpack.c.bf16 %v3002_v50, %v3001_v36 }
 0x132   : > { %v5483_v2 = vadd.f32 %v4207_v38, %v1061_v4  ;;  %v1053_v55 = vadd.f32 %v1052_v44, %v5428_v53  ;;  %v4210_v23 = vpop.f32.mrf.mxu0  ;;  %4497 = vmatmul.mubr.bf16.gmra.mxu0 %v3020_v30  ;;  %v2696_v53 = vld [vmem:[#allocation2 + $0x129] sm:$0xff]  ;;  %v3003_v4 = vld [vmem:[#allocation2 + $0x13a] sm:$0xff] }
 0x133   : > { %v4162_v57 = vpop.f32.mrf.mxu1  ;;  %4449 = vmatmul.mubr.bf16.gmra.mxu1 %v5274_v42  ;;  %4500 = vmatprep.mubr.bf16.mxu0 %v3021_v32  ;;  %v2717_v52 = vpack.c.bf16 %v2696_v53, %v2695_v48 }
 0x134   : > { %v5487_v22 = vadd.f32 %v1326_v25, %v1053_v55  ;;  %v1074_v29 = vadd.f32 %v4162_v57, %v5434_v54  ;;  %v1339_v26 = vpop.f32.mrf.mxu0  ;;  %4452 = vmatprep.mubr.bf16.mxu1 %v5289_v13  ;;  %v3004_v25 = vld [vmem:[#allocation2 + $0x142] sm:$0xff]  ;;  %v3005_v57 = vld [vmem:[#allocation2 + $0x152] sm:$0xff] }
 0x135   : > { %v1065_v28 = vpop.f32.mrf.mxu1  ;;  %v3024_v50 = vpack.c.bf16 %v3004_v25, %v3003_v4  ;;  %v3025_v53 = vpack.c.bf16 %v3006_v10, %v3005_v57 }
 0x136   : > { %v5491_v24 = vadd.f32 %v4210_v23, %v1074_v29  ;;  %v1066_v62 = vadd.f32 %v1065_v28, %v5439_v9  ;;  %v4211_v42 = vpop.f32.mrf.mxu0  ;;  %v2697_v9 = vld [vmem:[#allocation2 + $0x139] sm:$0xff]  ;;  %v2698_v23 = vld [vmem:[#allocation2 + $0x141] sm:$0xff] }
 0x137   : > { %v4163_v37 = vpop.f32.mrf.mxu1  ;;  %v2700_v29 = vld [vmem:[#allocation2 + $0x159] sm:$0xff]  ;;  %v2718_v48 = vpack.c.bf16 %v2698_v23, %v2697_v9  ;;  %v2702_v9 = vld [vmem:[#allocation2 + $0x171] sm:$0xff] }
 0x138   : > { %v5494_v19 = vadd.f32 %v1339_v26, %v1066_v62  ;;  %v1077_v54 = vadd.f32 %v4163_v37, %v5443_v18  ;;  %v1342_v17 = vpop.f32.mrf.mxu0 }
 0x139   : > { %v1068_v13 = vpop.f32.mrf.mxu1 }
 0x13a   : > { %v5497_v38 = vadd.f32 %v4211_v42, %v1077_v54  ;;  %v1069_v30 = vadd.f32 %v1068_v13, %v5447_v61  ;;  %v4214_v31 = vpop.f32.mrf.mxu0  ;;  %4501 = vmatmul.mubr.bf16.gmra.mxu0 %v3022_v15  ;;  %v2699_v61 = vld [vmem:[#allocation2 + $0x151] sm:$0xff] }
 0x13b   : > { %v4166_v32 = vpop.f32.mrf.mxu1  ;;  %4453 = vmatmul.mubr.bf16.gmra.mxu1 %v5294_v21  ;;  %4504 = vmatprep.mubr.bf16.mxu0 %v3023_v60  ;;  %v2719_v15 = vpack.c.bf16 %v2700_v29, %v2699_v61  ;;  %v3008_v13 = vld [vmem:[#allocation2 + $0x172] sm:$0xff] }
 0x13c   : > { %v5501_v44 = vadd.f32 %v1342_v17, %v1069_v30  ;;  %v1090_v18 = vadd.f32 %v4166_v32, %v5374_v34  ;;  %v1355_v55 = vpop.f32.mrf.mxu0  ;;  %4456 = vmatprep.mubr.bf16.mxu1 %v2717_v52 }
 0x13d   : > { %v1081_v8 = vpop.f32.mrf.mxu1 }
 0x13e   : > { %v5504_v26 = vadd.f32 %v4214_v31, %v1090_v18  ;;  %v1082_v21 = vadd.f32 %v1081_v8, %v5378_v39  ;;  %v4215_v36 = vpop.f32.mrf.mxu0  ;;  %v3007_v39 = vld [vmem:[#allocation2 + $0x16a] sm:$0xff] }
 0x13f   : > { %v4167_v28 = vpop.f32.mrf.mxu1 }
 0x140   : > { %v5507_v62 = vadd.f32 %v1355_v55, %v1082_v21  ;;  %v1093_v34 = vadd.f32 %v4167_v28, %v5383_v6  ;;  %v1358_v42 = vpop.f32.mrf.mxu0  ;;  %v2701_v6 = vld [vmem:[#allocation2 + $0x169] sm:$0xff]  ;;  %v3026_v55 = vpack.c.bf16 %v3008_v13, %v3007_v39 }
 0x141   : > { %v1084_v37 = vpop.f32.mrf.mxu1  ;;  %v2720_v57 = vpack.c.bf16 %v2702_v9, %v2701_v6  ;;  %v3012_v28 = vld [vmem:[#allocation2 + $0x1a2] sm:$0xff] }
 0x142   : > { %v5510_v60 = vadd.f32 %v4215_v36, %v1093_v34  ;;  %v1085_v54 = vadd.f32 %v1084_v37, %v5389_v14  ;;  %v4218_v17 = vpop.f32.mrf.mxu0  ;;  %4505 = vmatmul.mubr.bf16.gmra.mxu0 %v3024_v50 }
 0x143   : > { %v4170_v52 = vpop.f32.mrf.mxu1  ;;  %4457 = vmatmul.mubr.bf16.gmra.mxu1 %v2718_v48  ;;  %4508 = vmatprep.mubr.bf16.mxu0 %v3025_v53 }
 0x144   : > { %v5513_v30 = vadd.f32 %v1358_v42, %v1085_v54  ;;  %v1106_v31 = vadd.f32 %v4170_v52, %v5394_v47  ;;  %v1371_v32 = vpop.f32.mrf.mxu0  ;;  %4460 = vmatprep.mubr.bf16.mxu1 %v2719_v15  ;;  %v2706_v42 = vld [vmem:[#allocation2 + $0x1a1] sm:$0xff] }
 0x145   : > { %v1097_v4 = vpop.f32.mrf.mxu1 }
 0x146   : > { %v5516_v25 = vadd.f32 %v4218_v17, %v1106_v31  ;;  %v1098_v14 = vadd.f32 %v1097_v4, %v5398_v45  ;;  %v4219_v18 = vpop.f32.mrf.mxu0  ;;  %v3011_v45 = vld [vmem:[#allocation2 + $0x19a] sm:$0xff] }
 0x147   : > { %v4171_v23 = vpop.f32.mrf.mxu1  ;;  %v3028_v17 = vpack.c.bf16 %v3012_v28, %v3011_v45 }
 0x148   : > { %v5519_v10 = vadd.f32 %v1371_v32, %v1098_v14  ;;  %v1109_v8 = vadd.f32 %v4171_v23, %v5403_v7  ;;  %v1374_v61 = vpop.f32.mrf.mxu0  ;;  %v2705_v7 = vld [vmem:[#allocation2 + $0x199] sm:$0xff] }
 0x149   : > { %v1100_v29 = vpop.f32.mrf.mxu1 }
 0x14a   : > { %v5522_v47 = vadd.f32 %v4219_v18, %v1109_v8  ;;  %v1101_v21 = vadd.f32 %v1100_v29, %v5409_v41  ;;  %v4222_v36 = vpop.f32.mrf.mxu0  ;;  %4509 = vmatmul.mubr.bf16.gmra.mxu0 %v3026_v55 }
 0x14b   : > { %v4174_v50 = vpop.f32.mrf.mxu1  ;;  %4461 = vmatmul.mubr.bf16.gmra.mxu1 %v2720_v57  ;;  %4512 = vmatprep.mubr.bf16.mxu0 %v5432_v43  ;;  %v2722_v43 = vpack.c.bf16 %v2706_v42, %v2705_v7 }
 0x14c   : > { %v5526_v48 = vadd.f32 %v1374_v61, %v1101_v21  ;;  %v1122_v53 = vadd.f32 %v4174_v50, %v5414_v5  ;;  %v1387_v34 = vpop.f32.mrf.mxu0  ;;  %4464 = vmatprep.mubr.bf16.mxu1 %v5189_v33 }
 0x14d   : > { %v1113_v15 = vpop.f32.mrf.mxu1 }
 0x14e   : > { %v5530_v37 = vadd.f32 %v4222_v36, %v1122_v53  ;;  %v1114_v41 = vadd.f32 %v1113_v15, %v5418_v1  ;;  %v4223_v54 = vpop.f32.mrf.mxu0 }
 0x14f   : > { %v4175_v52 = vpop.f32.mrf.mxu1 }
 0x150   : > { %v5533_v39 = vadd.f32 %v1387_v34, %v1114_v41  ;;  %v1125_v13 = vadd.f32 %v4175_v52, %v5424_v51  ;;  %v1390_v31 = vpop.f32.mrf.mxu0 }
 0x151   : > { %v1116_v5 = vpop.f32.mrf.mxu1 }
 0x152   : > { %v5536_v32 = vadd.f32 %v4223_v54, %v1125_v13  ;;  %v1117_v33 = vadd.f32 %v1116_v5, %v5430_v12  ;;  %v4226_v6 = vpop.f32.mrf.mxu0  ;;  %4513 = vmatmul.mubr.bf16.gmra.mxu0 %v3028_v17 }
 0x153   : > { %v4178_v9 = vpop.f32.mrf.mxu1  ;;  %4465 = vmatmul.mubr.bf16.gmra.mxu1 %v2722_v43 }
 0x154   : > { %v5539_v4 = vadd.f32 %v1390_v31, %v1117_v33  ;;  %v1138_v1 = vadd.f32 %v4178_v9, %v5436_v56  ;;  %v1403_v14 = vpop.f32.mrf.mxu0 }
 0x155   : > { %v1129_v18 = vpop.f32.mrf.mxu1 }
 0x156   : > { %v5542_v55 = vadd.f32 %v4226_v6, %v1138_v1  ;;  %v1130_v51 = vadd.f32 %v1129_v18, %v5441_v27  ;;  %v4227_v23 = vpop.f32.mrf.mxu0 }
 0x157   : > { %v4179_v57 = vpop.f32.mrf.mxu1 }
 0x158   : > { %v5545_v8 = vadd.f32 %v1403_v14, %v1130_v51  ;;  %v1141_v12 = vadd.f32 %v4179_v57, %v5445_v40  ;;  %v1406_v61 = vpop.f32.mrf.mxu0 }
 0x159   : > { %v1132_v29 = vpop.f32.mrf.mxu1 }
 0x15a   : > { %v5548_v21 = vadd.f32 %v4227_v23, %v1141_v12  ;;  %v1133_v36 = vadd.f32 %v1132_v29, %v5449_v63  ;;  %v4294_v50 = vpop.f32.mrf.mxu0 }
 0x15b   : > { %v4246_v56 = vpop.f32.mrf.mxu1 }
 0x15c   : > { %v5551_v45 = vadd.f32 %v1406_v61, %v1133_v36  ;;  %v1726_v28 = vadd.f32 %v4246_v56, %v5452_v46  ;;  %v1903_v53 = vpop.f32.mrf.mxu0 }
 0x15d   : > { %v1597_v27 = vpop.f32.mrf.mxu1 }
 0x15e   : > { %v5554_v34 = vadd.f32 %v4294_v50, %v1726_v28  ;;  %v1724_v7 = vadd.f32 %v1597_v27, %v5455_v16  ;;  %v4295_v42 = vpop.f32.mrf.mxu0 }
 0x15f   : > { %v4247_v40 = vpop.f32.mrf.mxu1 }
 0x160   : > { %v5557_v15 = vadd.f32 %v1903_v53, %v1724_v7  ;;  %v1727_v41 = vadd.f32 %v4247_v40, %v5458_v49  ;;  %v1906_v54 = vpop.f32.mrf.mxu0 }
 0x161   : > { %v1600_v63 = vpop.f32.mrf.mxu1 }
 0x162   : > { %v5560_v17 = vadd.f32 %v4295_v42, %v1727_v41  ;;  %v1725_v52 = vadd.f32 %v1600_v63, %v5461_v3  ;;  %v4298_v43 = vpop.f32.mrf.mxu0 }
 0x163   : > { %v4250_v46 = vpop.f32.mrf.mxu1 }
 0x164   : > { %v5563_v13 = vadd.f32 %v1906_v54, %v1725_v52  ;;  %v1730_v31 = vadd.f32 %v4250_v46, %v5464_v59  ;;  %v1919_v5 = vpop.f32.mrf.mxu0 }
 0x165   : > { %v1613_v16 = vpop.f32.mrf.mxu1 }
 0x166   : > { %v5566_v33 = vadd.f32 %v4298_v43, %v1730_v31  ;;  %v1728_v6 = vadd.f32 %v1613_v16, %v5467_v11  ;;  %v4299_v9 = vpop.f32.mrf.mxu0 }
 0x167   : > { %v4251_v49 = vpop.f32.mrf.mxu1 }
 0x168   : > { %v5569_v1 = vadd.f32 %v1919_v5, %v1728_v6  ;;  %v1731_v14 = vadd.f32 %v4251_v49, %v5470_v20  ;;  %v1922_v18 = vpop.f32.mrf.mxu0 }
 0x169   : > { %v1616_v3 = vpop.f32.mrf.mxu1 }
 0x16a   : > { %v5572_v51 = vadd.f32 %v4299_v9, %v1731_v14  ;;  %v1729_v23 = vadd.f32 %v1616_v3, %v5473_v0  ;;  %v4302_v57 = vpop.f32.mrf.mxu0 }
 0x16b   : > { %v4254_v59 = vpop.f32.mrf.mxu1 }
 0x16c   : > { %v5575_v12 = vadd.f32 %v1922_v18, %v1729_v23  ;;  %v1734_v61 = vadd.f32 %v4254_v59, %v5477_v58  ;;  %v1935_v29 = vpop.f32.mrf.mxu0 }
 0x16d   : > { %v1629_v11 = vpop.f32.mrf.mxu1 }
 0x16e   : > { %v5578_v36 = vadd.f32 %v4302_v57, %v1734_v61  ;;  %v1732_v50 = vadd.f32 %v1629_v11, %v5480_v35  ;;  %v4303_v56 = vpop.f32.mrf.mxu0 }
 0x16f   : > { %v4255_v20 = vpop.f32.mrf.mxu1 }
 0x170   : > { %v5581_v28 = vadd.f32 %v1935_v29, %v1732_v50  ;;  %v1735_v53 = vadd.f32 %v4255_v20, %v5483_v2  ;;  %v1938_v27 = vpop.f32.mrf.mxu0 }
 0x171   : > { %v1632_v0 = vpop.f32.mrf.mxu1 }
 0x172   : > { %v5584_v7 = vadd.f32 %v4303_v56, %v1735_v53  ;;  %v1733_v42 = vadd.f32 %v1632_v0, %v5487_v22  ;;  %v4306_v40 = vpop.f32.mrf.mxu0 }
 0x173   : > { %v4258_v58 = vpop.f32.mrf.mxu1 }
 0x174   : > { %v5587_v41 = vadd.f32 %v1938_v27, %v1733_v42  ;;  %v1738_v54 = vadd.f32 %v4258_v58, %v5491_v24  ;;  %v1951_v63 = vpop.f32.mrf.mxu0 }
 0x175   : > { %v1645_v35 = vpop.f32.mrf.mxu1 }
 0x176   : > { %v5590_v52 = vadd.f32 %v4306_v40, %v1738_v54  ;;  %v1736_v43 = vadd.f32 %v1645_v35, %v5494_v19  ;;  %v4307_v46 = vpop.f32.mrf.mxu0 }
 0x177   : > { %v4259_v2 = vpop.f32.mrf.mxu1 }
 0x178   : > { %v5593_v31 = vadd.f32 %v1951_v63, %v1736_v43  ;;  %v1739_v5 = vadd.f32 %v4259_v2, %v5497_v38  ;;  %v1954_v16 = vpop.f32.mrf.mxu0 }
 0x179   : > { %v1648_v22 = vpop.f32.mrf.mxu1 }
 0x17a   : > { %v5596_v6 = vadd.f32 %v4307_v46, %v1739_v5  ;;  %v1737_v9 = vadd.f32 %v1648_v22, %v5501_v44  ;;  %v4310_v49 = vpop.f32.mrf.mxu0 }
 0x17b   : > { %v4262_v24 = vpop.f32.mrf.mxu1 }
 0x17c   : > { %v5599_v14 = vadd.f32 %v1954_v16, %v1737_v9  ;;  %v1742_v18 = vadd.f32 %v4262_v24, %v5504_v26  ;;  %v1967_v3 = vpop.f32.mrf.mxu0 }
 0x17d   : > { %v1661_v19 = vpop.f32.mrf.mxu1 }
 0x17e   : > { %v5602_v23 = vadd.f32 %v4310_v49, %v1742_v18  ;;  %v1740_v57 = vadd.f32 %v1661_v19, %v5507_v62  ;;  %v4311_v59 = vpop.f32.mrf.mxu0 }
 0x17f   : > { %v4263_v38 = vpop.f32.mrf.mxu1 }
 0x180   : > { %v5605_v61 = vadd.f32 %v1967_v3, %v1740_v57  ;;  %v1743_v29 = vadd.f32 %v4263_v38, %v5510_v60  ;;  %v1970_v11 = vpop.f32.mrf.mxu0 }
 0x181   : > { %v1664_v44 = vpop.f32.mrf.mxu1 }
 0x182   : > { %v5608_v50 = vadd.f32 %v4311_v59, %v1743_v29  ;;  %v1741_v56 = vadd.f32 %v1664_v44, %v5513_v30  ;;  %v4314_v20 = vpop.f32.mrf.mxu0 }
 0x183   : > { %v4266_v26 = vpop.f32.mrf.mxu1 }
 0x184   : > { %5997 = vst [vmem:[#allocation9_spill] sm:$0xff] %v5608_v50  ;;  %v5611_v53 = vadd.f32 %v1970_v11, %v1741_v56  ;;  %v1746_v27 = vadd.f32 %v4266_v26, %v5516_v25  ;;  %v1983_v0 = vpop.f32.mrf.mxu0 }
 0x185   : > { %v1677_v62 = vpop.f32.mrf.mxu1 }
 0x186   : > { %5998 = vst [vmem:[#allocation10_spill] sm:$0xff] %v5611_v53  ;;  %v5614_v42 = vadd.f32 %v4314_v20, %v1746_v27  ;;  %v1744_v40 = vadd.f32 %v1677_v62, %v5519_v10  ;;  %v4315_v58 = vpop.f32.mrf.mxu0 }
 0x187   : > { %v4267_v60 = vpop.f32.mrf.mxu1 }
 0x188   : > { %5999 = vst [vmem:[#allocation11_spill] sm:$0xff] %v5614_v42  ;;  %v5617_v54 = vadd.f32 %v1983_v0, %v1744_v40  ;;  %v1747_v63 = vadd.f32 %v4267_v60, %v5522_v47  ;;  %v1986_v35 = vpop.f32.mrf.mxu0 }
 0x189   : > { %v1680_v30 = vpop.f32.mrf.mxu1 }
 0x18a   : > { %6000 = vst [vmem:[#allocation12_spill] sm:$0xff] %v5617_v54  ;;  %v5620_v43 = vadd.f32 %v4315_v58, %v1747_v63  ;;  %v1745_v46 = vadd.f32 %v1680_v30, %v5526_v48  ;;  %v4318_v2 = vpop.f32.mrf.mxu0 }
 0x18b   : > { %v4270_v25 = vpop.f32.mrf.mxu1 }
 0x18c   : > { %6001 = vst [vmem:[#allocation13_spill] sm:$0xff] %v5620_v43  ;;  %v5623_v5 = vadd.f32 %v1986_v35, %v1745_v46  ;;  %v1750_v16 = vadd.f32 %v4270_v25, %v5530_v37  ;;  %v1999_v22 = vpop.f32.mrf.mxu0 }
 0x18d   : > { %v1693_v10 = vpop.f32.mrf.mxu1 }
 0x18e   : > { %6002 = vst [vmem:[#allocation14_spill] sm:$0xff] %v5623_v5  ;;  %v5626_v9 = vadd.f32 %v4318_v2, %v1750_v16  ;;  %v1748_v49 = vadd.f32 %v1693_v10, %v5533_v39  ;;  %v4319_v24 = vpop.f32.mrf.mxu0 }
 0x18f   : > { %v4271_v47 = vpop.f32.mrf.mxu1 }
 0x190   : > { %6003 = vst [vmem:[#allocation15_spill] sm:$0xff] %v5626_v9  ;;  %v5629_v18 = vadd.f32 %v1999_v22, %v1748_v49  ;;  %v1751_v3 = vadd.f32 %v4271_v47, %v5536_v32  ;;  %v2002_v19 = vpop.f32.mrf.mxu0 }
 0x191   : > { %v1696_v48 = vpop.f32.mrf.mxu1 }
 0x192   : > { %6004 = vst [vmem:[#allocation16_spill] sm:$0xff] %v5629_v18  ;;  %v5632_v57 = vadd.f32 %v4319_v24, %v1751_v3  ;;  %v1749_v59 = vadd.f32 %v1696_v48, %v5539_v4  ;;  %v4322_v38 = vpop.f32.mrf.mxu0 }
 0x193   : > { %v4274_v37 = vpop.f32.mrf.mxu1 }
 0x194   : > { %6005 = vst [vmem:[#allocation17_spill] sm:$0xff] %v5632_v57  ;;  %v5635_v29 = vadd.f32 %v2002_v19, %v1749_v59  ;;  %v1754_v11 = vadd.f32 %v4274_v37, %v5542_v55  ;;  %v2015_v44 = vpop.f32.mrf.mxu0 }
 0x195   : > { %v1709_v39 = vpop.f32.mrf.mxu1 }
 0x196   : > { %6006 = vst [vmem:[#allocation18_spill] sm:$0xff] %v5635_v29  ;;  %v5638_v56 = vadd.f32 %v4322_v38, %v1754_v11  ;;  %v1752_v20 = vadd.f32 %v1709_v39, %v5545_v8  ;;  %v4323_v26 = vpop.f32.mrf.mxu0 }
 0x197   : > { %v4275_v32 = vpop.f32.mrf.mxu1 }
 0x198   : > { %6007 = vst [vmem:[#allocation19_spill] sm:$0xff] %v5638_v56  ;;  %v5641_v27 = vadd.f32 %v2015_v44, %v1752_v20  ;;  %v1755_v0 = vadd.f32 %v4275_v32, %v5548_v21  ;;  %v2018_v62 = vpop.f32.mrf.mxu0 }
 0x199   : > { %v1712_v4 = vpop.f32.mrf.mxu1 }
 0x19a   : > { %6008 = vst [vmem:[#allocation20_spill] sm:$0xff] %v5641_v27  ;;  %v5644_v40 = vadd.f32 %v4323_v26, %v1755_v0  ;;  %v1753_v58 = vadd.f32 %v1712_v4, %v5551_v45  ;;  %v5647_v60 = vpop.f32.mrf.mxu0 }
 0x19b   : > { %v4342_v55 = vpop.f32.mrf.mxu1 }
 0x19c   : > { %6009 = vst [vmem:[#allocation21_spill] sm:$0xff] %v5644_v40  ;;  %v5649_v63 = vadd.f32 %v2018_v62, %v1753_v58  ;;  %v5651_v35 = vpop.f32.mrf.mxu0 }
 0x19d   : > { %v2209_v8 = vpop.f32.mrf.mxu1 }
 0x19e   : > { %6010 = vst [vmem:[#allocation22_spill] sm:$0xff] %v5649_v63  ;;  %v5653_v30 = vpop.f32.mrf.mxu0 }
 0x19f   : > { %v5655_v46 = vpop.f32.mrf.mxu1 }
 0x1a0   : > { %v5657_v2 = vpop.f32.mrf.mxu0 }
 0x1a1   : > { %v5659_v21 = vpop.f32.mrf.mxu1 }
 0x1a2   : > { %v5661_v25 = vpop.f32.mrf.mxu0 }
 0x1a3   : > { %v5663_v16 = vpop.f32.mrf.mxu1 }
 0x1a4   : > { %v5665_v45 = vpop.f32.mrf.mxu0 }
 0x1a5   : > { %v5667_v22 = vpop.f32.mrf.mxu1 }
 0x1a6   : > { %v5669_v10 = vpop.f32.mrf.mxu0 }
 0x1a7   : > { %v5671_v49 = vpop.f32.mrf.mxu1 }
 0x1a8   : > { %v5673_v24 = vpop.f32.mrf.mxu0 }
 0x1a9   : > { %v5675_v47 = vpop.f32.mrf.mxu1 }
 0x1aa   : > { %v5677_v3 = vpop.f32.mrf.mxu0 }
 0x1ab   : > { %v5679_v19 = vpop.f32.mrf.mxu1 }
 0x1ac   : > { %v5681_v48 = vpop.f32.mrf.mxu0 }
 0x1ad   : > { %v5683_v59 = vpop.f32.mrf.mxu1 }
 0x1ae   : > { %v5685_v38 = vpop.f32.mrf.mxu0 }
 0x1af   : > { %v5687_v37 = vpop.f32.mrf.mxu1 }
 0x1b0   : > { %v5689_v11 = vpop.f32.mrf.mxu0 }
 0x1b1   : > { %v5691_v44 = vpop.f32.mrf.mxu1 }
 0x1b2   : > { %v5693_v39 = vpop.f32.mrf.mxu0 }
 0x1b3   : > { %v5695_v20 = vpop.f32.mrf.mxu1 }
 0x1b4   : > { %v5697_v26 = vpop.f32.mrf.mxu0 }
 0x1b5   : > { %v5699_v32 = vpop.f32.mrf.mxu1 }
 0x1b6   : > { %v5701_v0 = vpop.f32.mrf.mxu0 }
 0x1b7   : > { %v5703_v62 = vpop.f32.mrf.mxu1 }
 0x1b8   : > { %v5705_v4 = vpop.f32.mrf.mxu0 }
 0x1b9   : > { %v5707_v58 = vpop.f32.mrf.mxu1 }
 0x1ba   : > { %v5709_v63 = vpop.f32.mrf.mxu0 }
 0x1bb   : > { %v5711_v40 = vpop.f32.mrf.mxu1 }
 0x1bc   : > { %v5713_v27 = vpop.f32.mrf.mxu0 }
 0x1bd   : > { %6011 = vst [vmem:[#allocation23_spill] sm:$0xff] %v5713_v27  ;;  %v5715_v56 = vpop.f32.mrf.mxu1 }
 0x1be   : > { %v5717_v29 = vpop.f32.mrf.mxu0 }
 0x1bf   : > { %6012 = vst [vmem:[#allocation24_spill] sm:$0xff] %v5717_v29  ;;  %v5719_v57 = vpop.f32.mrf.mxu1 }
 0x1c0   : > { %6013 = vst [vmem:[#allocation25_spill] sm:$0xff] %v5719_v57  ;;  %v5721_v18 = vpop.f32.mrf.mxu0 }
 0x1c1   : > { %6014 = vst [vmem:[#allocation26_spill] sm:$0xff] %v5721_v18  ;;  %v5723_v9 = vpop.f32.mrf.mxu1 }
 0x1c2   : > { %6015 = vst [vmem:[#allocation27_spill] sm:$0xff] %v5723_v9  ;;  %v5725_v5 = vpop.f32.mrf.mxu0 }
 0x1c3   : > { %6016 = vst [vmem:[#allocation28_spill] sm:$0xff] %v5725_v5  ;;  %v5727_v43 = vpop.f32.mrf.mxu1 }
 0x1c4   : > { %6017 = vst [vmem:[#allocation29_spill] sm:$0xff] %v5727_v43  ;;  %v5729_v54 = vpop.f32.mrf.mxu0 }
 0x1c5   : > { %6018 = vst [vmem:[#allocation30_spill] sm:$0xff] %v5729_v54  ;;  %v5731_v42 = vpop.f32.mrf.mxu1 }
 0x1c6   : > { %6019 = vst [vmem:[#allocation31_spill] sm:$0xff] %v5731_v42  ;;  %v5733_v53 = vpop.f32.mrf.mxu0 }
 0x1c7   : > { %6020 = vst [vmem:[#allocation32_spill] sm:$0xff] %v5733_v53  ;;  %v5735_v27 = vpop.f32.mrf.mxu1 }
 0x1c8   : > { %6021 = vst [vmem:[#allocation33_spill] sm:$0xff] %v5735_v27  ;;  %v5737_v50 = vpop.f32.mrf.mxu0 }
 0x1c9   : > { %6022 = vst [vmem:[#allocation34_spill] sm:$0xff] %v5737_v50  ;;  %v5739_v29 = vpop.f32.mrf.mxu1 }
 0x1ca   : > { %6023 = vst [vmem:[#allocation35_spill] sm:$0xff] %v5739_v29  ;;  %v5741_v57 = vpop.f32.mrf.mxu0 }
 0x1cb   : > { %6024 = vst [vmem:[#allocation36_spill] sm:$0xff] %v5741_v57  ;;  %v5743_v18 = vpop.f32.mrf.mxu1 }
 0x1cc   : > { %6025 = vst [vmem:[#allocation37_spill] sm:$0xff] %v5743_v18  ;;  %v5745_v9 = vpop.f32.mrf.mxu0 }
 0x1cd   : > { %6026 = vst [vmem:[#allocation38_spill] sm:$0xff] %v5745_v9  ;;  %v5747_v5 = vpop.f32.mrf.mxu1  ;;  %v2338_v9 = vadd.f32 %v4342_v55, %v5554_v34  ;;  %v2337_v55 = vadd.f32 %v5659_v21, %v5563_v13 }
 0x1ce   : > { %6027 = vst [vmem:[#allocation39_spill] sm:$0xff] %v5747_v5  ;;  %v5749_v54 = vpop.f32.mrf.mxu0 }
 0x1cf   : > { %6028 = vst [vmem:[#allocation40_spill] sm:$0xff] %v5749_v54  ;;  %v5751_v42 = vpop.f32.mrf.mxu1  ;;  %v2336_v54 = vadd.f32 %v2209_v8, %v5557_v15  ;;  %v2644_v13 = vadd.f32 %v5657_v2, %v2337_v55  ;;  %v2341_v2 = vadd.f32 %v5675_v47, %v5575_v12 }
 0x1d0   : > { %6029 = vst [vmem:[#allocation41_spill] sm:$0xff] %v5751_v42  ;;  %v5753_v53 = vpop.f32.mrf.mxu0 }
 0x1d1   : > { %6030 = vst [vmem:[#allocation42_spill] sm:$0xff] %v5753_v53  ;;  %v5755_v27 = vpop.f32.mrf.mxu1  ;;  %v2643_v34 = vadd.f32 %v5651_v35, %v2336_v54 }
 0x1d2   : > { %v5757_v50 = vpop.f32.mrf.mxu0 }
 0x1d3   : > { %6031 = vst [vmem:[#allocation43_spill] sm:$0xff] %v5757_v50  ;;  %v5759_v29 = vpop.f32.mrf.mxu1  ;;  %v2645_v50 = vadd.f32 %v5647_v60, %v2338_v9 }
 0x1d4   : > { %6032 = vst [vmem:[#allocation44_spill] sm:$0xff] %v5759_v29  ;;  %v5761_v57 = vpop.f32.mrf.mxu0 }
 0x1d5   : > { %6033 = vst [vmem:[#allocation45_spill] sm:$0xff] %v5761_v57  ;;  %v5763_v18 = vpop.f32.mrf.mxu1  ;;  %v2339_v57 = vadd.f32 %v5655_v46, %v5560_v17  ;;  %v2342_v17 = vadd.f32 %v5663_v16, %v5566_v33 }
 0x1d6   : > { %6034 = vst [vmem:[#allocation46_spill] sm:$0xff] %v5763_v18  ;;  %v5766_v43 = vpop.f32.mrf.mxu0 }
 0x1d7   : > { %6035 = vst [vmem:[#allocation47_spill] sm:$0xff] %v5766_v43  ;;  %v5768_v5 = vpop.f32.mrf.mxu1  ;;  %v2646_v9 = vadd.f32 %v5653_v30, %v2339_v57  ;;  %v2649_v57 = vadd.f32 %v5661_v25, %v2342_v17  ;;  %v2343_v30 = vadd.f32 %v5671_v49, %v5572_v51  ;;  %v2346_v25 = vadd.f32 %v5679_v19, %v5578_v36 }
 0x1d8   : > { %6036 = vst [vmem:[#allocation48_spill] sm:$0xff] %v5768_v5  ;;  %v5771_v42 = vpop.f32.mrf.mxu0 }
 0x1d9   : > { %6037 = vst [vmem:[#allocation49_spill] sm:$0xff] %v5771_v42  ;;  %v5773_v53 = vpop.f32.mrf.mxu1  ;;  %v2650_v12 = vadd.f32 %v5669_v10, %v2343_v30  ;;  %v2653_v19 = vadd.f32 %v5677_v3, %v2346_v25 }
 0x1da   : > { %v4486_v29 = vpop.f32.mrf.mxu0 }
 0x1db   : > { %v4438_v18 = vpop.f32.mrf.mxu1 }
 0x1dc   : > { %v2951_v43 = vadd.f32 %v4438_v18, %v2645_v50  ;;  %v3128_v5 = vpop.f32.mrf.mxu0  ;;  %v2340_v50 = vadd.f32 %v5667_v22, %v5569_v1 }
 0x1dd   : > { %v2822_v15 = vpop.f32.mrf.mxu1 }
 0x1de   : > { %v3257_v60 = vadd.f32 %v4486_v29, %v2951_v43  ;;  %v2949_v54 = vadd.f32 %v2822_v15, %v2643_v34  ;;  %v4487_v35 = vpop.f32.mrf.mxu0  ;;  %v2647_v1 = vadd.f32 %v5665_v45, %v2340_v50  ;;  %v2648_v45 = vadd.f32 %v5673_v24, %v2341_v2 }
 0x1df   : > { %v4439_v8 = vpop.f32.mrf.mxu1  ;;  %v2344_v50 = vadd.f32 %v5683_v59, %v5581_v28 }
 0x1e0   : > { %3289 = vst [vmem:[%s5785_s26 + $0x10] sm:$0xff] %v3257_v60  ;;  %v3255_v18 = vadd.f32 %v3128_v5, %v2949_v54  ;;  %v2952_v46 = vadd.f32 %v4439_v8, %v2646_v9  ;;  %v3131_v21 = vpop.f32.mrf.mxu0  ;;  %v3359_v54 = vmul.f32 %v3257_v60, %v3257_v60 }
 0x1e1   : > { %v2825_v42 = vpop.f32.mrf.mxu1 }
 0x1e2   : > { %3287 = vst [vmem:[%s5785_s26] sm:$0xff] %v3255_v18  ;;  %v3258_v33 = vadd.f32 %v4487_v35, %v2952_v46  ;;  %v2950_v43 = vadd.f32 %v2825_v42, %v2644_v13  ;;  %v4490_v29 = vpop.f32.mrf.mxu0  ;;  %v3357_v55 = vmul.f32 %v3255_v18, %v3255_v18 }
 0x1e3   : > { %v4442_v16 = vpop.f32.mrf.mxu1 }
 0x1e4   : > { %3290 = vst [vmem:[%s5785_s26 + $0x18] sm:$0xff] %v3258_v33  ;;  %v3256_v5 = vadd.f32 %v3131_v21, %v2950_v43  ;;  %v2955_v22 = vadd.f32 %v4442_v16, %v2649_v57  ;;  %v3144_v34 = vpop.f32.mrf.mxu0  ;;  %v3360_v21 = vmul.f32 %v3258_v33, %v3258_v33 }
 0x1e5   : > { %v2838_v42 = vpop.f32.mrf.mxu1 }
 0x1e6   : > { %3288 = vst [vmem:[%s5785_s26 + $0x8] sm:$0xff] %v3256_v5  ;;  %v3319_v15 = vadd.f32 %v3256_v5, %v3255_v18  ;;  %v3358_v9 = vmul.f32 %v3256_v5, %v3256_v5  ;;  %v3261_v51 = vadd.f32 %v4490_v29, %v2955_v22  ;;  %v2953_v49 = vadd.f32 %v2838_v42, %v2647_v1  ;;  %v4491_v17 = vpop.f32.mrf.mxu0 }
 0x1e7   : > { %v4443_v47 = vpop.f32.mrf.mxu1  ;;  %v2347_v18 = vadd.f32 %v5687_v37, %v5584_v7  ;;  %v2345_v29 = vadd.f32 %v5691_v44, %v5587_v41  ;;  %v2651_v1 = vadd.f32 %v5681_v48, %v2344_v50  ;;  %v2350_v42 = vadd.f32 %v5695_v20, %v5590_v52 }
 0x1e8   : > { %v3320_v35 = vadd.f32 %v3319_v15, %v3257_v60  ;;  %v3389_v8 = vadd.f32 %v3358_v9, %v3357_v55  ;;  %3293 = vst [vmem:[%s5785_s26 + $0x30] sm:$0xff] %v3261_v51  ;;  %v3259_v13 = vadd.f32 %v3144_v34, %v2953_v49  ;;  %v3147_v36 = vpop.f32.mrf.mxu0  ;;  %v2956_v46 = vadd.f32 %v4443_v47, %v2650_v12 }
 0x1e9   : > { %v2841_v10 = vpop.f32.mrf.mxu1  ;;  %v2654_v5 = vadd.f32 %v5685_v38, %v2347_v18  ;;  %v2652_v55 = vadd.f32 %v5689_v11, %v2345_v29  ;;  %v2348_v15 = vadd.f32 %v5699_v32, %v5593_v31  ;;  %v3363_v38 = vmul.f32 %v3261_v51, %v3261_v51 }
 0x1ea   : > { %v3390_v57 = vadd.f32 %v3389_v8, %v3359_v54  ;;  %3291 = vst [vmem:[%s5785_s26 + $0x20] sm:$0xff] %v3259_v13  ;;  %v3321_v24 = vadd.f32 %v3320_v35, %v3258_v33  ;;  %v2954_v60 = vadd.f32 %v2841_v10, %v2648_v45  ;;  %v4494_v43 = vpop.f32.mrf.mxu0  ;;  %v3361_v3 = vmul.f32 %v3259_v13, %v3259_v13 }
 0x1eb   : > { %v3262_v30 = vadd.f32 %v4491_v17, %v2956_v46  ;;  %v4446_v2 = vpop.f32.mrf.mxu1  ;;  %v2351_v47 = vadd.f32 %v5703_v62, %v5596_v6  ;;  %v2349_v10 = vadd.f32 %v5707_v58, %v5599_v14 }
 0x1ec   : > { %v3322_v28 = vadd.f32 %v3321_v24, %v3259_v13  ;;  %v3391_v59 = vadd.f32 %v3390_v57, %v3360_v21  ;;  %v3260_v16 = vadd.f32 %v3147_v36, %v2954_v60  ;;  %v2959_v7 = vadd.f32 %v4446_v2, %v2653_v19  ;;  %v3160_v37 = vpop.f32.mrf.mxu0 }
 0x1ed   : > { %3294 = vst [vmem:[%s5785_s26 + $0x38] sm:$0xff] %v3262_v30  ;;  %v2854_v33 = vpop.f32.mrf.mxu1  ;;  %v3364_v11 = vmul.f32 %v3262_v30, %v3262_v30  ;;  %v2657_v13 = vadd.f32 %v5693_v39, %v2350_v42  ;;  %v2658_v46 = vadd.f32 %v5701_v0, %v2351_v47  ;;  %v2354_v21 = vadd.f32 %v5711_v40, %v5602_v23 }
 0x1ee   : > { %v3392_v22 = vadd.f32 %v3391_v59, %v3361_v3  ;;  %3292 = vst [vmem:[%s5785_s26 + $0x28] sm:$0xff] %v3260_v16  ;;  %v3323_v34 = vadd.f32 %v3322_v28, %v3260_v16  ;;  %v3362_v25 = vmul.f32 %v3260_v16, %v3260_v16  ;;  %v3265_v41 = vadd.f32 %v4494_v43, %v2959_v7  ;;  %v4495_v44 = vpop.f32.mrf.mxu0  ;;  %v6038_v7 = vld [vmem:[#allocation9_spill] sm:$0xff] }
 0x1ef   : > { %v2957_v48 = vadd.f32 %v2854_v33, %v2651_v1  ;;  %v4447_v9 = vpop.f32.mrf.mxu1  ;;  %v2352_v3 = vadd.f32 %v5715_v56, %v5605_v61  ;;  %v2656_v59 = vadd.f32 %v5705_v4, %v2349_v10  ;;  %v2661_v16 = vadd.f32 %v5709_v63, %v2354_v21  ;;  %v6049_v21 = vld [vmem:[#allocation13_spill] sm:$0xff] }
 0x1f0   : > { %v3324_v49 = vadd.f32 %v3323_v34, %v3261_v51  ;;  %v3393_v17 = vadd.f32 %v3392_v22, %v3362_v25  ;;  %3297 = vst [vmem:[%s5785_s26 + $0x50] sm:$0xff] %v3265_v41  ;;  %v2960_v12 = vadd.f32 %v4447_v9, %v2654_v5  ;;  %v3163_v45 = vpop.f32.mrf.mxu0  ;;  %v2655_v51 = vadd.f32 %v5697_v26, %v2348_v15  ;;  %v6040_v25 = vld [vmem:[#allocation23_spill] sm:$0xff] }
 0x1f1   : > { %v3263_v54 = vadd.f32 %v3160_v37, %v2957_v48  ;;  %v2857_v35 = vpop.f32.mrf.mxu1  ;;  %v3367_v0 = vmul.f32 %v3265_v41, %v3265_v41  ;;  %v6039_v37 = vld [vmem:[#allocation25_spill] sm:$0xff] }
 0x1f2   : > { %v3394_v52 = vadd.f32 %v3393_v17, %v3363_v38  ;;  %v3325_v20 = vadd.f32 %v3324_v49, %v3262_v30  ;;  %v3266_v8 = vadd.f32 %v4495_v44, %v2960_v12  ;;  %v2958_v31 = vadd.f32 %v2857_v35, %v2652_v55  ;;  %v4498_v32 = vpop.f32.mrf.mxu0  ;;  %v6041_v44 = vld [vmem:[#allocation10_spill] sm:$0xff]  ;;  %v6042_v55 = vld [vmem:[#allocation27_spill] sm:$0xff]  ;;  %v6043_v17 = vld [vmem:[#allocation24_spill] sm:$0xff] }
 0x1f3   : > { %3295 = vst [vmem:[%s5785_s26 + $0x40] sm:$0xff] %v3263_v54  ;;  %v4450_v36 = vpop.f32.mrf.mxu1  ;;  %v3365_v50 = vmul.f32 %v3263_v54, %v3263_v54  ;;  %v2355_v1 = vadd.f32 %v6039_v37, %v6038_v7  ;;  %v2353_v42 = vadd.f32 %v6042_v55, %v6041_v44  ;;  %v6053_v7 = vld [vmem:[#allocation14_spill] sm:$0xff]  ;;  %v6054_v37 = vld [vmem:[#allocation35_spill] sm:$0xff] }
 0x1f4   : > { %v3326_v19 = vadd.f32 %v3325_v20, %v3263_v54  ;;  %v3395_v18 = vadd.f32 %v3394_v52, %v3364_v11  ;;  %3298 = vst [vmem:[%s5785_s26 + $0x58] sm:$0xff] %v3266_v8  ;;  %v3264_v6 = vadd.f32 %v3163_v45, %v2958_v31  ;;  %v3176_v62 = vpop.f32.mrf.mxu0  ;;  %v2963_v39 = vadd.f32 %v4450_v36, %v2657_v13  ;;  %v6044_v11 = vld [vmem:[#allocation11_spill] sm:$0xff]  ;;  %v6045_v54 = vld [vmem:[#allocation29_spill] sm:$0xff]  ;;  %v6046_v36 = vld [vmem:[#allocation26_spill] sm:$0xff] }
 0x1f5   : > { %v2870_v57 = vpop.f32.mrf.mxu1  ;;  %v3368_v61 = vmul.f32 %v3266_v8, %v3266_v8  ;;  %v2662_v12 = vadd.f32 %v6043_v17, %v2355_v1  ;;  %v2358_v35 = vadd.f32 %v6045_v54, %v6044_v11  ;;  %v2357_v1 = vadd.f32 %v6054_v37, %v6053_v7  ;;  %v6056_v55 = vld [vmem:[#allocation15_spill] sm:$0xff]  ;;  %v6058_v17 = vld [vmem:[#allocation34_spill] sm:$0xff] }
 0x1f6   : > { %v3396_v24 = vadd.f32 %v3395_v18, %v3365_v50  ;;  %3296 = vst [vmem:[%s5785_s26 + $0x48] sm:$0xff] %v3264_v6  ;;  %v3327_v26 = vadd.f32 %v3326_v19, %v3264_v6  ;;  %v3366_v60 = vmul.f32 %v3264_v6, %v3264_v6  ;;  %v2961_v43 = vadd.f32 %v2870_v57, %v2655_v51  ;;  %v4499_v29 = vpop.f32.mrf.mxu0  ;;  %v6047_v50 = vld [vmem:[#allocation12_spill] sm:$0xff]  ;;  %v6048_v18 = vld [vmem:[#allocation31_spill] sm:$0xff] }
 0x1f7   : > { %v3269_v30 = vadd.f32 %v4498_v32, %v2963_v39  ;;  %v4451_v2 = vpop.f32.mrf.mxu1  ;;  %v2660_v19 = vadd.f32 %v6046_v36, %v2353_v42  ;;  %v2356_v6 = vadd.f32 %v6048_v18, %v6047_v50  ;;  %v6050_v39 = vld [vmem:[#allocation33_spill] sm:$0xff]  ;;  %v6063_v50 = vld [vmem:[#allocation36_spill] sm:$0xff] }
 0x1f8   : > { %v3328_v14 = vadd.f32 %v3327_v26, %v3265_v41  ;;  %v3397_v58 = vadd.f32 %v3396_v24, %v3366_v60  ;;  %v3267_v28 = vadd.f32 %v3176_v62, %v2961_v43  ;;  %v2964_v23 = vadd.f32 %v4451_v2, %v2658_v46  ;;  %v3179_v40 = vpop.f32.mrf.mxu0  ;;  %v6057_v42 = vld [vmem:[#allocation37_spill] sm:$0xff] }
 0x1f9   : > { %3301 = vst [vmem:[%s5785_s26 + $0x70] sm:$0xff] %v3269_v30  ;;  %v2873_v5 = vpop.f32.mrf.mxu1  ;;  %v2659_v41 = vadd.f32 %v6040_v25, %v2352_v3  ;;  %v2359_v57 = vadd.f32 %v6050_v39, %v6049_v21  ;;  %v3371_v24 = vmul.f32 %v3269_v30, %v3269_v30 }
 0x1fa   : > { %v3398_v56 = vadd.f32 %v3397_v58, %v3367_v0  ;;  %3299 = vst [vmem:[%s5785_s26 + $0x60] sm:$0xff] %v3267_v28  ;;  %v3329_v33 = vadd.f32 %v3328_v14, %v3266_v8  ;;  %v3270_v22 = vadd.f32 %v4499_v29, %v2964_v23  ;;  %v4502_v34 = vpop.f32.mrf.mxu0  ;;  %v2962_v4 = vadd.f32 %v2873_v5, %v2656_v59  ;;  %v6051_v29 = vld [vmem:[#allocation28_spill] sm:$0xff]  ;;  %v6052_v59 = vld [vmem:[#allocation30_spill] sm:$0xff] }
 0x1fb   : > { %v4454_v63 = vpop.f32.mrf.mxu1  ;;  %v3369_v48 = vmul.f32 %v3267_v28, %v3267_v28  ;;  %v2665_v3 = vadd.f32 %v6051_v29, %v2358_v35 }
 0x1fc   : > { %v3330_v15 = vadd.f32 %v3329_v33, %v3267_v28  ;;  %v3399_v9 = vadd.f32 %v3398_v56, %v3368_v61  ;;  %3302 = vst [vmem:[%s5785_s26 + $0x78] sm:$0xff] %v3270_v22  ;;  %v2967_v38 = vadd.f32 %v4454_v63, %v2661_v16  ;;  %v3192_v49 = vpop.f32.mrf.mxu0  ;;  %v3268_v45 = vadd.f32 %v3179_v40, %v2962_v4  ;;  %v6055_v56 = vld [vmem:[#allocation32_spill] sm:$0xff] }
 0x1fd   : > { %v2886_v47 = vpop.f32.mrf.mxu1  ;;  %v3372_v58 = vmul.f32 %v3270_v22, %v3270_v22  ;;  %v2663_v16 = vadd.f32 %v6052_v59, %v2356_v6  ;;  %v2666_v33 = vadd.f32 %v6055_v56, %v2359_v57  ;;  %v6067_v59 = vld [vmem:[#allocation19_spill] sm:$0xff]  ;;  %v6069_v56 = vld [vmem:[#allocation42_spill] sm:$0xff] }
 0x1fe   : > { %v3400_v52 = vadd.f32 %v3399_v9, %v3369_v48  ;;  %v3273_v20 = vadd.f32 %v4502_v34, %v2967_v38  ;;  %v2965_v8 = vadd.f32 %v2886_v47, %v2659_v41  ;;  %v4503_v31 = vpop.f32.mrf.mxu0  ;;  %3300 = vst [vmem:[%s5785_s26 + $0x68] sm:$0xff] %v3268_v45  ;;  %v3331_v32 = vadd.f32 %v3330_v15, %v3268_v45  ;;  %v6060_v47 = vld [vmem:[#allocation39_spill] sm:$0xff] }
 0x1ff   : > { %v3370_v13 = vmul.f32 %v3268_v45, %v3268_v45  ;;  %v4455_v51 = vpop.f32.mrf.mxu1  ;;  %v6059_v45 = vld [vmem:[#allocation16_spill] sm:$0xff] }
 0x200   : > { %3305 = vst [vmem:[%s5785_s26 + $0x90] sm:$0xff] %v3273_v20  ;;  %v3271_v62 = vadd.f32 %v3192_v49, %v2965_v8  ;;  %v2968_v46 = vadd.f32 %v4455_v51, %v2662_v12  ;;  %v3195_v10 = vpop.f32.mrf.mxu0  ;;  %v3332_v26 = vadd.f32 %v3331_v32, %v3269_v30  ;;  %v2664_v12 = vadd.f32 %v6058_v17, %v2357_v1  ;;  %v6061_v8 = vld [vmem:[#allocation17_spill] sm:$0xff]  ;;  %v6074_v17 = vld [vmem:[#allocation48_spill] sm:$0xff] }
 0x201   : > { %v3401_v60 = vadd.f32 %v3400_v52, %v3370_v13  ;;  %v2889_v43 = vpop.f32.mrf.mxu1  ;;  %v2360_v11 = vadd.f32 %v6060_v47, %v6059_v45  ;;  %v3375_v13 = vmul.f32 %v3273_v20, %v3273_v20 }
 0x202   : > { %3303 = vst [vmem:[%s5785_s26 + $0x80] sm:$0xff] %v3271_v62  ;;  %v3274_v0 = vadd.f32 %v4503_v31, %v2968_v46  ;;  %v2966_v2 = vadd.f32 %v2889_v43, %v2660_v19  ;;  %v4506_v14 = vpop.f32.mrf.mxu0  ;;  %v3333_v23 = vadd.f32 %v3332_v26, %v3270_v22  ;;  %v3373_v25 = vmul.f32 %v3271_v62, %v3271_v62  ;;  %v6062_v31 = vld [vmem:[#allocation41_spill] sm:$0xff] }
 0x203   : > { %v3402_v28 = vadd.f32 %v3401_v60, %v3371_v24  ;;  %v4458_v40 = vpop.f32.mrf.mxu1  ;;  %v2362_v22 = vadd.f32 %v6057_v42, %v6056_v55  ;;  %v2363_v32 = vadd.f32 %v6062_v31, %v6061_v8  ;;  %v6064_v24 = vld [vmem:[#allocation38_spill] sm:$0xff]  ;;  %v6075_v31 = vld [vmem:[#allocation45_spill] sm:$0xff] }
 0x204   : > { %3306 = vst [vmem:[%s5785_s26 + $0x98] sm:$0xff] %v3274_v0  ;;  %v3272_v30 = vadd.f32 %v3195_v10, %v2966_v2  ;;  %v2971_v5 = vadd.f32 %v4458_v40, %v2665_v3  ;;  %v3208_v61 = vpop.f32.mrf.mxu0  ;;  %v3334_v34 = vadd.f32 %v3333_v23, %v3271_v62  ;;  %v3376_v10 = vmul.f32 %v3274_v0, %v3274_v0  ;;  %v6065_v60 = vld [vmem:[#allocation18_spill] sm:$0xff]  ;;  %v6066_v2 = vld [vmem:[#allocation40_spill] sm:$0xff] }
 0x205   : > { %v3403_v41 = vadd.f32 %v3402_v28, %v3372_v58  ;;  %v2902_v44 = vpop.f32.mrf.mxu1  ;;  %v2669_v18 = vadd.f32 %v6063_v50, %v2362_v22  ;;  %v2667_v26 = vadd.f32 %v6064_v24, %v2360_v11  ;;  %v2361_v43 = vadd.f32 %v5755_v27, %v6065_v60 }
 0x206   : > { %3304 = vst [vmem:[%s5785_s26 + $0x88] sm:$0xff] %v3272_v30  ;;  %v3374_v4 = vmul.f32 %v3272_v30, %v3272_v30  ;;  %v3277_v63 = vadd.f32 %v4506_v14, %v2971_v5  ;;  %v2969_v15 = vadd.f32 %v2902_v44, %v2663_v16  ;;  %v4507_v48 = vpop.f32.mrf.mxu0  ;;  %v3335_v38 = vadd.f32 %v3334_v34, %v3272_v30  ;;  %v6068_v16 = vld [vmem:[#allocation44_spill] sm:$0xff] }
 0x207   : > { %v3404_v9 = vadd.f32 %v3403_v41, %v3373_v25  ;;  %v4459_v49 = vpop.f32.mrf.mxu1  ;;  %v2670_v14 = vadd.f32 %v6066_v2, %v2363_v32  ;;  %v6070_v34 = vld [vmem:[#allocation20_spill] sm:$0xff]  ;;  %v6071_v25 = vld [vmem:[#allocation46_spill] sm:$0xff] }
 0x208   : > { %3309 = vst [vmem:[%s5785_s26 + $0xb0] sm:$0xff] %v3277_v63  ;;  %v3275_v54 = vadd.f32 %v3208_v61, %v2969_v15  ;;  %v2972_v35 = vadd.f32 %v4459_v49, %v2666_v33  ;;  %v3211_v52 = vpop.f32.mrf.mxu0  ;;  %v3336_v51 = vadd.f32 %v3335_v38, %v3273_v20  ;;  %v2668_v33 = vadd.f32 %v6069_v56, %v2361_v43  ;;  %v6073_v49 = vld [vmem:[#allocation21_spill] sm:$0xff] }
 0x209   : > { %v3405_v36 = vadd.f32 %v3404_v9, %v3374_v4  ;;  %v2905_v19 = vpop.f32.mrf.mxu1  ;;  %v2364_v41 = vadd.f32 %v6071_v25, %v6070_v34  ;;  %v3379_v22 = vmul.f32 %v3277_v63, %v3277_v63  ;;  %v6072_v9 = vld [vmem:[#allocation43_spill] sm:$0xff]  ;;  %v6078_v43 = vld [vmem:[#allocation49_spill] sm:$0xff] }
 0x20a   : > { %3307 = vst [vmem:[%s5785_s26 + $0xa0] sm:$0xff] %v3275_v54  ;;  %v3278_v6 = vadd.f32 %v4507_v48, %v2972_v35  ;;  %v2970_v62 = vadd.f32 %v2905_v19, %v2664_v12  ;;  %v4510_v46 = vpop.f32.mrf.mxu0  ;;  %v3337_v39 = vadd.f32 %v3336_v51, %v3274_v0  ;;  %v3377_v28 = vmul.f32 %v3275_v54, %v3275_v54 }
 0x20b   : > { %v3406_v21 = vadd.f32 %v3405_v36, %v3375_v13  ;;  %v4462_v57 = vpop.f32.mrf.mxu1  ;;  %v2366_v0 = vadd.f32 %v6068_v16, %v6067_v59  ;;  %v2367_v12 = vadd.f32 %v6074_v17, %v6073_v49  ;;  %v2671_v32 = vadd.f32 %v6075_v31, %v2364_v41  ;;  %v6076_v13 = vld [vmem:[#allocation22_spill] sm:$0xff] }
 0x20c   : > { %3310 = vst [vmem:[%s5785_s26 + $0xb8] sm:$0xff] %v3278_v6  ;;  %v3276_v20 = vadd.f32 %v3211_v52, %v2970_v62  ;;  %v2975_v29 = vadd.f32 %v4462_v57, %v2669_v18  ;;  %v3224_v3 = vpop.f32.mrf.mxu0  ;;  %v3338_v58 = vadd.f32 %v3337_v39, %v3275_v54  ;;  %v3380_v54 = vmul.f32 %v3278_v6, %v3278_v6 }
 0x20d   : > { %v3407_v23 = vadd.f32 %v3406_v21, %v3376_v10  ;;  %v2918_v40 = vpop.f32.mrf.mxu1  ;;  %v2673_v38 = vadd.f32 %v6072_v9, %v2366_v0  ;;  %v6077_v10 = vld [vmem:[#allocation47_spill] sm:$0xff] }
 0x20e   : > { %3308 = vst [vmem:[%s5785_s26 + $0xa8] sm:$0xff] %v3276_v20  ;;  %v3378_v7 = vmul.f32 %v3276_v20, %v3276_v20  ;;  %v3281_v37 = vadd.f32 %v4510_v46, %v2975_v29  ;;  %v2973_v1 = vadd.f32 %v2918_v40, %v2667_v26  ;;  %v4511_v30 = vpop.f32.mrf.mxu0  ;;  %v3339_v5 = vadd.f32 %v3338_v58, %v3276_v20 }
 0x20f   : > { %v3408_v27 = vadd.f32 %v3407_v23, %v3377_v28  ;;  %v4463_v61 = vpop.f32.mrf.mxu1  ;;  %v2674_v21 = vadd.f32 %v6077_v10, %v2367_v12 }
 0x210   : > { %3313 = vst [vmem:[%s5785_s26 + $0xd0] sm:$0xff] %v3281_v37  ;;  %v3279_v44 = vadd.f32 %v3224_v3, %v2973_v1  ;;  %v2976_v55 = vadd.f32 %v4463_v61, %v2670_v14  ;;  %v3227_v42 = vpop.f32.mrf.mxu0  ;;  %v3340_v4 = vadd.f32 %v3339_v5, %v3277_v63  ;;  %v2365_v63 = vadd.f32 %v5773_v53, %v6076_v13 }
 0x211   : > { %v3409_v15 = vadd.f32 %v3408_v27, %v3378_v7  ;;  %v2921_v48 = vpop.f32.mrf.mxu1  ;;  %v3383_v2 = vmul.f32 %v3281_v37, %v3281_v37 }
 0x212   : > { %3311 = vst [vmem:[%s5785_s26 + $0xc0] sm:$0xff] %v3279_v44  ;;  %v3282_v45 = vadd.f32 %v4511_v30, %v2976_v55  ;;  %v2974_v47 = vadd.f32 %v2921_v48, %v2668_v33  ;;  %v4514_v11 = vpop.f32.mrf.mxu0  ;;  %v3341_v52 = vadd.f32 %v3340_v4, %v3278_v6  ;;  %v3381_v18 = vmul.f32 %v3279_v44, %v3279_v44 }
 0x213   : > { %v3410_v35 = vadd.f32 %v3409_v15, %v3379_v22  ;;  %v4466_v8 = vpop.f32.mrf.mxu1  ;;  %v2672_v20 = vadd.f32 %v6078_v43, %v2365_v63 }
 0x214   : > { %3314 = vst [vmem:[%s5785_s26 + $0xd8] sm:$0xff] %v3282_v45  ;;  %v3280_v51 = vadd.f32 %v3227_v42, %v2974_v47  ;;  %v2979_v36 = vadd.f32 %v4466_v8, %v2673_v38  ;;  %v3240_v19 = vpop.f32.mrf.mxu0  ;;  %v3342_v50 = vadd.f32 %v3341_v52, %v3279_v44  ;;  %v3384_v59 = vmul.f32 %v3282_v45, %v3282_v45 }
 0x215   : > { %v3411_v62 = vadd.f32 %v3410_v35, %v3380_v54  ;;  %v2934_v46 = vpop.f32.mrf.mxu1 }
 0x216   : > { %3312 = vst [vmem:[%s5785_s26 + $0xc8] sm:$0xff] %v3280_v51  ;;  %v3382_v6 = vmul.f32 %v3280_v51, %v3280_v51  ;;  %v3285_v39 = vadd.f32 %v4514_v11, %v2979_v36  ;;  %v2977_v57 = vadd.f32 %v2934_v46, %v2671_v32  ;;  %v3343_v26 = vadd.f32 %v3342_v50, %v3280_v51  ;;  %v4515_v53 = vpop.f32.mrf.mxu0 }
 0x217   : > { %v3412_v24 = vadd.f32 %v3411_v62, %v3381_v18  ;;  %v4467_v60 = vpop.f32.mrf.mxu1 }
 0x218   : > { %3317 = vst [vmem:[%s5785_s26 + $0xf0] sm:$0xff] %v3285_v39  ;;  %v3283_v29 = vadd.f32 %v3240_v19, %v2977_v57  ;;  %v2980_v3 = vadd.f32 %v4467_v60, %v2674_v21  ;;  %v3344_v14 = vadd.f32 %v3343_v26, %v3281_v37  ;;  %v3243_v7 = vpop.f32.mrf.mxu0  ;;  %v3387_v37 = vmul.f32 %v3285_v39, %v3285_v39 }
 0x219   : > { %v3413_v58 = vadd.f32 %v3412_v24, %v3382_v6  ;;  %v2937_v28 = vpop.f32.mrf.mxu1 }
 0x21a   : > { %3315 = vst [vmem:[%s5785_s26 + $0xe0] sm:$0xff] %v3283_v29  ;;  %v3286_v23 = vadd.f32 %v4515_v53, %v2980_v3  ;;  %v2978_v40 = vadd.f32 %v2937_v28, %v2672_v20  ;;  %v3345_v0 = vadd.f32 %v3344_v14, %v3282_v45  ;;  %v3385_v27 = vmul.f32 %v3283_v29, %v3283_v29 }
 0x21b   : > { %v3414_v16 = vadd.f32 %v3413_v58, %v3383_v2 }
 0x21c   : > { %3318 = vst [vmem:[%s5785_s26 + $0xf8] sm:$0xff] %v3286_v23  ;;  %v3284_v1 = vadd.f32 %v3243_v7, %v2978_v40  ;;  %v3346_v30 = vadd.f32 %v3345_v0, %v3283_v29  ;;  %v3388_v41 = vmul.f32 %v3286_v23, %v3286_v23 }
 0x21d   : > { %v3415_v5 = vadd.f32 %v3414_v16, %v3384_v59 }
 0x21e   : > { %3316 = vst [vmem:[%s5785_s26 + $0xe8] sm:$0xff] %v3284_v1  ;;  %v3386_v61 = vmul.f32 %v3284_v1, %v3284_v1  ;;  %v3347_v33 = vadd.f32 %v3346_v30, %v3284_v1  ;;  %s4656_s26 = sshll.u32 %s4746_s20, 4  ;;  %s4657_s26 = int_to_ptr.vmem [resolvable:$false] %s4656_s26 }
 0x21f   : > { %v3416_v56 = vadd.f32 %v3415_v5, %v3385_v27  ;;  %s4658_s11 = scalar_lea.vmem %s4657_s26, 32  ;;  %p4659_p0 = scmp.lt.s32.totalorder %s5918_s29, %s4657_s26 }
 0x220   : > { %v3348_v34 = vadd.f32 %v3347_v33, %v3285_v39  ;;  %p4660_p1 = scmp.lt.s32.totalorder %s4658_s11, %s4652_s18 }
 0x221   : > { %v3417_v25 = vadd.f32 %v3416_v56, %v3386_v61 }
 0x222   : > { %v3349_v44 = vadd.f32 %v3348_v34, %v3286_v23  ;;  %p4661_p2 = por %p4660_p1, %p4659_p0 }
 0x223   : > { %v3418_v55 = vadd.f32 %v3417_v25, %v3387_v37 }
 0x224   : > { %v3350_v42 = vrot.slane %v3349_v44, 4  ;;  %p4662_p3 = pnand %p4661_p2, %p4655_p13 }
 0x225   : > { %v3419_v22 = vadd.f32 %v3418_v55, %v3388_v41 }
 0x226   : > { %v3351_v4 = vadd.f32 %v3350_v42, %v3349_v44 }
 0x227   : > { %v3420_v15 = vrot.slane %v3419_v22, 4 }
 0x228   : > { %v3352_v48 = vrot.slane %v3351_v4, 2 }
 0x229   : > { %v3421_v9 = vadd.f32 %v3420_v15, %v3419_v22 }
 0x22a   : > { %v3353_v38 = vadd.f32 %v3352_v48, %v3351_v4 }
 0x22b   : > { %v3422_v49 = vrot.slane %v3421_v9, 2 }
 0x22c   : > { %v3354_v17 = vrot.slane %v3353_v38, 1 }
 0x22d   : > { %v3423_v12 = vadd.f32 %v3422_v49, %v3421_v9 }
 0x22e   : > { %v3355_v45 = vadd.f32 %v3354_v17, %v3353_v38 }
 0x22f   : > { %v3424_v47 = vrot.slane %v3423_v12, 1 }
 0x230   : > { %3356 = vst [vmem:[%s254_s28] sm:$0x1] %v3355_v45 }
 0x231   : > { %v3425_v11 = vadd.f32 %v3424_v47, %v3423_v12 }
 0x232   : > { %4665 = shalt.err (!%p4662_p3)
}
 0x233   : > { %s4666_s19 = scalar_lea.hbm %s5916_s14, 16  ;;  %s4670_s25 = scalar_lea.hbm %s5993_s5, 32 }
 0x234   : > { %p4667_p4 = scmp.ne.s32.totalorder %s5916_s14, %s4666_s19  ;;  %p4671_p9 = scmp.lt.s32.totalorder %s5916_s14, %s5993_s5 }
 0x235   : > { %p4672_p10 = scmp.lt.s32.totalorder %s4670_s25, %s4666_s19 }
 0x236   : > { %p4668_p7 = pnand %p4667_p4, %p4821_p5 }
 0x237   : > { %p4673_p11 = por %p4672_p10, %p4671_p9 }
 0x238   : > { %p4669_p8 = pneg %p4668_p7 }
 0x23a   : > { %p4674_p12 = pnand %p4673_p11, %p4669_p8 }
 0x23c   : > { %4677 = shalt.err (!%p4674_p12)
}
 0x23d   : > { %4532 = dma.vmem_to_hbm [thread:$0]  (%p4821_p5), %s5918_s29, 16, %s5916_s14, %s3433_s17   ;;  %3426 = vst [vmem:[%s260_s9] sm:$0x1] %v3425_v11 }
 0x23e   : > { %s3437_s18 = scalar_lea.sflag [#allocation6], %s5906_s13  ;;  %s4678_s26 = scalar_lea.vmem %s5925_s10, 16 }
 0x23f   : > { %p4679_p13 = scmp.ne.s32.totalorder %s5925_s10, %s4678_s26  ;;  %s4747_s11 = smov [#allocation5]  }
 0x240   : > { %s4682_s19 = sshll.u32 %s4747_s11, 4  ;;  %s4683_s19 = int_to_ptr.vmem [resolvable:$false] %s4682_s19 }
 0x241   : > { %p4680_p0 = pnand %p4679_p13, %p4821_p5  ;;  %s4684_s28 = scalar_lea.vmem %s4683_s19, 32 }
 0x242   : > { %p4685_p2 = scmp.lt.s32.totalorder %s5925_s10, %s4683_s19  ;;  %p4686_p3 = scmp.lt.s32.totalorder %s4684_s28, %s4678_s26 }
 0x243   : > { %p4681_p1 = pneg %p4680_p0 }
 0x244   : > { %p4687_p4 = por %p4686_p3, %p4685_p2 }
 0x246   : > { %p4688_p7 = pnand %p4687_p4, %p4681_p1 }
 0x248   : > { %4691 = shalt.err (!%p4688_p7)
}
 0x249   : > { %s4692_s29 = scalar_lea.hbm %s5923_s16, 16  ;;  %s4696_s14 = scalar_lea.hbm %s5994_s6, 32 }
 0x24a   : > { %p4693_p8 = scmp.ne.s32.totalorder %s5923_s16, %s4692_s29  ;;  %p4697_p11 = scmp.lt.s32.totalorder %s5923_s16, %s5994_s6 }
 0x24b   : > { %p4698_p12 = scmp.lt.s32.totalorder %s4696_s14, %s4692_s29 }
 0x24c   : > { %p4694_p9 = pnand %p4693_p8, %p4821_p5 }
 0x24d   : > { %p4699_p13 = por %p4698_p12, %p4697_p11 }
 0x24e   : > { %p4695_p10 = pneg %p4694_p9 }
 0x250   : > { %p4700_p0 = pnand %p4699_p13, %p4695_p10 }
 0x252   : > { %4703 = shalt.err (!%p4700_p0)
}
 0x253   : > { %4533 = dma.vmem_to_hbm [thread:$0]  (%p4821_p5), %s5925_s10, 16, %s5923_s16, %s3437_s18  }
 0x254 PF: > { %p4543_p1 = scmp.ge.s32.totalorder %s4742_s24, 2  ;;  %s3485_s25 = sand.u32 1, %s4730_s21  }
 0x255   : > { %s3486_s15 = scalar_lea.sflag [#allocation4], %s3485_s25 }
 0x256   : > { %p4537_p2 = pnand %p4543_p1, %p4825_p6 }
 0x258   : > { %p4538_p3 = pneg %p4537_p2 }
 0x25a   : > { %4721 = dma.done.wait (%p4538_p3), %s3486_s15, 16  }
 0x25b   : > { %4723 = vsyncadd (%p4538_p3), %s3486_s15, 4294967280  ;;  %s3494_s20 = scalar_lea.sflag [#allocation6], %s3485_s25 }
 0x25c   : > { %4725 = dma.done.wait (%p4538_p3), %s3494_s20, 16  }
 0x25d   : > { %4727 = vsyncadd (%p4538_p3), %s3494_s20, 4294967280  ;;  %p20_p5 = scmp.ge.s32.totalorder %s4808_s27, 4   ;;  %s6079_s21 = smov %s4734_s22 }
 0x25e   : > { %s6080_s22 = smov %s4738_s23  ;;  %s6081_s23 = smov %s4819_s30 }
 0x25f   : > { %s6082_s24 = smov %s4808_s27  ;;  %22 = sbr.rel (!%p20_p5) target bundleno = 5 (0x5), region = 110 }
 0x264   :  { %3498 = vsyncpa [#allocation4], 1 }
 0x265   :  { %3500 = vsyncpa [#allocation4 + $0x1], 1 }
 0x266   :  { %3501 = vsyncpa [#allocation6], 1 }
 0x267   :  { %3503 = vsyncpa [#allocation6 + $0x1], 1 }

</bundles_post_ra>
